<compile_context>
chip_gen: v6e
topology: v6e:2x2x1
jax: 0.10.0
libtpu: 0.0.40
codegen_flags: <defaults>
</compile_context>

<pallas_src>
import numpy as np
import jax
import jax.numpy as jnp
from jax.experimental import pallas as pl
from jax.experimental.pallas import tpu as pltpu

K1 = 5
K2 = 5
C1 = 64
C2 = 64
L_IN = 400               # implied by fc1 = Linear(64*392, 128): 400 - 4 - 4 = 392
L1 = L_IN - K1 + 1       # 396
L2 = L1 - K2 + 1         # 392
F_FLAT = C2 * L2         # 25088
H1 = 128
NCLS = 4
K1P = 8                  # conv1 contraction zero-padded to one sublane group
TK = 12544               # fc1 K tile: 25088 = 2 * 12544 (multiple of 128, = 32ch * 392)


# ---------------------------------------------------------------- kernels ---

def conv_stack_kernel(x_ref, w1_ref, b1_ref, w2_ref, b2_ref, o_ref):
    # x: (B, L_IN)  w1: (C1, K1P)  b1: (C1, 1)  w2: (C2, K2*C1)  b2: (C2, 1)
    # o: (B, C2, L2)
    x = x_ref[...]
    w1 = w1_ref[...]
    b1 = b1_ref[...]
    w2 = w2_ref[...]
    b2 = b2_ref[...]
    Bb = o_ref.shape[0]
    pad = jnp.zeros((K1P - K1, L1), jnp.float32)
    for bi in range(Bb):                      # B is tiny and static (unrolled)
        # conv1 + relu: window stack (K1P, L1) -> single small MXU matmul
        xw = jnp.concatenate(
            [x[bi:bi + 1, k:k + L1] for k in range(K1)] + [pad], axis=0)
        y1 = jnp.maximum(
            jnp.dot(w1, xw, preferred_element_type=jnp.float32) + b1, 0.0)
        # conv2 + relu: im2col stack (K2*C1, L2) -> single MXU matmul
        y1s = jnp.concatenate([y1[:, k:k + L2] for k in range(K2)], axis=0)
        y2 = jnp.maximum(
            jnp.dot(w2, y1s, preferred_element_type=jnp.float32) + b2, 0.0)
        o_ref[bi] = y2


def head_kernel(flat_ref, wf1_ref, bf1_ref, wf2_ref, bf2_ref, o_ref, acc_ref):
    # flat tile: (B, TK) f32   wf1 tile: (TK, H1) bf16   bf1: (1, H1)
    # wf2: (H1, NCLS)          bf2: (1, NCLS)            o: (B, NCLS)
    k = pl.program_id(0)

    @pl.when(k == 0)
    def _():
        acc_ref[...] = jnp.zeros_like(acc_ref)

    acc_ref[...] += jnp.dot(flat_ref[...].astype(jnp.bfloat16), wf1_ref[...],
                            preferred_element_type=jnp.float32)

    @pl.when(k == pl.num_programs(0) - 1)
    def _():
        h = jnp.maximum(acc_ref[...] + bf1_ref[...], 0.0)        # fc1 + relu
        logits = jnp.dot(h, wf2_ref[...],
                         preferred_element_type=jnp.float32) + bf2_ref[...]
        m = jnp.max(logits, axis=1, keepdims=True)
        e = jnp.exp(logits - m)
        o_ref[...] = e / jnp.sum(e, axis=1, keepdims=True)       # softmax


# ------------------------------------------------------- parameter prep -----

def prepare_params(params):
    """One-time weight rearrangement (outside the jitted forward)."""
    w1, b1, w2, b2, wf1, bf1, wf2, bf2 = params
    w1p = jnp.pad(w1[:, 0, :], ((0, 0), (0, K1P - K1)))           # (C1, K1P)
    b1p = b1.reshape(C1, 1)
    # im2col row order is k*C1 + c  ->  w2p[o, k*C1 + c] = w2[o, c, k]
    w2p = jnp.transpose(w2, (0, 2, 1)).reshape(C2, K2 * C1)       # (C2, K2*C1)
    b2p = b2.reshape(C2, 1)
    wf1p = wf1.T.astype(jnp.bfloat16)                             # (F_FLAT, H1)
    bf1p = bf1.reshape(1, H1)
    wf2p = wf2.T                                                  # (H1, NCLS)
    bf2p = bf2.reshape(1, NCLS)
    return (w1p, b1p, w2p, b2p, wf1p, bf1p, wf2p, bf2p)


# ---------------------------------------------------------------- wrapper ---

def conv1d_model_forward(x, prep):
    w1p, b1p, w2p, b2p, wf1p, bf1p, wf2p, bf2p = prep
    B = x.shape[0]
    x2d = x[:, 0, :]                                   # (B, 400)
    vmem = pl.BlockSpec(memory_space=pltpu.MemorySpace.VMEM)

    # conv1 + relu + conv2 + relu (fused, everything resident in VMEM)
    y2 = pl.pallas_call(
        conv_stack_kernel,
        out_shape=jax.ShapeDtypeStruct((B, C2, L2), jnp.float32),
        in_specs=[vmem] * 5,
        out_specs=vmem,
    )(x2d, w1p, b1p, w2p, b2p)

    # TODO(synk): nn.Dropout(0.25)/(0.5) are stochastic; treated as identity
    # (inference semantics) here.
    flat = y2.reshape(B, F_FLAT)   # matches torch .view(B, -1): idx = c*392 + t

    # fc1 (K-tiled, bf16 weights / f32 accumulation) + relu, with fc2 + softmax
    # fused into the final grid step's epilogue.
    nsteps = F_FLAT // TK
    out = pl.pallas_call(
        head_kernel,
        out_shape=jax.ShapeDtypeStruct((B, NCLS), jnp.float32),
        grid_spec=pltpu.PrefetchScalarGridSpec(
            num_scalar_prefetch=0,
            grid=(nsteps,),
            in_specs=[
                pl.BlockSpec((B, TK), lambda k: (0, k)),
                pl.BlockSpec((TK, H1), lambda k: (k, 0)),
                pl.BlockSpec((1, H1), lambda k: (0, 0)),
                pl.BlockSpec((H1, NCLS), lambda k: (0, 0)),
                pl.BlockSpec((1, NCLS), lambda k: (0, 0)),
            ],
            out_specs=pl.BlockSpec((B, NCLS), lambda k: (0, 0)),
            scratch_shapes=[pltpu.VMEM((B, H1), jnp.float32)],
        ),
        compiler_params=pltpu.CompilerParams(
            dimension_semantics=("arbitrary",)),
    )(flat, wf1p, bf1p, wf2p, bf2p)
    return out


# --------------------------------------------------------------- reference --

def reference_forward(x, params):
    w1, b1, w2, b2, wf1, bf1, wf2, bf2 = params
    dn = ('NCH', 'OIH', 'NCH')
    y = jax.lax.conv_general_dilated(x, w1, (1,), 'VALID', dimension_numbers=dn)
    y = jax.nn.relu(y + b1[None, :, None])
    y = jax.lax.conv_general_dilated(y, w2, (1,), 'VALID', dimension_numbers=dn)
    y = jax.nn.relu(y + b2[None, :, None])
    f = y.reshape(x.shape[0], -1)
    h = jax.nn.relu(f @ wf1.T + bf1)
    logits = h @ wf2.T + bf2
    return jax.nn.softmax(logits, axis=1)


if __name__ == "__main__":
    key = jax.random.PRNGKey(0)
    ks = jax.random.split(key, 9)
    B = 2
    x = jax.random.normal(ks[0], (B, 1, L_IN), jnp.float32)

    # Deterministic synthetic parameters (PyTorch shapes: (out, in, k) / (out, in)).
    w1 = jax.random.normal(ks[1], (C1, 1, K1), jnp.float32) * 0.05
    b1 = jax.random.normal(ks[2], (C1,), jnp.float32) * 0.05
    w2 = jax.random.normal(ks[3], (C2, C1, K2), jnp.float32) * 0.05
    b2 = jax.random.normal(ks[4], (C2,), jnp.float32) * 0.05
    wf1 = jax.random.normal(ks[5], (H1, F_FLAT), jnp.float32) * 0.01
    bf1 = jax.random.normal(ks[6], (H1,), jnp.float32) * 0.01
    wf2 = jax.random.normal(ks[7], (NCLS, H1), jnp.float32) * 0.05
    bf2 = jax.random.normal(ks[8], (NCLS,), jnp.float32) * 0.05
    params = (w1, b1, w2, b2, wf1, bf1, wf2, bf2)

    # One-time parameter preparation (outside the per-call forward).
    prep = prepare_params(params)

    out = jax.jit(conv1d_model_forward)(x, prep)
    out = jax.block_until_ready(out)
    assert out.shape == (B, NCLS)

    ref = reference_forward(x, params)
    # bf16 fc1 weights (f32 accumulation) -> slightly looser tolerance than f32.
    np.testing.assert_allclose(np.asarray(out), np.asarray(ref),
                               rtol=1e-2, atol=1e-3)
    print("KERNEL_OK")
</pallas_src>

<mosaic_0001>
module attributes {stable_mosaic.version = 11 : i64} {
  func.func @conv_stack_kernel(%arg0: memref<2x400xf32, #tpu.memory_space<vmem>>, %arg1: memref<64x8xf32, #tpu.memory_space<vmem>>, %arg2: memref<64x1xf32, #tpu.memory_space<vmem>>, %arg3: memref<64x320xf32, #tpu.memory_space<vmem>>, %arg4: memref<64x1xf32, #tpu.memory_space<vmem>>, %arg5: memref<2x64x392xf32, #tpu.memory_space<vmem>>) attributes {dimension_semantics = [], scalar_prefetch = 0 : i64, scratch_operands = 0 : i64, tpu.core_type = #tpu.core_type<tc>} {
    %c0 = arith.constant 0 : index
    %c0_0 = arith.constant 0 : index
    %0 = vector.load %arg0[%c0, %c0_0] : memref<2x400xf32, #tpu.memory_space<vmem>>, vector<2x400xf32>
    %c0_1 = arith.constant 0 : index
    %c0_2 = arith.constant 0 : index
    %1 = vector.load %arg1[%c0_1, %c0_2] : memref<64x8xf32, #tpu.memory_space<vmem>>, vector<64x8xf32>
    %c0_3 = arith.constant 0 : index
    %c0_4 = arith.constant 0 : index
    %2 = vector.load %arg2[%c0_3, %c0_4] : memref<64x1xf32, #tpu.memory_space<vmem>>, vector<64x1xf32>
    %c0_5 = arith.constant 0 : index
    %c0_6 = arith.constant 0 : index
    %3 = vector.load %arg3[%c0_5, %c0_6] : memref<64x320xf32, #tpu.memory_space<vmem>>, vector<64x320xf32>
    %c0_7 = arith.constant 0 : index
    %c0_8 = arith.constant 0 : index
    %4 = vector.load %arg4[%c0_7, %c0_8] : memref<64x1xf32, #tpu.memory_space<vmem>>, vector<64x1xf32>
    %cst = arith.constant 0.000000e+00 : f32
    %5 = vector.broadcast %cst : f32 to vector<3x396xf32>
    %6 = vector.extract_strided_slice %0 {offsets = [0, 0], sizes = [1, 396], strides = [1, 1]} : vector<2x400xf32> to vector<1x396xf32>
    %7 = vector.extract_strided_slice %0 {offsets = [0, 1], sizes = [1, 396], strides = [1, 1]} : vector<2x400xf32> to vector<1x396xf32>
    %8 = vector.extract_strided_slice %0 {offsets = [0, 2], sizes = [1, 396], strides = [1, 1]} : vector<2x400xf32> to vector<1x396xf32>
    %9 = vector.extract_strided_slice %0 {offsets = [0, 3], sizes = [1, 396], strides = [1, 1]} : vector<2x400xf32> to vector<1x396xf32>
    %10 = vector.extract_strided_slice %0 {offsets = [0, 4], sizes = [1, 396], strides = [1, 1]} : vector<2x400xf32> to vector<1x396xf32>
    %11 = tpu.concatenate %6, %7, %8, %9, %10, %5 in 0 : vector<1x396xf32>, vector<1x396xf32>, vector<1x396xf32>, vector<1x396xf32>, vector<1x396xf32>, vector<3x396xf32> -> vector<8x396xf32>
    %cst_9 = arith.constant dense<0.000000e+00> : vector<64x396xf32>
    %12 = tpu.matmul %1, %11, %cst_9 {dimension_numbers = #tpu.dot_dimension_numbers<[1], [0], [0], [1], [0, 0, 1, 1], [], []>} : vector<64x8xf32>, vector<8x396xf32>, vector<64x396xf32> -> vector<64x396xf32>
    %13 = vector.broadcast %2 : vector<64x1xf32> to vector<64x396xf32>
    %14 = arith.addf %12, %13 : vector<64x396xf32>
    %cst_10 = arith.constant 0.000000e+00 : f32
    %15 = vector.broadcast %cst_10 : f32 to vector<64x396xf32>
    %16 = arith.maximumf %14, %15 : vector<64x396xf32>
    %17 = vector.extract_strided_slice %16 {offsets = [0, 0], sizes = [64, 392], strides = [1, 1]} : vector<64x396xf32> to vector<64x392xf32>
    %18 = vector.extract_strided_slice %16 {offsets = [0, 1], sizes = [64, 392], strides = [1, 1]} : vector<64x396xf32> to vector<64x392xf32>
    %19 = vector.extract_strided_slice %16 {offsets = [0, 2], sizes = [64, 392], strides = [1, 1]} : vector<64x396xf32> to vector<64x392xf32>
    %20 = vector.extract_strided_slice %16 {offsets = [0, 3], sizes = [64, 392], strides = [1, 1]} : vector<64x396xf32> to vector<64x392xf32>
    %21 = vector.extract_strided_slice %16 {offsets = [0, 4], sizes = [64, 392], strides = [1, 1]} : vector<64x396xf32> to vector<64x392xf32>
    %22 = tpu.concatenate %17, %18, %19, %20, %21 in 0 : vector<64x392xf32>, vector<64x392xf32>, vector<64x392xf32>, vector<64x392xf32>, vector<64x392xf32> -> vector<320x392xf32>
    %cst_11 = arith.constant dense<0.000000e+00> : vector<64x392xf32>
    %23 = tpu.matmul %3, %22, %cst_11 {dimension_numbers = #tpu.dot_dimension_numbers<[1], [0], [0], [1], [0, 0, 1, 1], [], []>} : vector<64x320xf32>, vector<320x392xf32>, vector<64x392xf32> -> vector<64x392xf32>
    %24 = vector.broadcast %4 : vector<64x1xf32> to vector<64x392xf32>
    %25 = arith.addf %23, %24 : vector<64x392xf32>
    %cst_12 = arith.constant 0.000000e+00 : f32
    %26 = vector.broadcast %cst_12 : f32 to vector<64x392xf32>
    %27 = arith.maximumf %25, %26 : vector<64x392xf32>
    %c0_13 = arith.constant 0 : index
    %c0_14 = arith.constant 0 : index
    %c0_15 = arith.constant 0 : index
    %28 = vector.load %arg5[%c0_13, %c0_14, %c0_15] : memref<2x64x392xf32, #tpu.memory_space<vmem>>, vector<1x64x392xf32>
    %29 = vector.shape_cast %28 : vector<1x64x392xf32> to vector<64x392xf32>
    %30 = vector.shape_cast %27 : vector<64x392xf32> to vector<1x64x392xf32>
    tpu.vector_store %arg5[%c0_13, %c0_14, %c0_15], %30 {strides = array<i32>} : memref<2x64x392xf32, #tpu.memory_space<vmem>>, vector<1x64x392xf32>,
    %31 = vector.extract_strided_slice %0 {offsets = [1, 0], sizes = [1, 396], strides = [1, 1]} : vector<2x400xf32> to vector<1x396xf32>
    %32 = vector.extract_strided_slice %0 {offsets = [1, 1], sizes = [1, 396], strides = [1, 1]} : vector<2x400xf32> to vector<1x396xf32>
    %33 = vector.extract_strided_slice %0 {offsets = [1, 2], sizes = [1, 396], strides = [1, 1]} : vector<2x400xf32> to vector<1x396xf32>
    %34 = vector.extract_strided_slice %0 {offsets = [1, 3], sizes = [1, 396], strides = [1, 1]} : vector<2x400xf32> to vector<1x396xf32>
    %35 = vector.extract_strided_slice %0 {offsets = [1, 4], sizes = [1, 396], strides = [1, 1]} : vector<2x400xf32> to vector<1x396xf32>
    %36 = tpu.concatenate %31, %32, %33, %34, %35, %5 in 0 : vector<1x396xf32>, vector<1x396xf32>, vector<1x396xf32>, vector<1x396xf32>, vector<1x396xf32>, vector<3x396xf32> -> vector<8x396xf32>
    %cst_16 = arith.constant dense<0.000000e+00> : vector<64x396xf32>
    %37 = tpu.matmul %1, %36, %cst_16 {dimension_numbers = #tpu.dot_dimension_numbers<[1], [0], [0], [1], [0, 0, 1, 1], [], []>} : vector<64x8xf32>, vector<8x396xf32>, vector<64x396xf32> -> vector<64x396xf32>
    %38 = vector.broadcast %2 : vector<64x1xf32> to vector<64x396xf32>
    %39 = arith.addf %37, %38 : vector<64x396xf32>
    %cst_17 = arith.constant 0.000000e+00 : f32
    %40 = vector.broadcast %cst_17 : f32 to vector<64x396xf32>
    %41 = arith.maximumf %39, %40 : vector<64x396xf32>
    %42 = vector.extract_strided_slice %41 {offsets = [0, 0], sizes = [64, 392], strides = [1, 1]} : vector<64x396xf32> to vector<64x392xf32>
    %43 = vector.extract_strided_slice %41 {offsets = [0, 1], sizes = [64, 392], strides = [1, 1]} : vector<64x396xf32> to vector<64x392xf32>
    %44 = vector.extract_strided_slice %41 {offsets = [0, 2], sizes = [64, 392], strides = [1, 1]} : vector<64x396xf32> to vector<64x392xf32>
    %45 = vector.extract_strided_slice %41 {offsets = [0, 3], sizes = [64, 392], strides = [1, 1]} : vector<64x396xf32> to vector<64x392xf32>
    %46 = vector.extract_strided_slice %41 {offsets = [0, 4], sizes = [64, 392], strides = [1, 1]} : vector<64x396xf32> to vector<64x392xf32>
    %47 = tpu.concatenate %42, %43, %44, %45, %46 in 0 : vector<64x392xf32>, vector<64x392xf32>, vector<64x392xf32>, vector<64x392xf32>, vector<64x392xf32> -> vector<320x392xf32>
    %cst_18 = arith.constant dense<0.000000e+00> : vector<64x392xf32>
    %48 = tpu.matmul %3, %47, %cst_18 {dimension_numbers = #tpu.dot_dimension_numbers<[1], [0], [0], [1], [0, 0, 1, 1], [], []>} : vector<64x320xf32>, vector<320x392xf32>, vector<64x392xf32> -> vector<64x392xf32>
    %49 = vector.broadcast %4 : vector<64x1xf32> to vector<64x392xf32>
    %50 = arith.addf %48, %49 : vector<64x392xf32>
    %cst_19 = arith.constant 0.000000e+00 : f32
    %51 = vector.broadcast %cst_19 : f32 to vector<64x392xf32>
    %52 = arith.maximumf %50, %51 : vector<64x392xf32>
    %c1 = arith.constant 1 : index
    %c0_20 = arith.constant 0 : index
    %c0_21 = arith.constant 0 : index
    %53 = vector.load %arg5[%c1, %c0_20, %c0_21] : memref<2x64x392xf32, #tpu.memory_space<vmem>>, vector<1x64x392xf32>
    %54 = vector.shape_cast %53 : vector<1x64x392xf32> to vector<64x392xf32>
    %55 = vector.shape_cast %52 : vector<64x392xf32> to vector<1x64x392xf32>
    tpu.vector_store %arg5[%c1, %c0_20, %c0_21], %55 {strides = array<i32>} : memref<2x64x392xf32, #tpu.memory_space<vmem>>, vector<1x64x392xf32>,
    return
  }
}

module attributes {stable_mosaic.version = 11 : i64} {
  func.func @head_kernel(%arg0: i32, %arg1: memref<2x12544xf32, #tpu.memory_space<vmem>>, %arg2: memref<12544x128xbf16, #tpu.memory_space<vmem>>, %arg3: memref<1x128xf32, #tpu.memory_space<vmem>>, %arg4: memref<128x4xf32, #tpu.memory_space<vmem>>, %arg5: memref<1x4xf32, #tpu.memory_space<vmem>>, %arg6: memref<2x4xf32, #tpu.memory_space<vmem>>, %arg7: memref<2x128xf32, #tpu.memory_space<vmem>>) attributes {dimension_semantics = [#tpu.dimension_semantics<arbitrary>], iteration_bounds = array<i64: 2>, scalar_prefetch = 0 : i64, scratch_operands = 1 : i64, tpu.core_type = #tpu.core_type<tc>, window_params = [{transform_indices = @transform_0, window_bounds = array<i64: 2, 12544>}, {transform_indices = @transform_1, window_bounds = array<i64: 12544, 128>}, {pipeline_mode = #tpu.pipeline_mode<synchronous>, transform_indices = @transform_2, window_bounds = array<i64: 1, 128>}, {pipeline_mode = #tpu.pipeline_mode<synchronous>, transform_indices = @transform_3, window_bounds = array<i64: 128, 4>}, {pipeline_mode = #tpu.pipeline_mode<synchronous>, transform_indices = @transform_4, window_bounds = array<i64: 1, 4>}, {pipeline_mode = #tpu.pipeline_mode<synchronous>, transform_indices = @transform_5, window_bounds = array<i64: 2, 4>}]} {
    %c0_i32 = arith.constant 0 : i32
    %0 = arith.cmpi eq, %arg0, %c0_i32 : i32
    %1 = arith.extui %0 : i1 to i32
    %c0_i32_0 = arith.constant 0 : i32
    %2 = arith.cmpi ne, %1, %c0_i32_0 : i32
    scf.if %2 {
      %cst_9 = arith.constant 0.000000e+00 : f32
      %13 = vector.broadcast %cst_9 : f32 to vector<2x128xf32>
      %c0_10 = arith.constant 0 : index
      %c0_11 = arith.constant 0 : index
      %14 = vector.load %arg7[%c0_10, %c0_11] : memref<2x128xf32, #tpu.memory_space<vmem>>, vector<2x128xf32>
      tpu.vector_store %arg7[%c0_10, %c0_11], %13 {strides = array<i32>} : memref<2x128xf32, #tpu.memory_space<vmem>>, vector<2x128xf32>,
    } else {
    }
    %c0 = arith.constant 0 : index
    %c0_1 = arith.constant 0 : index
    %3 = vector.load %arg7[%c0, %c0_1] : memref<2x128xf32, #tpu.memory_space<vmem>>, vector<2x128xf32>
    %c0_2 = arith.constant 0 : index
    %c0_3 = arith.constant 0 : index
    %4 = vector.load %arg1[%c0_2, %c0_3] : memref<2x12544xf32, #tpu.memory_space<vmem>>, vector<2x12544xf32>
    %5 = arith.truncf %4 : vector<2x12544xf32> to vector<2x12544xbf16>
    %c0_4 = arith.constant 0 : index
    %c0_5 = arith.constant 0 : index
    %6 = vector.load %arg2[%c0_4, %c0_5] : memref<12544x128xbf16, #tpu.memory_space<vmem>>, vector<12544x128xbf16>
    %cst = arith.constant dense<0.000000e+00> : vector<2x128xf32>
    %7 = tpu.matmul %5, %6, %cst {dimension_numbers = #tpu.dot_dimension_numbers<[1], [0], [0], [1], [0, 0, 1, 1], [], []>} : vector<2x12544xbf16>, vector<12544x128xbf16>, vector<2x128xf32> -> vector<2x128xf32>
    %8 = arith.addf %3, %7 : vector<2x128xf32>
    %c0_6 = arith.constant 0 : index
    %c0_7 = arith.constant 0 : index
    %9 = vector.load %arg7[%c0_6, %c0_7] : memref<2x128xf32, #tpu.memory_space<vmem>>, vector<2x128xf32>
    tpu.vector_store %arg7[%c0_6, %c0_7], %8 {strides = array<i32>} : memref<2x128xf32, #tpu.memory_space<vmem>>, vector<2x128xf32>,
    %c1_i32 = arith.constant 1 : i32
    %10 = arith.cmpi eq, %arg0, %c1_i32 : i32
    %11 = arith.extui %10 : i1 to i32
    %c0_i32_8 = arith.constant 0 : i32
    %12 = arith.cmpi ne, %11, %c0_i32_8 : i32
    scf.if %12 {
      %c0_9 = arith.constant 0 : index
      %c0_10 = arith.constant 0 : index
      %13 = vector.load %arg7[%c0_9, %c0_10] : memref<2x128xf32, #tpu.memory_space<vmem>>, vector<2x128xf32>
      %c0_11 = arith.constant 0 : index
      %c0_12 = arith.constant 0 : index
      %14 = vector.load %arg3[%c0_11, %c0_12] : memref<1x128xf32, #tpu.memory_space<vmem>>, vector<1x128xf32>
      %15 = vector.broadcast %14 : vector<1x128xf32> to vector<2x128xf32>
      %16 = arith.addf %13, %15 : vector<2x128xf32>
      %cst_13 = arith.constant 0.000000e+00 : f32
      %17 = vector.broadcast %cst_13 : f32 to vector<2x128xf32>
      %18 = arith.maximumf %16, %17 : vector<2x128xf32>
      %c0_14 = arith.constant 0 : index
      %c0_15 = arith.constant 0 : index
      %19 = vector.load %arg4[%c0_14, %c0_15] : memref<128x4xf32, #tpu.memory_space<vmem>>, vector<128x4xf32>
      %cst_16 = arith.constant dense<0.000000e+00> : vector<2x4xf32>
      %20 = tpu.matmul %18, %19, %cst_16 {dimension_numbers = #tpu.dot_dimension_numbers<[1], [0], [0], [1], [0, 0, 1, 1], [], []>} : vector<2x128xf32>, vector<128x4xf32>, vector<2x4xf32> -> vector<2x4xf32>
      %c0_17 = arith.constant 0 : index
      %c0_18 = arith.constant 0 : index
      %21 = vector.load %arg5[%c0_17, %c0_18] : memref<1x4xf32, #tpu.memory_space<vmem>>, vector<1x4xf32>
      %22 = vector.broadcast %21 : vector<1x4xf32> to vector<2x4xf32>
      %23 = arith.addf %20, %22 : vector<2x4xf32>
      %cst_19 = arith.constant dense<0xFF800000> : vector<2xf32>
      %24 = vector.multi_reduction <maximumf>, %23, %cst_19 [1] : vector<2x4xf32> to vector<2xf32>
      %25 = vector.shape_cast %24 : vector<2xf32> to vector<2x1xf32>
      %26 = vector.broadcast %25 : vector<2x1xf32> to vector<2x4xf32>
      %27 = arith.subf %23, %26 : vector<2x4xf32>
      %28 = math.exp %27 : vector<2x4xf32>
      %cst_20 = arith.constant dense<0.000000e+00> : vector<2xf32>
      %29 = vector.multi_reduction <add>, %28, %cst_20 [1] : vector<2x4xf32> to vector<2xf32>
      %30 = vector.shape_cast %29 : vector<2xf32> to vector<2x1xf32>
      %31 = vector.broadcast %30 : vector<2x1xf32> to vector<2x4xf32>
      %32 = arith.divf %28, %31 : vector<2x4xf32>
      %c0_21 = arith.constant 0 : index
      %c0_22 = arith.constant 0 : index
      %33 = vector.load %arg6[%c0_21, %c0_22] : memref<2x4xf32, #tpu.memory_space<vmem>>, vector<2x4xf32>
      tpu.vector_store %arg6[%c0_21, %c0_22], %32 {strides = array<i32>} : memref<2x4xf32, #tpu.memory_space<vmem>>, vector<2x4xf32>,
    } else {
    }
    return
  }
  func.func @transform_0(%arg0: i32) -> (i32, i32) {
    %c0_i32 = arith.constant 0 : i32
    %c0_i32_0 = arith.constant 0 : i32
    return %c0_i32, %arg0 : i32, i32
  }
  func.func @transform_1(%arg0: i32) -> (i32, i32) {
    %c0_i32 = arith.constant 0 : i32
    %c0_i32_0 = arith.constant 0 : i32
    return %arg0, %c0_i32 : i32, i32
  }
  func.func @transform_2(%arg0: i32) -> (i32, i32) {
    %c0_i32 = arith.constant 0 : i32
    %c0_i32_0 = arith.constant 0 : i32
    %c0_i32_1 = arith.constant 0 : i32
    return %c0_i32, %c0_i32_0 : i32, i32
  }
  func.func @transform_3(%arg0: i32) -> (i32, i32) {
    %c0_i32 = arith.constant 0 : i32
    %c0_i32_0 = arith.constant 0 : i32
    %c0_i32_1 = arith.constant 0 : i32
    return %c0_i32, %c0_i32_0 : i32, i32
  }
  func.func @transform_4(%arg0: i32) -> (i32, i32) {
    %c0_i32 = arith.constant 0 : i32
    %c0_i32_0 = arith.constant 0 : i32
    %c0_i32_1 = arith.constant 0 : i32
    return %c0_i32, %c0_i32_0 : i32, i32
  }
  func.func @transform_5(%arg0: i32) -> (i32, i32) {
    %c0_i32 = arith.constant 0 : i32
    %c0_i32_0 = arith.constant 0 : i32
    %c0_i32_1 = arith.constant 0 : i32
    return %c0_i32, %c0_i32_0 : i32, i32
  }
}

</mosaic_0001>

<bundles_post_ra>
// kernel: conv1d_model_forward.2
= control target key start
LH: loop header
LB: loop body
LE: loop exit
PB: predicated region body
PF: predicated region fallthrough
CT: control target
= control target key end

     0   :  { %10 = vsyncpa [#allocation3], 0  ;;  %s3171_s18 = smov [#allocation2]   ;;  %s5979_s0 = inlined_call_operand.vmem [shape: f32[2,400], index: 0, kind: input, shape index: {}]   ;;  %s5980_s1 = inlined_call_operand.vmem [shape: f32[64,8], index: 1, kind: input, shape index: {}]   ;;  %s5981_s2 = inlined_call_operand.vmem [shape: f32[64,1], index: 2, kind: input, shape index: {}]   ;;  %s5982_s3 = inlined_call_operand.hbm [shape: f32[64,320], index: 3, kind: input, shape index: {}]   ;;  %s5983_s4 = inlined_call_operand.vmem [shape: f32[64,1], index: 4, kind: input, shape index: {}]   ;;  %s5984_s5 = inlined_call_operand.vmem [shape: f32[2,64,392], index: 5, kind: output, shape index: {}]  }
   0x1   :  { %s22_s19 = sshll.u32 %s3171_s18, 4  ;;  %s23_s19 = int_to_ptr.vmem [resolvable:$true] %s22_s19 }
   0x2   :  { %s3157_s20 = scalar_lea.vmem %s23_s19, 3072  ;;  %p3162_p1 = scmp.lt.s32.totalorder %s23_s19, %s23_s19 }
   0x3   :  { %p3158_p0 = scmp.ne.s32.totalorder %s23_s19, %s3157_s20  ;;  %p3163_p2 = scmp.lt.s32.totalorder %s3157_s20, %s3157_s20 }
   0x5   :  { %p3164_p3 = por %p3163_p2, %p3162_p1 }
   0x7   :  { %p3165_p4 = pnand %p3164_p3, %p3158_p0 }
   0x9   :  { %3168 = shalt.err (!%p3165_p4)
}
   0xa   :  { %s3172_s21 = smov 384   ;;  %s3173_s22 = smov 24  }
   0xb   :  { %28 = dma.hbm_to_vmem [thread:$0]  %s5982_s3, 3072, %s23_s19, [#allocation3], %s3172_s21, %s3172_s21, %s3173_s22  }
   0xc   :  { %3169 = dma.done.wait [#allocation3], 3072  }
   0xd   :  { %3170 = vsyncadd [#allocation3], 4294964224  ;;  %v84_v0 = vlaneseq  ;;  %v3221_v5 = vld [vmem:[%s5979_s0] sm:$0xff]  ;;  %s3174_s3 = smov 127   ;;  %s3175_s0 = smov 126   ;;  %v5985_v11 = vmov 0.0  }
   0xe   :  { %s3176_s27 = smov 125   ;;  %322 = vmatprep.mubr.f32.mxu0 %v5985_v11  ;;  %435 = vmatprep.mubr.f32.mxu1 %v5985_v11  ;;  %s3178_s28 = smov 124   ;;  %v50_v12 = vld [vmem:[%s5981_s2 + $0x38] sm:$0xff]  ;;  %v3179_v13 = vmov 0   ;;  %v49_v14 = vld [vmem:[%s5981_s2 + $0x30] sm:$0xff]  ;;  %v47_v15 = vld [vmem:[%s5981_s2 + $0x20] sm:$0xff] }
   0xf   :  { %v3213_v1 = vshrl.u32 %v84_v0, 7  ;;  %3114 = vset.pattern.permute.xlu0 %v3179_v13  ;;  %3115 = vset.pattern.permute.xlu1 %v3179_v13  ;;  %v48_v16 = vld [vmem:[%s5981_s2 + $0x28] sm:$0xff]  ;;  %v45_v17 = vld [vmem:[%s5981_s2 + $0x10] sm:$0xff]  ;;  %v46_v18 = vld [vmem:[%s5981_s2 + $0x18] sm:$0xff]  ;;  %vm128_vm0 = vcmask 1031168   ;;  %vm112_vm1 = vcmask 1039360  }
  0x10   :  { %v43_v19 = vld [vmem:[%s5981_s2] sm:$0xff]  ;;  %v44_v20 = vld [vmem:[%s5981_s2 + $0x8] sm:$0xff]  ;;  %vm144_vm2 = vcmask 1022976   ;;  %vm173_vm3 = vcmask 1041408   ;;  %vm168_vm4 = vcmask 1040384   ;;  %vm160_vm5 = vcmask 1014784  }
  0x11   :  { %v90_v2 = vsub.s32 2, %v3213_v1  ;;  %v86_v3 = vsub.s32 0, %v3213_v1  ;;  %v94_v4 = vsub.s32 4, %v3213_v1  ;;  %v98_v9 = vsub.s32 6, %v3213_v1  ;;  %v35_v51 = vld [vmem:[%s5980_s1] sm:$0xff]  ;;  %v36_v63 = vld [vmem:[%s5980_s1 + $0x8] sm:$0xff] }
  0x12   :  { %vm178_vm6 = vcmask 1042432   ;;  %vm183_vm7 = vcmask 1043456   ;;  %vm188_vm8 = vcmask 1044480   ;;  %vm233_vm9 = vcmask 64512  }
  0x13   :  { %v3224_v6 = vrot.slane %v3221_v5, %v90_v2  ;;  %v3227_v7 = vrot.slane %v3221_v5, %v86_v3  ;;  %v3234_v8 = vrot.slane %v3221_v5, %v94_v4  ;;  %v3250_v10 = vrot.slane %v3221_v5, %v98_v9  ;;  %v37_v4 = vld [vmem:[%s5980_s1 + $0x10] sm:$0xff] }
  0x14   :  { %v41_v9 = vld [vmem:[%s5980_s1 + $0x30] sm:$0xff]  ;;  %vm1068_vm10 = vcmask 523264  }
  0x15   :  { %106 = vrot.lane.b32.xlu0 %v3224_v6, %s3174_s3  ;;  %104 = vrot.lane.b32.xlu1 %v3227_v7, %s3174_s3 }
  0x19   :  { %108 = vrot.lane.b32.xlu0 %v3234_v8, %s3174_s3  ;;  %122 = vrot.lane.b32.xlu1 %v3224_v6, %s3175_s0 }
  0x1d   :  { %124 = vrot.lane.b32.xlu0 %v3234_v8, %s3175_s0  ;;  %120 = vrot.lane.b32.xlu1 %v3227_v7, %s3175_s0 }
  0x21   :  { %138 = vrot.lane.b32.xlu0 %v3224_v6, %s3176_s27  ;;  %140 = vrot.lane.b32.xlu1 %v3234_v8, %s3176_s27 }
  0x25   :  { %110 = vrot.lane.b32.xlu0 %v3250_v10, %s3174_s3  ;;  %136 = vrot.lane.b32.xlu1 %v3227_v7, %s3176_s27 }
  0x29   :  { %154 = vrot.lane.b32.xlu0 %v3224_v6, %s3178_s28  ;;  %156 = vrot.lane.b32.xlu1 %v3234_v8, %s3178_s28 }
  0x2d   :  { %126 = vrot.lane.b32.xlu0 %v3250_v10, %s3175_s0  ;;  %152 = vrot.lane.b32.xlu1 %v3227_v7, %s3178_s28 }
  0x31   :  { %142 = vrot.lane.b32.xlu0 %v3250_v10, %s3176_s27  ;;  %158 = vrot.lane.b32.xlu1 %v3250_v10, %s3178_s28 }
  0x35   :  { %230 = vperm.xlu0 %3114, %v50_v12   ;;  %225 = vperm.xlu1 %3115, %v49_v14  }
  0x39   :  { %215 = vperm.xlu0 %3114, %v47_v15   ;;  %220 = vperm.xlu1 %3115, %v48_v16  }
  0x3d   :  { %205 = vperm.xlu0 %3114, %v45_v17   ;;  %210 = vperm.xlu1 %3115, %v46_v18  }
  0x41   :  { %195 = vperm.xlu0 %3114, %v43_v19   ;;  %200 = vperm.xlu1 %3115, %v44_v20  }
  0x87   :  { %v107_v21 = vpop.permute.xlu0 %106  ;;  %v105_v22 = vpop.permute.xlu1 %104 }
  0x88   :  { %v113_v35 = vsel %vm112_vm1, %v105_v22, %v107_v21 }
  0x89   :  { %v169_v44 = vsel %vm168_vm4, %v3227_v7, %v113_v35  ;;  %v39_v7 = vld [vmem:[%s5980_s1 + $0x20] sm:$0xff] }
  0x8b   :  { %v109_v23 = vpop.permute.xlu0 %108  ;;  %v123_v24 = vpop.permute.xlu1 %122 }
  0x8c   :  { %v114_v29 = vsel %vm112_vm1, %v107_v21, %v109_v23 }
  0x8d   :  { %v170_v34 = vsel %vm168_vm4, %v3224_v6, %v114_v29  ;;  %v38_v6 = vld [vmem:[%s5980_s1 + $0x18] sm:$0xff] }
  0x8f   :  { %v125_v25 = vpop.permute.xlu0 %124  ;;  %v121_v26 = vpop.permute.xlu1 %120 }
  0x90   :  { %v130_v32 = vsel %vm128_vm0, %v123_v24, %v125_v25  ;;  %v129_v39 = vsel %vm128_vm0, %v121_v26, %v123_v24 }
  0x91   :  { %v175_v38 = vsel %vm173_vm3, %v170_v34, %v130_v32  ;;  %v174_v45 = vsel %vm173_vm3, %v169_v44, %v129_v39 }
  0x93   :  { %v139_v27 = vpop.permute.xlu0 %138  ;;  %v141_v28 = vpop.permute.xlu1 %140 }
  0x94   :  { %v146_v33 = vsel %vm144_vm2, %v139_v27, %v141_v28 }
  0x95   :  { %v180_v41 = vsel %vm178_vm6, %v175_v38, %v146_v33 }
  0x97   :  { %v111_v30 = vpop.permute.xlu0 %110  ;;  %v137_v31 = vpop.permute.xlu1 %136 }
  0x98   :  { %v145_v42 = vsel %vm144_vm2, %v137_v31, %v139_v27  ;;  %v115_v48 = vsel %vm112_vm1, %v109_v23, %v111_v30  ;;  %v172_v54 = vsel %vm168_vm4, %v3250_v10, %v111_v30  ;;  %v42_v10 = vld [vmem:[%s5980_s1 + $0x38] sm:$0xff] }
  0x99   :  { %v179_v50 = vsel %vm178_vm6, %v174_v45, %v145_v42  ;;  %v171_v55 = vsel %vm168_vm4, %v3234_v8, %v115_v48  ;;  %v40_v8 = vld [vmem:[%s5980_s1 + $0x28] sm:$0xff] }
  0x9b   :  { %v155_v36 = vpop.permute.xlu0 %154  ;;  %v157_v37 = vpop.permute.xlu1 %156 }
  0x9c   :  { %v162_v40 = vsel %vm160_vm5, %v155_v36, %v157_v37 }
  0x9d   :  { %v185_v43 = vsel %vm183_vm7, %v180_v41, %v162_v40 }
  0x9e   :  { %3001 = vmatprep.subr.msk.mxu0 %vm188_vm8, %v185_v43 }
  0x9f   :  { %v127_v46 = vpop.permute.xlu0 %126  ;;  %v153_v47 = vpop.permute.xlu1 %152 }
  0xa0   :  { %v161_v49 = vsel %vm160_vm5, %v153_v47, %v155_v36  ;;  %v131_v52 = vsel %vm128_vm0, %v125_v25, %v127_v46  ;;  %v177_v56 = vsel %vm173_vm3, %v172_v54, %v127_v46 }
  0xa1   :  { %v184_v53 = vsel %vm183_vm7, %v179_v50, %v161_v49  ;;  %v176_v59 = vsel %vm173_vm3, %v171_v55, %v131_v52 }
  0xa2   :  { %3002 = vmatpush1.msk.msra.mxu0 %vm188_vm8, %v184_v53 }
  0xa3   :  { %v143_v57 = vpop.permute.xlu0 %142  ;;  %3003 = vmatmul.mubr.msk.f32.vlgmr.msra.gmra.mxu0 %vm233_vm9, %v35_v51  ;;  %v159_v58 = vpop.permute.xlu1 %158 }
  0xa4   :  { %v147_v60 = vsel %vm144_vm2, %v141_v28, %v143_v57  ;;  %v163_v61 = vsel %vm160_vm5, %v157_v37, %v159_v58  ;;  %328 = vmatprep.mubr.f32.mxu0 %v5985_v11  ;;  %v182_v62 = vsel %vm178_vm6, %v177_v56, %v143_v57 }
  0xa5   :  { %v187_v0 = vsel %vm183_vm7, %v182_v62, %v159_v58  ;;  %v181_v2 = vsel %vm178_vm6, %v176_v59, %v147_v60 }
  0xa6   :  { %3011 = vmatprep.subr.msk.mxu1 %vm188_vm8, %v187_v0  ;;  %v186_v3 = vsel %vm183_vm7, %v181_v2, %v163_v61 }
  0xa7   :  { %3004 = vmatmul.mubr.msk.f32.gmra.mxu0 %vm233_vm9, %v36_v63  ;;  %3012 = vmatpush1.msk.msra.mxu1 %vm188_vm8, %v186_v3 }
  0xa8   :  { %3013 = vmatmul.mubr.msk.f32.vlgmr.msra.gmra.mxu1 %vm233_vm9, %v35_v51  ;;  %334 = vmatprep.mubr.f32.mxu0 %v5985_v11 }
  0xa9   :  { %441 = vmatprep.mubr.f32.mxu1 %v5985_v11 }
  0xab   :  { %3005 = vmatmul.mubr.msk.f32.gmra.mxu0 %vm233_vm9, %v37_v4 }
  0xac   :  { %3014 = vmatmul.mubr.msk.f32.gmra.mxu1 %vm233_vm9, %v36_v63  ;;  %340 = vmatprep.mubr.f32.mxu0 %v5985_v11 }
  0xad   :  { %447 = vmatprep.mubr.f32.mxu1 %v5985_v11 }
  0xaf   :  { %3006 = vmatmul.mubr.msk.f32.gmra.mxu0 %vm233_vm9, %v38_v6 }
  0xb0   :  { %3015 = vmatmul.mubr.msk.f32.gmra.mxu1 %vm233_vm9, %v37_v4  ;;  %346 = vmatprep.mubr.f32.mxu0 %v5985_v11  ;;  %v3385_v12 = vpop.permute.xlu0 %230  ;;  %v3393_v17 = vpop.permute.xlu1 %225 }
  0xb1   :  { %453 = vmatprep.mubr.f32.mxu1 %v5985_v11  ;;  %6099 = vst [vmem:[#allocation5_spill] sm:$0xff] %v3385_v12  ;;  %6103 = vst [vmem:[#allocation9_spill] sm:$0xff] %v3393_v17 }
  0xb3   :  { %3007 = vmatmul.mubr.msk.f32.gmra.mxu0 %vm233_vm9, %v39_v7 }
  0xb4   :  { %3016 = vmatmul.mubr.msk.f32.gmra.mxu1 %vm233_vm9, %v38_v6  ;;  %352 = vmatprep.mubr.f32.mxu0 %v5985_v11  ;;  %v3387_v13 = vpop.permute.xlu0 %215  ;;  %v3401_v22 = vpop.permute.xlu1 %220 }
  0xb5   :  { %459 = vmatprep.mubr.f32.mxu1 %v5985_v11  ;;  %6100 = vst [vmem:[#allocation6_spill] sm:$0xff] %v3387_v13  ;;  %6105 = vst [vmem:[#allocation11_spill] sm:$0xff] %v3401_v22 }
  0xb7   :  { %3008 = vmatmul.mubr.msk.f32.gmra.mxu0 %vm233_vm9, %v40_v8 }
  0xb8   :  { %3017 = vmatmul.mubr.msk.f32.gmra.mxu1 %vm233_vm9, %v39_v7  ;;  %358 = vmatprep.mubr.f32.mxu0 %v5985_v11  ;;  %v3389_v14 = vpop.permute.xlu0 %205  ;;  %v3413_v29 = vpop.permute.xlu1 %210 }
  0xb9   :  { %465 = vmatprep.mubr.f32.mxu1 %v5985_v11  ;;  %6101 = vst [vmem:[#allocation7_spill] sm:$0xff] %v3389_v14  ;;  %6108 = vst [vmem:[#allocation14_spill] sm:$0xff] %v3413_v29 }
  0xbb   :  { %3009 = vmatmul.mubr.msk.f32.gmra.mxu0 %vm233_vm9, %v41_v9 }
  0xbc   :  { %3018 = vmatmul.mubr.msk.f32.gmra.mxu1 %vm233_vm9, %v40_v8  ;;  %364 = vmatprep.mubr.f32.mxu0 %v5985_v11  ;;  %v3391_v15 = vpop.permute.xlu0 %195  ;;  %v3423_v31 = vpop.permute.xlu1 %200 }
  0xbd   :  { %471 = vmatprep.mubr.f32.mxu1 %v5985_v11  ;;  %6102 = vst [vmem:[#allocation8_spill] sm:$0xff] %v3391_v15  ;;  %6110 = vst [vmem:[#allocation16_spill] sm:$0xff] %v3423_v31 }
  0xbf   :  { %3010 = vmatmul.mubr.msk.f32.gmra.mxu0 %vm233_vm9, %v42_v10 }
  0xc0   :  { %3019 = vmatmul.mubr.msk.f32.gmra.mxu1 %vm233_vm9, %v41_v9 }
  0xc1   :  { %477 = vmatprep.mubr.f32.mxu1 %v5985_v11 }
  0xc4   :  { %3020 = vmatmul.mubr.msk.f32.gmra.mxu1 %vm233_vm9, %v42_v10 }
  0xc5   :  { %1270 = vmatprep.mubr.f32.mxu1 %v5985_v11 }
 0x163   :  { %v324_v16 = vpop.f32.mrf.mxu0 }
 0x164   :  { %v325_v18 = vadd.f32 %v324_v16, %v3391_v15 }
 0x165   :  { %v326_v23 = vpop.f32.mrf.mxu0 }
 0x166   :  { %v3396_v19 = vmax.f32 %v325_v18, 0.0  ;;  %v327_v27 = vadd.f32 %v326_v23, %v3391_v15 }
 0x167   :  { %v330_v35 = vpop.f32.mrf.mxu0 }
 0x168   :  { %6104 = vst [vmem:[#allocation10_spill] sm:$0xff] %v3396_v19  ;;  %548 = vrot.lane.b32.xlu0 %v3396_v19, %s3174_s3  ;;  %v437_v20 = vpop.f32.mrf.mxu1  ;;  %v3415_v30 = vmax.f32 %v327_v27, 0.0  ;;  %v331_v36 = vadd.f32 %v330_v35, %v3423_v31 }
 0x169   :  { %v438_v21 = vadd.f32 %v437_v20, %v3391_v15  ;;  %v332_v39 = vpop.f32.mrf.mxu0 }
 0x16a   :  { %v439_v24 = vpop.f32.mrf.mxu1  ;;  %6109 = vst [vmem:[#allocation15_spill] sm:$0xff] %v3415_v30  ;;  %v3444_v40 = vmax.f32 %v331_v36, 0.0  ;;  %v333_v42 = vadd.f32 %v332_v39, %v3423_v31 }
 0x16b   :  { %v3403_v25 = vmax.f32 %v438_v21, 0.0  ;;  %v440_v26 = vadd.f32 %v439_v24, %v3391_v15  ;;  %v336_v43 = vpop.f32.mrf.mxu0 }
 0x16c   :  { %v443_v32 = vpop.f32.mrf.mxu1  ;;  %6112 = vst [vmem:[#allocation18_spill] sm:$0xff] %v3444_v40  ;;  %v337_v44 = vadd.f32 %v336_v43, %v3389_v14  ;;  %v3456_v45 = vmax.f32 %v333_v42, 0.0 }
 0x16d   :  { %6106 = vst [vmem:[#allocation12_spill] sm:$0xff] %v3403_v25  ;;  %v3407_v28 = vmax.f32 %v440_v26, 0.0  ;;  %552 = vrot.lane.b32.xlu1 %v3403_v25, %s3174_s3  ;;  %v444_v33 = vadd.f32 %v443_v32, %v3423_v31  ;;  %v338_v50 = vpop.f32.mrf.mxu0 }
 0x16e   :  { %v445_v37 = vpop.f32.mrf.mxu1  ;;  %6114 = vst [vmem:[#allocation20_spill] sm:$0xff] %v3456_v45  ;;  %v3460_v47 = vmax.f32 %v337_v44, 0.0  ;;  %v339_v52 = vadd.f32 %v338_v50, %v3389_v14 }
 0x16f   :  { %6107 = vst [vmem:[#allocation13_spill] sm:$0xff] %v3407_v28  ;;  %554 = vrot.lane.b32.xlu0 %v3407_v28, %s3174_s3  ;;  %v3434_v34 = vmax.f32 %v444_v33, 0.0  ;;  %v446_v38 = vadd.f32 %v445_v37, %v3423_v31  ;;  %v342_v58 = vpop.f32.mrf.mxu0 }
 0x170   :  { %v449_v46 = vpop.f32.mrf.mxu1  ;;  %v3481_v55 = vmax.f32 %v339_v52, 0.0  ;;  %v343_v61 = vadd.f32 %v342_v58, %v3413_v29 }
 0x171   :  { %912 = vrot.lane.b32.xlu1 %v3403_v25, %s3178_s28  ;;  %6111 = vst [vmem:[#allocation17_spill] sm:$0xff] %v3434_v34  ;;  %v3448_v41 = vmax.f32 %v446_v38, 0.0  ;;  %v450_v51 = vadd.f32 %v449_v46, %v3389_v14  ;;  %v344_v63 = vpop.f32.mrf.mxu0 }
 0x172   :  { %v451_v48 = vpop.f32.mrf.mxu1  ;;  %v3506_v0 = vmax.f32 %v343_v61, 0.0  ;;  %v345_v2 = vadd.f32 %v344_v63, %v3413_v29 }
 0x173   :  { %550 = vrot.lane.b32.xlu0 %v3415_v30, %s3174_s3  ;;  %6113 = vst [vmem:[#allocation19_spill] sm:$0xff] %v3448_v41  ;;  %v452_v49 = vadd.f32 %v451_v48, %v3389_v14  ;;  %v3477_v54 = vmax.f32 %v450_v51, 0.0  ;;  %v348_v4 = vpop.f32.mrf.mxu0 }
 0x174   :  { %v455_v56 = vpop.f32.mrf.mxu1  ;;  %v3517_v6 = vmax.f32 %v345_v2, 0.0  ;;  %v349_v7 = vadd.f32 %v348_v4, %v3387_v13 }
 0x175   :  { %792 = vrot.lane.b32.xlu1 %v3403_v25, %s3176_s27  ;;  %v3473_v53 = vmax.f32 %v452_v49, 0.0  ;;  %6116 = vst [vmem:[#allocation22_spill] sm:$0xff] %v3477_v54  ;;  %v456_v57 = vadd.f32 %v455_v56, %v3413_v29  ;;  %v350_v18 = vpop.f32.mrf.mxu0 }
 0x176   :  { %v457_v60 = vpop.f32.mrf.mxu1  ;;  %v3524_v9 = vmax.f32 %v349_v7, 0.0  ;;  %v351_v21 = vadd.f32 %v350_v18, %v3387_v13 }
 0x177   :  { %910 = vrot.lane.b32.xlu0 %v3415_v30, %s3178_s28  ;;  %6115 = vst [vmem:[#allocation21_spill] sm:$0xff] %v3473_v53  ;;  %v3496_v59 = vmax.f32 %v456_v57, 0.0  ;;  %v458_v62 = vadd.f32 %v457_v60, %v3413_v29  ;;  %v354_v33 = vpop.f32.mrf.mxu0 }
 0x178   :  { %v461_v8 = vpop.f32.mrf.mxu1  ;;  %v3545_v26 = vmax.f32 %v351_v21, 0.0  ;;  %v355_v37 = vadd.f32 %v354_v33, %v3401_v22 }
 0x179   :  { %908 = vrot.lane.b32.xlu1 %v3396_v19, %s3178_s28  ;;  %6117 = vst [vmem:[#allocation23_spill] sm:$0xff] %v3496_v59  ;;  %v3511_v3 = vmax.f32 %v458_v62, 0.0  ;;  %v462_v20 = vadd.f32 %v461_v8, %v3387_v13  ;;  %v356_v39 = vpop.f32.mrf.mxu0 }
 0x17a   :  { %v463_v10 = vpop.f32.mrf.mxu1  ;;  %v3570_v42 = vmax.f32 %v355_v37, 0.0  ;;  %v357_v43 = vadd.f32 %v356_v39, %v3401_v22 }
 0x17b   :  { %790 = vrot.lane.b32.xlu0 %v3415_v30, %s3176_s27  ;;  %6118 = vst [vmem:[#allocation24_spill] sm:$0xff] %v3511_v3  ;;  %v464_v16 = vadd.f32 %v463_v10, %v3387_v13  ;;  %v3541_v24 = vmax.f32 %v462_v20, 0.0  ;;  %v360_v46 = vpop.f32.mrf.mxu0 }
 0x17c   :  { %v467_v27 = vpop.f32.mrf.mxu1  ;;  %v3581_v48 = vmax.f32 %v357_v43, 0.0  ;;  %v361_v49 = vadd.f32 %v360_v46, %v3393_v17 }
 0x17d   :  { %788 = vrot.lane.b32.xlu1 %v3396_v19, %s3176_s27  ;;  %v3537_v23 = vmax.f32 %v464_v16, 0.0  ;;  %6120 = vst [vmem:[#allocation26_spill] sm:$0xff] %v3541_v24  ;;  %v468_v32 = vadd.f32 %v467_v27, %v3401_v22  ;;  %v362_v61 = vpop.f32.mrf.mxu0 }
 0x17e   :  { %v469_v36 = vpop.f32.mrf.mxu1  ;;  %v3588_v51 = vmax.f32 %v361_v49, 0.0  ;;  %v363_v2 = vadd.f32 %v362_v61, %v3393_v17 }
 0x17f   :  { %560 = vrot.lane.b32.xlu0 %v3434_v34, %s3174_s3  ;;  %6119 = vst [vmem:[#allocation25_spill] sm:$0xff] %v3537_v23  ;;  %v3560_v35 = vmax.f32 %v468_v32, 0.0  ;;  %v470_v38 = vadd.f32 %v469_v36, %v3401_v22  ;;  %v366_v43 = vpop.f32.mrf.mxu0 }
 0x180   :  { %v473_v50 = vpop.f32.mrf.mxu1  ;;  %v3621_v16 = vmax.f32 %v363_v2, 0.0  ;;  %v367_v49 = vadd.f32 %v366_v43, %v3385_v12 }
 0x181   :  { %800 = vrot.lane.b32.xlu1 %v3434_v34, %s3176_s27  ;;  %6121 = vst [vmem:[#allocation27_spill] sm:$0xff] %v3560_v35  ;;  %v3575_v44 = vmax.f32 %v470_v38, 0.0  ;;  %v474_v62 = vadd.f32 %v473_v50, %v3393_v17 }
 0x182   :  { %v475_v56 = vpop.f32.mrf.mxu1  ;;  %v3667_v61 = vmax.f32 %v367_v49, 0.0 }
 0x183   :  { %920 = vrot.lane.b32.xlu0 %v3434_v34, %s3178_s28  ;;  %6122 = vst [vmem:[#allocation28_spill] sm:$0xff] %v3575_v44  ;;  %v476_v58 = vadd.f32 %v475_v56, %v3393_v17  ;;  %v3615_v8 = vmax.f32 %v474_v62, 0.0 }
 0x184   :  { %v479_v27 = vpop.f32.mrf.mxu1 }
 0x185   :  { %556 = vrot.lane.b32.xlu1 %v3444_v40, %s3174_s3  ;;  %v3609_v4 = vmax.f32 %v476_v58, 0.0  ;;  %6126 = vst [vmem:[#allocation32_spill] sm:$0xff] %v3615_v8  ;;  %v480_v33 = vadd.f32 %v479_v27, %v3385_v12 }
 0x186   :  { %v481_v56 = vpop.f32.mrf.mxu1 }
 0x187   :  { %562 = vrot.lane.b32.xlu0 %v3448_v41, %s3174_s3  ;;  %6125 = vst [vmem:[#allocation31_spill] sm:$0xff] %v3609_v4  ;;  %v3648_v38 = vmax.f32 %v480_v33, 0.0  ;;  %v482_v62 = vadd.f32 %v481_v56, %v3385_v12  ;;  %v368_v33 = vpop.f32.mrf.mxu0 }
 0x188   :  { %v369_v49 = vadd.f32 %v368_v33, %v3385_v12 }
 0x189   :  { %916 = vrot.lane.b32.xlu1 %v3444_v40, %s3178_s28  ;;  %6133 = vst [vmem:[#allocation39_spill] sm:$0xff] %v3648_v38  ;;  %v3678_v43 = vmax.f32 %v482_v62, 0.0 }
 0x18a   :  { %v3693_v22 = vmax.f32 %v369_v49, 0.0 }
 0x18b   :  { %798 = vrot.lane.b32.xlu0 %v3456_v45, %s3176_s27  ;;  %6138 = vst [vmem:[#allocation44_spill] sm:$0xff] %v3678_v43 }
 0x18d   :  { %796 = vrot.lane.b32.xlu1 %v3444_v40, %s3176_s27 }
 0x18f   :  { %564 = vrot.lane.b32.xlu0 %v3460_v47, %s3174_s3 }
 0x191   :  { %558 = vrot.lane.b32.xlu1 %v3456_v45, %s3174_s3 }
 0x193   :  { %924 = vrot.lane.b32.xlu0 %v3460_v47, %s3178_s28 }
 0x195   :  { %918 = vrot.lane.b32.xlu1 %v3456_v45, %s3178_s28 }
 0x197   :  { %570 = vrot.lane.b32.xlu0 %v3473_v53, %s3174_s3 }
 0x199   :  { %568 = vrot.lane.b32.xlu1 %v3477_v54, %s3174_s3 }
 0x19b   :  { %566 = vrot.lane.b32.xlu0 %v3481_v55, %s3174_s3 }
 0x19d   :  { %928 = vrot.lane.b32.xlu1 %v3477_v54, %s3178_s28 }
 0x19f   :  { %926 = vrot.lane.b32.xlu0 %v3481_v55, %s3178_s28 }
 0x1a1   :  { %808 = vrot.lane.b32.xlu1 %v3477_v54, %s3176_s27 }
 0x1a3   :  { %806 = vrot.lane.b32.xlu0 %v3481_v55, %s3176_s27 }
 0x1a5   :  { %804 = vrot.lane.b32.xlu1 %v3460_v47, %s3176_s27 }
 0x1a7   :  { %576 = vrot.lane.b32.xlu0 %v3496_v59, %s3174_s3 }
 0x1a9   :  { %816 = vrot.lane.b32.xlu1 %v3496_v59, %s3176_s27 }
 0x1ab   :  { %936 = vrot.lane.b32.xlu0 %v3496_v59, %s3178_s28 }
 0x1ad   :  { %572 = vrot.lane.b32.xlu1 %v3506_v0, %s3174_s3 }
 0x1af   :  { %578 = vrot.lane.b32.xlu0 %v3511_v3, %s3174_s3 }
 0x1b1   :  { %932 = vrot.lane.b32.xlu1 %v3506_v0, %s3178_s28 }
 0x1b3   :  { %814 = vrot.lane.b32.xlu0 %v3517_v6, %s3176_s27 }
 0x1b5   :  { %812 = vrot.lane.b32.xlu1 %v3506_v0, %s3176_s27 }
 0x1b7   :  { %580 = vrot.lane.b32.xlu0 %v3524_v9, %s3174_s3 }
 0x1b9   :  { %574 = vrot.lane.b32.xlu1 %v3517_v6, %s3174_s3 }
 0x1bb   :  { %940 = vrot.lane.b32.xlu0 %v3524_v9, %s3178_s28 }
 0x1bd   :  { %934 = vrot.lane.b32.xlu1 %v3517_v6, %s3178_s28 }
 0x1bf   :  { %586 = vrot.lane.b32.xlu0 %v3537_v23, %s3174_s3 }
 0x1c1   :  { %584 = vrot.lane.b32.xlu1 %v3541_v24, %s3174_s3 }
 0x1c3   :  { %582 = vrot.lane.b32.xlu0 %v3545_v26, %s3174_s3 }
 0x1c5   :  { %944 = vrot.lane.b32.xlu1 %v3541_v24, %s3178_s28 }
 0x1c7   :  { %942 = vrot.lane.b32.xlu0 %v3545_v26, %s3178_s28 }
 0x1c9   :  { %824 = vrot.lane.b32.xlu1 %v3541_v24, %s3176_s27 }
 0x1cb   :  { %822 = vrot.lane.b32.xlu0 %v3545_v26, %s3176_s27 }
 0x1cd   :  { %820 = vrot.lane.b32.xlu1 %v3524_v9, %s3176_s27 }
 0x1cf   :  { %592 = vrot.lane.b32.xlu0 %v3560_v35, %s3174_s3 }
 0x1d1   :  { %832 = vrot.lane.b32.xlu1 %v3560_v35, %s3176_s27 }
 0x1d3   :  { %952 = vrot.lane.b32.xlu0 %v3560_v35, %s3178_s28 }
 0x1d5   :  { %588 = vrot.lane.b32.xlu1 %v3570_v42, %s3174_s3 }
 0x1d7   :  { %594 = vrot.lane.b32.xlu0 %v3575_v44, %s3174_s3 }
 0x1d9   :  { %948 = vrot.lane.b32.xlu1 %v3570_v42, %s3178_s28 }
 0x1da   :  { %v3590_v52 = vpop.permute.xlu0 %548 }
 0x1db   :  { %830 = vrot.lane.b32.xlu0 %v3581_v48, %s3176_s27 }
 0x1dd   :  { %828 = vrot.lane.b32.xlu1 %v3570_v42, %s3176_s27 }
 0x1df   :  { %596 = vrot.lane.b32.xlu0 %v3588_v51, %s3174_s3  ;;  %v3596_v57 = vpop.permute.xlu1 %552 }
 0x1e1   :  { %v3599_v60 = vpop.permute.xlu0 %554  ;;  %590 = vrot.lane.b32.xlu1 %v3581_v48, %s3174_s3 }
 0x1e2   :  { %6123 = vst [vmem:[#allocation29_spill] sm:$0xff] %v3599_v60 }
 0x1e3   :  { %956 = vrot.lane.b32.xlu0 %v3588_v51, %s3178_s28  ;;  %v3606_v63 = vpop.permute.xlu1 %912 }
 0x1e4   :  { %6124 = vst [vmem:[#allocation30_spill] sm:$0xff] %v3606_v63 }
 0x1e5   :  { %v3611_v7 = vpop.permute.xlu0 %550  ;;  %950 = vrot.lane.b32.xlu1 %v3581_v48, %s3178_s28 }
 0x1e7   :  { %602 = vrot.lane.b32.xlu0 %v3609_v4, %s3174_s3  ;;  %v3619_v10 = vpop.permute.xlu1 %792 }
 0x1e8   :  { %6127 = vst [vmem:[#allocation33_spill] sm:$0xff] %v3619_v10 }
 0x1e9   :  { %v3623_v18 = vpop.permute.xlu0 %910  ;;  %600 = vrot.lane.b32.xlu1 %v3615_v8, %s3174_s3 }
 0x1ea   :  { %6128 = vst [vmem:[#allocation34_spill] sm:$0xff] %v3623_v18 }
 0x1eb   :  { %598 = vrot.lane.b32.xlu0 %v3621_v16, %s3174_s3  ;;  %v3629_v20 = vpop.permute.xlu1 %908 }
 0x1ec   :  { %6129 = vst [vmem:[#allocation35_spill] sm:$0xff] %v3629_v20 }
 0x1ed   :  { %v3631_v21 = vpop.permute.xlu0 %790  ;;  %960 = vrot.lane.b32.xlu1 %v3615_v8, %s3178_s28 }
 0x1ee   :  { %6130 = vst [vmem:[#allocation36_spill] sm:$0xff] %v3631_v21 }
 0x1ef   :  { %958 = vrot.lane.b32.xlu0 %v3621_v16, %s3178_s28  ;;  %v3637_v32 = vpop.permute.xlu1 %788 }
 0x1f0   :  { %6131 = vst [vmem:[#allocation37_spill] sm:$0xff] %v3637_v32 }
 0x1f1   :  { %v3640_v36 = vpop.permute.xlu0 %560  ;;  %840 = vrot.lane.b32.xlu1 %v3615_v8, %s3176_s27 }
 0x1f3   :  { %838 = vrot.lane.b32.xlu0 %v3621_v16, %s3176_s27  ;;  %v3646_v37 = vpop.permute.xlu1 %800 }
 0x1f4   :  { %6132 = vst [vmem:[#allocation38_spill] sm:$0xff] %v3646_v37 }
 0x1f5   :  { %v3650_v39 = vpop.permute.xlu0 %920  ;;  %836 = vrot.lane.b32.xlu1 %v3588_v51, %s3176_s27 }
 0x1f7   :  { %608 = vrot.lane.b32.xlu0 %v3648_v38, %s3174_s3  ;;  %v3656_v46 = vpop.permute.xlu1 %556 }
 0x1f9   :  { %v3659_v50 = vpop.permute.xlu0 %562  ;;  %848 = vrot.lane.b32.xlu1 %v3648_v38, %s3176_s27 }
 0x1fa   :  { %6134 = vst [vmem:[#allocation40_spill] sm:$0xff] %v3659_v50 }
 0x1fb   :  { %968 = vrot.lane.b32.xlu0 %v3648_v38, %s3178_s28  ;;  %v3665_v58 = vpop.permute.xlu1 %916 }
 0x1fc   :  { %6135 = vst [vmem:[#allocation41_spill] sm:$0xff] %v3665_v58 }
 0x1fd   :  { %v3670_v2 = vpop.permute.xlu0 %798  ;;  %728 = vrot.lane.b32.xlu1 %v3648_v38, %s3175_s0 }
 0x1fe   :  { %6136 = vst [vmem:[#allocation42_spill] sm:$0xff] %v3670_v2 }
 0x1ff   :  { %844 = vrot.lane.b32.xlu0 %v3667_v61, %s3176_s27  ;;  %v3676_v27 = vpop.permute.xlu1 %796 }
 0x200   :  { %6137 = vst [vmem:[#allocation43_spill] sm:$0xff] %v3676_v27 }
 0x201   :  { %v3680_v11 = vpop.permute.xlu0 %564  ;;  %604 = vrot.lane.b32.xlu1 %v3667_v61, %s3174_s3 }
 0x203   :  { %610 = vrot.lane.b32.xlu0 %v3678_v43, %s3174_s3  ;;  %v3687_v56 = vpop.permute.xlu1 %558 }
 0x205   :  { %v3689_v17 = vpop.permute.xlu0 %924  ;;  %964 = vrot.lane.b32.xlu1 %v3667_v61, %s3178_s28 }
 0x207   :  { %718 = vrot.lane.b32.xlu0 %v3621_v16, %s3175_s0  ;;  %v3697_v62 = vpop.permute.xlu1 %918 }
 0x208   :  { %6139 = vst [vmem:[#allocation45_spill] sm:$0xff] %v3697_v62 }
 0x209   :  { %v3699_v13 = vpop.permute.xlu0 %570  ;;  %606 = vrot.lane.b32.xlu1 %v3693_v22, %s3174_s3 }
 0x20a   :  { %6140 = vst [vmem:[#allocation46_spill] sm:$0xff] %v3699_v13 }
 0x20b   :  { %716 = vrot.lane.b32.xlu0 %v3588_v51, %s3175_s0  ;;  %v3705_v33 = vpop.permute.xlu1 %568 }
 0x20d   :  { %v3707_v12 = vpop.permute.xlu0 %566  ;;  %724 = vrot.lane.b32.xlu1 %v3667_v61, %s3175_s0 }
 0x20f   :  { %712 = vrot.lane.b32.xlu0 %v3560_v35, %s3175_s0  ;;  %v3713_v49 = vpop.permute.xlu1 %928 }
 0x211   :  { %v3715_v29 = vpop.permute.xlu0 %926  ;;  %720 = vrot.lane.b32.xlu1 %v3615_v8, %s3175_s0 }
 0x213   :  { %702 = vrot.lane.b32.xlu0 %v3545_v26, %s3175_s0  ;;  %v3721_v14 = vpop.permute.xlu1 %808 }
 0x214   :  { %6141 = vst [vmem:[#allocation47_spill] sm:$0xff] %v3721_v14 }
 0x215   :  { %v3723_v31 = vpop.permute.xlu0 %806  ;;  %710 = vrot.lane.b32.xlu1 %v3581_v48, %s3175_s0 }
 0x216   :  { %6142 = vst [vmem:[#allocation48_spill] sm:$0xff] %v3723_v31 }
 0x217   :  { %700 = vrot.lane.b32.xlu0 %v3524_v9, %s3175_s0  ;;  %v3729_v15 = vpop.permute.xlu1 %804 }
 0x218   :  { %6143 = vst [vmem:[#allocation49_spill] sm:$0xff] %v3729_v15 }
 0x219   :  { %v3731_v35 = vpop.permute.xlu0 %576  ;;  %966 = vrot.lane.b32.xlu1 %v3693_v22, %s3178_s28 }
 0x21b   :  { %696 = vrot.lane.b32.xlu0 %v3496_v59, %s3175_s0  ;;  %v3737_v8 = vpop.permute.xlu1 %816 }
 0x21c   :  { %6144 = vst [vmem:[#allocation50_spill] sm:$0xff] %v3737_v8 }
 0x21d   :  { %v3739_v38 = vpop.permute.xlu0 %936  ;;  %708 = vrot.lane.b32.xlu1 %v3570_v42, %s3175_s0 }
 0x21f   :  { %686 = vrot.lane.b32.xlu0 %v3481_v55, %s3175_s0  ;;  %v3745_v60 = vpop.permute.xlu1 %572 }
 0x221   :  { %v3747_v32 = vpop.permute.xlu0 %578  ;;  %704 = vrot.lane.b32.xlu1 %v3541_v24, %s3175_s0 }
 0x222   :  { %6145 = vst [vmem:[#allocation51_spill] sm:$0xff] %v3747_v32  ;;  %v3807_v32 = vld [vmem:[#allocation2 + $0x8] sm:$0xff] }
 0x223   :  { %684 = vrot.lane.b32.xlu0 %v3460_v47, %s3175_s0  ;;  %v3753_v59 = vpop.permute.xlu1 %932  ;;  %6151 = vst [vmem:[#allocation57_spill] sm:$0xff] %v3807_v32  ;;  %1157 = vmatprep.mubr.f32.mxu0 %v3807_v32 }
 0x225   :  { %v3755_v21 = vpop.permute.xlu0 %814  ;;  %694 = vrot.lane.b32.xlu1 %v3517_v6, %s3175_s0 }
 0x226   :  { %6146 = vst [vmem:[#allocation52_spill] sm:$0xff] %v3755_v21 }
 0x227   :  { %846 = vrot.lane.b32.xlu0 %v3693_v22, %s3176_s27  ;;  %v3761_v10 = vpop.permute.xlu1 %812 }
 0x228   :  { %6147 = vst [vmem:[#allocation53_spill] sm:$0xff] %v3761_v10 }
 0x229   :  { %v3763_v50 = vpop.permute.xlu0 %580  ;;  %692 = vrot.lane.b32.xlu1 %v3506_v0, %s3175_s0 }
 0x22b   :  { %680 = vrot.lane.b32.xlu0 %v3434_v34, %s3175_s0  ;;  %v3769_v24 = vpop.permute.xlu1 %574 }
 0x22d   :  { %v3771_v27 = vpop.permute.xlu0 %940  ;;  %688 = vrot.lane.b32.xlu1 %v3477_v54, %s3175_s0 }
 0x22f   :  { %670 = vrot.lane.b32.xlu0 %v3415_v30, %s3175_s0  ;;  %v3777_v2 = vpop.permute.xlu1 %934 }
 0x231   :  { %v3779_v37 = vpop.permute.xlu0 %586  ;;  %678 = vrot.lane.b32.xlu1 %v3456_v45, %s3175_s0 }
 0x232   :  { %6148 = vst [vmem:[#allocation54_spill] sm:$0xff] %v3779_v37 }
 0x233   :  { %668 = vrot.lane.b32.xlu0 %v3396_v19, %s3175_s0  ;;  %v3785_v34 = vpop.permute.xlu1 %584 }
 0x235   :  { %v3787_v13 = vpop.permute.xlu0 %582  ;;  %676 = vrot.lane.b32.xlu1 %v3444_v40, %s3175_s0 }
 0x237   :  { %726 = vrot.lane.b32.xlu0 %v3693_v22, %s3175_s0  ;;  %v3793_v54 = vpop.permute.xlu1 %944 }
 0x239   :  { %v3795_v15 = vpop.permute.xlu0 %942  ;;  %672 = vrot.lane.b32.xlu1 %v3403_v25, %s3175_s0 }
 0x23b   :  { %842 = vrot.lane.b32.xlu0 %v3609_v4, %s3176_s27  ;;  %v3801_v31 = vpop.permute.xlu1 %824 }
 0x23c   :  { %6149 = vst [vmem:[#allocation55_spill] sm:$0xff] %v3801_v31 }
 0x23d   :  { %v3803_v14 = vpop.permute.xlu0 %822  ;;  %850 = vrot.lane.b32.xlu1 %v3678_v43, %s3176_s27 }
 0x23e   :  { %6150 = vst [vmem:[#allocation56_spill] sm:$0xff] %v3803_v14 }
 0x23f   :  { %826 = vrot.lane.b32.xlu0 %v3537_v23, %s3176_s27  ;;  %v3812_v10 = vpop.permute.xlu1 %820 }
 0x240   :  { %6152 = vst [vmem:[#allocation58_spill] sm:$0xff] %v3812_v10 }
 0x241   :  { %v3814_v25 = vpop.permute.xlu0 %592  ;;  %834 = vrot.lane.b32.xlu1 %v3575_v44, %s3176_s27 }
 0x243   :  { %810 = vrot.lane.b32.xlu0 %v3473_v53, %s3176_s27  ;;  %v3820_v21 = vpop.permute.xlu1 %832 }
 0x244   :  { %6153 = vst [vmem:[#allocation59_spill] sm:$0xff] %v3820_v21 }
 0x245   :  { %v3822_v8 = vpop.permute.xlu0 %952  ;;  %818 = vrot.lane.b32.xlu1 %v3511_v3, %s3176_s27 }
 0x247   :  { %794 = vrot.lane.b32.xlu0 %v3407_v28, %s3176_s27  ;;  %v3828_v32 = vpop.permute.xlu1 %588 }
 0x249   :  { %v3830_v37 = vpop.permute.xlu0 %594  ;;  %802 = vrot.lane.b32.xlu1 %v3448_v41, %s3176_s27 }
 0x24a   :  { %6154 = vst [vmem:[#allocation60_spill] sm:$0xff] %v3830_v37 }
 0x24b   :  { %730 = vrot.lane.b32.xlu0 %v3678_v43, %s3175_s0  ;;  %v3836_v10 = vpop.permute.xlu1 %948 }
 0x24d   :  { %v3838_v14 = vpop.permute.xlu0 %830  ;;  %970 = vrot.lane.b32.xlu1 %v3678_v43, %s3178_s28 }
 0x24e   :  { %6155 = vst [vmem:[#allocation61_spill] sm:$0xff] %v3838_v14 }
 0x24f   :  { %722 = vrot.lane.b32.xlu0 %v3609_v4, %s3175_s0  ;;  %v3844_v31 = vpop.permute.xlu1 %828 }
 0x250   :  { %6156 = vst [vmem:[#allocation62_spill] sm:$0xff] %v3844_v31 }
 0x251   :  { %v3846_v21 = vpop.permute.xlu0 %596  ;;  %962 = vrot.lane.b32.xlu1 %v3609_v4, %s3178_s28 }
 0x253   :  { %714 = vrot.lane.b32.xlu0 %v3575_v44, %s3175_s0  ;;  %v3852_v37 = vpop.permute.xlu1 %590 }
 0x255   :  { %v3854_v19 = vpop.permute.xlu0 %956  ;;  %954 = vrot.lane.b32.xlu1 %v3575_v44, %s3178_s28 }
 0x257   :  { %706 = vrot.lane.b32.xlu0 %v3537_v23, %s3175_s0  ;;  %v3860_v43 = vpop.permute.xlu1 %950 }
 0x259   :  { %v3862_v31 = vpop.permute.xlu0 %602  ;;  %946 = vrot.lane.b32.xlu1 %v3537_v23, %s3178_s28 }
 0x25a   :  { %6157 = vst [vmem:[#allocation63_spill] sm:$0xff] %v3862_v31  ;;  %v1619_v31 = vsub.s32 5, %v3213_v1 }
 0x25b   :  { %698 = vrot.lane.b32.xlu0 %v3511_v3, %s3175_s0  ;;  %v3868_v4 = vpop.permute.xlu1 %600 }
 0x25d   :  { %v599_v14 = vpop.permute.xlu0 %598  ;;  %938 = vrot.lane.b32.xlu1 %v3511_v3, %s3178_s28  ;;  %v1615_v3 = vsub.s32 3, %v3213_v1 }
 0x25f   :  { %690 = vrot.lane.b32.xlu0 %v3473_v53, %s3175_s0  ;;  %v3874_v44 = vpop.permute.xlu1 %960 }
 0x261   :  { %v3876_v30 = vpop.permute.xlu0 %958  ;;  %930 = vrot.lane.b32.xlu1 %v3473_v53, %s3178_s28  ;;  %v3895_v53 = vrot.slane %v3221_v5, %v1619_v31 }
 0x263   :  { %682 = vrot.lane.b32.xlu0 %v3448_v41, %s3175_s0  ;;  %v3882_v23 = vpop.permute.xlu1 %840 }
 0x264   :  { %6158 = vst [vmem:[#allocation64_spill] sm:$0xff] %v3882_v23 }
 0x265   :  { %v3885_v20 = vpop.permute.xlu0 %838  ;;  %922 = vrot.lane.b32.xlu1 %v3448_v41, %s3178_s28  ;;  %v1611_v41 = vsub.s32 1, %v3213_v1 }
 0x266   :  { %6159 = vst [vmem:[#allocation65_spill] sm:$0xff] %v3885_v20  ;;  %v3902_v20 = vrot.slane %v3221_v5, %v1615_v3 }
 0x267   :  { %674 = vrot.lane.b32.xlu0 %v3407_v28, %s3175_s0  ;;  %v3892_v18 = vpop.permute.xlu1 %836  ;;  %v3914_v31 = vrot.slane %v3221_v5, %v1611_v41  ;;  %v1623_v41 = vsub.s32 7, %v3213_v1 }
 0x268   :  { %6160 = vst [vmem:[#allocation66_spill] sm:$0xff] %v3892_v18 }
 0x269   :  { %v3897_v63 = vpop.permute.xlu0 %608  ;;  %914 = vrot.lane.b32.xlu1 %v3407_v28, %s3178_s28 }
 0x26b   :  { %1633 = vrot.lane.b32.xlu0 %v3895_v53, %s3174_s3  ;;  %v3907_v23 = vpop.permute.xlu1 %848 }
 0x26c   :  { %6161 = vst [vmem:[#allocation67_spill] sm:$0xff] %v3907_v23 }
 0x26d   :  { %v3909_v40 = vpop.permute.xlu0 %968  ;;  %1631 = vrot.lane.b32.xlu1 %v3902_v20, %s3174_s3 }
 0x26f   :  { %1646 = vrot.lane.b32.xlu0 %v3902_v20, %s3175_s0  ;;  %v3918_v3 = vpop.permute.xlu1 %728 }
 0x270   :  { %6162 = vst [vmem:[#allocation68_spill] sm:$0xff] %v3918_v3 }
 0x271   :  { %v3920_v28 = vpop.permute.xlu0 %844  ;;  %1629 = vrot.lane.b32.xlu1 %v3914_v31, %s3174_s3 }
 0x272   :  { %6163 = vst [vmem:[#allocation69_spill] sm:$0xff] %v3920_v28  ;;  %v3938_v28 = vrot.slane %v3221_v5, %v1623_v41  ;;  %v631_v5 = vsel %vm112_vm1, %v599_v14, %v3868_v4 }
 0x273   :  { %1644 = vrot.lane.b32.xlu0 %v3914_v31, %s3175_s0  ;;  %v605_v18 = vpop.permute.xlu1 %604 }
 0x275   :  { %v3926_v23 = vpop.permute.xlu0 %610  ;;  %1648 = vrot.lane.b32.xlu1 %v3895_v53, %s3175_s0 }
 0x276   :  { %6164 = vst [vmem:[#allocation70_spill] sm:$0xff] %v3926_v23 }
 0x277   :  { %1663 = vrot.lane.b32.xlu0 %v3895_v53, %s3176_s27  ;;  %v965_v3 = vpop.permute.xlu1 %964 }
 0x279   :  { %v3933_v58 = vpop.permute.xlu0 %718  ;;  %1661 = vrot.lane.b32.xlu1 %v3902_v20, %s3176_s27 }
 0x27a   :  { %6165 = vst [vmem:[#allocation71_spill] sm:$0xff] %v3933_v58  ;;  %v630_v58 = vsel %vm112_vm1, %v3846_v21, %v599_v14  ;;  %v625_v14 = vsel %vm112_vm1, %v3787_v13, %v3785_v34 }
 0x27b   :  { %1659 = vrot.lane.b32.xlu0 %v3914_v31, %s3176_s27  ;;  %v607_v23 = vpop.permute.xlu1 %606 }
 0x27c   :  { %v634_v45 = vsel %vm112_vm1, %v607_v23, %v3897_v63  ;;  %v633_v1 = vsel %vm112_vm1, %v605_v18, %v607_v23  ;;  %v628_v23 = vsel %vm112_vm1, %v3852_v37, %v3814_v25 }
 0x27d   :  { %v3945_v62 = vpop.permute.xlu0 %716  ;;  %1635 = vrot.lane.b32.xlu1 %v3938_v28, %s3174_s3  ;;  %1093 = vmatprep.subr.mxu0 %v634_v45  ;;  %v627_v45 = vsel %vm112_vm1, %v3828_v32, %v3852_v37  ;;  %v622_v32 = vsel %vm112_vm1, %v3769_v24, %v3731_v35 }
 0x27e   :  { %1094 = vmatpush1.msra.mxu0 %v633_v1  ;;  %v621_v1 = vsel %vm112_vm1, %v3745_v60, %v3769_v24  ;;  %v616_v24 = vsel %vm112_vm1, %v3687_v56, %v3640_v36 }
 0x27f   :  { %1678 = vrot.lane.b32.xlu0 %v3895_v53, %s3178_s28  ;;  %1095 = vmatprep.subr.mxu0 %v631_v5  ;;  %v3953_v41 = vpop.permute.xlu1 %724  ;;  %v618_v5 = vsel %vm112_vm1, %v3680_v11, %v3707_v12  ;;  %v613_v11 = vsel %vm112_vm1, %v3611_v7, %v3596_v57 }
 0x280   :  { %1096 = vmatpush1.msra.mxu0 %v630_v58  ;;  %v624_v58 = vsel %vm112_vm1, %v3763_v50, %v3787_v13  ;;  %v619_v13 = vsel %vm112_vm1, %v3707_v12, %v3705_v33 }
 0x281   :  { %v3960_v18 = vpop.permute.xlu0 %712  ;;  %1676 = vrot.lane.b32.xlu1 %v3902_v20, %s3178_s28  ;;  %1097 = vmatprep.subr.mxu0 %v628_v23  ;;  %v615_v23 = vsel %vm112_vm1, %v3656_v46, %v3687_v56  ;;  %v991_v46 = vsel %vm160_vm5, %v3876_v30, %v3874_v44  ;;  %v6170_v56 = vld [vmem:[#allocation30_spill] sm:$0xff] }
 0x282   :  { %1098 = vmatpush1.msra.mxu0 %v627_v45  ;;  %v612_v45 = vsel %vm112_vm1, %v3590_v52, %v3611_v7  ;;  %v990_v7 = vsel %vm160_vm5, %v3854_v19, %v3876_v30  ;;  %v985_v19 = vsel %vm160_vm5, %v3795_v15, %v3793_v54 }
 0x283   :  { %1674 = vrot.lane.b32.xlu0 %v3914_v31, %s3178_s28  ;;  %1099 = vmatprep.subr.mxu0 %v625_v14  ;;  %v3972_v21 = vpop.permute.xlu1 %720 }
 0x284   :  { %1100 = vmatpush1.msra.mxu0 %v624_v58 }
 0x285   :  { %v3980_v37 = vpop.permute.xlu0 %702  ;;  %1650 = vrot.lane.b32.xlu1 %v3938_v28, %s3175_s0  ;;  %1101 = vmatprep.subr.mxu0 %v622_v32 }
 0x286   :  { %1102 = vmatpush1.msra.mxu0 %v621_v1  ;;  %v6173_v1 = vld [vmem:[#allocation15_spill] sm:$0xff] }
 0x287   :  { %1680 = vrot.lane.b32.xlu0 %v3938_v28, %s3178_s28  ;;  %1103 = vmatprep.subr.mxu0 %v619_v13  ;;  %v3992_v50 = vpop.permute.xlu1 %710 }
 0x288   :  { %1104 = vmatpush1.msra.mxu0 %v618_v5  ;;  %v4087_v5 = vld [vmem:[#allocation2 + $0x10] sm:$0xff] }
 0x289   :  { %v4000_v60 = vpop.permute.xlu0 %700  ;;  %1665 = vrot.lane.b32.xlu1 %v3938_v28, %s3176_s27  ;;  %1105 = vmatprep.subr.mxu0 %v616_v24  ;;  %v6174_v24 = vld [vmem:[#allocation10_spill] sm:$0xff] }
 0x28a   :  { %1106 = vmatpush1.msra.mxu0 %v615_v23  ;;  %v6175_v23 = vld [vmem:[#allocation67_spill] sm:$0xff] }
 0x28b   :  { %1107 = vmatprep.subr.mxu0 %v613_v11  ;;  %v967_v12 = vpop.permute.xlu1 %966 }
 0x28c   :  { %1108 = vmatpush1.msra.mxu0 %v612_v45  ;;  %v994_v14 = vsel %vm160_vm5, %v967_v12, %v3909_v40  ;;  %v993_v58 = vsel %vm160_vm5, %v965_v3, %v967_v12  ;;  %v6176_v45 = vld [vmem:[#allocation70_spill] sm:$0xff] }
 0x28d   :  { %v4016_v32 = vpop.permute.xlu0 %696  ;;  %1109 = vmatprep.subr.mxu0 %v3693_v22  ;;  %1222 = vmatprep.subr.mxu1 %v994_v14  ;;  %v988_v22 = vsel %vm160_vm5, %v3860_v43, %v3822_v8  ;;  %v6177_v14 = vld [vmem:[#allocation69_spill] sm:$0xff] }
 0x28e   :  { %1110 = vmatpush1.msra.mxu0 %v3667_v61  ;;  %1223 = vmatpush1.msra.mxu1 %v993_v58 }
 0x28f   :  { %1111 = vmatprep.subr.mxu0 %v3621_v16  ;;  %1224 = vmatprep.subr.mxu1 %v991_v46  ;;  %v4024_v52 = vpop.permute.xlu1 %708  ;;  %v987_v16 = vsel %vm160_vm5, %v3836_v10, %v3860_v43  ;;  %v6169_v43 = vld [vmem:[#allocation18_spill] sm:$0xff]  ;;  %v635_v46 = vsel %vm112_vm1, %v3897_v63, %v6176_v45  ;;  %v6182_v63 = vld [vmem:[#allocation59_spill] sm:$0xff] }
 0x290   :  { %1112 = vmatpush1.msra.mxu0 %v3588_v51  ;;  %1225 = vmatpush1.msra.mxu1 %v990_v7  ;;  %v6178_v7 = vld [vmem:[#allocation64_spill] sm:$0xff] }
 0x291   :  { %v4033_v61 = vpop.permute.xlu0 %686  ;;  %1113 = vmatprep.subr.mxu0 %v3581_v48  ;;  %1226 = vmatprep.subr.mxu1 %v988_v22  ;;  %v984_v48 = vsel %vm160_vm5, %v3771_v27, %v3795_v15  ;;  %v979_v15 = vsel %vm160_vm5, %v3715_v29, %v3713_v49  ;;  %v6179_v22 = vld [vmem:[#allocation65_spill] sm:$0xff] }
 0x292   :  { %1114 = vmatpush1.msra.mxu0 %v3570_v42  ;;  %1227 = vmatpush1.msra.mxu1 %v987_v16  ;;  %v982_v42 = vsel %vm160_vm5, %v3777_v2, %v3739_v38  ;;  %v871_v16 = vsel %vm144_vm2, %v6179_v22, %v6178_v7 }
 0x293   :  { %1115 = vmatprep.subr.mxu0 %v3545_v26  ;;  %1228 = vmatprep.subr.mxu1 %v985_v19  ;;  %v4044_v30 = vpop.permute.xlu1 %704  ;;  %v981_v26 = vsel %vm160_vm5, %v3753_v59, %v3777_v2  ;;  %v6166_v59 = vld [vmem:[#allocation45_spill] sm:$0xff]  ;;  %v6167_v2 = vld [vmem:[#allocation20_spill] sm:$0xff]  ;;  %v6180_v19 = vld [vmem:[#allocation66_spill] sm:$0xff] }
 0x294   :  { %1116 = vmatpush1.msra.mxu0 %v3524_v9  ;;  %1229 = vmatpush1.msra.mxu1 %v984_v48  ;;  %v870_v48 = vsel %vm144_vm2, %v6180_v19, %v6179_v22  ;;  %v6193_v22 = vld [vmem:[#allocation51_spill] sm:$0xff]  ;;  %v6195_v19 = vld [vmem:[#allocation48_spill] sm:$0xff] }
 0x295   :  { %v4053_v51 = vpop.permute.xlu0 %684  ;;  %1117 = vmatprep.subr.mxu0 %v3517_v6  ;;  %1230 = vmatprep.subr.mxu1 %v982_v42  ;;  %v978_v6 = vsel %vm160_vm5, %v3689_v17, %v3715_v29  ;;  %v6171_v17 = vld [vmem:[#allocation34_spill] sm:$0xff] }
 0x296   :  { %1118 = vmatpush1.msra.mxu0 %v3506_v0  ;;  %1231 = vmatpush1.msra.mxu1 %v981_v26  ;;  %v976_v0 = vsel %vm160_vm5, %v6166_v59, %v3650_v39  ;;  %v973_v29 = vsel %vm160_vm5, %v6171_v17, %v6170_v56  ;;  %v6181_v26 = vld [vmem:[#allocation63_spill] sm:$0xff] }
 0x297   :  { %1119 = vmatprep.subr.mxu0 %v3481_v55  ;;  %1232 = vmatprep.subr.mxu1 %v979_v15  ;;  %v4064_v9 = vpop.permute.xlu1 %694  ;;  %v6168_v55 = vld [vmem:[#allocation41_spill] sm:$0xff]  ;;  %v632_v15 = vsel %vm112_vm1, %v3868_v4, %v6181_v26  ;;  %v6186_v4 = vld [vmem:[#allocation55_spill] sm:$0xff] }
 0x298   :  { %1120 = vmatpush1.msra.mxu0 %v3460_v47  ;;  %1233 = vmatpush1.msra.mxu1 %v978_v6  ;;  %v975_v27 = vsel %vm160_vm5, %v6168_v55, %v6166_v59  ;;  %v6172_v47 = vld [vmem:[#allocation35_spill] sm:$0xff]  ;;  %v6183_v6 = vld [vmem:[#allocation61_spill] sm:$0xff]  ;;  %v6185_v55 = vld [vmem:[#allocation60_spill] sm:$0xff] }
 0x299   :  { %v847_v10 = vpop.permute.xlu0 %846  ;;  %1121 = vmatprep.subr.mxu0 %v6167_v2  ;;  %1234 = vmatprep.subr.mxu1 %v976_v0  ;;  %v972_v3 = vsel %vm160_vm5, %v6172_v47, %v6171_v17  ;;  %v868_v59 = vsel %vm144_vm2, %v6183_v6, %v6182_v63  ;;  %v6184_v0 = vld [vmem:[#allocation62_spill] sm:$0xff] }
 0x29a   :  { %1122 = vmatpush1.msra.mxu0 %v6169_v43  ;;  %1235 = vmatpush1.msra.mxu1 %v975_v27  ;;  %v874_v11 = vsel %vm144_vm2, %v847_v10, %v6175_v23  ;;  %v873_v58 = vsel %vm144_vm2, %v6177_v14, %v847_v10  ;;  %v867_v10 = vsel %vm144_vm2, %v6184_v0, %v6183_v6  ;;  %v6187_v43 = vld [vmem:[#allocation56_spill] sm:$0xff]  ;;  %v6192_v14 = vld [vmem:[#allocation53_spill] sm:$0xff] }
 0x29b   :  { %1123 = vmatprep.subr.mxu0 %v6173_v1  ;;  %1236 = vmatprep.subr.mxu1 %v973_v29  ;;  %v4085_v13 = vpop.permute.xlu1 %692  ;;  %v629_v27 = vsel %vm112_vm1, %v3814_v25, %v6185_v55  ;;  %v865_v17 = vsel %vm144_vm2, %v6187_v43, %v6186_v4  ;;  %v6188_v29 = vld [vmem:[#allocation58_spill] sm:$0xff] }
 0x29c   :  { %1124 = vmatpush1.msra.mxu0 %v6174_v24  ;;  %1237 = vmatpush1.msra.mxu1 %v972_v3  ;;  %v864_v47 = vsel %vm144_vm2, %v6188_v29, %v6187_v43  ;;  %v6189_v1 = vld [vmem:[#allocation54_spill] sm:$0xff]  ;;  %v6201_v29 = vld [vmem:[#allocation40_spill] sm:$0xff] }
 0x29d   :  { %v4092_v12 = vpop.permute.xlu0 %680  ;;  %1125 = vmatprep.subr.mxu0 %v874_v11  ;;  %1319 = vmatprep.subr.mxu1 %v6176_v45  ;;  %v626_v24 = vsel %vm112_vm1, %v3785_v34, %v6189_v1  ;;  %v6190_v25 = vld [vmem:[#allocation50_spill] sm:$0xff]  ;;  %v6191_v11 = vld [vmem:[#allocation52_spill] sm:$0xff]  ;;  %v6194_v34 = vld [vmem:[#allocation47_spill] sm:$0xff] }
 0x29e   :  { %1126 = vmatpush2.msra.mxu0 %v873_v58  ;;  %3021 = vmatmul.mubr.msk.f32.vlgmr.msra.gmra.mxu1 %vm1068_vm10, %v4087_v5  ;;  %v862_v45 = vsel %vm144_vm2, %v6191_v11, %v6190_v25  ;;  %v861_v58 = vsel %vm144_vm2, %v6192_v14, %v6191_v11  ;;  %v6204_v11 = vld [vmem:[#allocation37_spill] sm:$0xff] }
 0x29f   :  { %1320 = vmatpush1.msra.mxu1 %v635_v46  ;;  %1127 = vmatprep.subr.mxu0 %v871_v16  ;;  %v4108_v42 = vpop.permute.xlu1 %688  ;;  %v623_v16 = vsel %vm112_vm1, %v3731_v35, %v6193_v22  ;;  %v6198_v35 = vld [vmem:[#allocation38_spill] sm:$0xff] }
 0x2a0   :  { %1321 = vmatprep.subr.mxu1 %v6181_v26  ;;  %1128 = vmatpush2.msra.mxu0 %v870_v48  ;;  %v859_v48 = vsel %vm144_vm2, %v6195_v19, %v6194_v34  ;;  %v6196_v26 = vld [vmem:[#allocation49_spill] sm:$0xff] }
 0x2a1   :  { %1322 = vmatpush1.msra.mxu1 %v632_v15  ;;  %v4120_v2 = vpop.permute.xlu0 %670  ;;  %1129 = vmatprep.subr.mxu0 %v868_v59  ;;  %v858_v15 = vsel %vm144_vm2, %v6196_v26, %v6195_v19  ;;  %v6197_v59 = vld [vmem:[#allocation46_spill] sm:$0xff]  ;;  %v6207_v26 = vld [vmem:[#allocation44_spill] sm:$0xff] }
 0x2a2   :  { %1323 = vmatprep.subr.mxu1 %v6185_v55  ;;  %1130 = vmatpush2.msra.mxu0 %v867_v10  ;;  %v620_v0 = vsel %vm112_vm1, %v3705_v33, %v6197_v59  ;;  %v6199_v10 = vld [vmem:[#allocation42_spill] sm:$0xff]  ;;  %v6203_v33 = vld [vmem:[#allocation36_spill] sm:$0xff] }
 0x2a3   :  { %1324 = vmatpush1.msra.mxu1 %v629_v27  ;;  %1131 = vmatprep.subr.mxu0 %v865_v17  ;;  %v4132_v3 = vpop.permute.xlu1 %678  ;;  %v856_v55 = vsel %vm144_vm2, %v6199_v10, %v6198_v35  ;;  %v6200_v27 = vld [vmem:[#allocation43_spill] sm:$0xff] }
 0x2a4   :  { %1325 = vmatprep.subr.mxu1 %v6189_v1  ;;  %1132 = vmatpush2.msra.mxu0 %v864_v47  ;;  %v855_v43 = vsel %vm144_vm2, %v6200_v27, %v6199_v10  ;;  %v617_v47 = vsel %vm112_vm1, %v3640_v36, %v6201_v29  ;;  %v6202_v1 = vld [vmem:[#allocation33_spill] sm:$0xff]  ;;  %v6206_v36 = vld [vmem:[#allocation68_spill] sm:$0xff]  ;;  %v747_v27 = vsel %vm128_vm0, %v4024_v52, %v3992_v50 }
 0x2a5   :  { %1326 = vmatpush1.msra.mxu1 %v626_v24  ;;  %v4144_v46 = vpop.permute.xlu0 %668  ;;  %1133 = vmatprep.subr.mxu0 %v862_v45  ;;  %v853_v24 = vsel %vm144_vm2, %v6203_v33, %v6202_v1  ;;  %v852_v45 = vsel %vm144_vm2, %v6204_v11, %v6203_v33  ;;  %v6213_v33 = vld [vmem:[#allocation27_spill] sm:$0xff]  ;;  %v6214_v52 = vld [vmem:[#allocation25_spill] sm:$0xff]  ;;  %v741_v11 = vsel %vm128_vm0, %v4085_v13, %v4064_v9 }
 0x2a6   :  { %1327 = vmatprep.subr.mxu1 %v6193_v22  ;;  %1134 = vmatpush2.msra.mxu0 %v861_v58  ;;  %v6205_v58 = vld [vmem:[#allocation29_spill] sm:$0xff] }
 0x2a7   :  { %1328 = vmatpush1.msra.mxu1 %v623_v16  ;;  %1135 = vmatprep.subr.mxu0 %v859_v48  ;;  %v4156_v6 = vpop.permute.xlu1 %676  ;;  %v614_v22 = vsel %vm112_vm1, %v3596_v57, %v6205_v58  ;;  %v6218_v13 = vld [vmem:[#allocation21_spill] sm:$0xff] }
 0x2a8   :  { %1329 = vmatprep.subr.mxu1 %v6197_v59  ;;  %1136 = vmatpush2.msra.mxu0 %v858_v15  ;;  %v6208_v15 = vld [vmem:[#allocation71_spill] sm:$0xff] }
 0x2a9   :  { %1330 = vmatpush1.msra.mxu1 %v620_v0  ;;  %v727_v17 = vpop.permute.xlu0 %726  ;;  %1137 = vmatprep.subr.mxu0 %v856_v55  ;;  %v751_v59 = vsel %vm128_vm0, %v6208_v15, %v3972_v21  ;;  %v750_v57 = vsel %vm128_vm0, %v3945_v62, %v6208_v15  ;;  %v6209_v0 = vld [vmem:[#allocation39_spill] sm:$0xff]  ;;  %v6212_v62 = vld [vmem:[#allocation28_spill] sm:$0xff]  ;;  %v6219_v15 = vld [vmem:[#allocation22_spill] sm:$0xff] }
 0x2aa   :  { %1331 = vmatprep.subr.mxu1 %v6201_v29  ;;  %1138 = vmatpush2.msra.mxu0 %v855_v43  ;;  %v754_v16 = vsel %vm128_vm0, %v727_v17, %v6206_v36  ;;  %v753_v48 = vsel %vm128_vm0, %v3953_v41, %v727_v17  ;;  %v6210_v55 = vld [vmem:[#allocation31_spill] sm:$0xff]  ;;  %v748_v41 = vsel %vm128_vm0, %v3992_v50, %v3960_v18  ;;  %v6211_v43 = vld [vmem:[#allocation32_spill] sm:$0xff] }
 0x2ab   :  { %1332 = vmatpush1.msra.mxu1 %v617_v47  ;;  %1139 = vmatprep.subr.mxu0 %v853_v24  ;;  %v4178_v14 = vpop.permute.xlu1 %672  ;;  %v745_v29 = vsel %vm128_vm0, %v3980_v37, %v4044_v30  ;;  %v744_v47 = vsel %vm128_vm0, %v4000_v60, %v3980_v37  ;;  %v742_v24 = vsel %vm128_vm0, %v4064_v9, %v4016_v32  ;;  %v6216_v37 = vld [vmem:[#allocation24_spill] sm:$0xff] }
 0x2ac   :  { %1333 = vmatprep.subr.mxu1 %v6205_v58  ;;  %1140 = vmatpush2.msra.mxu0 %v852_v45  ;;  %v6215_v45 = vld [vmem:[#allocation26_spill] sm:$0xff]  ;;  %v739_v60 = vsel %vm128_vm0, %v4033_v61, %v4108_v42 }
 0x2ad   :  { %1334 = vmatpush1.msra.mxu1 %v614_v22  ;;  %v4186_v19 = vpop.permute.xlu0 %842  ;;  %1141 = vmatprep.subr.mxu0 %v754_v16  ;;  %v738_v22 = vsel %vm128_vm0, %v4053_v51, %v4033_v61  ;;  %v6217_v16 = vld [vmem:[#allocation23_spill] sm:$0xff]  ;;  %v733_v51 = vsel %vm128_vm0, %v4120_v2, %v4178_v14 }
 0x2ae   :  { %1335 = vmatprep.subr.mxu1 %v6207_v26  ;;  %1142 = vmatpush2.msra.mxu0 %v753_v48  ;;  %v736_v48 = vsel %vm128_vm0, %v4132_v3, %v4092_v12  ;;  %v735_v26 = vsel %vm128_vm0, %v4156_v6, %v4132_v3  ;;  %v6220_v61 = vld [vmem:[#allocation19_spill] sm:$0xff]  ;;  %v4254_v6 = vld [vmem:[#allocation2 + $0x20] sm:$0xff] }
 0x2af   :  { %1336 = vmatpush1.msra.mxu1 %v6209_v0  ;;  %1143 = vmatprep.subr.mxu0 %v751_v59  ;;  %v851_v10 = vpop.permute.xlu1 %850  ;;  %v732_v0 = vsel %vm128_vm0, %v4144_v46, %v4120_v2  ;;  %v4264_v46 = vld [vmem:[#allocation2 + $0x18] sm:$0xff] }
 0x2b0   :  { %1337 = vmatprep.subr.mxu1 %v6210_v55  ;;  %1144 = vmatpush2.msra.mxu0 %v750_v57  ;;  %v4248_v57 = vld [vmem:[#allocation2] sm:$0xff] }
 0x2b1   :  { %1338 = vmatpush1.msra.mxu1 %v6211_v43  ;;  %v4206_v17 = vpop.permute.xlu0 %826  ;;  %1145 = vmatprep.subr.mxu0 %v748_v41  ;;  %v6221_v55 = vld [vmem:[#allocation17_spill] sm:$0xff] }
 0x2b2   :  { %1339 = vmatprep.subr.mxu1 %v6212_v62  ;;  %1146 = vmatpush2.msra.mxu0 %v747_v27  ;;  %v6222_v41 = vld [vmem:[#allocation13_spill] sm:$0xff]  ;;  %v6223_v27 = vld [vmem:[#allocation12_spill] sm:$0xff]  ;;  %v875_v62 = vsel %vm144_vm2, %v6175_v23, %v851_v10 }
 0x2b3   :  { %1340 = vmatpush1.msra.mxu1 %v6213_v33  ;;  %1147 = vmatprep.subr.mxu0 %v745_v29  ;;  %v835_v50 = vpop.permute.xlu1 %834  ;;  %v6224_v29 = vmov 0.0  }
 0x2b4   :  { %1341 = vmatprep.subr.mxu1 %v6214_v52  ;;  %1148 = vmatpush2.msra.mxu0 %v744_v47  ;;  %v872_v47 = vsel %vm144_vm2, %v6178_v7, %v4186_v19  ;;  %v4273_v52 = vld [vmem:[#allocation2 + $0x38] sm:$0xff] }
 0x2b5   :  { %1342 = vmatpush1.msra.mxu1 %v6215_v45  ;;  %v4224_v58 = vpop.permute.xlu0 %810  ;;  %1149 = vmatprep.subr.mxu0 %v742_v24  ;;  %v869_v24 = vsel %vm144_vm2, %v6182_v63, %v835_v50  ;;  %v4295_v45 = vld [vmem:[#allocation2 + $0x40] sm:$0xff] }
 0x2b6   :  { %1343 = vmatprep.subr.mxu1 %v6216_v37  ;;  %1150 = vmatpush2.msra.mxu0 %v741_v11  ;;  %v4291_v11 = vld [vmem:[#allocation2 + $0x30] sm:$0xff] }
 0x2b7   :  { %1344 = vmatpush1.msra.mxu1 %v6217_v16  ;;  %1151 = vmatprep.subr.mxu0 %v739_v60  ;;  %v819_v9 = vpop.permute.xlu1 %818  ;;  %v4309_v60 = vld [vmem:[#allocation2 + $0x48] sm:$0xff]  ;;  %v4314_v16 = vld [vmem:[#allocation2 + $0x58] sm:$0xff] }
 0x2b8   :  { %1345 = vmatprep.subr.mxu1 %v6218_v13  ;;  %1152 = vmatpush2.msra.mxu0 %v738_v22  ;;  %v4328_v13 = vld [vmem:[#allocation2 + $0x60] sm:$0xff] }
 0x2b9   :  { %1346 = vmatpush1.msra.mxu1 %v6219_v15  ;;  %v4242_v59 = vpop.permute.xlu0 %794  ;;  %1153 = vmatprep.subr.mxu0 %v736_v48  ;;  %v4338_v15 = vld [vmem:[#allocation2 + $0x80] sm:$0xff] }
 0x2ba   :  { %1347 = vmatprep.subr.mxu1 %v6220_v61  ;;  %1154 = vmatpush2.msra.mxu0 %v735_v26  ;;  %v4335_v26 = vld [vmem:[#allocation2 + $0x70] sm:$0xff]  ;;  %v4349_v61 = vld [vmem:[#allocation2 + $0x78] sm:$0xff] }
 0x2bb   :  { %1348 = vmatpush1.msra.mxu1 %v6221_v55  ;;  %1155 = vmatprep.subr.mxu0 %v733_v51  ;;  %v803_v3 = vpop.permute.xlu1 %802 }
 0x2bc   :  { %1349 = vmatprep.subr.mxu1 %v6222_v41  ;;  %1156 = vmatpush2.msra.mxu0 %v732_v0  ;;  %v857_v22 = vsel %vm144_vm2, %v6198_v35, %v803_v3  ;;  %v854_v35 = vsel %vm144_vm2, %v6202_v1, %v4242_v59 }
 0x2bd   :  { %1350 = vmatpush1.msra.mxu1 %v6223_v27  ;;  %v4258_v43 = vpop.permute.xlu0 %730  ;;  %1158 = vmatmul.mubr.f32.vlgmr.msra.gmra.mxu0 %v4248_v57  ;;  %v4366_v27 = vld [vmem:[#allocation2 + $0x90] sm:$0xff] }
 0x2be   :  { %1351 = vmatprep.subr.mxu1 %v851_v10  ;;  %1163 = vmatprep.mubr.f32.mxu0 %v4254_v6  ;;  %v4277_v10 = vld [vmem:[#allocation2 + $0x28] sm:$0xff] }
 0x2bf   :  { %1352 = vmatpush2.msra.mxu1 %v875_v62  ;;  %v971_v2 = vpop.permute.xlu1 %970  ;;  %1276 = vmatprep.mubr.f32.mxu1 %v6224_v29 }
 0x2c0   :  { %1353 = vmatprep.subr.mxu1 %v4186_v19  ;;  %1448 = vmatprep.subr.mxu0 %v971_v2  ;;  %v995_v33 = vsel %vm160_vm5, %v3909_v40, %v971_v2  ;;  %v866_v40 = vsel %vm144_vm2, %v6186_v4, %v4206_v17  ;;  %v4298_v4 = vld [vmem:[#allocation2 + $0x50] sm:$0xff] }
 0x2c1   :  { %1354 = vmatpush2.msra.mxu1 %v872_v47  ;;  %v4275_v23 = vpop.permute.xlu0 %722  ;;  %1449 = vmatpush1.msra.mxu0 %v995_v33  ;;  %v4374_v2 = vld [vmem:[#allocation2 + $0xb0] sm:$0xff]  ;;  %v4383_v33 = vld [vmem:[#allocation2 + $0xa8] sm:$0xff] }
 0x2c2   :  { %1355 = vmatprep.subr.mxu1 %v835_v50  ;;  %1164 = vmatmul.mubr.f32.gmra.mxu0 %v4264_v46  ;;  %v863_v50 = vsel %vm144_vm2, %v6190_v25, %v819_v9  ;;  %v860_v25 = vsel %vm144_vm2, %v6194_v34, %v4224_v58 }
 0x2c3   :  { %1356 = vmatpush2.msra.mxu1 %v869_v24  ;;  %v963_v7 = vpop.permute.xlu1 %962  ;;  %1169 = vmatprep.mubr.f32.mxu0 %v4273_v52 }
 0x2c4   :  { %1357 = vmatprep.subr.mxu1 %v4206_v17  ;;  %3022 = vmatmul.mubr.msk.f32.gmra.mxu1 %vm1068_vm10, %v4277_v10  ;;  %v992_v19 = vsel %vm160_vm5, %v3874_v44, %v963_v7 }
 0x2c5   :  { %1358 = vmatpush2.msra.mxu1 %v866_v40  ;;  %1450 = vmatprep.subr.mxu0 %v963_v7  ;;  %v715_v63 = vpop.permute.xlu0 %714 }
 0x2c6   :  { %1359 = vmatprep.subr.mxu1 %v819_v9  ;;  %1451 = vmatpush1.msra.mxu0 %v992_v19  ;;  %v4317_v9 = vld [vmem:[#allocation2 + $0x68] sm:$0xff]  ;;  %v749_v0 = vsel %vm128_vm0, %v3960_v18, %v715_v63 }
 0x2c7   :  { %1170 = vmatmul.mubr.f32.gmra.mxu0 %v4291_v11  ;;  %1360 = vmatpush2.msra.mxu1 %v863_v50  ;;  %v955_v37 = vpop.permute.xlu1 %954 }
 0x2c8   :  { %1282 = vmatprep.mubr.f32.mxu1 %v6224_v29  ;;  %1361 = vmatprep.subr.mxu1 %v4224_v58  ;;  %v989_v44 = vsel %vm160_vm5, %v3822_v8, %v955_v37 }
 0x2c9   :  { %3023 = vmatmul.mubr.msk.f32.gmra.mxu1 %vm1068_vm10, %v4295_v45  ;;  %1452 = vmatprep.subr.mxu0 %v955_v37  ;;  %v707_v17 = vpop.permute.xlu0 %706 }
 0x2ca   :  { %1362 = vmatpush2.msra.mxu1 %v860_v25  ;;  %1175 = vmatprep.mubr.f32.mxu0 %v4298_v4  ;;  %v746_v18 = vsel %vm128_vm0, %v4044_v30, %v707_v17 }
 0x2cb   :  { %1363 = vmatprep.subr.mxu1 %v803_v3  ;;  %1453 = vmatpush1.msra.mxu0 %v989_v44  ;;  %v947_v8 = vpop.permute.xlu1 %946  ;;  %v4357_v3 = vld [vmem:[#allocation2 + $0x98] sm:$0xff] }
 0x2cc   :  { %1176 = vmatmul.mubr.f32.gmra.mxu0 %v4309_v60  ;;  %1364 = vmatpush2.msra.mxu1 %v857_v22  ;;  %v986_v58 = vsel %vm160_vm5, %v3793_v54, %v947_v8  ;;  %v755_v54 = vsel %vm128_vm0, %v6206_v36, %v4258_v43  ;;  %v752_v36 = vsel %vm128_vm0, %v3972_v21, %v4275_v23 }
 0x2cd   :  { %1288 = vmatprep.mubr.f32.mxu1 %v6224_v29  ;;  %1365 = vmatprep.subr.mxu1 %v4242_v59  ;;  %v699_v34 = vpop.permute.xlu0 %698 }
 0x2ce   :  { %3024 = vmatmul.mubr.msk.f32.gmra.mxu1 %vm1068_vm10, %v4314_v16  ;;  %1454 = vmatprep.subr.mxu0 %v947_v8  ;;  %v743_v62 = vsel %vm128_vm0, %v4016_v32, %v699_v34 }
 0x2cf   :  { %1366 = vmatpush2.msra.mxu1 %v854_v35  ;;  %1181 = vmatprep.mubr.f32.mxu0 %v4317_v9  ;;  %v939_v48 = vpop.permute.xlu1 %938 }
 0x2d0   :  { %1367 = vmatprep.subr.mxu1 %v4258_v43  ;;  %1455 = vmatpush1.msra.mxu0 %v986_v58  ;;  %v983_v59 = vsel %vm160_vm5, %v3739_v38, %v939_v48  ;;  %v4354_v38 = vld [vmem:[#allocation2 + $0x88] sm:$0xff] }
 0x2d1   :  { %1182 = vmatmul.mubr.f32.gmra.mxu0 %v4328_v13  ;;  %1368 = vmatpush2.msra.mxu1 %v755_v54  ;;  %v691_v1 = vpop.permute.xlu0 %690 }
 0x2d2   :  { %1294 = vmatprep.mubr.f32.mxu1 %v6224_v29  ;;  %1369 = vmatprep.subr.mxu1 %v4275_v23  ;;  %v740_v32 = vsel %vm128_vm0, %v4108_v42, %v691_v1 }
 0x2d3   :  { %3025 = vmatmul.mubr.msk.f32.gmra.mxu1 %vm1068_vm10, %v4335_v26  ;;  %1456 = vmatprep.subr.mxu0 %v939_v48  ;;  %v931_v51 = vpop.permute.xlu1 %930 }
 0x2d4   :  { %1370 = vmatpush2.msra.mxu1 %v752_v36  ;;  %1187 = vmatprep.mubr.f32.mxu0 %v4338_v15  ;;  %v980_v21 = vsel %vm160_vm5, %v3713_v49, %v931_v51  ;;  %v4371_v49 = vld [vmem:[#allocation2 + $0xa0] sm:$0xff] }
 0x2d5   :  { %1371 = vmatprep.subr.mxu1 %v715_v63  ;;  %1457 = vmatpush1.msra.mxu0 %v983_v59  ;;  %v683_v55 = vpop.permute.xlu0 %682  ;;  %v6225_v63 = vld [vmem:[#allocation57_spill] sm:$0xff] }
 0x2d6   :  { %1188 = vmatmul.mubr.f32.gmra.mxu0 %v4349_v61  ;;  %1372 = vmatpush2.msra.mxu1 %v749_v0  ;;  %v737_v24 = vsel %vm128_vm0, %v4092_v12, %v683_v55 }
 0x2d7   :  { %1300 = vmatprep.mubr.f32.mxu1 %v6224_v29  ;;  %1373 = vmatprep.subr.mxu1 %v707_v17  ;;  %v923_v41 = vpop.permute.xlu1 %922 }
 0x2d8   :  { %3026 = vmatmul.mubr.msk.f32.gmra.mxu1 %vm1068_vm10, %v4354_v38  ;;  %1458 = vmatprep.subr.mxu0 %v931_v51  ;;  %v977_v47 = vsel %vm160_vm5, %v3650_v39, %v923_v41  ;;  %v4390_v39 = vld [vmem:[#allocation2 + $0xb8] sm:$0xff] }
 0x2d9   :  { %1374 = vmatpush2.msra.mxu1 %v746_v18  ;;  %1193 = vmatprep.mubr.f32.mxu0 %v4357_v3  ;;  %v675_v43 = vpop.permute.xlu0 %674  ;;  %v3120_v18 = vld [vmem:[%s5980_s1 + $0x20] sm:$0xff] }
 0x2da   :  { %1375 = vmatprep.subr.mxu1 %v699_v34  ;;  %1459 = vmatpush1.msra.mxu0 %v980_v21  ;;  %v734_v42 = vsel %vm128_vm0, %v4178_v14, %v675_v43  ;;  %v3118_v21 = vld [vmem:[%s5980_s1 + $0x10] sm:$0xff] }
 0x2db   :  { %1194 = vmatmul.mubr.f32.gmra.mxu0 %v4366_v27  ;;  %1376 = vmatpush2.msra.mxu1 %v743_v62  ;;  %v915_v30 = vpop.permute.xlu1 %914  ;;  %v3123_v62 = vld [vmem:[%s5980_s1 + $0x38] sm:$0xff] }
 0x2dc   :  { %1306 = vmatprep.mubr.f32.mxu1 %v6224_v29  ;;  %1377 = vmatprep.subr.mxu1 %v691_v1  ;;  %v974_v40 = vsel %vm160_vm5, %v6170_v56, %v915_v30 }
 0x2dd   :  { %3027 = vmatmul.mubr.msk.f32.gmra.mxu1 %vm1068_vm10, %v4371_v49  ;;  %1460 = vmatprep.subr.mxu0 %v923_v41  ;;  %v4385_v23 = vpop.permute.xlu0 %1633  ;;  %v3119_v41 = vld [vmem:[%s5980_s1 + $0x18] sm:$0xff] }
 0x2de   :  { %1378 = vmatpush2.msra.mxu1 %v740_v32  ;;  %1199 = vmatprep.mubr.f32.mxu0 %v4374_v2 }
 0x2df   :  { %1379 = vmatprep.subr.mxu1 %v683_v55  ;;  %1461 = vmatpush1.msra.mxu0 %v977_v47  ;;  %v1632_v7 = vpop.permute.xlu1 %1631  ;;  %v3116_v55 = vld [vmem:[%s5980_s1] sm:$0xff] }
 0x2e0   :  { %1200 = vmatmul.mubr.f32.gmra.mxu0 %v4383_v33  ;;  %1380 = vmatpush2.msra.mxu1 %v737_v24 }
 0x2e1   :  { %1312 = vmatprep.mubr.f32.mxu1 %v6224_v29  ;;  %1381 = vmatprep.subr.mxu1 %v675_v43  ;;  %v1647_v19 = vpop.permute.xlu0 %1646  ;;  %v3122_v43 = vld [vmem:[%s5980_s1 + $0x30] sm:$0xff] }
 0x2e2   :  { %3028 = vmatmul.mubr.msk.f32.gmra.mxu1 %vm1068_vm10, %v4390_v39  ;;  %1462 = vmatprep.subr.mxu0 %v915_v30 }
 0x2e3   :  { %1382 = vmatpush2.msra.mxu1 %v734_v42  ;;  %1463 = vmatpush1.msra.mxu0 %v974_v40  ;;  %v1630_v12 = vpop.permute.xlu1 %1629 }
 0x2e4   :  { %1496 = vmatprep.mubr.f32.mxu0 %v6224_v29  ;;  %1383 = vmatprep.mubr.f32.mxu1 %v6225_v63 }
 0x2e5   :  { %3029 = vmatmul.mubr.msk.f32.vlgmr.msra.gmra.mxu0 %vm1068_vm10, %v4087_v5  ;;  %v1645_v14 = vpop.permute.xlu0 %1644 }
 0x2e6   :  { %1384 = vmatmul.mubr.f32.vlgmr.msra.gmra.mxu1 %v4248_v57  ;;  %1502 = vmatprep.mubr.f32.mxu0 %v6224_v29  ;;  %v1638_v57 = vsel %vm112_vm1, %v1632_v7, %v4385_v23  ;;  %v1652_v25 = vsel %vm128_vm0, %v1645_v14, %v1647_v19 }
 0x2e7   :  { %1389 = vmatprep.mubr.f32.mxu1 %v4254_v6  ;;  %v1649_v56 = vpop.permute.xlu1 %1648  ;;  %v1637_v6 = vsel %vm112_vm1, %v1630_v12, %v1632_v7 }
 0x2e8   :  { %v1689_v44 = vsel %vm168_vm4, %v3914_v31, %v1637_v6 }
 0x2e9   :  { %3030 = vmatmul.mubr.msk.f32.gmra.mxu0 %vm1068_vm10, %v4277_v10  ;;  %v1664_v50 = vpop.permute.xlu0 %1663  ;;  %v1653_v10 = vsel %vm128_vm0, %v1647_v19, %v1649_v56 }
 0x2ea   :  { %1390 = vmatmul.mubr.f32.gmra.mxu1 %v4264_v46  ;;  %1508 = vmatprep.mubr.f32.mxu0 %v6224_v29 }
 0x2eb   :  { %1395 = vmatprep.mubr.f32.mxu1 %v4273_v52  ;;  %v1662_v37 = vpop.permute.xlu1 %1661 }
 0x2ec   :  { %v1668_v52 = vsel %vm144_vm2, %v1662_v37, %v1664_v50 }
 0x2ed   :  { %3031 = vmatmul.mubr.msk.f32.gmra.mxu0 %vm1068_vm10, %v4295_v45  ;;  %v1660_v5 = vpop.permute.xlu0 %1659 }
 0x2ee   :  { %1396 = vmatmul.mubr.f32.gmra.mxu1 %v4291_v11  ;;  %1514 = vmatprep.mubr.f32.mxu0 %v6224_v29  ;;  %v1690_v11 = vsel %vm168_vm4, %v3902_v20, %v1638_v57  ;;  %v1667_v17 = vsel %vm144_vm2, %v1660_v5, %v1662_v37 }
 0x2ef   :  { %1401 = vmatprep.mubr.f32.mxu1 %v4298_v4  ;;  %v1636_v46 = vpop.permute.xlu1 %1635  ;;  %v1694_v4 = vsel %vm173_vm3, %v1690_v11, %v1653_v10 }
 0x2f0   :  { %v1698_v20 = vsel %vm178_vm6, %v1694_v4, %v1668_v52  ;;  %v1639_v48 = vsel %vm112_vm1, %v4385_v23, %v1636_v46  ;;  %v1692_v54 = vsel %vm168_vm4, %v3938_v28, %v1636_v46 }
 0x2f1   :  { %3032 = vmatmul.mubr.msk.f32.gmra.mxu0 %vm1068_vm10, %v4314_v16  ;;  %v1679_v45 = vpop.permute.xlu0 %1678  ;;  %v1693_v16 = vsel %vm173_vm3, %v1689_v44, %v1652_v25  ;;  %v1691_v1 = vsel %vm168_vm4, %v3895_v53, %v1639_v48 }
 0x2f2   :  { %1402 = vmatmul.mubr.f32.gmra.mxu1 %v4309_v60  ;;  %1520 = vmatprep.mubr.f32.mxu0 %v6224_v29  ;;  %v1697_v34 = vsel %vm178_vm6, %v1693_v16, %v1667_v17 }
 0x2f3   :  { %1407 = vmatprep.mubr.f32.mxu1 %v4317_v9  ;;  %v1677_v22 = vpop.permute.xlu1 %1676 }
 0x2f4   :  { %v1683_v8 = vsel %vm160_vm5, %v1677_v22, %v1679_v45 }
 0x2f5   :  { %3033 = vmatmul.mubr.msk.f32.gmra.mxu0 %vm1068_vm10, %v4335_v26  ;;  %v1675_v31 = vpop.permute.xlu0 %1674  ;;  %v1702_v60 = vsel %vm183_vm7, %v1698_v20, %v1683_v8 }
 0x2f6   :  { %1408 = vmatmul.mubr.f32.gmra.mxu1 %v4328_v13  ;;  %1526 = vmatprep.mubr.f32.mxu0 %v6224_v29  ;;  %v1682_v9 = vsel %vm160_vm5, %v1675_v31, %v1677_v22 }
 0x2f7   :  { %1413 = vmatprep.mubr.f32.mxu1 %v4338_v15  ;;  %v1701_v58 = vsel %vm183_vm7, %v1697_v34, %v1682_v9  ;;  %3037 = vmatprep.subr.msk.mxu0 %vm188_vm8, %v1702_v60  ;;  %v1651_v35 = vpop.permute.xlu1 %1650 }
 0x2f8   :  { %3038 = vmatpush1.msk.msra.mxu0 %vm188_vm8, %v1701_v58  ;;  %v1654_v13 = vsel %vm128_vm0, %v1649_v56, %v1651_v35  ;;  %v1696_v15 = vsel %vm173_vm3, %v1692_v54, %v1651_v35 }
 0x2f9   :  { %3034 = vmatmul.mubr.msk.f32.gmra.mxu0 %vm1068_vm10, %v4354_v38  ;;  %v1681_v26 = vpop.permute.xlu0 %1680  ;;  %v1695_v36 = vsel %vm173_vm3, %v1691_v1, %v1654_v13 }
 0x2fa   :  { %1414 = vmatmul.mubr.f32.gmra.mxu1 %v4349_v61  ;;  %1532 = vmatprep.mubr.f32.mxu0 %v6224_v29  ;;  %v1684_v28 = vsel %vm160_vm5, %v1679_v45, %v1681_v26 }
 0x2fb   :  { %1419 = vmatprep.mubr.f32.mxu1 %v4357_v3  ;;  %v1666_v59 = vpop.permute.xlu1 %1665  ;;  %v3117_v3 = vld [vmem:[%s5980_s1 + $0x8] sm:$0xff] }
 0x2fc   :  { %v1669_v51 = vsel %vm144_vm2, %v1664_v50, %v1666_v59  ;;  %v1700_v0 = vsel %vm178_vm6, %v1696_v15, %v1666_v59 }
 0x2fd   :  { %3035 = vmatmul.mubr.msk.f32.gmra.mxu0 %vm1068_vm10, %v4371_v49  ;;  %v1699_v61 = vsel %vm178_vm6, %v1695_v36, %v1669_v51  ;;  %v1704_v53 = vsel %vm183_vm7, %v1700_v0, %v1681_v26  ;;  %v3124_v49 = vld [vmem:[#allocation2 + $0x8] sm:$0xff] }
 0x2fe   :  { %1420 = vmatmul.mubr.f32.gmra.mxu1 %v4366_v27  ;;  %1538 = vmatprep.mubr.f32.mxu0 %v6224_v29  ;;  %v1703_v38 = vsel %vm183_vm7, %v1699_v61, %v1684_v28  ;;  %v3121_v27 = vld [vmem:[%s5980_s1 + $0x28] sm:$0xff] }
 0x2ff   :  { %1425 = vmatprep.mubr.f32.mxu1 %v4374_v2  ;;  %3047 = vmatprep.subr.msk.mxu1 %vm188_vm8, %v1704_v53 }
 0x300   :  { %3048 = vmatpush1.msk.msra.mxu1 %vm188_vm8, %v1703_v38 }
 0x301   :  { %3036 = vmatmul.mubr.msk.f32.gmra.mxu0 %vm1068_vm10, %v4390_v39 }
 0x302   :  { %1426 = vmatmul.mubr.f32.gmra.mxu1 %v4383_v33  ;;  %1773 = vmatprep.mubr.f32.mxu0 %v6224_v29 }
 0x303   :  { %1886 = vmatprep.mubr.f32.mxu1 %v6224_v29 }
 0x305   :  { %3039 = vmatmul.mubr.msk.f32.vlgmr.msra.gmra.mxu0 %vm233_vm9, %v3116_v55 }
 0x306   :  { %3049 = vmatmul.mubr.msk.f32.vlgmr.msra.gmra.mxu1 %vm233_vm9, %v3116_v55  ;;  %1779 = vmatprep.mubr.f32.mxu0 %v6224_v29 }
 0x307   :  { %1892 = vmatprep.mubr.f32.mxu1 %v6224_v29 }
 0x309   :  { %3040 = vmatmul.mubr.msk.f32.gmra.mxu0 %vm233_vm9, %v3117_v3 }
 0x30a   :  { %3050 = vmatmul.mubr.msk.f32.gmra.mxu1 %vm233_vm9, %v3117_v3  ;;  %1785 = vmatprep.mubr.f32.mxu0 %v6224_v29 }
 0x30b   :  { %1898 = vmatprep.mubr.f32.mxu1 %v6224_v29 }
 0x30d   :  { %3041 = vmatmul.mubr.msk.f32.gmra.mxu0 %vm233_vm9, %v3118_v21 }
 0x30e   :  { %3051 = vmatmul.mubr.msk.f32.gmra.mxu1 %vm233_vm9, %v3118_v21  ;;  %1791 = vmatprep.mubr.f32.mxu0 %v6224_v29 }
 0x30f   :  { %1904 = vmatprep.mubr.f32.mxu1 %v6224_v29 }
 0x311   :  { %3042 = vmatmul.mubr.msk.f32.gmra.mxu0 %vm233_vm9, %v3119_v41 }
 0x312   :  { %3052 = vmatmul.mubr.msk.f32.gmra.mxu1 %vm233_vm9, %v3119_v41  ;;  %1797 = vmatprep.mubr.f32.mxu0 %v6224_v29 }
 0x313   :  { %1910 = vmatprep.mubr.f32.mxu1 %v6224_v29 }
 0x315   :  { %3043 = vmatmul.mubr.msk.f32.gmra.mxu0 %vm233_vm9, %v3120_v18 }
 0x316   :  { %3053 = vmatmul.mubr.msk.f32.gmra.mxu1 %vm233_vm9, %v3120_v18  ;;  %1803 = vmatprep.mubr.f32.mxu0 %v6224_v29  ;;  %v6283_v18 = vld [vmem:[#allocation8_spill] sm:$0xff] }
 0x317   :  { %1916 = vmatprep.mubr.f32.mxu1 %v6224_v29 }
 0x319   :  { %3044 = vmatmul.mubr.msk.f32.gmra.mxu0 %vm233_vm9, %v3121_v27 }
 0x31a   :  { %3054 = vmatmul.mubr.msk.f32.gmra.mxu1 %vm233_vm9, %v3121_v27  ;;  %1809 = vmatprep.mubr.f32.mxu0 %v6224_v29 }
 0x31b   :  { %1922 = vmatprep.mubr.f32.mxu1 %v6224_v29 }
 0x31d   :  { %3045 = vmatmul.mubr.msk.f32.gmra.mxu0 %vm233_vm9, %v3122_v43 }
 0x31e   :  { %3055 = vmatmul.mubr.msk.f32.gmra.mxu1 %vm233_vm9, %v3122_v43  ;;  %1815 = vmatprep.mubr.f32.mxu0 %v6224_v29 }
 0x31f   :  { %1928 = vmatprep.mubr.f32.mxu1 %v6224_v29 }
 0x321   :  { %3046 = vmatmul.mubr.msk.f32.gmra.mxu0 %vm233_vm9, %v3123_v62 }
 0x322   :  { %3056 = vmatmul.mubr.msk.f32.gmra.mxu1 %vm233_vm9, %v3123_v62  ;;  %2543 = vmatprep.mubr.f32.mxu0 %v3124_v49 }
 0x323   :  { %2656 = vmatprep.mubr.f32.mxu1 %v6224_v29 }
 0x35e   :  { %v4537_v30 = vpop.f32.mrf.mxu1 }
 0x35f   :  { %6227 = vst [vmem:[#allocation20_spill] sm:$0xff] %v4537_v30 }
 0x360   :  { %v4541_v32 = vpop.f32.mrf.mxu1 }
 0x361   :  { %6229 = vst [vmem:[#allocation18_spill] sm:$0xff] %v4541_v32 }
 0x37d   :  { %v4535_v2 = vpop.f32.mrf.mxu0 }
 0x37e   :  { %6226 = vst [vmem:[#allocation45_spill] sm:$0xff] %v4535_v2 }
 0x37f   :  { %v4539_v47 = vpop.f32.mrf.mxu0 }
 0x380   :  { %6228 = vst [vmem:[#allocation41_spill] sm:$0xff] %v4539_v47 }
 0x382   :  { %v4543_v33 = vpop.f32.mrf.mxu0 }
 0x383   :  { %6230 = vst [vmem:[#allocation30_spill] sm:$0xff] %v4543_v33 }
 0x384   :  { %v4545_v23 = vpop.f32.mrf.mxu0  ;;  %v4547_v24 = vpop.f32.mrf.mxu1 }
 0x385   :  { %6231 = vst [vmem:[#allocation34_spill] sm:$0xff] %v4545_v23  ;;  %6232 = vst [vmem:[#allocation35_spill] sm:$0xff] %v4547_v24 }
 0x386   :  { %v4549_v39 = vpop.f32.mrf.mxu1 }
 0x387   :  { %6233 = vst [vmem:[#allocation15_spill] sm:$0xff] %v4549_v39  ;;  %v4551_v7 = vpop.f32.mrf.mxu0 }
 0x388   :  { %6234 = vst [vmem:[#allocation10_spill] sm:$0xff] %v4551_v7 }
 0x389   :  { %v4553_v42 = vpop.f32.mrf.mxu0  ;;  %v4555_v40 = vpop.f32.mrf.mxu1 }
 0x38a   :  { %6235 = vst [vmem:[#allocation67_spill] sm:$0xff] %v4553_v42  ;;  %6236 = vst [vmem:[#allocation70_spill] sm:$0xff] %v4555_v40 }
 0x38b   :  { %v4557_v19 = vpop.f32.mrf.mxu1 }
 0x38c   :  { %6237 = vst [vmem:[#allocation69_spill] sm:$0xff] %v4557_v19  ;;  %v4559_v12 = vpop.f32.mrf.mxu0 }
 0x38d   :  { %6238 = vst [vmem:[#allocation64_spill] sm:$0xff] %v4559_v12 }
 0x38e   :  { %v4561_v63 = vpop.f32.mrf.mxu0  ;;  %v4563_v14 = vpop.f32.mrf.mxu1 }
 0x38f   :  { %6239 = vst [vmem:[#allocation65_spill] sm:$0xff] %v4561_v63  ;;  %6240 = vst [vmem:[#allocation66_spill] sm:$0xff] %v4563_v14 }
 0x390   :  { %v4565_v56 = vpop.f32.mrf.mxu1 }
 0x391   :  { %6241 = vst [vmem:[#allocation63_spill] sm:$0xff] %v4565_v56  ;;  %v4567_v50 = vpop.f32.mrf.mxu0 }
 0x392   :  { %6242 = vst [vmem:[#allocation59_spill] sm:$0xff] %v4567_v50  ;;  %v6315_v50 = vld [vmem:[#allocation5_spill] sm:$0xff] }
 0x393   :  { %v4569_v37 = vpop.f32.mrf.mxu0  ;;  %v4571_v5 = vpop.f32.mrf.mxu1 }
 0x394   :  { %6243 = vst [vmem:[#allocation61_spill] sm:$0xff] %v4569_v37  ;;  %6244 = vst [vmem:[#allocation62_spill] sm:$0xff] %v4571_v5 }
 0x395   :  { %v4573_v57 = vpop.f32.mrf.mxu1 }
 0x396   :  { %6245 = vst [vmem:[#allocation60_spill] sm:$0xff] %v4573_v57  ;;  %v4575_v6 = vpop.f32.mrf.mxu0 }
 0x397   :  { %6246 = vst [vmem:[#allocation55_spill] sm:$0xff] %v4575_v6 }
 0x398   :  { %v4577_v46 = vpop.f32.mrf.mxu0  ;;  %v4579_v10 = vpop.f32.mrf.mxu1 }
 0x399   :  { %6247 = vst [vmem:[#allocation56_spill] sm:$0xff] %v4577_v46  ;;  %6248 = vst [vmem:[#allocation58_spill] sm:$0xff] %v4579_v10 }
 0x39a   :  { %v4581_v52 = vpop.f32.mrf.mxu1 }
 0x39b   :  { %6249 = vst [vmem:[#allocation54_spill] sm:$0xff] %v4581_v52  ;;  %v4583_v45 = vpop.f32.mrf.mxu0 }
 0x39c   :  { %6250 = vst [vmem:[#allocation50_spill] sm:$0xff] %v4583_v45 }
 0x39d   :  { %v4585_v11 = vpop.f32.mrf.mxu0  ;;  %v4587_v44 = vpop.f32.mrf.mxu1 }
 0x39e   :  { %6251 = vst [vmem:[#allocation52_spill] sm:$0xff] %v4585_v11  ;;  %6252 = vst [vmem:[#allocation53_spill] sm:$0xff] %v4587_v44  ;;  %v6292_v44 = vld [vmem:[#allocation7_spill] sm:$0xff] }
 0x39f   :  { %v4589_v25 = vpop.f32.mrf.mxu1 }
 0x3a0   :  { %6253 = vst [vmem:[#allocation51_spill] sm:$0xff] %v4589_v25  ;;  %v4591_v4 = vpop.f32.mrf.mxu0 }
 0x3a1   :  { %6254 = vst [vmem:[#allocation47_spill] sm:$0xff] %v4591_v4  ;;  %v6287_v4 = vld [vmem:[#allocation16_spill] sm:$0xff] }
 0x3a2   :  { %v4593_v17 = vpop.f32.mrf.mxu0  ;;  %v4595_v22 = vpop.f32.mrf.mxu1 }
 0x3a3   :  { %6255 = vst [vmem:[#allocation48_spill] sm:$0xff] %v4593_v17  ;;  %6256 = vst [vmem:[#allocation49_spill] sm:$0xff] %v4595_v22 }
 0x3a4   :  { %v4597_v8 = vpop.f32.mrf.mxu1 }
 0x3a5   :  { %6257 = vst [vmem:[#allocation46_spill] sm:$0xff] %v4597_v8  ;;  %v4599_v20 = vpop.f32.mrf.mxu0 }
 0x3a6   :  { %6258 = vst [vmem:[#allocation38_spill] sm:$0xff] %v4599_v20  ;;  %v4601_v16 = vpop.f32.mrf.mxu1 }
 0x3a7   :  { %6259 = vst [vmem:[#allocation42_spill] sm:$0xff] %v4601_v16  ;;  %v4603_v31 = vpop.f32.mrf.mxu0 }
 0x3a8   :  { %6260 = vst [vmem:[#allocation43_spill] sm:$0xff] %v4603_v31  ;;  %v4605_v60 = vpop.f32.mrf.mxu1 }
 0x3a9   :  { %6261 = vst [vmem:[#allocation40_spill] sm:$0xff] %v4605_v60  ;;  %v4609_v9 = vpop.f32.mrf.mxu0 }
 0x3aa   :  { %v4607_v34 = vpop.f32.mrf.mxu1  ;;  %6263 = vst [vmem:[#allocation36_spill] sm:$0xff] %v4609_v9 }
 0x3ab   :  { %6262 = vst [vmem:[#allocation33_spill] sm:$0xff] %v4607_v34  ;;  %v4615_v48 = vpop.f32.mrf.mxu0 }
 0x3ac   :  { %v4611_v58 = vpop.f32.mrf.mxu1  ;;  %6266 = vst [vmem:[#allocation68_spill] sm:$0xff] %v4615_v48 }
 0x3ad   :  { %6264 = vst [vmem:[#allocation37_spill] sm:$0xff] %v4611_v58  ;;  %v4621_v26 = vpop.f32.mrf.mxu0 }
 0x3ae   :  { %v4613_v35 = vpop.f32.mrf.mxu1  ;;  %6269 = vst [vmem:[#allocation39_spill] sm:$0xff] %v4621_v26 }
 0x3af   :  { %6265 = vst [vmem:[#allocation29_spill] sm:$0xff] %v4613_v35  ;;  %v4627_v59 = vpop.f32.mrf.mxu0 }
 0x3b0   :  { %v4617_v13 = vpop.f32.mrf.mxu1  ;;  %6272 = vst [vmem:[#allocation28_spill] sm:$0xff] %v4627_v59 }
 0x3b1   :  { %6267 = vst [vmem:[#allocation44_spill] sm:$0xff] %v4617_v13  ;;  %v4633_v0 = vpop.f32.mrf.mxu0 }
 0x3b2   :  { %v4619_v54 = vpop.f32.mrf.mxu1  ;;  %6275 = vst [vmem:[#allocation26_spill] sm:$0xff] %v4633_v0 }
 0x3b3   :  { %6268 = vst [vmem:[#allocation71_spill] sm:$0xff] %v4619_v54  ;;  %v4639_v53 = vpop.f32.mrf.mxu0 }
 0x3b4   :  { %v4623_v1 = vpop.f32.mrf.mxu1  ;;  %6278 = vst [vmem:[#allocation21_spill] sm:$0xff] %v4639_v53 }
 0x3b5   :  { %6270 = vst [vmem:[#allocation31_spill] sm:$0xff] %v4623_v1  ;;  %v4645_v3 = vpop.f32.mrf.mxu0 }
 0x3b6   :  { %v4625_v15 = vpop.f32.mrf.mxu1  ;;  %6281 = vst [vmem:[#allocation17_spill] sm:$0xff] %v4645_v3 }
 0x3b7   :  { %6271 = vst [vmem:[#allocation32_spill] sm:$0xff] %v4625_v15  ;;  %v4650_v43 = vpop.f32.mrf.mxu0 }
 0x3b8   :  { %v4629_v36 = vpop.f32.mrf.mxu1  ;;  %6284 = vst [vmem:[#allocation12_spill] sm:$0xff] %v4650_v43 }
 0x3b9   :  { %6273 = vst [vmem:[#allocation27_spill] sm:$0xff] %v4629_v36 }
 0x3ba   :  { %v4631_v51 = vpop.f32.mrf.mxu1 }
 0x3bb   :  { %6274 = vst [vmem:[#allocation25_spill] sm:$0xff] %v4631_v51 }
 0x3bc   :  { %v4635_v28 = vpop.f32.mrf.mxu1 }
 0x3bd   :  { %6276 = vst [vmem:[#allocation24_spill] sm:$0xff] %v4635_v28  ;;  %v6301_v28 = vld [vmem:[#allocation6_spill] sm:$0xff] }
 0x3be   :  { %v4637_v61 = vpop.f32.mrf.mxu1 }
 0x3bf   :  { %6277 = vst [vmem:[#allocation23_spill] sm:$0xff] %v4637_v61 }
 0x3c0   :  { %v4641_v38 = vpop.f32.mrf.mxu1 }
 0x3c1   :  { %6279 = vst [vmem:[#allocation22_spill] sm:$0xff] %v4641_v38 }
 0x3c2   :  { %v4643_v55 = vpop.f32.mrf.mxu1 }
 0x3c3   :  { %6280 = vst [vmem:[#allocation19_spill] sm:$0xff] %v4643_v55  ;;  %v4660_v55 = vpop.f32.mrf.mxu0 }
 0x3c4   :  { %v4647_v21 = vpop.f32.mrf.mxu1  ;;  %6288 = vst [vmem:[#allocation16_spill] sm:$0xff] %v4660_v55 }
 0x3c5   :  { %6282 = vst [vmem:[#allocation13_spill] sm:$0xff] %v4647_v21 }
 0x3c6   :  { %v1888_v41 = vpop.f32.mrf.mxu1 }
 0x3c7   :  { %v1889_v27 = vadd.f32 %v1888_v41, %v6283_v18 }
 0x3c8   :  { %v1890_v62 = vpop.f32.mrf.mxu1 }
 0x3c9   :  { %v4652_v49 = vmax.f32 %v1889_v27, 0.0  ;;  %v1891_v8 = vadd.f32 %v1890_v62, %v6283_v18  ;;  %v4668_v27 = vpop.f32.mrf.mxu0 }
 0x3ca   :  { %v1894_v22 = vpop.f32.mrf.mxu1  ;;  %6290 = vst [vmem:[#allocation73_spill] sm:$0xff] %v4668_v27 }
 0x3cb   :  { %6285 = vst [vmem:[#allocation57_spill] sm:$0xff] %v4652_v49  ;;  %v4655_v17 = vmax.f32 %v1891_v8, 0.0  ;;  %v1895_v38 = vadd.f32 %v1894_v22, %v6287_v4  ;;  %2003 = vrot.lane.b32.xlu1 %v4652_v49, %s3174_s3  ;;  %v4675_v62 = vpop.f32.mrf.mxu0 }
 0x3cc   :  { %v1896_v21 = vpop.f32.mrf.mxu1  ;;  %6291 = vst [vmem:[#allocation74_spill] sm:$0xff] %v4675_v62 }
 0x3cd   :  { %6286 = vst [vmem:[#allocation8_spill] sm:$0xff] %v4655_v17  ;;  %2005 = vrot.lane.b32.xlu0 %v4655_v17, %s3174_s3  ;;  %v4664_v41 = vmax.f32 %v1895_v38, 0.0  ;;  %v1897_v22 = vadd.f32 %v1896_v21, %v6287_v4  ;;  %v4685_v11 = vpop.f32.mrf.mxu0 }
 0x3ce   :  { %v1900_v8 = vpop.f32.mrf.mxu1  ;;  %6294 = vst [vmem:[#allocation75_spill] sm:$0xff] %v4685_v11 }
 0x3cf   :  { %6289 = vst [vmem:[#allocation72_spill] sm:$0xff] %v4664_v41  ;;  %2363 = vrot.lane.b32.xlu1 %v4652_v49, %s3178_s28  ;;  %v1901_v38 = vadd.f32 %v1900_v8, %v6292_v44  ;;  %v4680_v61 = vmax.f32 %v1897_v22, 0.0  ;;  %v6297_v8 = vld [vmem:[#allocation14_spill] sm:$0xff]  ;;  %v4696_v22 = vpop.f32.mrf.mxu0 }
 0x3d0   :  { %v1902_v25 = vpop.f32.mrf.mxu1  ;;  %6298 = vst [vmem:[#allocation14_spill] sm:$0xff] %v4696_v22 }
 0x3d1   :  { %2011 = vrot.lane.b32.xlu0 %v4664_v41, %s3174_s3  ;;  %6293 = vst [vmem:[#allocation7_spill] sm:$0xff] %v4680_v61  ;;  %v1903_v27 = vadd.f32 %v1902_v25, %v6292_v44  ;;  %v4687_v45 = vmax.f32 %v1901_v38, 0.0  ;;  %v4704_v38 = vpop.f32.mrf.mxu0 }
 0x3d2   :  { %v1906_v21 = vpop.f32.mrf.mxu1  ;;  %6300 = vst [vmem:[#allocation79_spill] sm:$0xff] %v4704_v38 }
 0x3d3   :  { %2243 = vrot.lane.b32.xlu1 %v4652_v49, %s3176_s27  ;;  %6295 = vst [vmem:[#allocation76_spill] sm:$0xff] %v4687_v45  ;;  %v4691_v62 = vmax.f32 %v1903_v27, 0.0  ;;  %v1907_v55 = vadd.f32 %v1906_v21, %v6297_v8  ;;  %v1775_v22 = vpop.f32.mrf.mxu0 }
 0x3d4   :  { %v1908_v25 = vpop.f32.mrf.mxu1 }
 0x3d5   :  { %2371 = vrot.lane.b32.xlu0 %v4664_v41, %s3178_s28  ;;  %6296 = vst [vmem:[#allocation77_spill] sm:$0xff] %v4691_v62  ;;  %v4700_v11 = vmax.f32 %v1907_v55, 0.0  ;;  %v1909_v21 = vadd.f32 %v1908_v25, %v6297_v8  ;;  %v1776_v55 = vadd.f32 %v1775_v22, %v6283_v18  ;;  %v1777_v25 = vpop.f32.mrf.mxu0 }
 0x3d6   :  { %v1912_v27 = vpop.f32.mrf.mxu1 }
 0x3d7   :  { %2251 = vrot.lane.b32.xlu1 %v4664_v41, %s3176_s27  ;;  %6299 = vst [vmem:[#allocation78_spill] sm:$0xff] %v4700_v11  ;;  %v1913_v52 = vadd.f32 %v1912_v27, %v6301_v28  ;;  %v4715_v10 = vmax.f32 %v1909_v21, 0.0  ;;  %v4723_v51 = vmax.f32 %v1776_v55, 0.0  ;;  %v1781_v22 = vpop.f32.mrf.mxu0  ;;  %v1778_v21 = vadd.f32 %v1777_v25, %v6283_v18 }
 0x3d8   :  { %v1782_v27 = vadd.f32 %v1781_v22, %v6287_v4  ;;  %v6307_v22 = vld [vmem:[#allocation11_spill] sm:$0xff] }
 0x3d9   :  { %2013 = vrot.lane.b32.xlu0 %v4680_v61, %s3174_s3  ;;  %6302 = vst [vmem:[#allocation6_spill] sm:$0xff] %v4715_v10  ;;  %v4719_v38 = vmax.f32 %v1913_v52, 0.0  ;;  %6304 = vst [vmem:[#allocation81_spill] sm:$0xff] %v4723_v51  ;;  %v1914_v52 = vpop.f32.mrf.mxu1  ;;  %v4741_v46 = vmax.f32 %v1778_v21, 0.0 }
 0x3da   :  { %v4737_v55 = vmax.f32 %v1782_v27, 0.0  ;;  %v1915_v18 = vadd.f32 %v1914_v52, %v6301_v28  ;;  %v1783_v27 = vpop.f32.mrf.mxu0 }
 0x3db   :  { %2019 = vrot.lane.b32.xlu1 %v4687_v45, %s3174_s3  ;;  %6303 = vst [vmem:[#allocation80_spill] sm:$0xff] %v4719_v38  ;;  %v1918_v43 = vpop.f32.mrf.mxu1  ;;  %6306 = vst [vmem:[#allocation83_spill] sm:$0xff] %v4741_v46 }
 0x3dc   :  { %6305 = vst [vmem:[#allocation82_spill] sm:$0xff] %v4737_v55  ;;  %v1919_v6 = vadd.f32 %v1918_v43, %v6307_v22  ;;  %v4755_v21 = vmax.f32 %v1915_v18, 0.0  ;;  %v1784_v43 = vadd.f32 %v1783_v27, %v6287_v4  ;;  %v6311_v18 = vld [vmem:[#allocation9_spill] sm:$0xff] }
 0x3dd   :  { %2021 = vrot.lane.b32.xlu0 %v4691_v62, %s3174_s3  ;;  %v1920_v52 = vpop.f32.mrf.mxu1 }
 0x3de   :  { %v4751_v25 = vmax.f32 %v1919_v6, 0.0  ;;  %6309 = vst [vmem:[#allocation84_spill] sm:$0xff] %v4755_v21  ;;  %v4764_v6 = vmax.f32 %v1784_v43, 0.0  ;;  %v1921_v4 = vadd.f32 %v1920_v52, %v6307_v22  ;;  %v1787_v43 = vpop.f32.mrf.mxu0 }
 0x3df   :  { %2379 = vrot.lane.b32.xlu1 %v4687_v45, %s3178_s28  ;;  %v1924_v3 = vpop.f32.mrf.mxu1  ;;  %v1788_v52 = vadd.f32 %v1787_v43, %v6292_v44 }
 0x3e0   :  { %6308 = vst [vmem:[#allocation11_spill] sm:$0xff] %v4751_v25  ;;  %6310 = vst [vmem:[#allocation85_spill] sm:$0xff] %v4764_v6  ;;  %v1925_v36 = vadd.f32 %v1924_v3, %v6311_v18  ;;  %v4780_v57 = vmax.f32 %v1921_v4, 0.0  ;;  %v1789_v3 = vpop.f32.mrf.mxu0 }
 0x3e1   :  { %2027 = vrot.lane.b32.xlu0 %v4700_v11, %s3174_s3  ;;  %v1926_v5 = vpop.f32.mrf.mxu1  ;;  %v4791_v15 = vmax.f32 %v1788_v52, 0.0  ;;  %v1790_v43 = vadd.f32 %v1789_v3, %v6292_v44 }
 0x3e2   :  { %v4776_v27 = vmax.f32 %v1925_v36, 0.0  ;;  %6313 = vst [vmem:[#allocation86_spill] sm:$0xff] %v4780_v57  ;;  %v1793_v36 = vpop.f32.mrf.mxu0  ;;  %v1927_v44 = vadd.f32 %v1926_v5, %v6311_v18 }
 0x3e3   :  { %2259 = vrot.lane.b32.xlu1 %v4687_v45, %s3176_s27  ;;  %6314 = vst [vmem:[#allocation87_spill] sm:$0xff] %v4791_v15  ;;  %v1794_v4 = vadd.f32 %v1793_v36, %v6297_v8  ;;  %v1930_v53 = vpop.f32.mrf.mxu1  ;;  %v4806_v52 = vmax.f32 %v1790_v43, 0.0 }
 0x3e4   :  { %6312 = vst [vmem:[#allocation9_spill] sm:$0xff] %v4776_v27  ;;  %v1931_v0 = vadd.f32 %v1930_v53, %v6315_v50  ;;  %v4819_v53 = vmax.f32 %v1927_v44, 0.0 }
 0x3e5   :  { %2387 = vrot.lane.b32.xlu0 %v4700_v11, %s3178_s28  ;;  %v4801_v37 = vmax.f32 %v1794_v4, 0.0  ;;  %v1932_v43 = vpop.f32.mrf.mxu1 }
 0x3e6   :  { %v4810_v36 = vmax.f32 %v1931_v0, 0.0  ;;  %6317 = vst [vmem:[#allocation88_spill] sm:$0xff] %v4819_v53  ;;  %v1795_v0 = vpop.f32.mrf.mxu0  ;;  %v1933_v44 = vadd.f32 %v1932_v43, %v6315_v50 }
 0x3e7   :  { %2267 = vrot.lane.b32.xlu1 %v4700_v11, %s3176_s27  ;;  %v1796_v5 = vadd.f32 %v1795_v0, %v6297_v8 }
 0x3e8   :  { %6316 = vst [vmem:[#allocation5_spill] sm:$0xff] %v4810_v36  ;;  %v1799_v4 = vpop.f32.mrf.mxu0 }
 0x3e9   :  { %2029 = vrot.lane.b32.xlu0 %v4715_v10, %s3174_s3  ;;  %v4832_v3 = vmax.f32 %v1796_v5, 0.0  ;;  %v1800_v0 = vadd.f32 %v1799_v4, %v6301_v28  ;;  %v4844_v5 = vmax.f32 %v1933_v44, 0.0 }
 0x3ea   :  { %v1801_v8 = vpop.f32.mrf.mxu0 }
 0x3eb   :  { %2035 = vrot.lane.b32.xlu1 %v4719_v38, %s3174_s3  ;;  %6318 = vst [vmem:[#allocation89_spill] sm:$0xff] %v4844_v5  ;;  %v4848_v56 = vmax.f32 %v1800_v0, 0.0  ;;  %v1802_v14 = vadd.f32 %v1801_v8, %v6301_v28 }
 0x3ec   :  { %v1805_v1 = vpop.f32.mrf.mxu0 }
 0x3ed   :  { %1999 = vrot.lane.b32.xlu0 %v4723_v51, %s3174_s3  ;;  %v1806_v43 = vadd.f32 %v1805_v1, %v6307_v22  ;;  %v4868_v1 = vmax.f32 %v1802_v14, 0.0 }
 0x3ee   :  { %v1807_v8 = vpop.f32.mrf.mxu0 }
 0x3ef   :  { %2395 = vrot.lane.b32.xlu1 %v4719_v38, %s3178_s28  ;;  %v4862_v54 = vmax.f32 %v1806_v43, 0.0  ;;  %v1808_v63 = vadd.f32 %v1807_v8, %v6307_v22 }
 0x3f0   :  { %v1811_v12 = vpop.f32.mrf.mxu0 }
 0x3f1   :  { %2359 = vrot.lane.b32.xlu0 %v4723_v51, %s3178_s28  ;;  %v4891_v13 = vmax.f32 %v1808_v63, 0.0  ;;  %v1812_v22 = vadd.f32 %v1811_v12, %v6311_v18 }
 0x3f2   :  { %v1813_v40 = vpop.f32.mrf.mxu0 }
 0x3f3   :  { %2275 = vrot.lane.b32.xlu1 %v4719_v38, %s3176_s27  ;;  %v4906_v42 = vmax.f32 %v1812_v22, 0.0  ;;  %v1814_v9 = vadd.f32 %v1813_v40, %v6311_v18 }
 0x3f4   :  { %v1817_v63 = vpop.f32.mrf.mxu0 }
 0x3f5   :  { %2239 = vrot.lane.b32.xlu0 %v4723_v51, %s3176_s27  ;;  %v1818_v12 = vadd.f32 %v1817_v63, %v6315_v50  ;;  %v4928_v63 = vmax.f32 %v1814_v9, 0.0 }
 0x3f6   :  { %v1819_v18 = vpop.f32.mrf.mxu0 }
 0x3f7   :  { %2007 = vrot.lane.b32.xlu1 %v4737_v55, %s3174_s3  ;;  %v4922_v22 = vmax.f32 %v1818_v12, 0.0  ;;  %v1820_v34 = vadd.f32 %v1819_v18, %v6315_v50 }
 0x3f9   :  { %2001 = vrot.lane.b32.xlu0 %v4741_v46, %s3174_s3  ;;  %v4951_v33 = vmax.f32 %v1820_v34, 0.0 }
 0x3fb   :  { %2367 = vrot.lane.b32.xlu1 %v4737_v55, %s3178_s28 }
 0x3fd   :  { %2361 = vrot.lane.b32.xlu0 %v4741_v46, %s3178_s28 }
 0x3ff   :  { %2283 = vrot.lane.b32.xlu1 %v4751_v25, %s3176_s27 }
 0x401   :  { %2037 = vrot.lane.b32.xlu0 %v4755_v21, %s3174_s3 }
 0x403   :  { %2247 = vrot.lane.b32.xlu1 %v4737_v55, %s3176_s27 }
 0x405   :  { %2241 = vrot.lane.b32.xlu0 %v4741_v46, %s3176_s27 }
 0x407   :  { %2009 = vrot.lane.b32.xlu1 %v4764_v6, %s3174_s3 }
 0x409   :  { %2043 = vrot.lane.b32.xlu0 %v4751_v25, %s3174_s3 }
 0x40b   :  { %2369 = vrot.lane.b32.xlu1 %v4764_v6, %s3178_s28 }
 0x40d   :  { %2403 = vrot.lane.b32.xlu0 %v4751_v25, %s3178_s28 }
 0x40f   :  { %2051 = vrot.lane.b32.xlu1 %v4776_v27, %s3174_s3 }
 0x411   :  { %2045 = vrot.lane.b32.xlu0 %v4780_v57, %s3174_s3 }
 0x413   :  { %2411 = vrot.lane.b32.xlu1 %v4776_v27, %s3178_s28 }
 0x415   :  { %2249 = vrot.lane.b32.xlu0 %v4764_v6, %s3176_s27 }
 0x417   :  { %2291 = vrot.lane.b32.xlu1 %v4776_v27, %s3176_s27 }
 0x419   :  { %2015 = vrot.lane.b32.xlu0 %v4791_v15, %s3174_s3 }
 0x41b   :  { %2255 = vrot.lane.b32.xlu1 %v4791_v15, %s3176_s27 }
 0x41d   :  { %2375 = vrot.lane.b32.xlu0 %v4791_v15, %s3178_s28 }
 0x41f   :  { %2023 = vrot.lane.b32.xlu1 %v4801_v37, %s3174_s3 }
 0x421   :  { %2017 = vrot.lane.b32.xlu0 %v4806_v52, %s3174_s3 }
 0x423   :  { %2419 = vrot.lane.b32.xlu1 %v4810_v36, %s3178_s28 }
 0x425   :  { %2377 = vrot.lane.b32.xlu0 %v4806_v52, %s3178_s28 }
 0x427   :  { %2383 = vrot.lane.b32.xlu1 %v4801_v37, %s3178_s28 }
 0x429   :  { %2053 = vrot.lane.b32.xlu0 %v4819_v53, %s3174_s3 }
 0x42b   :  { %2299 = vrot.lane.b32.xlu1 %v4810_v36, %s3176_s27 }
 0x42d   :  { %2257 = vrot.lane.b32.xlu0 %v4806_v52, %s3176_s27 }
 0x42f   :  { %2263 = vrot.lane.b32.xlu1 %v4801_v37, %s3176_s27 }
 0x431   :  { %2059 = vrot.lane.b32.xlu0 %v4810_v36, %s3174_s3 }
 0x433   :  { %2025 = vrot.lane.b32.xlu1 %v4832_v3, %s3174_s3 }
 0x435   :  { %2179 = vrot.lane.b32.xlu0 %v4810_v36, %s3175_s0 }
 0x437   :  { %2385 = vrot.lane.b32.xlu1 %v4832_v3, %s3178_s28 }
 0x439   :  { %2265 = vrot.lane.b32.xlu0 %v4832_v3, %s3176_s27 }
 0x43b   :  { %2061 = vrot.lane.b32.xlu1 %v4844_v5, %s3174_s3 }
 0x43d   :  { %2031 = vrot.lane.b32.xlu0 %v4848_v56, %s3174_s3  ;;  %v4855_v4 = vpop.permute.xlu1 %2003 }
 0x43f   :  { %v4858_v44 = vpop.permute.xlu0 %2005  ;;  %2271 = vrot.lane.b32.xlu1 %v4848_v56, %s3176_s27 }
 0x440   :  { %6319 = vst [vmem:[#allocation90_spill] sm:$0xff] %v4858_v44 }
 0x441   :  { %2391 = vrot.lane.b32.xlu0 %v4848_v56, %s3178_s28  ;;  %v4866_v0 = vpop.permute.xlu1 %2363 }
 0x442   :  { %6320 = vst [vmem:[#allocation91_spill] sm:$0xff] %v4866_v0 }
 0x443   :  { %v4870_v59 = vpop.permute.xlu0 %2011  ;;  %2039 = vrot.lane.b32.xlu1 %v4862_v54, %s3174_s3 }
 0x445   :  { %2033 = vrot.lane.b32.xlu0 %v4868_v1, %s3174_s3  ;;  %v4876_v28 = vpop.permute.xlu1 %2243 }
 0x446   :  { %6321 = vst [vmem:[#allocation92_spill] sm:$0xff] %v4876_v28 }
 0x447   :  { %v4878_v43 = vpop.permute.xlu0 %2371  ;;  %2399 = vrot.lane.b32.xlu1 %v4862_v54, %s3178_s28 }
 0x449   :  { %2393 = vrot.lane.b32.xlu0 %v4868_v1, %s3178_s28  ;;  %v4885_v14 = vpop.permute.xlu1 %2251 }
 0x44a   :  { %6322 = vst [vmem:[#allocation93_spill] sm:$0xff] %v4885_v14 }
 0x44b   :  { %v4887_v26 = vpop.permute.xlu0 %2013  ;;  %2279 = vrot.lane.b32.xlu1 %v4862_v54, %s3176_s27 }
 0x44c   :  { %6323 = vst [vmem:[#allocation94_spill] sm:$0xff] %v4887_v26 }
 0x44d   :  { %2273 = vrot.lane.b32.xlu0 %v4868_v1, %s3176_s27  ;;  %v4895_v19 = vpop.permute.xlu1 %2019 }
 0x44f   :  { %v4898_v8 = vpop.permute.xlu0 %2021  ;;  %2041 = vrot.lane.b32.xlu1 %v4891_v13, %s3174_s3 }
 0x450   :  { %6324 = vst [vmem:[#allocation95_spill] sm:$0xff] %v4898_v8 }
 0x451   :  { %2281 = vrot.lane.b32.xlu0 %v4891_v13, %s3176_s27  ;;  %v4904_v35 = vpop.permute.xlu1 %2379 }
 0x453   :  { %v4908_v7 = vpop.permute.xlu0 %2027  ;;  %2401 = vrot.lane.b32.xlu1 %v4891_v13, %s3178_s28 }
 0x455   :  { %2047 = vrot.lane.b32.xlu0 %v4906_v42, %s3174_s3  ;;  %v4915_v48 = vpop.permute.xlu1 %2259 }
 0x456   :  { %6325 = vst [vmem:[#allocation96_spill] sm:$0xff] %v4915_v48 }
 0x457   :  { %v4918_v39 = vpop.permute.xlu0 %2387  ;;  %2287 = vrot.lane.b32.xlu1 %v4906_v42, %s3176_s27 }
 0x459   :  { %2407 = vrot.lane.b32.xlu0 %v4906_v42, %s3178_s28  ;;  %v4926_v24 = vpop.permute.xlu1 %2267 }
 0x45a   :  { %6326 = vst [vmem:[#allocation97_spill] sm:$0xff] %v4926_v24 }
 0x45b   :  { %v4930_v58 = vpop.permute.xlu0 %2029  ;;  %2055 = vrot.lane.b32.xlu1 %v4922_v22, %s3174_s3 }
 0x45c   :  { %6327 = vst [vmem:[#allocation98_spill] sm:$0xff] %v4930_v58 }
 0x45d   :  { %2049 = vrot.lane.b32.xlu0 %v4928_v63, %s3174_s3  ;;  %v4936_v40 = vpop.permute.xlu1 %2035 }
 0x45f   :  { %v4938_v12 = vpop.permute.xlu0 %1999  ;;  %2415 = vrot.lane.b32.xlu1 %v4922_v22, %s3178_s28 }
 0x461   :  { %2409 = vrot.lane.b32.xlu0 %v4928_v63, %s3178_s28  ;;  %v4945_v9 = vpop.permute.xlu1 %2395 }
 0x463   :  { %v4947_v23 = vpop.permute.xlu0 %2359  ;;  %2295 = vrot.lane.b32.xlu1 %v4922_v22, %s3176_s27 }
 0x464   :  { %6328 = vst [vmem:[#allocation99_spill] sm:$0xff] %v4947_v23 }
 0x465   :  { %2289 = vrot.lane.b32.xlu0 %v4928_v63, %s3176_s27  ;;  %v4955_v31 = vpop.permute.xlu1 %2275 }
 0x466   :  { %6329 = vst [vmem:[#allocation100_spill] sm:$0xff] %v4955_v31 }
 0x467   :  { %v4957_v20 = vpop.permute.xlu0 %2239  ;;  %2057 = vrot.lane.b32.xlu1 %v4951_v33, %s3174_s3 }
 0x468   :  { %6330 = vst [vmem:[#allocation101_spill] sm:$0xff] %v4957_v20 }
 0x469   :  { %2169 = vrot.lane.b32.xlu0 %v4928_v63, %s3175_s0  ;;  %v4963_v50 = vpop.permute.xlu1 %2007 }
 0x46b   :  { %v4965_v18 = vpop.permute.xlu0 %2001  ;;  %2175 = vrot.lane.b32.xlu1 %v4922_v22, %s3175_s0 }
 0x46d   :  { %2167 = vrot.lane.b32.xlu0 %v4906_v42, %s3175_s0  ;;  %v4971_v34 = vpop.permute.xlu1 %2367 }
 0x46f   :  { %v4973_v32 = vpop.permute.xlu0 %2361  ;;  %2171 = vrot.lane.b32.xlu1 %v4776_v27, %s3175_s0 }
 0x470   :  { %6331 = vst [vmem:[#allocation102_spill] sm:$0xff] %v4973_v32 }
 0x471   :  { %2163 = vrot.lane.b32.xlu0 %v4751_v25, %s3175_s0  ;;  %v4979_v30 = vpop.permute.xlu1 %2283 }
 0x472   :  { %6332 = vst [vmem:[#allocation103_spill] sm:$0xff] %v4979_v30 }
 0x473   :  { %v4981_v60 = vpop.permute.xlu0 %2037  ;;  %2161 = vrot.lane.b32.xlu1 %v4891_v13, %s3175_s0 }
 0x474   :  { %6333 = vst [vmem:[#allocation104_spill] sm:$0xff] %v4981_v60 }
 0x475   :  { %2417 = vrot.lane.b32.xlu0 %v4951_v33, %s3178_s28  ;;  %v4987_v16 = vpop.permute.xlu1 %2247 }
 0x476   :  { %6334 = vst [vmem:[#allocation105_spill] sm:$0xff] %v4987_v16 }
 0x477   :  { %v4989_v47 = vpop.permute.xlu0 %2241  ;;  %2159 = vrot.lane.b32.xlu1 %v4862_v54, %s3175_s0 }
 0x478   :  { %6335 = vst [vmem:[#allocation106_spill] sm:$0xff] %v4989_v47 }
 0x479   :  { %2153 = vrot.lane.b32.xlu0 %v4868_v1, %s3175_s0  ;;  %v4995_v2 = vpop.permute.xlu1 %2009 }
 0x47b   :  { %v4997_v25 = vpop.permute.xlu0 %2043  ;;  %2155 = vrot.lane.b32.xlu1 %v4719_v38, %s3175_s0 }
 0x47d   :  { %2151 = vrot.lane.b32.xlu0 %v4848_v56, %s3175_s0  ;;  %v5003_v27 = vpop.permute.xlu1 %2369 }
 0x47f   :  { %v5005_v20 = vpop.permute.xlu0 %2403  ;;  %2145 = vrot.lane.b32.xlu1 %v4832_v3, %s3175_s0 }
 0x481   :  { %2147 = vrot.lane.b32.xlu0 %v4700_v11, %s3175_s0  ;;  %v5011_v36 = vpop.permute.xlu1 %2051 }
 0x483   :  { %v5013_v47 = vpop.permute.xlu0 %2045  ;;  %2143 = vrot.lane.b32.xlu1 %v4801_v37, %s3175_s0 }
 0x484   :  { %6336 = vst [vmem:[#allocation107_spill] sm:$0xff] %v5013_v47 }
 0x485   :  { %2137 = vrot.lane.b32.xlu0 %v4806_v52, %s3175_s0  ;;  %v5019_v38 = vpop.permute.xlu1 %2411 }
 0x487   :  { %v5021_v28 = vpop.permute.xlu0 %2249  ;;  %2139 = vrot.lane.b32.xlu1 %v4687_v45, %s3175_s0 }
 0x488   :  { %6337 = vst [vmem:[#allocation108_spill] sm:$0xff] %v5021_v28 }
 0x489   :  { %2297 = vrot.lane.b32.xlu0 %v4951_v33, %s3176_s27  ;;  %v5027_v11 = vpop.permute.xlu1 %2291 }
 0x48a   :  { %6338 = vst [vmem:[#allocation109_spill] sm:$0xff] %v5027_v11 }
 0x48b   :  { %v2016_v16 = vpop.permute.xlu0 %2015  ;;  %2129 = vrot.lane.b32.xlu1 %v4764_v6, %s3175_s0 }
 0x48d   :  { %2135 = vrot.lane.b32.xlu0 %v4791_v15, %s3175_s0  ;;  %v2256_v14 = vpop.permute.xlu1 %2255 }
 0x48f   :  { %v2376_v44 = vpop.permute.xlu0 %2375  ;;  %2127 = vrot.lane.b32.xlu1 %v4737_v55, %s3175_s0 }
 0x491   :  { %2131 = vrot.lane.b32.xlu0 %v4664_v41, %s3175_s0  ;;  %v5037_v45 = vpop.permute.xlu1 %2023 }
 0x493   :  { %v5039_v28 = vpop.permute.xlu0 %2017  ;;  %2123 = vrot.lane.b32.xlu1 %v4652_v49, %s3175_s0 }
 0x494   :  { %v5045_v48 = vsel %vm112_vm1, %v2016_v16, %v5039_v28 }
 0x495   :  { %2121 = vrot.lane.b32.xlu0 %v4741_v46, %s3175_s0  ;;  %v5049_v26 = vpop.permute.xlu1 %2419 }
 0x497   :  { %v5051_v24 = vpop.permute.xlu0 %2377  ;;  %2177 = vrot.lane.b32.xlu1 %v4951_v33, %s3175_s0 }
 0x498   :  { %v5057_v41 = vsel %vm160_vm5, %v2376_v44, %v5051_v24 }
 0x499   :  { %2119 = vrot.lane.b32.xlu0 %v4723_v51, %s3175_s0  ;;  %v2384_v49 = vpop.permute.xlu1 %2383 }
 0x49b   :  { %v5061_v16 = vpop.permute.xlu0 %2053  ;;  %2301 = vrot.lane.b32.xlu1 %v4844_v5, %s3176_s27 }
 0x49c   :  { %6339 = vst [vmem:[#allocation110_spill] sm:$0xff] %v5061_v16 }
 0x49d   :  { %2293 = vrot.lane.b32.xlu0 %v4819_v53, %s3176_s27  ;;  %v5067_v8 = vpop.permute.xlu1 %2299 }
 0x49e   :  { %6340 = vst [vmem:[#allocation111_spill] sm:$0xff] %v5067_v8 }
 0x49f   :  { %v5069_v31 = vpop.permute.xlu0 %2257  ;;  %2285 = vrot.lane.b32.xlu1 %v4780_v57, %s3176_s27 }
 0x4a0   :  { %6341 = vst [vmem:[#allocation112_spill] sm:$0xff] %v5069_v31  ;;  %v5075_v44 = vsel %vm144_vm2, %v2256_v14, %v5069_v31 }
 0x4a1   :  { %6342 = vst [vmem:[#allocation113_spill] sm:$0xff] %v5075_v44  ;;  %2277 = vrot.lane.b32.xlu0 %v4755_v21, %s3176_s27  ;;  %v2264_v58 = vpop.permute.xlu1 %2263 }
 0x4a3   :  { %v5079_v30 = vpop.permute.xlu0 %2059  ;;  %2269 = vrot.lane.b32.xlu1 %v4715_v10, %s3176_s27 }
 0x4a5   :  { %2261 = vrot.lane.b32.xlu0 %v4691_v62, %s3176_s27  ;;  %v5085_v60 = vpop.permute.xlu1 %2025 }
 0x4a7   :  { %v5087_v11 = vpop.permute.xlu0 %2179  ;;  %2253 = vrot.lane.b32.xlu1 %v4680_v61, %s3176_s27 }
 0x4a8   :  { %6343 = vst [vmem:[#allocation114_spill] sm:$0xff] %v5087_v11 }
 0x4a9   :  { %2245 = vrot.lane.b32.xlu0 %v4655_v17, %s3176_s27  ;;  %v5093_v14 = vpop.permute.xlu1 %2385 }
 0x4aa   :  { %v5097_v44 = vsel %vm160_vm5, %v2384_v49, %v5093_v14 }
 0x4ab   :  { %v5099_v31 = vpop.permute.xlu0 %2265  ;;  %2181 = vrot.lane.b32.xlu1 %v4844_v5, %s3175_s0 }
 0x4ac   :  { %6344 = vst [vmem:[#allocation115_spill] sm:$0xff] %v5099_v31  ;;  %v5105_v11 = vsel %vm144_vm2, %v2264_v58, %v5099_v31 }
 0x4ad   :  { %6345 = vst [vmem:[#allocation116_spill] sm:$0xff] %v5105_v11  ;;  %2173 = vrot.lane.b32.xlu0 %v4819_v53, %s3175_s0  ;;  %v5109_v47 = vpop.permute.xlu1 %2061 }
 0x4ae   :  { %6346 = vst [vmem:[#allocation117_spill] sm:$0xff] %v5109_v47 }
 0x4af   :  { %v5111_v8 = vpop.permute.xlu0 %2031  ;;  %2421 = vrot.lane.b32.xlu1 %v4844_v5, %s3178_s28 }
 0x4b1   :  { %2165 = vrot.lane.b32.xlu0 %v4780_v57, %s3175_s0  ;;  %v2272_v49 = vpop.permute.xlu1 %2271 }
 0x4b3   :  { %v5117_v16 = vpop.permute.xlu0 %2391  ;;  %2413 = vrot.lane.b32.xlu1 %v4819_v53, %s3178_s28 }
 0x4b5   :  { %2157 = vrot.lane.b32.xlu0 %v4755_v21, %s3175_s0  ;;  %v2040_v58 = vpop.permute.xlu1 %2039 }
 0x4b7   :  { %v2034_v11 = vpop.permute.xlu0 %2033  ;;  %2405 = vrot.lane.b32.xlu1 %v4780_v57, %s3178_s28 }
 0x4b9   :  { %2149 = vrot.lane.b32.xlu0 %v4715_v10, %s3175_s0  ;;  %v5127_v5 = vpop.permute.xlu1 %2399 }
 0x4bb   :  { %v5129_v31 = vpop.permute.xlu0 %2393  ;;  %2397 = vrot.lane.b32.xlu1 %v4755_v21, %s3178_s28 }
 0x4bd   :  { %2141 = vrot.lane.b32.xlu0 %v4691_v62, %s3175_s0  ;;  %v5135_v53 = vpop.permute.xlu1 %2279 }
 0x4be   :  { %6347 = vst [vmem:[#allocation118_spill] sm:$0xff] %v5135_v53 }
 0x4bf   :  { %v5137_v29 = vpop.permute.xlu0 %2273  ;;  %2389 = vrot.lane.b32.xlu1 %v4715_v10, %s3178_s28 }
 0x4c0   :  { %6348 = vst [vmem:[#allocation119_spill] sm:$0xff] %v5137_v29  ;;  %v5143_v57 = vsel %vm144_vm2, %v2272_v49, %v5137_v29  ;;  %v75_v49 = vld [vmem:[%s5983_s4] sm:$0xff] }
 0x4c1   :  { %6349 = vst [vmem:[#allocation120_spill] sm:$0xff] %v5143_v57  ;;  %2133 = vrot.lane.b32.xlu0 %v4680_v61, %s3175_s0  ;;  %v2042_v51 = vpop.permute.xlu1 %2041 }
 0x4c3   :  { %v5147_v47 = vpop.permute.xlu0 %2281  ;;  %2381 = vrot.lane.b32.xlu1 %v4691_v62, %s3178_s28  ;;  %v76_v62 = vld [vmem:[%s5983_s4 + $0x8] sm:$0xff] }
 0x4c4   :  { %6350 = vst [vmem:[#allocation121_spill] sm:$0xff] %v5147_v47  ;;  %v78_v47 = vld [vmem:[%s5983_s4 + $0x18] sm:$0xff] }
 0x4c5   :  { %2125 = vrot.lane.b32.xlu0 %v4655_v17, %s3175_s0  ;;  %v5153_v21 = vpop.permute.xlu1 %2401 }
 0x4c7   :  { %v2048_v53 = vpop.permute.xlu0 %2047  ;;  %2373 = vrot.lane.b32.xlu1 %v4680_v61, %s3178_s28  ;;  %v77_v61 = vld [vmem:[%s5983_s4 + $0x10] sm:$0xff] }
 0x4c9   :  { %2365 = vrot.lane.b32.xlu0 %v4655_v17, %s3178_s28  ;;  %v5162_v10 = vpop.permute.xlu1 %2287 }
 0x4ca   :  { %6351 = vst [vmem:[#allocation122_spill] sm:$0xff] %v5162_v10  ;;  %v79_v10 = vld [vmem:[%s5983_s4 + $0x20] sm:$0xff] }
 0x4cb   :  { %v5167_v57 = vpop.permute.xlu0 %2407  ;;  %1030 = vperm.xlu1 %3115, %v75_v49   ;;  %v80_v49 = vld [vmem:[%s5983_s4 + $0x28] sm:$0xff] }
 0x4cd   :  { %1035 = vperm.xlu0 %3114, %v76_v62   ;;  %v2056_v29 = vpop.permute.xlu1 %2055  ;;  %v81_v62 = vld [vmem:[%s5983_s4 + $0x30] sm:$0xff] }
 0x4cf   :  { %v2050_v17 = vpop.permute.xlu0 %2049  ;;  %1040 = vperm.xlu1 %3115, %v77_v61   ;;  %v82_v61 = vld [vmem:[%s5983_s4 + $0x38] sm:$0xff] }
 0x4d1   :  { %1045 = vperm.xlu0 %3114, %v78_v47   ;;  %v2416_v46 = vpop.permute.xlu1 %2415 }
 0x4d3   :  { %v2410_v55 = vpop.permute.xlu0 %2409  ;;  %1050 = vperm.xlu1 %3115, %v79_v10  }
 0x4d5   :  { %1055 = vperm.xlu0 %3114, %v80_v49   ;;  %v5184_v23 = vpop.permute.xlu1 %2295  ;;  %v2082_v49 = vsel %vm112_vm1, %v2050_v17, %v5011_v36 }
 0x4d6   :  { %6352 = vst [vmem:[#allocation123_spill] sm:$0xff] %v5184_v23  ;;  %v2081_v23 = vsel %vm112_vm1, %v2048_v53, %v2050_v17 }
 0x4d7   :  { %v5189_v6 = vpop.permute.xlu0 %2289  ;;  %1060 = vperm.xlu1 %3115, %v81_v62   ;;  %v2079_v62 = vsel %vm112_vm1, %v2042_v51, %v4997_v25 }
 0x4d9   :  { %1065 = vperm.xlu0 %3114, %v82_v61   ;;  %v2058_v47 = vpop.permute.xlu1 %2057 }
 0x4da   :  { %v2084_v32 = vsel %vm112_vm1, %v2056_v29, %v2058_v47  ;;  %v2085_v10 = vsel %vm112_vm1, %v2058_v47, %v5079_v30  ;;  %v2078_v29 = vsel %vm112_vm1, %v2040_v58, %v2042_v51  ;;  %v2075_v47 = vsel %vm112_vm1, %v5111_v8, %v2034_v11 }
 0x4db   :  { %v5194_v0 = vpop.permute.xlu0 %2169  ;;  %2479 = vmatprep.subr.mxu0 %v2085_v10  ;;  %v2072_v51 = vsel %vm112_vm1, %v5037_v45, %v5085_v60  ;;  %v2067_v58 = vsel %vm112_vm1, %v4995_v2, %v4870_v59  ;;  %v2066_v45 = vsel %vm112_vm1, %v4963_v50, %v4995_v2  ;;  %v2442_v2 = vsel %vm160_vm5, %v2410_v55, %v5019_v38 }
 0x4dc   :  { %2480 = vmatpush1.msra.mxu0 %v2084_v32  ;;  %v2076_v32 = vsel %vm112_vm1, %v2034_v11, %v4936_v40  ;;  %v2070_v11 = vsel %vm112_vm1, %v5039_v28, %v4895_v19  ;;  %v2064_v28 = vsel %vm112_vm1, %v4965_v18, %v4855_v4 }
 0x4dd   :  { %2481 = vmatprep.subr.mxu0 %v2082_v49  ;;  %v5199_v15 = vpop.permute.xlu1 %2175 }
 0x4de   :  { %2482 = vmatpush1.msra.mxu0 %v2081_v23  ;;  %v2073_v23 = vsel %vm112_vm1, %v5085_v60, %v4908_v7 }
 0x4df   :  { %v5204_v61 = vpop.permute.xlu0 %2167  ;;  %2483 = vmatprep.subr.mxu0 %v2079_v62  ;;  %v2063_v62 = vsel %vm112_vm1, %v4938_v12, %v4965_v18  ;;  %v2439_v12 = vsel %vm160_vm5, %v5153_v21, %v5005_v20  ;;  %v2438_v18 = vsel %vm160_vm5, %v5127_v5, %v5153_v21  ;;  %v6353_v5 = vld [vmem:[#allocation87_spill] sm:$0xff] }
 0x4e0   :  { %2484 = vmatpush1.msra.mxu0 %v2078_v29 }
 0x4e1   :  { %2485 = vmatprep.subr.mxu0 %v2076_v32  ;;  %v5210_v17 = vpop.permute.xlu1 %2171  ;;  %v6361_v32 = vld [vmem:[#allocation81_spill] sm:$0xff] }
 0x4e2   :  { %2486 = vmatpush1.msra.mxu0 %v2075_v47  ;;  %v5315_v47 = vld [vmem:[#allocation2 + $0x10] sm:$0xff] }
 0x4e3   :  { %v5218_v53 = vpop.permute.xlu0 %2163  ;;  %2487 = vmatprep.subr.mxu0 %v2073_v23 }
 0x4e4   :  { %2488 = vmatpush1.msra.mxu0 %v2072_v51  ;;  %v6362_v51 = vmov 0.0  }
 0x4e5   :  { %2489 = vmatprep.subr.mxu0 %v2070_v11  ;;  %v5223_v8 = vpop.permute.xlu1 %2161  ;;  %v6363_v11 = vld [vmem:[#allocation110_spill] sm:$0xff] }
 0x4e6   :  { %2490 = vmatpush1.msra.mxu0 %v5045_v48 }
 0x4e7   :  { %v2418_v10 = vpop.permute.xlu0 %2417  ;;  %2491 = vmatprep.subr.mxu0 %v2067_v58  ;;  %v2083_v58 = vsel %vm112_vm1, %v5011_v36, %v6363_v11  ;;  %v6367_v36 = vld [vmem:[#allocation109_spill] sm:$0xff] }
 0x4e8   :  { %v2444_v60 = vsel %vm160_vm5, %v2416_v46, %v2418_v10  ;;  %2492 = vmatpush1.msra.mxu0 %v2066_v45  ;;  %v2445_v48 = vsel %vm160_vm5, %v2418_v10, %v5049_v26  ;;  %v2441_v46 = vsel %vm160_vm5, %v5167_v57, %v2410_v55  ;;  %v2435_v55 = vsel %vm160_vm5, %v5117_v16, %v5129_v31  ;;  %v6364_v10 = vld [vmem:[#allocation123_spill] sm:$0xff] }
 0x4e9   :  { %2493 = vmatprep.subr.mxu0 %v2064_v28  ;;  %2608 = vmatprep.subr.mxu1 %v2445_v48  ;;  %v5238_v49 = vpop.permute.xlu1 %2159  ;;  %v6366_v48 = vld [vmem:[#allocation107_spill] sm:$0xff] }
 0x4ea   :  { %2494 = vmatpush1.msra.mxu0 %v2063_v62  ;;  %2609 = vmatpush1.msra.mxu1 %v2444_v60  ;;  %v2080_v62 = vsel %vm112_vm1, %v4997_v25, %v6366_v48  ;;  %v6370_v25 = vld [vmem:[#allocation103_spill] sm:$0xff] }
 0x4eb   :  { %v5247_v50 = vpop.permute.xlu0 %2153  ;;  %2495 = vmatprep.subr.mxu0 %v4951_v33  ;;  %2610 = vmatprep.subr.mxu1 %v2442_v2  ;;  %v2436_v33 = vsel %vm160_vm5, %v5129_v31, %v4945_v9  ;;  %v2430_v31 = vsel %vm160_vm5, %v5051_v24, %v4904_v35  ;;  %v2426_v24 = vsel %vm160_vm5, %v4971_v34, %v5003_v27  ;;  %v6360_v34 = vld [vmem:[#allocation117_spill] sm:$0xff] }
 0x4ec   :  { %2496 = vmatpush1.msra.mxu0 %v4922_v22  ;;  %2611 = vmatpush1.msra.mxu1 %v2441_v46  ;;  %v2086_v29 = vsel %vm112_vm1, %v5079_v30, %v6360_v34  ;;  %v6365_v30 = vld [vmem:[#allocation111_spill] sm:$0xff]  ;;  %v2322_v2 = vsel %vm144_vm2, %v5189_v6, %v6367_v36  ;;  %v6368_v46 = vld [vmem:[#allocation122_spill] sm:$0xff] }
 0x4ed   :  { %2497 = vmatprep.subr.mxu0 %v4928_v63  ;;  %2612 = vmatprep.subr.mxu1 %v2439_v12  ;;  %v5258_v57 = vpop.permute.xlu1 %2155  ;;  %v6356_v63 = vld [vmem:[#allocation85_spill] sm:$0xff]  ;;  %v2321_v12 = vsel %vm144_vm2, %v6368_v46, %v5189_v6 }
 0x4ee   :  { %2498 = vmatpush1.msra.mxu0 %v4906_v42  ;;  %2613 = vmatpush1.msra.mxu1 %v2438_v18  ;;  %v2433_v42 = vsel %vm160_vm5, %v5093_v14, %v4918_v39  ;;  %v6386_v46 = vld [vmem:[#allocation93_spill] sm:$0xff] }
 0x4ef   :  { %v5267_v22 = vpop.permute.xlu0 %2151  ;;  %2499 = vmatprep.subr.mxu0 %v4891_v13  ;;  %2614 = vmatprep.subr.mxu1 %v2436_v33  ;;  %v6369_v33 = vld [vmem:[#allocation104_spill] sm:$0xff] }
 0x4f0   :  { %2500 = vmatpush1.msra.mxu0 %v4862_v54  ;;  %2615 = vmatpush1.msra.mxu1 %v2435_v55  ;;  %v2427_v54 = vsel %vm160_vm5, %v5003_v27, %v4878_v43  ;;  %v6359_v27 = vld [vmem:[#allocation83_spill] sm:$0xff]  ;;  %v2077_v55 = vsel %vm112_vm1, %v4936_v40, %v6369_v33  ;;  %v6374_v40 = vld [vmem:[#allocation100_spill] sm:$0xff] }
 0x4f1   :  { %2501 = vmatprep.subr.mxu0 %v4868_v1  ;;  %2616 = vmatprep.subr.mxu1 %v2433_v42  ;;  %v5275_v21 = vpop.permute.xlu1 %2145  ;;  %v6371_v42 = vld [vmem:[#allocation121_spill] sm:$0xff] }
 0x4f2   :  { %2502 = vmatpush1.msra.mxu0 %v4848_v56  ;;  %2617 = vmatpush1.msra.mxu1 %v5097_v44  ;;  %v6358_v44 = vld [vmem:[#allocation82_spill] sm:$0xff] }
 0x4f3   :  { %v5282_v13 = vpop.permute.xlu0 %2147  ;;  %2503 = vmatprep.subr.mxu0 %v4832_v3  ;;  %2618 = vmatprep.subr.mxu1 %v2430_v31  ;;  %v6354_v3 = vld [vmem:[#allocation91_spill] sm:$0xff]  ;;  %v2319_v31 = vsel %vm144_vm2, %v6371_v42, %v6370_v25 }
 0x4f4   :  { %2504 = vmatpush1.msra.mxu0 %v4801_v37  ;;  %2619 = vmatpush1.msra.mxu1 %v5057_v41  ;;  %v6355_v37 = vld [vmem:[#allocation102_spill] sm:$0xff] }
 0x4f5   :  { %2505 = vmatprep.subr.mxu0 %v4806_v52  ;;  %2620 = vmatprep.subr.mxu1 %v2427_v54  ;;  %v5291_v56 = vpop.permute.xlu1 %2143  ;;  %v2424_v41 = vsel %vm160_vm5, %v6355_v37, %v6354_v3  ;;  %v6357_v52 = vld [vmem:[#allocation99_spill] sm:$0xff]  ;;  %v6372_v54 = vld [vmem:[#allocation118_spill] sm:$0xff] }
 0x4f6   :  { %2506 = vmatpush1.msra.mxu0 %v6353_v5  ;;  %2621 = vmatpush1.msra.mxu1 %v2426_v24  ;;  %v2423_v16 = vsel %vm160_vm5, %v6357_v52, %v6355_v37  ;;  %v2318_v24 = vsel %vm144_vm2, %v6372_v54, %v6371_v42  ;;  %v6373_v5 = vld [vmem:[#allocation98_spill] sm:$0xff]  ;;  %v6390_v54 = vld [vmem:[#allocation92_spill] sm:$0xff] }
 0x4f7   :  { %v5300_v1 = vpop.permute.xlu0 %2137  ;;  %2507 = vmatprep.subr.mxu0 %v6356_v63  ;;  %2622 = vmatprep.subr.mxu1 %v2424_v41  ;;  %v2074_v37 = vsel %vm112_vm1, %v4908_v7, %v6373_v5  ;;  %v6375_v41 = vld [vmem:[#allocation119_spill] sm:$0xff] }
 0x4f8   :  { %2508 = vmatpush1.msra.mxu0 %v6358_v44  ;;  %2623 = vmatpush1.msra.mxu1 %v2423_v16  ;;  %v2316_v63 = vsel %vm144_vm2, %v6375_v41, %v6374_v40  ;;  %v6376_v16 = vld [vmem:[#allocation95_spill] sm:$0xff]  ;;  %v6377_v44 = vld [vmem:[#allocation120_spill] sm:$0xff]  ;;  %v6393_v41 = vld [vmem:[#allocation101_spill] sm:$0xff] }
 0x4f9   :  { %2509 = vmatprep.subr.mxu0 %v6359_v27  ;;  %2705 = vmatprep.subr.mxu1 %v6360_v34  ;;  %v5309_v14 = vpop.permute.xlu1 %2139  ;;  %v2071_v27 = vsel %vm112_vm1, %v4895_v19, %v6376_v16  ;;  %v6378_v34 = vld [vmem:[#allocation97_spill] sm:$0xff] }
 0x4fa   :  { %2510 = vmatpush1.msra.mxu0 %v6361_v32  ;;  %3057 = vmatmul.mubr.msk.f32.vlgmr.msra.gmra.mxu1 %vm1068_vm10, %v5315_v47 }
 0x4fb   :  { %2706 = vmatpush1.msra.mxu1 %v2086_v29  ;;  %v2298_v23 = vpop.permute.xlu0 %2297  ;;  %2662 = vmatprep.mubr.f32.mxu1 %v6362_v51  ;;  %v6379_v29 = vld [vmem:[#allocation115_spill] sm:$0xff] }
 0x4fc   :  { %v2324_v45 = vsel %vm144_vm2, %v6364_v10, %v2298_v23  ;;  %2707 = vmatprep.subr.mxu1 %v6363_v11  ;;  %v2325_v60 = vsel %vm144_vm2, %v2298_v23, %v6365_v30  ;;  %v2313_v7 = vsel %vm144_vm2, %v6379_v29, %v6378_v34  ;;  %v6380_v23 = vld [vmem:[#allocation94_spill] sm:$0xff]  ;;  %v6381_v11 = vld [vmem:[#allocation116_spill] sm:$0xff] }
 0x4fd   :  { %2708 = vmatpush1.msra.mxu1 %v2083_v58  ;;  %2511 = vmatprep.subr.mxu0 %v2325_v60  ;;  %v5328_v28 = vpop.permute.xlu1 %2129  ;;  %v2068_v58 = vsel %vm112_vm1, %v4870_v59, %v6380_v23  ;;  %v6382_v10 = vld [vmem:[#allocation96_spill] sm:$0xff] }
 0x4fe   :  { %2709 = vmatprep.subr.mxu1 %v6366_v48  ;;  %2512 = vmatpush2.msra.mxu0 %v2324_v45  ;;  %v6383_v45 = vld [vmem:[#allocation112_spill] sm:$0xff]  ;;  %v6384_v48 = vld [vmem:[#allocation90_spill] sm:$0xff] }
 0x4ff   :  { %2710 = vmatpush1.msra.mxu1 %v2080_v62  ;;  %v5340_v18 = vpop.permute.xlu0 %2135  ;;  %2513 = vmatprep.subr.mxu0 %v2322_v2  ;;  %v2310_v19 = vsel %vm144_vm2, %v6383_v45, %v6382_v10  ;;  %v6385_v62 = vld [vmem:[#allocation113_spill] sm:$0xff]  ;;  %v2065_v2 = vsel %vm112_vm1, %v4855_v4, %v6384_v48  ;;  %v2201_v45 = vsel %vm128_vm0, %v5204_v61, %v5194_v0 }
 0x500   :  { %2711 = vmatprep.subr.mxu1 %v6369_v33  ;;  %2514 = vmatpush2.msra.mxu0 %v2321_v12  ;;  %v6387_v12 = vld [vmem:[#allocation108_spill] sm:$0xff]  ;;  %v2196_v61 = vsel %vm128_vm0, %v5247_v50, %v5258_v57 }
 0x501   :  { %2712 = vmatpush1.msra.mxu1 %v2077_v55  ;;  %2515 = vmatprep.subr.mxu0 %v2319_v31  ;;  %v5352_v6 = vpop.permute.xlu1 %2127  ;;  %v2307_v59 = vsel %vm144_vm2, %v6387_v12, %v6386_v46  ;;  %v6388_v55 = vld [vmem:[#allocation105_spill] sm:$0xff] }
 0x502   :  { %2713 = vmatprep.subr.mxu1 %v6373_v5  ;;  %2516 = vmatpush2.msra.mxu0 %v2318_v24  ;;  %v2306_v42 = vsel %vm144_vm2, %v6388_v55, %v6387_v12  ;;  %v6389_v31 = vld [vmem:[#allocation89_spill] sm:$0xff]  ;;  %v6391_v24 = vld [vmem:[#allocation106_spill] sm:$0xff]  ;;  %v6400_v12 = vld [vmem:[#allocation80_spill] sm:$0xff] }
 0x503   :  { %2714 = vmatpush1.msra.mxu1 %v2074_v37  ;;  %v5361_v52 = vpop.permute.xlu0 %2131  ;;  %2517 = vmatprep.subr.mxu0 %v2316_v63  ;;  %v2304_v5 = vsel %vm144_vm2, %v6391_v24, %v6390_v54  ;;  %v6392_v37 = vld [vmem:[#allocation5_spill] sm:$0xff]  ;;  %v2303_v63 = vsel %vm144_vm2, %v6393_v41, %v6391_v24  ;;  %v6402_v55 = vld [vmem:[#allocation78_spill] sm:$0xff]  ;;  %v6404_v24 = vld [vmem:[#allocation76_spill] sm:$0xff] }
 0x504   :  { %2715 = vmatprep.subr.mxu1 %v6376_v16  ;;  %2518 = vmatpush2.msra.mxu0 %v6377_v44  ;;  %v6394_v16 = vld [vmem:[#allocation88_spill] sm:$0xff]  ;;  %v6395_v44 = vld [vmem:[#allocation114_spill] sm:$0xff] }
 0x505   :  { %2716 = vmatpush1.msra.mxu1 %v2071_v27  ;;  %2519 = vmatprep.subr.mxu0 %v2313_v7  ;;  %v5371_v32 = vpop.permute.xlu1 %2123  ;;  %v6396_v7 = vld [vmem:[#allocation9_spill] sm:$0xff]  ;;  %v6406_v41 = vld [vmem:[#allocation72_spill] sm:$0xff] }
 0x506   :  { %2717 = vmatprep.subr.mxu1 %v6380_v23  ;;  %2520 = vmatpush2.msra.mxu0 %v6381_v11  ;;  %v6397_v11 = vld [vmem:[#allocation86_spill] sm:$0xff] }
 0x507   :  { %2718 = vmatpush1.msra.mxu1 %v2068_v58  ;;  %v5381_v60 = vpop.permute.xlu0 %2121  ;;  %2521 = vmatprep.subr.mxu0 %v2310_v19  ;;  %v2202_v58 = vsel %vm128_vm0, %v5194_v0, %v5210_v17  ;;  %v6398_v19 = vld [vmem:[#allocation11_spill] sm:$0xff]  ;;  %v6401_v0 = vld [vmem:[#allocation6_spill] sm:$0xff] }
 0x508   :  { %2719 = vmatprep.subr.mxu1 %v6384_v48  ;;  %2522 = vmatpush2.msra.mxu0 %v6385_v62  ;;  %v2199_v62 = vsel %vm128_vm0, %v5223_v8, %v5218_v53 }
 0x509   :  { %2720 = vmatpush1.msra.mxu1 %v2065_v2  ;;  %2523 = vmatprep.subr.mxu0 %v2307_v59  ;;  %v2178_v33 = vpop.permute.xlu1 %2177  ;;  %v2198_v2 = vsel %vm128_vm0, %v5238_v49, %v5223_v8  ;;  %v6403_v8 = vld [vmem:[#allocation77_spill] sm:$0xff]  ;;  %v2193_v49 = vsel %vm128_vm0, %v5275_v21, %v5282_v13 }
 0x50a   :  { %2721 = vmatprep.subr.mxu1 %v6389_v31  ;;  %2524 = vmatpush2.msra.mxu0 %v2306_v42  ;;  %v2205_v27 = vsel %vm128_vm0, %v2178_v33, %v6395_v44  ;;  %v2204_v29 = vsel %vm128_vm0, %v5199_v15, %v2178_v33  ;;  %v6399_v15 = vld [vmem:[#allocation84_spill] sm:$0xff]  ;;  %v2195_v33 = vsel %vm128_vm0, %v5267_v22, %v5247_v50  ;;  %v6405_v50 = vld [vmem:[#allocation7_spill] sm:$0xff] }
 0x50b   :  { %2722 = vmatpush1.msra.mxu1 %v6392_v37  ;;  %v2120_v4 = vpop.permute.xlu0 %2119  ;;  %2525 = vmatprep.subr.mxu0 %v2304_v5  ;;  %v2192_v31 = vsel %vm128_vm0, %v5291_v56, %v5275_v21  ;;  %v2190_v22 = vsel %vm128_vm0, %v5300_v1, %v5309_v14  ;;  %v2189_v37 = vsel %vm128_vm0, %v5340_v18, %v5300_v1  ;;  %v6407_v21 = vld [vmem:[#allocation8_spill] sm:$0xff] }
 0x50c   :  { %2723 = vmatprep.subr.mxu1 %v6394_v16  ;;  %2526 = vmatpush2.msra.mxu0 %v2303_v63  ;;  %v2187_v56 = vsel %vm128_vm0, %v5328_v28, %v5361_v52  ;;  %v2186_v16 = vsel %vm128_vm0, %v5352_v6, %v5328_v28  ;;  %v2184_v18 = vsel %vm128_vm0, %v5381_v60, %v5371_v32  ;;  %v5465_v6 = vld [vmem:[#allocation2] sm:$0xff] }
 0x50d   :  { %2724 = vmatpush1.msra.mxu1 %v6396_v7  ;;  %2527 = vmatprep.subr.mxu0 %v2205_v27  ;;  %v2302_v23 = vpop.permute.xlu1 %2301  ;;  %v6408_v27 = vld [vmem:[#allocation57_spill] sm:$0xff]  ;;  %v2183_v7 = vsel %vm128_vm0, %v2120_v4, %v5381_v60 }
 0x50e   :  { %2725 = vmatprep.subr.mxu1 %v6397_v11  ;;  %2528 = vmatpush2.msra.mxu0 %v2204_v29  ;;  %v2326_v1 = vsel %vm144_vm2, %v6365_v30, %v2302_v23 }
 0x50f   :  { %2726 = vmatpush1.msra.mxu1 %v6398_v19  ;;  %v2294_v48 = vpop.permute.xlu0 %2293  ;;  %2529 = vmatprep.subr.mxu0 %v2202_v58  ;;  %v5470_v58 = vld [vmem:[#allocation2 + $0x28] sm:$0xff] }
 0x510   :  { %2727 = vmatprep.subr.mxu1 %v6399_v15  ;;  %2530 = vmatpush2.msra.mxu0 %v2201_v45  ;;  %v2323_v28 = vsel %vm144_vm2, %v6367_v36, %v2294_v48  ;;  %v5474_v36 = vld [vmem:[#allocation2 + $0x20] sm:$0xff] }
 0x511   :  { %2728 = vmatpush1.msra.mxu1 %v6400_v12  ;;  %2531 = vmatprep.subr.mxu0 %v2199_v62  ;;  %v2286_v59 = vpop.permute.xlu1 %2285  ;;  %v5487_v15 = vld [vmem:[#allocation2 + $0x40] sm:$0xff] }
 0x512   :  { %2729 = vmatprep.subr.mxu1 %v6401_v0  ;;  %2532 = vmatpush2.msra.mxu0 %v2198_v2  ;;  %v5493_v2 = vld [vmem:[#allocation2 + $0x38] sm:$0xff] }
 0x513   :  { %2730 = vmatpush1.msra.mxu1 %v6402_v55  ;;  %v2278_v42 = vpop.permute.xlu0 %2277  ;;  %2533 = vmatprep.subr.mxu0 %v2196_v61  ;;  %v5510_v55 = vld [vmem:[#allocation2 + $0x50] sm:$0xff] }
 0x514   :  { %2731 = vmatprep.subr.mxu1 %v6403_v8  ;;  %2534 = vmatpush2.msra.mxu0 %v2195_v33  ;;  %v2317_v4 = vsel %vm144_vm2, %v6374_v40, %v2278_v42  ;;  %v5521_v8 = vld [vmem:[#allocation2 + $0x70] sm:$0xff] }
 0x515   :  { %2732 = vmatpush1.msra.mxu1 %v6404_v24  ;;  %2535 = vmatprep.subr.mxu0 %v2193_v49  ;;  %v2270_v5 = vpop.permute.xlu1 %2269  ;;  %v5527_v24 = vld [vmem:[#allocation2 + $0x68] sm:$0xff] }
 0x516   :  { %2733 = vmatprep.subr.mxu1 %v6405_v50  ;;  %2536 = vmatpush2.msra.mxu0 %v2192_v31  ;;  %v2314_v19 = vsel %vm144_vm2, %v6378_v34, %v2270_v5  ;;  %v5538_v50 = vld [vmem:[#allocation2 + $0x88] sm:$0xff] }
 0x517   :  { %2734 = vmatpush1.msra.mxu1 %v6406_v41  ;;  %v2262_v63 = vpop.permute.xlu0 %2261  ;;  %2537 = vmatprep.subr.mxu0 %v2190_v22 }
 0x518   :  { %2735 = vmatprep.subr.mxu1 %v6407_v21  ;;  %2538 = vmatpush2.msra.mxu0 %v2189_v37  ;;  %v2311_v62 = vsel %vm144_vm2, %v6382_v10, %v2262_v63 }
 0x519   :  { %2736 = vmatpush1.msra.mxu1 %v6408_v27  ;;  %2539 = vmatprep.subr.mxu0 %v2187_v56  ;;  %v2254_v29 = vpop.permute.xlu1 %2253  ;;  %v5555_v56 = vld [vmem:[#allocation2 + $0xa0] sm:$0xff] }
 0x51a   :  { %2737 = vmatprep.subr.mxu1 %v2302_v23  ;;  %2540 = vmatpush2.msra.mxu0 %v2186_v16  ;;  %v2320_v23 = vsel %vm144_vm2, %v6370_v25, %v2286_v59  ;;  %v5480_v25 = vld [vmem:[#allocation2 + $0x18] sm:$0xff]  ;;  %v2308_v10 = vsel %vm144_vm2, %v6386_v46, %v2254_v29 }
 0x51b   :  { %2738 = vmatpush2.msra.mxu1 %v2326_v1  ;;  %v2246_v11 = vpop.permute.xlu0 %2245  ;;  %2541 = vmatprep.subr.mxu0 %v2184_v18 }
 0x51c   :  { %2739 = vmatprep.subr.mxu1 %v2294_v48  ;;  %2542 = vmatpush2.msra.mxu0 %v2183_v7  ;;  %v2305_v61 = vsel %vm144_vm2, %v6390_v54, %v2246_v11  ;;  %v5578_v7 = vld [vmem:[#allocation2 + $0xb0] sm:$0xff] }
 0x51d   :  { %2740 = vmatpush2.msra.mxu1 %v2323_v28  ;;  %2544 = vmatmul.mubr.f32.vlgmr.msra.gmra.mxu0 %v5465_v6  ;;  %v2182_v30 = vpop.permute.xlu1 %2181 }
 0x51e   :  { %2741 = vmatprep.subr.mxu1 %v2286_v59  ;;  %3058 = vmatmul.mubr.msk.f32.gmra.mxu1 %vm1068_vm10, %v5470_v58  ;;  %v5504_v59 = vld [vmem:[#allocation2 + $0x58] sm:$0xff]  ;;  %v2206_v54 = vsel %vm128_vm0, %v6395_v44, %v2182_v30  ;;  %v5530_v44 = vld [vmem:[#allocation2 + $0x60] sm:$0xff] }
 0x51f   :  { %2742 = vmatpush2.msra.mxu1 %v2320_v23  ;;  %v2174_v60 = vpop.permute.xlu0 %2173  ;;  %2549 = vmatprep.mubr.f32.mxu0 %v5474_v36  ;;  %v6410_v23 = vld [vmem:[#allocation41_spill] sm:$0xff] }
 0x520   :  { %2743 = vmatprep.subr.mxu1 %v2278_v42  ;;  %2668 = vmatprep.mubr.f32.mxu1 %v6362_v51  ;;  %v2203_v31 = vsel %vm128_vm0, %v5210_v17, %v2174_v60 }
 0x521   :  { %2744 = vmatpush2.msra.mxu1 %v2317_v4  ;;  %2550 = vmatmul.mubr.f32.gmra.mxu0 %v5480_v25  ;;  %v2422_v45 = vpop.permute.xlu1 %2421 }
 0x522   :  { %2745 = vmatprep.subr.mxu1 %v2270_v5  ;;  %v2446_v48 = vsel %vm160_vm5, %v5049_v26, %v2422_v45  ;;  %3059 = vmatmul.mubr.msk.f32.gmra.mxu1 %vm1068_vm10, %v5487_v15  ;;  %v5496_v26 = vld [vmem:[#allocation2 + $0x30] sm:$0xff] }
 0x523   :  { %2746 = vmatpush2.msra.mxu1 %v2314_v19  ;;  %2834 = vmatprep.subr.mxu0 %v2422_v45  ;;  %v2166_v40 = vpop.permute.xlu0 %2165  ;;  %v6413_v19 = vld [vmem:[#allocation20_spill] sm:$0xff] }
 0x524   :  { %2747 = vmatprep.subr.mxu1 %v2262_v63  ;;  %2835 = vmatpush1.msra.mxu0 %v2446_v48  ;;  %v2200_v17 = vsel %vm128_vm0, %v5218_v53, %v2166_v40  ;;  %v5544_v63 = vld [vmem:[#allocation2 + $0x80] sm:$0xff] }
 0x525   :  { %2555 = vmatprep.mubr.f32.mxu0 %v5493_v2  ;;  %2748 = vmatpush2.msra.mxu1 %v2311_v62  ;;  %v2414_v34 = vpop.permute.xlu1 %2413 }
 0x526   :  { %2556 = vmatmul.mubr.f32.gmra.mxu0 %v5496_v26  ;;  %2674 = vmatprep.mubr.f32.mxu1 %v6362_v51  ;;  %v2443_v12 = vsel %vm160_vm5, %v5019_v38, %v2414_v34  ;;  %v5513_v38 = vld [vmem:[#allocation2 + $0x48] sm:$0xff] }
 0x527   :  { %2749 = vmatprep.subr.mxu1 %v2254_v29  ;;  %3060 = vmatmul.mubr.msk.f32.gmra.mxu1 %vm1068_vm10, %v5504_v59  ;;  %v2158_v0 = vpop.permute.xlu0 %2157  ;;  %v5563_v29 = vld [vmem:[#allocation2 + $0x98] sm:$0xff] }
 0x528   :  { %2750 = vmatpush2.msra.mxu1 %v2308_v10  ;;  %2836 = vmatprep.subr.mxu0 %v2414_v34  ;;  %v2197_v37 = vsel %vm128_vm0, %v5258_v57, %v2158_v0 }
 0x529   :  { %2751 = vmatprep.subr.mxu1 %v2246_v11  ;;  %2837 = vmatpush1.msra.mxu0 %v2443_v12  ;;  %v2406_v33 = vpop.permute.xlu1 %2405  ;;  %v6416_v12 = vld [vmem:[#allocation43_spill] sm:$0xff] }
 0x52a   :  { %2561 = vmatprep.mubr.f32.mxu0 %v5510_v55  ;;  %2752 = vmatpush2.msra.mxu1 %v2305_v61  ;;  %v2440_v46 = vsel %vm160_vm5, %v5005_v20, %v2406_v33  ;;  %v6418_v61 = vld [vmem:[#allocation34_spill] sm:$0xff] }
 0x52b   :  { %2562 = vmatmul.mubr.f32.gmra.mxu0 %v5513_v38  ;;  %2680 = vmatprep.mubr.f32.mxu1 %v6362_v51  ;;  %v2150_v42 = vpop.permute.xlu0 %2149 }
 0x52c   :  { %2753 = vmatprep.subr.mxu1 %v2182_v30  ;;  %3061 = vmatmul.mubr.msk.f32.gmra.mxu1 %vm1068_vm10, %v5521_v8  ;;  %v2194_v57 = vsel %vm128_vm0, %v5282_v13, %v2150_v42  ;;  %v5566_v13 = vld [vmem:[#allocation2 + $0x90] sm:$0xff]  ;;  %v3148_v30 = vld [vmem:[#allocation2 + $0x8] sm:$0xff] }
 0x52d   :  { %2754 = vmatpush2.msra.mxu1 %v2206_v54  ;;  %2838 = vmatprep.subr.mxu0 %v2406_v33  ;;  %v2398_v49 = vpop.permute.xlu1 %2397  ;;  %v6419_v33 = vld [vmem:[#allocation33_spill] sm:$0xff] }
 0x52e   :  { %2755 = vmatprep.subr.mxu1 %v2174_v60  ;;  %2839 = vmatpush1.msra.mxu0 %v2440_v46  ;;  %v2437_v5 = vsel %vm160_vm5, %v4945_v9, %v2398_v49  ;;  %v5547_v9 = vld [vmem:[#allocation2 + $0x78] sm:$0xff] }
 0x52f   :  { %2567 = vmatprep.mubr.f32.mxu0 %v5527_v24  ;;  %2756 = vmatpush2.msra.mxu1 %v2203_v31  ;;  %v2142_v20 = vpop.permute.xlu0 %2141  ;;  %v6420_v31 = vld [vmem:[#allocation37_spill] sm:$0xff] }
 0x530   :  { %2568 = vmatmul.mubr.f32.gmra.mxu0 %v5530_v44  ;;  %2686 = vmatprep.mubr.f32.mxu1 %v6362_v51  ;;  %v2191_v27 = vsel %vm128_vm0, %v5309_v14, %v2142_v20  ;;  %v5572_v14 = vld [vmem:[#allocation2 + $0xb8] sm:$0xff] }
 0x531   :  { %2757 = vmatprep.subr.mxu1 %v2166_v40  ;;  %3062 = vmatmul.mubr.msk.f32.gmra.mxu1 %vm1068_vm10, %v5538_v50  ;;  %v2390_v22 = vpop.permute.xlu1 %2389  ;;  %v6414_v40 = vld [vmem:[#allocation18_spill] sm:$0xff] }
 0x532   :  { %2758 = vmatpush2.msra.mxu1 %v2200_v17  ;;  %2840 = vmatprep.subr.mxu0 %v2398_v49  ;;  %v2434_v53 = vsel %vm160_vm5, %v4918_v39, %v2390_v22  ;;  %v6421_v17 = vld [vmem:[#allocation35_spill] sm:$0xff] }
 0x533   :  { %2759 = vmatprep.subr.mxu1 %v2158_v0  ;;  %2841 = vmatpush1.msra.mxu0 %v2437_v5  ;;  %v2134_v41 = vpop.permute.xlu0 %2133  ;;  %v6417_v0 = vld [vmem:[#allocation30_spill] sm:$0xff] }
 0x534   :  { %2573 = vmatprep.mubr.f32.mxu0 %v5544_v63  ;;  %2760 = vmatpush2.msra.mxu1 %v2197_v37  ;;  %v2188_v39 = vsel %vm128_vm0, %v5361_v52, %v2134_v41  ;;  %v6422_v37 = vld [vmem:[#allocation15_spill] sm:$0xff] }
 0x535   :  { %2574 = vmatmul.mubr.f32.gmra.mxu0 %v5547_v9  ;;  %2692 = vmatprep.mubr.f32.mxu1 %v6362_v51  ;;  %v2382_v21 = vpop.permute.xlu1 %2381 }
 0x536   :  { %2761 = vmatprep.subr.mxu1 %v2150_v42  ;;  %3063 = vmatmul.mubr.msk.f32.gmra.mxu1 %vm1068_vm10, %v5555_v56  ;;  %v2431_v1 = vsel %vm160_vm5, %v4904_v35, %v2382_v21  ;;  %v5581_v35 = vld [vmem:[#allocation2 + $0xa8] sm:$0xff] }
 0x537   :  { %2762 = vmatpush2.msra.mxu1 %v2194_v57  ;;  %2842 = vmatprep.subr.mxu0 %v2390_v22  ;;  %v2126_v16 = vpop.permute.xlu0 %2125  ;;  %v6425_v57 = vld [vmem:[#allocation10_spill] sm:$0xff] }
 0x538   :  { %2763 = vmatprep.subr.mxu1 %v2142_v20  ;;  %2843 = vmatpush1.msra.mxu0 %v2434_v53  ;;  %v2185_v18 = vsel %vm128_vm0, %v5371_v32, %v2126_v16  ;;  %v6423_v53 = vld [vmem:[#allocation36_spill] sm:$0xff] }
 0x539   :  { %2579 = vmatprep.mubr.f32.mxu0 %v5563_v29  ;;  %2764 = vmatpush2.msra.mxu1 %v2191_v27  ;;  %v2374_v52 = vpop.permute.xlu1 %2373  ;;  %v6426_v27 = vld [vmem:[#allocation67_spill] sm:$0xff] }
 0x53a   :  { %2580 = vmatmul.mubr.f32.gmra.mxu0 %v5566_v13  ;;  %2698 = vmatprep.mubr.f32.mxu1 %v6362_v51  ;;  %v2428_v28 = vsel %vm160_vm5, %v4878_v43, %v2374_v52 }
 0x53b   :  { %2765 = vmatprep.subr.mxu1 %v2134_v41  ;;  %3064 = vmatmul.mubr.msk.f32.gmra.mxu1 %vm1068_vm10, %v5572_v14  ;;  %v2366_v11 = vpop.permute.xlu0 %2365 }
 0x53c   :  { %2766 = vmatpush2.msra.mxu1 %v2188_v39  ;;  %2844 = vmatprep.subr.mxu0 %v2382_v21  ;;  %v2425_v32 = vsel %vm160_vm5, %v6354_v3, %v2366_v11  ;;  %v6409_v3 = vld [vmem:[#allocation45_spill] sm:$0xff] }
 0x53d   :  { %2845 = vmatpush1.msra.mxu0 %v2431_v1  ;;  %2585 = vmatprep.mubr.f32.mxu0 %v5578_v7 }
 0x53e   :  { %2767 = vmatprep.subr.mxu1 %v2126_v16  ;;  %2586 = vmatmul.mubr.f32.gmra.mxu0 %v5581_v35 }
 0x53f   :  { %2768 = vmatpush2.msra.mxu1 %v2185_v18  ;;  %2769 = vmatprep.mubr.f32.mxu1 %v3148_v30 }
 0x540   :  { %2770 = vmatmul.mubr.f32.vlgmr.msra.gmra.mxu1 %v5465_v6  ;;  %2846 = vmatprep.subr.mxu0 %v2374_v52 }
 0x541   :  { %2847 = vmatpush1.msra.mxu0 %v2428_v28  ;;  %2775 = vmatprep.mubr.f32.mxu1 %v5474_v36  ;;  %v6411_v36 = vld [vmem:[#allocation42_spill] sm:$0xff] }
 0x542   :  { %2848 = vmatprep.subr.mxu0 %v2366_v11  ;;  %2882 = vmatprep.mubr.f32.mxu0 %v6362_v51 }
 0x543   :  { %2849 = vmatpush1.msra.mxu0 %v2425_v32  ;;  %v6428_v32 = vld [vmem:[#allocation70_spill] sm:$0xff] }
 0x544   :  { %2776 = vmatmul.mubr.f32.gmra.mxu1 %v5480_v25  ;;  %3065 = vmatmul.mubr.msk.f32.vlgmr.msra.gmra.mxu0 %vm1068_vm10, %v5315_v47  ;;  %v6412_v25 = vld [vmem:[#allocation40_spill] sm:$0xff] }
 0x545   :  { %2781 = vmatprep.mubr.f32.mxu1 %v5493_v2  ;;  %2888 = vmatprep.mubr.f32.mxu0 %v6362_v51  ;;  %v6415_v2 = vld [vmem:[#allocation38_spill] sm:$0xff] }
 0x546   :  { %v5596_v43 = vpop.permute.xlu1 %1030 }
 0x547   :  { %v1160_v6 = vadd.f32 %v6409_v3, %v5596_v43  ;;  %v1162_v60 = vadd.f32 %v6410_v23, %v5596_v43  ;;  %v1386_v4 = vadd.f32 %v6411_v36, %v5596_v43  ;;  %v1388_v45 = vadd.f32 %v6412_v25, %v5596_v43 }
 0x548   :  { %2782 = vmatmul.mubr.f32.gmra.mxu1 %v5496_v26  ;;  %3066 = vmatmul.mubr.msk.f32.gmra.mxu0 %vm1068_vm10, %v5470_v58  ;;  %v5609_v47 = vpop.permute.xlu0 %1035 }
 0x549   :  { %2787 = vmatprep.mubr.f32.mxu1 %v5510_v55  ;;  %2894 = vmatprep.mubr.f32.mxu0 %v6362_v51  ;;  %v1273_v48 = vadd.f32 %v6413_v19, %v1160_v6  ;;  %v1275_v62 = vadd.f32 %v6414_v40, %v1162_v60  ;;  %v1499_v34 = vadd.f32 %v6415_v2, %v1386_v4  ;;  %v6429_v6 = vld [vmem:[#allocation69_spill] sm:$0xff]  ;;  %v6430_v60 = vld [vmem:[#allocation44_spill] sm:$0xff]  ;;  %v6431_v4 = vld [vmem:[#allocation39_spill] sm:$0xff] }
 0x54a   :  { %v1501_v10 = vadd.f32 %v6416_v12, %v1388_v45  ;;  %v1166_v26 = vadd.f32 %v6417_v0, %v5609_v47  ;;  %v1168_v58 = vadd.f32 %v6418_v61, %v5609_v47  ;;  %v1392_v46 = vadd.f32 %v6419_v33, %v5609_v47  ;;  %v5623_v55 = vpop.permute.xlu1 %1040  ;;  %v6432_v45 = vld [vmem:[#allocation64_spill] sm:$0xff] }
 0x54b   :  { %v1545_v42 = vmax.f32 %v1273_v48, 0.0  ;;  %v1546_v54 = vmax.f32 %v1275_v62, 0.0  ;;  %v1547_v49 = vmax.f32 %v1499_v34, 0.0  ;;  %v1394_v20 = vadd.f32 %v6420_v31, %v5609_v47  ;;  %v6433_v48 = vld [vmem:[#allocation65_spill] sm:$0xff]  ;;  %v6434_v2 = vld [vmem:[#allocation28_spill] sm:$0xff]  ;;  %v6440_v31 = vld [vmem:[#allocation59_spill] sm:$0xff] }
 0x54c   :  { %2788 = vmatmul.mubr.f32.gmra.mxu1 %v5513_v38  ;;  %3067 = vmatmul.mubr.msk.f32.gmra.mxu0 %vm1068_vm10, %v5487_v15  ;;  %v1548_v5 = vmax.f32 %v1501_v10, 0.0  ;;  %v1279_v22 = vadd.f32 %v6421_v17, %v1166_v26  ;;  %v1281_v41 = vadd.f32 %v6422_v37, %v1168_v58  ;;  %v1505_v21 = vadd.f32 %v6423_v53, %v1392_v46  ;;  %v6424_v15 = vld [vmem:[#allocation68_spill] sm:$0xff]  ;;  %v5649_v1 = vpop.permute.xlu0 %1045  ;;  %v6436_v26 = vld [vmem:[#allocation66_spill] sm:$0xff]  ;;  %v6437_v58 = vld [vmem:[#allocation63_spill] sm:$0xff] }
 0x54d   :  { %1577 = vst [vmem:[%s5984_s5] sm:$0xff] %v1545_v42  ;;  %1578 = vst [vmem:[%s5984_s5 + $0x8] sm:$0xff] %v1546_v54  ;;  %v1507_v38 = vadd.f32 %v6424_v15, %v1394_v20  ;;  %2793 = vmatprep.mubr.f32.mxu1 %v5527_v24  ;;  %2900 = vmatprep.mubr.f32.mxu0 %v6362_v51  ;;  %v1172_v16 = vadd.f32 %v6425_v57, %v5623_v55  ;;  %v6427_v24 = vld [vmem:[#allocation29_spill] sm:$0xff]  ;;  %v6438_v46 = vld [vmem:[#allocation31_spill] sm:$0xff] }
 0x54e   :  { %1579 = vst [vmem:[%s5984_s5 + $0x10] sm:$0xff] %v1547_v49  ;;  %v1174_v39 = vadd.f32 %v6426_v27, %v5623_v55  ;;  %1580 = vst.msk [vmem:[%s5984_s5 + $0x18] sm:$0xff] %vm233_vm9, %v1548_v5  ;;  %v1549_v52 = vmax.f32 %v1279_v22, 0.0  ;;  %v1550_v18 = vmax.f32 %v1281_v41, 0.0  ;;  %v1551_v11 = vmax.f32 %v1505_v21, 0.0  ;;  %v5678_v62 = vpop.permute.xlu1 %1050  ;;  %v6441_v5 = vld [vmem:[#allocation61_spill] sm:$0xff] }
 0x54f   :  { %v1398_v28 = vadd.f32 %v6427_v24, %v5623_v55  ;;  %v1552_v30 = vmax.f32 %v1507_v38, 0.0  ;;  %v1285_v3 = vadd.f32 %v6428_v32, %v1172_v16  ;;  %v1400_v36 = vadd.f32 %v6430_v60, %v5623_v55  ;;  %v6442_v37 = vld [vmem:[#allocation21_spill] sm:$0xff]  ;;  %v6443_v15 = vld [vmem:[#allocation32_spill] sm:$0xff]  ;;  %v6444_v16 = vld [vmem:[#allocation62_spill] sm:$0xff] }
 0x550   :  { %v1287_v23 = vadd.f32 %v6429_v6, %v1174_v39  ;;  %1581 = vst [vmem:[%s5984_s5 + $0x20] sm:$0xff] %v1549_v52  ;;  %1582 = vst [vmem:[%s5984_s5 + $0x28] sm:$0xff] %v1550_v18  ;;  %2794 = vmatmul.mubr.f32.gmra.mxu1 %v5530_v44  ;;  %3068 = vmatmul.mubr.msk.f32.gmra.mxu0 %vm1068_vm10, %v5504_v59  ;;  %v1178_v19 = vadd.f32 %v6432_v45, %v5649_v1  ;;  %v6435_v59 = vld [vmem:[#allocation71_spill] sm:$0xff]  ;;  %v5704_v22 = vpop.permute.xlu0 %1055  ;;  %v6445_v39 = vld [vmem:[#allocation60_spill] sm:$0xff] }
 0x551   :  { %1583 = vst [vmem:[%s5984_s5 + $0x30] sm:$0xff] %v1551_v11  ;;  %v1511_v25 = vadd.f32 %v6431_v4, %v1398_v28  ;;  %v1180_v40 = vadd.f32 %v6433_v48, %v5649_v1  ;;  %1584 = vst.msk [vmem:[%s5984_s5 + $0x38] sm:$0xff] %vm233_vm9, %v1552_v30  ;;  %v1513_v44 = vadd.f32 %v6434_v2, %v1400_v36  ;;  %v1553_v34 = vmax.f32 %v1285_v3, 0.0  ;;  %v6446_v18 = vld [vmem:[#allocation27_spill] sm:$0xff]  ;;  %v6449_v32 = vld [vmem:[#allocation56_spill] sm:$0xff] }
 0x552   :  { %v1554_v12 = vmax.f32 %v1287_v23, 0.0  ;;  %v1404_v10 = vadd.f32 %v6435_v59, %v5649_v1  ;;  %2799 = vmatprep.mubr.f32.mxu1 %v5544_v63  ;;  %2906 = vmatprep.mubr.f32.mxu0 %v6362_v51  ;;  %v1291_v61 = vadd.f32 %v6436_v26, %v1178_v19  ;;  %v1406_v42 = vadd.f32 %v6438_v46, %v5649_v1  ;;  %v6439_v63 = vld [vmem:[#allocation26_spill] sm:$0xff]  ;;  %v6448_v28 = vld [vmem:[#allocation55_spill] sm:$0xff]  ;;  %v6450_v6 = vld [vmem:[#allocation12_spill] sm:$0xff] }
 0x553   :  { %v1555_v0 = vmax.f32 %v1511_v25, 0.0  ;;  %v1293_v33 = vadd.f32 %v6437_v58, %v1180_v40  ;;  %v1556_v54 = vmax.f32 %v1513_v44, 0.0  ;;  %1585 = vst [vmem:[%s5984_s5 + $0x40] sm:$0xff] %v1553_v34  ;;  %v1184_v20 = vadd.f32 %v6440_v31, %v5678_v62  ;;  %v6451_v4 = vld [vmem:[#allocation25_spill] sm:$0xff]  ;;  %v6452_v19 = vld [vmem:[#allocation58_spill] sm:$0xff]  ;;  %v6454_v44 = vld [vmem:[#allocation24_spill] sm:$0xff] }
 0x554   :  { %1586 = vst [vmem:[%s5984_s5 + $0x48] sm:$0xff] %v1554_v12  ;;  %v1517_v49 = vadd.f32 %v6439_v63, %v1404_v10  ;;  %v1186_v17 = vadd.f32 %v6441_v5, %v5678_v62  ;;  %v1519_v41 = vadd.f32 %v6442_v37, %v1406_v42  ;;  %v1557_v53 = vmax.f32 %v1291_v61, 0.0  ;;  %2800 = vmatmul.mubr.f32.gmra.mxu1 %v5547_v9  ;;  %v6447_v9 = vld [vmem:[#allocation17_spill] sm:$0xff]  ;;  %v6453_v40 = vld [vmem:[#allocation54_spill] sm:$0xff]  ;;  %v6455_v59 = vld [vmem:[#allocation16_spill] sm:$0xff]  ;;  %v5766_v58 = vpop.permute.xlu0 %1065 }
 0x555   :  { %1587 = vst [vmem:[%s5984_s5 + $0x50] sm:$0xff] %v1555_v0  ;;  %v1558_v21 = vmax.f32 %v1293_v33, 0.0  ;;  %3069 = vmatmul.mubr.msk.f32.gmra.mxu0 %vm1068_vm10, %v5521_v8  ;;  %v1410_v38 = vadd.f32 %v6443_v15, %v5678_v62  ;;  %1588 = vst.msk [vmem:[%s5984_s5 + $0x58] sm:$0xff] %vm233_vm9, %v1556_v54  ;;  %v1297_v27 = vadd.f32 %v6444_v16, %v1184_v20  ;;  %2805 = vmatprep.mubr.f32.mxu1 %v5563_v29  ;;  %v5736_v29 = vpop.permute.xlu1 %1060  ;;  %v6456_v0 = vld [vmem:[#allocation50_spill] sm:$0xff]  ;;  %v6457_v61 = vld [vmem:[#allocation52_spill] sm:$0xff] }
 0x556   :  { %v1559_v57 = vmax.f32 %v1517_v49, 0.0  ;;  %v1299_v52 = vadd.f32 %v6445_v39, %v1186_v17  ;;  %v1412_v11 = vadd.f32 %v6446_v18, %v5678_v62  ;;  %2912 = vmatprep.mubr.f32.mxu0 %v6362_v51  ;;  %v1560_v8 = vmax.f32 %v1519_v41, 0.0  ;;  %1589 = vst [vmem:[%s5984_s5 + $0x60] sm:$0xff] %v1557_v53  ;;  %v6459_v54 = vld [vmem:[#allocation23_spill] sm:$0xff]  ;;  %v6462_v17 = vld [vmem:[#allocation22_spill] sm:$0xff] }
 0x557   :  { %1590 = vst [vmem:[%s5984_s5 + $0x68] sm:$0xff] %v1558_v21  ;;  %v1523_v24 = vadd.f32 %v6447_v9, %v1410_v38  ;;  %v1190_v30 = vadd.f32 %v6448_v28, %v5704_v22  ;;  %v1192_v3 = vadd.f32 %v6449_v32, %v5704_v22  ;;  %v1561_v60 = vmax.f32 %v1297_v27, 0.0  ;;  %v6461_v20 = vld [vmem:[#allocation51_spill] sm:$0xff]  ;;  %v6463_v53 = vld [vmem:[#allocation74_spill] sm:$0xff] }
 0x558   :  { %1591 = vst [vmem:[%s5984_s5 + $0x70] sm:$0xff] %v1559_v57  ;;  %v1525_v23 = vadd.f32 %v6450_v6, %v1412_v11  ;;  %v1562_v36 = vmax.f32 %v1299_v52, 0.0  ;;  %v1416_v25 = vadd.f32 %v6451_v4, %v5704_v22  ;;  %1592 = vst.msk [vmem:[%s5984_s5 + $0x78] sm:$0xff] %vm233_vm9, %v1560_v8  ;;  %v1418_v34 = vadd.f32 %v6454_v44, %v5704_v22  ;;  %v6464_v15 = vld [vmem:[#allocation47_spill] sm:$0xff]  ;;  %v6465_v57 = vld [vmem:[#allocation48_spill] sm:$0xff] }
 0x559   :  { %v1563_v45 = vmax.f32 %v1523_v24, 0.0  ;;  %v1303_v48 = vadd.f32 %v6452_v19, %v1190_v30  ;;  %v1305_v2 = vadd.f32 %v6453_v40, %v1192_v3  ;;  %2806 = vmatmul.mubr.f32.gmra.mxu1 %v5566_v13  ;;  %3070 = vmatmul.mubr.msk.f32.gmra.mxu0 %vm1068_vm10, %v5538_v50  ;;  %1593 = vst [vmem:[%s5984_s5 + $0x80] sm:$0xff] %v1561_v60  ;;  %v6458_v50 = vld [vmem:[#allocation73_spill] sm:$0xff]  ;;  %v6466_v27 = vld [vmem:[#allocation75_spill] sm:$0xff]  ;;  %v6469_v24 = vld [vmem:[#allocation46_spill] sm:$0xff] }
 0x55a   :  { %v1564_v12 = vmax.f32 %v1525_v23, 0.0  ;;  %1594 = vst [vmem:[%s5984_s5 + $0x88] sm:$0xff] %v1562_v36  ;;  %v1529_v10 = vadd.f32 %v6455_v59, %v1416_v25  ;;  %v1196_v26 = vadd.f32 %v6456_v0, %v5736_v29  ;;  %v1198_v13 = vadd.f32 %v6457_v61, %v5736_v29  ;;  %2811 = vmatprep.mubr.f32.mxu1 %v5578_v7  ;;  %v6460_v7 = vld [vmem:[#allocation53_spill] sm:$0xff]  ;;  %v6467_v11 = vld [vmem:[#allocation19_spill] sm:$0xff] }
 0x55b   :  { %2918 = vmatprep.mubr.f32.mxu0 %v6362_v51  ;;  %1595 = vst [vmem:[%s5984_s5 + $0x90] sm:$0xff] %v1563_v45  ;;  %v1531_v33 = vadd.f32 %v6458_v50, %v1418_v34  ;;  %v1565_v46 = vmax.f32 %v1303_v48, 0.0  ;;  %v1566_v42 = vmax.f32 %v1305_v2, 0.0  ;;  %v1422_v63 = vadd.f32 %v6459_v54, %v5736_v29  ;;  %v6470_v30 = vld [vmem:[#allocation13_spill] sm:$0xff]  ;;  %v6472_v23 = vld [vmem:[#allocation79_spill] sm:$0xff] }
 0x55c   :  { %1596 = vst.msk [vmem:[%s5984_s5 + $0x98] sm:$0xff] %vm233_vm9, %v1564_v12  ;;  %v1567_v49 = vmax.f32 %v1529_v10, 0.0  ;;  %v1309_v31 = vadd.f32 %v6460_v7, %v1196_v26  ;;  %v1311_v5 = vadd.f32 %v6461_v20, %v1198_v13  ;;  %v1424_v37 = vadd.f32 %v6462_v17, %v5736_v29 }
 0x55d   :  { %v1568_v41 = vmax.f32 %v1531_v33, 0.0  ;;  %1597 = vst [vmem:[%s5984_s5 + $0xa0] sm:$0xff] %v1565_v46  ;;  %1598 = vst [vmem:[%s5984_s5 + $0xa8] sm:$0xff] %v1566_v42  ;;  %v1535_v21 = vadd.f32 %v6463_v53, %v1422_v63  ;;  %v1202_v38 = vadd.f32 %v6464_v15, %v5766_v58  ;;  %v1204_v16 = vadd.f32 %v6465_v57, %v5766_v58 }
 0x55e   :  { %2812 = vmatmul.mubr.f32.gmra.mxu1 %v5581_v35  ;;  %3071 = vmatmul.mubr.msk.f32.gmra.mxu0 %vm1068_vm10, %v5555_v56  ;;  %1599 = vst [vmem:[%s5984_s5 + $0xb0] sm:$0xff] %v1567_v49  ;;  %v1537_v39 = vadd.f32 %v6466_v27, %v1424_v37  ;;  %v1569_v52 = vmax.f32 %v1309_v31, 0.0  ;;  %v1570_v18 = vmax.f32 %v1311_v5, 0.0  ;;  %v1428_v8 = vadd.f32 %v6467_v11, %v5766_v58  ;;  %v6468_v56 = vld [vmem:[#allocation49_spill] sm:$0xff] }
 0x55f   :  { %2924 = vmatprep.mubr.f32.mxu0 %v6362_v51  ;;  %1600 = vst.msk [vmem:[%s5984_s5 + $0xb8] sm:$0xff] %vm233_vm9, %v1568_v41  ;;  %v1571_v35 = vmax.f32 %v1535_v21, 0.0  ;;  %v1315_v9 = vadd.f32 %v6468_v56, %v1202_v38  ;;  %v1317_v28 = vadd.f32 %v6469_v24, %v1204_v16  ;;  %v1430_v32 = vadd.f32 %v6470_v30, %v5766_v58  ;;  %v6471_v51 = vld [vmem:[#allocation14_spill] sm:$0xff] }
 0x560   :  { %v1572_v3 = vmax.f32 %v1537_v39, 0.0  ;;  %1601 = vst [vmem:[%s5984_s5 + $0xc0] sm:$0xff] %v1569_v52  ;;  %1602 = vst [vmem:[%s5984_s5 + $0xc8] sm:$0xff] %v1570_v18  ;;  %v1541_v6 = vadd.f32 %v6471_v51, %v1428_v8 }
 0x561   :  { %1603 = vst [vmem:[%s5984_s5 + $0xd0] sm:$0xff] %v1571_v35  ;;  %v1543_v60 = vadd.f32 %v6472_v23, %v1430_v32  ;;  %v1573_v36 = vmax.f32 %v1315_v9, 0.0  ;;  %v1574_v4 = vmax.f32 %v1317_v28, 0.0 }
 0x562   :  { %3072 = vmatmul.mubr.msk.f32.gmra.mxu0 %vm1068_vm10, %v5572_v14  ;;  %1604 = vst.msk [vmem:[%s5984_s5 + $0xd8] sm:$0xff] %vm233_vm9, %v1572_v3  ;;  %v1575_v25 = vmax.f32 %v1541_v6, 0.0 }
 0x563   :  { %v1576_v45 = vmax.f32 %v1543_v60, 0.0  ;;  %1605 = vst [vmem:[%s5984_s5 + $0xe0] sm:$0xff] %v1573_v36  ;;  %1606 = vst [vmem:[%s5984_s5 + $0xe8] sm:$0xff] %v1574_v4 }
 0x564   :  { %1607 = vst [vmem:[%s5984_s5 + $0xf0] sm:$0xff] %v1575_v25 }
 0x565   :  { %1608 = vst.msk [vmem:[%s5984_s5 + $0xf8] sm:$0xff] %vm233_vm9, %v1576_v45 }
 0x5ba   :  { %v2658_v14 = vpop.f32.mrf.mxu1 }
 0x5bc   :  { %v2660_v19 = vpop.f32.mrf.mxu1 }
 0x5dd   :  { %v2545_v48 = vpop.f32.mrf.mxu0 }
 0x5de   :  { %v2546_v40 = vadd.f32 %v2545_v48, %v5596_v43  ;;  %v2664_v2 = vpop.f32.mrf.mxu1 }
 0x5df   :  { %v2547_v44 = vpop.f32.mrf.mxu0 }
 0x5e0   :  { %v2659_v34 = vadd.f32 %v2658_v14, %v2546_v40  ;;  %v2548_v12 = vadd.f32 %v2547_v44, %v5596_v43  ;;  %v2666_v59 = vpop.f32.mrf.mxu1 }
 0x5e1   :  { %v2551_v10 = vpop.f32.mrf.mxu0 }
 0x5e2   :  { %v2931_v0 = vmax.f32 %v2659_v34, 0.0  ;;  %v2661_v26 = vadd.f32 %v2660_v19, %v2548_v12  ;;  %v2552_v61 = vadd.f32 %v2551_v10, %v5609_v47  ;;  %v2670_v13 = vpop.f32.mrf.mxu1 }
 0x5e3   :  { %v2553_v50 = vpop.f32.mrf.mxu0 }
 0x5e4   :  { %3073 = vst [vmem:[%s5984_s5 + $0x100] sm:$0xff] %v2931_v0  ;;  %v2932_v33 = vmax.f32 %v2661_v26, 0.0  ;;  %v2665_v46 = vadd.f32 %v2664_v2, %v2552_v61  ;;  %v2554_v42 = vadd.f32 %v2553_v50, %v5609_v47  ;;  %v2672_v54 = vpop.f32.mrf.mxu1 }
 0x5e6   :  { %3074 = vst [vmem:[%s5984_s5 + $0x108] sm:$0xff] %v2932_v33  ;;  %v2935_v63 = vmax.f32 %v2665_v46, 0.0  ;;  %v2667_v49 = vadd.f32 %v2666_v59, %v2554_v42  ;;  %v2557_v7 = vpop.f32.mrf.mxu0 }
 0x5e7   :  { %v2558_v31 = vadd.f32 %v2557_v7, %v5623_v55  ;;  %v2676_v20 = vpop.f32.mrf.mxu1 }
 0x5e8   :  { %3077 = vst [vmem:[%s5984_s5 + $0x120] sm:$0xff] %v2935_v63  ;;  %v2936_v5 = vmax.f32 %v2667_v49, 0.0  ;;  %v2559_v17 = vpop.f32.mrf.mxu0 }
 0x5e9   :  { %v2671_v37 = vadd.f32 %v2670_v13, %v2558_v31  ;;  %v2560_v41 = vadd.f32 %v2559_v17, %v5623_v55  ;;  %v2678_v53 = vpop.f32.mrf.mxu1 }
 0x5ea   :  { %3078 = vst [vmem:[%s5984_s5 + $0x128] sm:$0xff] %v2936_v5 }
 0x5eb   :  { %v2939_v21 = vmax.f32 %v2671_v37, 0.0  ;;  %v2673_v15 = vadd.f32 %v2672_v54, %v2560_v41  ;;  %v2563_v38 = vpop.f32.mrf.mxu0 }
 0x5ec   :  { %v2564_v57 = vadd.f32 %v2563_v38, %v5649_v1  ;;  %v2682_v16 = vpop.f32.mrf.mxu1 }
 0x5ed   :  { %3081 = vst [vmem:[%s5984_s5 + $0x140] sm:$0xff] %v2939_v21  ;;  %v2940_v27 = vmax.f32 %v2673_v15, 0.0  ;;  %v2565_v39 = vpop.f32.mrf.mxu0 }
 0x5ee   :  { %v2677_v52 = vadd.f32 %v2676_v20, %v2564_v57  ;;  %v2566_v18 = vadd.f32 %v2565_v39, %v5649_v1  ;;  %v2684_v11 = vpop.f32.mrf.mxu1 }
 0x5ef   :  { %3082 = vst [vmem:[%s5984_s5 + $0x148] sm:$0xff] %v2940_v27 }
 0x5f0   :  { %v2943_v8 = vmax.f32 %v2677_v52, 0.0  ;;  %v2679_v35 = vadd.f32 %v2678_v53, %v2566_v18  ;;  %v2569_v56 = vpop.f32.mrf.mxu0 }
 0x5f1   :  { %v2570_v9 = vadd.f32 %v2569_v56, %v5678_v62  ;;  %v2688_v24 = vpop.f32.mrf.mxu1 }
 0x5f2   :  { %3085 = vst [vmem:[%s5984_s5 + $0x160] sm:$0xff] %v2943_v8  ;;  %v2944_v28 = vmax.f32 %v2679_v35, 0.0  ;;  %v2571_v30 = vpop.f32.mrf.mxu0 }
 0x5f3   :  { %v2683_v32 = vadd.f32 %v2682_v16, %v2570_v9  ;;  %v2572_v3 = vadd.f32 %v2571_v30, %v5678_v62  ;;  %v2690_v51 = vpop.f32.mrf.mxu1 }
 0x5f4   :  { %3086 = vst [vmem:[%s5984_s5 + $0x168] sm:$0xff] %v2944_v28 }
 0x5f5   :  { %v2947_v6 = vmax.f32 %v2683_v32, 0.0  ;;  %v2685_v23 = vadd.f32 %v2684_v11, %v2572_v3  ;;  %v2575_v60 = vpop.f32.mrf.mxu0 }
 0x5f6   :  { %v2576_v36 = vadd.f32 %v2575_v60, %v5704_v22  ;;  %v2694_v4 = vpop.f32.mrf.mxu1 }
 0x5f7   :  { %3089 = vst [vmem:[%s5984_s5 + $0x180] sm:$0xff] %v2947_v6  ;;  %v2948_v25 = vmax.f32 %v2685_v23, 0.0  ;;  %v2577_v45 = vpop.f32.mrf.mxu0 }
 0x5f8   :  { %v2689_v14 = vadd.f32 %v2688_v24, %v2576_v36  ;;  %v2578_v19 = vadd.f32 %v2577_v45, %v5704_v22  ;;  %v2696_v48 = vpop.f32.mrf.mxu1 }
 0x5f9   :  { %3090 = vst [vmem:[%s5984_s5 + $0x188] sm:$0xff] %v2948_v25 }
 0x5fa   :  { %v2951_v40 = vmax.f32 %v2689_v14, 0.0  ;;  %v2691_v2 = vadd.f32 %v2690_v51, %v2578_v19  ;;  %v2581_v44 = vpop.f32.mrf.mxu0 }
 0x5fb   :  { %v2582_v34 = vadd.f32 %v2581_v44, %v5736_v29  ;;  %v2700_v12 = vpop.f32.mrf.mxu1 }
 0x5fc   :  { %3093 = vst [vmem:[%s5984_s5 + $0x1a0] sm:$0xff] %v2951_v40  ;;  %v2952_v59 = vmax.f32 %v2691_v2, 0.0  ;;  %v2583_v10 = vpop.f32.mrf.mxu0 }
 0x5fd   :  { %v2695_v0 = vadd.f32 %v2694_v4, %v2582_v34  ;;  %v2584_v26 = vadd.f32 %v2583_v10, %v5736_v29  ;;  %v2702_v61 = vpop.f32.mrf.mxu1 }
 0x5fe   :  { %3094 = vst [vmem:[%s5984_s5 + $0x1a8] sm:$0xff] %v2952_v59  ;;  %v2587_v13 = vpop.f32.mrf.mxu0 }
 0x5ff   :  { %v2955_v50 = vmax.f32 %v2695_v0, 0.0  ;;  %v2697_v33 = vadd.f32 %v2696_v48, %v2584_v26  ;;  %v2588_v46 = vadd.f32 %v2587_v13, %v5766_v58 }
 0x600   :  { %v2771_v42 = vpop.f32.mrf.mxu1  ;;  %v2589_v54 = vpop.f32.mrf.mxu0 }
 0x601   :  { %3097 = vst [vmem:[%s5984_s5 + $0x1c0] sm:$0xff] %v2955_v50  ;;  %v2956_v63 = vmax.f32 %v2697_v33, 0.0  ;;  %v2701_v49 = vadd.f32 %v2700_v12, %v2588_v46  ;;  %v2590_v7 = vadd.f32 %v2589_v54, %v5766_v58  ;;  %v2772_v5 = vadd.f32 %v2771_v42, %v5596_v43 }
 0x602   :  { %v2773_v31 = vpop.f32.mrf.mxu1 }
 0x603   :  { %3098 = vst [vmem:[%s5984_s5 + $0x1c8] sm:$0xff] %v2956_v63  ;;  %v2959_v20 = vmax.f32 %v2701_v49, 0.0  ;;  %v2703_v17 = vadd.f32 %v2702_v61, %v2590_v7  ;;  %v2774_v21 = vadd.f32 %v2773_v31, %v5596_v43 }
 0x604   :  { %v2777_v37 = vpop.f32.mrf.mxu1  ;;  %v2884_v41 = vpop.f32.mrf.mxu0 }
 0x605   :  { %3101 = vst [vmem:[%s5984_s5 + $0x1e0] sm:$0xff] %v2959_v20  ;;  %v2960_v53 = vmax.f32 %v2703_v17, 0.0  ;;  %v2885_v15 = vadd.f32 %v2884_v41, %v2772_v5  ;;  %v2778_v16 = vadd.f32 %v2777_v37, %v5609_v47 }
 0x606   :  { %v2779_v38 = vpop.f32.mrf.mxu1  ;;  %v2886_v57 = vpop.f32.mrf.mxu0 }
 0x607   :  { %3102 = vst [vmem:[%s5984_s5 + $0x1e8] sm:$0xff] %v2960_v53  ;;  %v2933_v27 = vmax.f32 %v2885_v15, 0.0  ;;  %v2887_v39 = vadd.f32 %v2886_v57, %v2774_v21  ;;  %v2780_v11 = vadd.f32 %v2779_v38, %v5609_v47 }
 0x608   :  { %v2783_v52 = vpop.f32.mrf.mxu1  ;;  %v2890_v18 = vpop.f32.mrf.mxu0 }
 0x609   :  { %3075 = vst [vmem:[%s5984_s5 + $0x110] sm:$0xff] %v2933_v27  ;;  %v2934_v43 = vmax.f32 %v2887_v39, 0.0  ;;  %v2891_v8 = vadd.f32 %v2890_v18, %v2778_v16  ;;  %v2784_v9 = vadd.f32 %v2783_v52, %v5623_v55 }
 0x60a   :  { %v2785_v35 = vpop.f32.mrf.mxu1  ;;  %v2892_v56 = vpop.f32.mrf.mxu0 }
 0x60b   :  { %3076 = vst.msk [vmem:[%s5984_s5 + $0x118] sm:$0xff] %vm233_vm9, %v2934_v43  ;;  %v2937_v24 = vmax.f32 %v2891_v8, 0.0  ;;  %v2893_v28 = vadd.f32 %v2892_v56, %v2780_v11  ;;  %v2786_v47 = vadd.f32 %v2785_v35, %v5623_v55 }
 0x60c   :  { %v2789_v30 = vpop.f32.mrf.mxu1  ;;  %v2896_v32 = vpop.f32.mrf.mxu0 }
 0x60d   :  { %3079 = vst [vmem:[%s5984_s5 + $0x130] sm:$0xff] %v2937_v24  ;;  %v2938_v3 = vmax.f32 %v2893_v28, 0.0  ;;  %v2897_v51 = vadd.f32 %v2896_v32, %v2784_v9  ;;  %v2790_v60 = vadd.f32 %v2789_v30, %v5649_v1 }
 0x60e   :  { %v2791_v6 = vpop.f32.mrf.mxu1  ;;  %v2898_v23 = vpop.f32.mrf.mxu0 }
 0x60f   :  { %3080 = vst.msk [vmem:[%s5984_s5 + $0x138] sm:$0xff] %vm233_vm9, %v2938_v3  ;;  %v2941_v36 = vmax.f32 %v2897_v51, 0.0  ;;  %v2899_v4 = vadd.f32 %v2898_v23, %v2786_v47  ;;  %v2792_v55 = vadd.f32 %v2791_v6, %v5649_v1 }
 0x610   :  { %v2795_v25 = vpop.f32.mrf.mxu1  ;;  %v2902_v45 = vpop.f32.mrf.mxu0 }
 0x611   :  { %3083 = vst [vmem:[%s5984_s5 + $0x150] sm:$0xff] %v2941_v36  ;;  %v2942_v14 = vmax.f32 %v2899_v4, 0.0  ;;  %v2903_v19 = vadd.f32 %v2902_v45, %v2790_v60  ;;  %v2796_v2 = vadd.f32 %v2795_v25, %v5678_v62 }
 0x612   :  { %v2797_v48 = vpop.f32.mrf.mxu1  ;;  %v2904_v40 = vpop.f32.mrf.mxu0 }
 0x613   :  { %3084 = vst.msk [vmem:[%s5984_s5 + $0x158] sm:$0xff] %vm233_vm9, %v2942_v14  ;;  %v2945_v44 = vmax.f32 %v2903_v19, 0.0  ;;  %v2905_v34 = vadd.f32 %v2904_v40, %v2792_v55  ;;  %v2798_v1 = vadd.f32 %v2797_v48, %v5678_v62 }
 0x614   :  { %v2801_v12 = vpop.f32.mrf.mxu1 }
 0x615   :  { %v2908_v59 = vpop.f32.mrf.mxu0  ;;  %3087 = vst [vmem:[%s5984_s5 + $0x170] sm:$0xff] %v2945_v44  ;;  %v2946_v10 = vmax.f32 %v2905_v34, 0.0  ;;  %v2802_v13 = vadd.f32 %v2801_v12, %v5704_v22 }
 0x616   :  { %v2909_v0 = vadd.f32 %v2908_v59, %v2796_v2  ;;  %v2803_v26 = vpop.f32.mrf.mxu1 }
 0x617   :  { %v2910_v61 = vpop.f32.mrf.mxu0  ;;  %3088 = vst.msk [vmem:[%s5984_s5 + $0x178] sm:$0xff] %vm233_vm9, %v2946_v10  ;;  %v2804_v62 = vadd.f32 %v2803_v26, %v5704_v22 }
 0x618   :  { %v2949_v50 = vmax.f32 %v2909_v0, 0.0  ;;  %v2911_v33 = vadd.f32 %v2910_v61, %v2798_v1 }
 0x619   :  { %v2807_v46 = vpop.f32.mrf.mxu1  ;;  %v2914_v42 = vpop.f32.mrf.mxu0 }
 0x61a   :  { %3091 = vst [vmem:[%s5984_s5 + $0x190] sm:$0xff] %v2949_v50  ;;  %v2950_v54 = vmax.f32 %v2911_v33, 0.0  ;;  %v2915_v63 = vadd.f32 %v2914_v42, %v2802_v13  ;;  %v2808_v31 = vadd.f32 %v2807_v46, %v5736_v29 }
 0x61b   :  { %v2809_v49 = vpop.f32.mrf.mxu1  ;;  %v2916_v7 = vpop.f32.mrf.mxu0 }
 0x61c   :  { %3092 = vst.msk [vmem:[%s5984_s5 + $0x198] sm:$0xff] %vm233_vm9, %v2950_v54  ;;  %v2953_v20 = vmax.f32 %v2915_v63, 0.0  ;;  %v2917_v5 = vadd.f32 %v2916_v7, %v2804_v62  ;;  %v2810_v22 = vadd.f32 %v2809_v49, %v5736_v29 }
 0x61e   :  { %v2813_v17 = vpop.f32.mrf.mxu1  ;;  %v2920_v37 = vpop.f32.mrf.mxu0  ;;  %3095 = vst [vmem:[%s5984_s5 + $0x1b0] sm:$0xff] %v2953_v20  ;;  %v2954_v41 = vmax.f32 %v2917_v5, 0.0 }
 0x61f   :  { %v2921_v53 = vadd.f32 %v2920_v37, %v2808_v31  ;;  %v2814_v38 = vadd.f32 %v2813_v17, %v5766_v58 }
 0x620   :  { %v2815_v21 = vpop.f32.mrf.mxu1  ;;  %v2922_v15 = vpop.f32.mrf.mxu0  ;;  %3096 = vst.msk [vmem:[%s5984_s5 + $0x1b8] sm:$0xff] %vm233_vm9, %v2954_v41 }
 0x621   :  { %v2957_v57 = vmax.f32 %v2921_v53, 0.0  ;;  %v2923_v16 = vadd.f32 %v2922_v15, %v2810_v22  ;;  %v2816_v29 = vadd.f32 %v2815_v21, %v5766_v58 }
 0x622   :  { %v2926_v27 = vpop.f32.mrf.mxu0 }
 0x623   :  { %3099 = vst [vmem:[%s5984_s5 + $0x1d0] sm:$0xff] %v2957_v57  ;;  %v2958_v39 = vmax.f32 %v2923_v16, 0.0  ;;  %v2927_v52 = vadd.f32 %v2926_v27, %v2814_v38 }
 0x624   :  { %v2928_v18 = vpop.f32.mrf.mxu0 }
 0x625   :  { %3100 = vst.msk [vmem:[%s5984_s5 + $0x1d8] sm:$0xff] %vm233_vm9, %v2958_v39  ;;  %v2961_v11 = vmax.f32 %v2927_v52, 0.0  ;;  %v2929_v43 = vadd.f32 %v2928_v18, %v2816_v29 }
 0x627   :  { %3103 = vst [vmem:[%s5984_s5 + $0x1f0] sm:$0xff] %v2961_v11  ;;  %v2962_v8 = vmax.f32 %v2929_v43, 0.0 }
 0x629   :  { %3104 = vst.msk [vmem:[%s5984_s5 + $0x1f8] sm:$0xff] %vm233_vm9, %v2962_v8 }
 0x62a   :  { %3000 = vsyncpa [#allocation3], 1 }

// kernel: conv1d_model_forward.3
= control target key start
LH: loop header
LB: loop body
LE: loop exit
PB: predicated region body
PF: predicated region fallthrough
CT: control target
= control target key end

     0   :  { %10 = vsyncpa [#allocation4], 0  ;;  %s13526_s0 = inlined_call_operand.vmem [shape: f32[2,25088], index: 0, kind: input, shape index: {}]   ;;  %s13527_s1 = inlined_call_operand.hbm [shape: bf16[25088,128], index: 1, kind: input, shape index: {}]   ;;  %s13528_s2 = inlined_call_operand.hbm [shape: f32[1,128], index: 2, kind: input, shape index: {}]   ;;  %s13529_s3 = inlined_call_operand.vmem [shape: f32[128,4], index: 3, kind: input, shape index: {}]   ;;  %s13530_s4 = inlined_call_operand.hbm [shape: f32[1,4], index: 4, kind: input, shape index: {}]   ;;  %s13531_s5 = inlined_call_operand.hbm [shape: f32[2,4], index: 5, kind: output, shape index: {}]  }
   0x1   :  { %12 = vsyncpa [#allocation4 + $0x1], 0 }
   0x2   :  { %13 = vsyncpa [#allocation7], 0 }
   0x3   :  { %14 = vsyncpa [#allocation5], 0  ;;  %s12399_s18 = smov 0   ;;  %s12401_s19 = smov 0  }
   0x4   :  { %s12403_s20 = smov 0   ;;  %s12405_s21 = smov 0  }
   0x5 LB: > { %s12418_s22 = sadd.s32 4294967295, %s12357_s21   ;;  %s12421_s23 = sadd.s32 1, %s12357_s21   ;;  %s12357_s21 = sphi %s12405_s21, %s13548_s21   ;;  %s12353_s20 = sphi %s12403_s20, %s13547_s20   ;;  %s12349_s19 = sphi %s12401_s19, %s13546_s19   ;;  %s12345_s18 = sphi %s12399_s18, %s13545_s18  }
   0x6   : > { %s50_s24 = ssub.s32 %s12357_s21, %s12421_s23  ;;  %s53_s25 = sadd.s32 1, %s12353_s20 }
   0x7   : > { %p51_p0 = scmp.eq.s32.totalorder %s50_s24, 0  ;;  %p60_p1 = scmp.ne.s32.totalorder %s12353_s20, %s12349_s19 }
   0x8   : > { %p61_p2 = scmp.eq.s32.totalorder %s12357_s21, 0  ;;  %p66_p3 = scmp.ne.s32.totalorder %s12349_s19, %s12345_s18 }
   0x9   : > { %s12431_s26 = scalar_select %p51_p0, %s12353_s20, %s53_s25  }
   0xa   : > { %p12433_p4 = por %p61_p2, %p60_p1  ;;  %p13532_p5 = scmp.eq.s32.totalorder %s12418_s22, 0 }
   0xb   : > { %p9391_p6 = scmp.ge.s32.totalorder %s12357_s21, 1  ;;  %p161_p7 = scmp.lt.s32.totalorder %s12357_s21, 3 }
   0xc   : > { %p12442_p8 = por %p13532_p5, %p66_p3  ;;  %s12359_s30 = smov [#allocation6]  }
   0xd   : > { %p12447_p10 = pnand %p9391_p6, %p161_p7  ;;  %s174_s6 = sshll.u32 %s12359_s30, 4  ;;  %s175_s6 = int_to_ptr.vmem [resolvable:$true] %s174_s6 }
   0xe   : > { %s13536_s28 = scalar_select %p12442_p8, 1, 0 }
   0xf   : > { %s13537_s29 = scalar_select %p12447_p10, 1, 0 }
  0x10   : > { %p11340_p11 = pneg %p12447_p10  ;;  %p11353_p12 = scmp.lt.s32.totalorder %s12357_s21, 2 }
  0x11   : > { %s12360_s8 = smov [#allocation8]   ;;  %s208_s11 = sand.u32 1, %s12353_s20  }
  0x12   : > { %p12456_p13 = pnand %p11340_p11, %p13532_p5  ;;  %s188_s9 = sshll.u32 %s12360_s8, 4  ;;  %s189_s9 = int_to_ptr.vmem [resolvable:$true] %s188_s9 }
  0x13   : > { %p12462_p0 = pnand %p11353_p12, %p12433_p4  ;;  %s12222_s12 = scalar_lea.vmem %s175_s6, 16 }
  0x14   : > { %p12213_p1 = pneg %p12456_p13  ;;  %p12223_p2 = scmp.ne.s32.totalorder %s175_s6, %s12222_s12 }
  0x15   : > { %s12229_s13 = scalar_lea.vmem %s175_s6, 32  ;;  %p12230_p7 = scmp.lt.s32.totalorder %s175_s6, %s175_s6 }
  0x16   : > { %p12225_p3 = pnand %p12223_p2, %p12213_p1  ;;  %p12231_p11 = scmp.lt.s32.totalorder %s12229_s13, %s12222_s12 }
  0x18   : > { %p12226_p6 = pneg %p12225_p3  ;;  %p12232_p9 = por %p12231_p11, %p12230_p7 }
  0x1a   : > { %p12233_p5 = pnand %p12232_p9, %p12226_p6 }
  0x1c   : > { %12236 = shalt.err (!%p12233_p5)
}
  0x1d   : > { %11343 = dma.hbm_to_vmem [thread:$0]  (!%p12456_p13), %s13528_s2, 16, %s175_s6, [#allocation7]  }
  0x1e   : > { %s12248_s16 = scalar_lea.vmem %s189_s9, 16  ;;  %s12255_s17 = scalar_lea.vmem %s189_s9, 32 }
  0x1f   : > { %p12249_p4 = scmp.ne.s32.totalorder %s189_s9, %s12248_s16  ;;  %p12256_p3 = scmp.lt.s32.totalorder %s189_s9, %s189_s9 }
  0x20   : > { %p12257_p8 = scmp.lt.s32.totalorder %s12255_s17, %s12248_s16 }
  0x21   : > { %p12251_p12 = pnand %p12249_p4, %p12213_p1 }
  0x22   : > { %p12258_p10 = por %p12257_p8, %p12256_p3 }
  0x23   : > { %p12252_p2 = pneg %p12251_p12 }
  0x25   : > { %p12259_p7 = pnand %p12258_p10, %p12252_p2 }
  0x27   : > { %12262 = shalt.err (!%p12259_p7)
}
  0x28   : > { %11346 = dma.hbm_to_vmem [thread:$0]  (!%p12456_p13), %s13530_s4, 16, %s189_s9, [#allocation7]  }
  0x29   : > { %s11324_s25 = smul.u32 6272, %s208_s11  ;;  %s12497_s13 = scalar_lea.sflag [#allocation4], %s208_s11 }
  0x2a   : > { %s10193_s27 = smul.u32 100352, %s12357_s21  ;;  %p12265_p8 = pneg %p12462_p0 }
  0x2b   : > { %s212_s7 = scalar_lea.vmem [#allocation3], %s11324_s25  ;;  %s12268_s15 = scalar_lea.hbm %s13527_s1, 200704 }
  0x2c   : > { %s12491_s8 = scalar_lea.hbm %s13527_s1, %s10193_s27  ;;  %s219_s12 = sshll.u32 %s212_s7, 4  ;;  %s12493_s12 = int_to_ptr.vmem [resolvable:$true] %s219_s12 }
  0x2d   : > { %s12263_s14 = scalar_lea.hbm %s12491_s8, 100352  ;;  %p12269_p13 = scmp.lt.s32.totalorder %s12491_s8, %s13527_s1 }
  0x2e   : > { %p12264_p5 = scmp.ne.s32.totalorder %s12491_s8, %s12263_s14  ;;  %p12270_p1 = scmp.lt.s32.totalorder %s12268_s15, %s12263_s14 }
  0x30   : > { %p12266_p9 = pnand %p12265_p8, %p12264_p5  ;;  %p12271_p6 = por %p12270_p1, %p12269_p13 }
  0x32   : > { %p12267_p10 = pneg %p12266_p9 }
  0x34   : > { %p12272_p11 = pnand %p12271_p6, %p12267_p10 }
  0x36   : > { %12275 = shalt.err (!%p12272_p11)
}
  0x37   : > { %s12276_s11 = scalar_lea.vmem %s12493_s12, 100352  ;;  %s12361_s18 = smov [#allocation3]  }
  0x38   : > { %p12277_p4 = scmp.ne.s32.totalorder %s12493_s12, %s12276_s11  ;;  %s12281_s24 = sshll.u32 %s12361_s18, 4  ;;  %s12282_s24 = int_to_ptr.vmem [resolvable:$false] %s12281_s24 }
  0x39   : > { %s12283_s25 = scalar_lea.vmem %s12282_s24, 200704  ;;  %p12284_p3 = scmp.lt.s32.totalorder %s12493_s12, %s12282_s24 }
  0x3a   : > { %p12279_p12 = pnand %p12277_p4, %p12265_p8  ;;  %p12285_p7 = scmp.lt.s32.totalorder %s12283_s25, %s12276_s11 }
  0x3c   : > { %p12280_p2 = pneg %p12279_p12  ;;  %p12286_p5 = por %p12285_p7, %p12284_p3 }
  0x3e   : > { %p12287_p9 = pnand %p12286_p5, %p12280_p2 }
  0x40   : > { %12290 = shalt.err (!%p12287_p9)
}
  0x41   : > { %s12362_s27 = smov 64   ;;  %s12363_s30 = smov 4  }
  0x42   : > { %11350 = dma.hbm_to_vmem [thread:$0]  (!%p12462_p0), %s12491_s8, 100352, %s12493_s12, %s12497_s13, %s12362_s27, %s12362_s27, %s12363_s30  }
  0x43   : > { %p13540_p8 = scmp.ne.s32.totalorder %s13537_s29, 0 }
  0x44   : > { %s233_s6 = sand.u32 (!%p13540_p8), 1, %s12349_s19   ;;  %p13541_p10 = scmp.ne.s32.totalorder (!%p13540_p8), %s13536_s28, 0 }
  0x45   : > { %231 = sbr.rel (%p13540_p8) target bundleno = 1647 (0x66f), region = 40  ;;  %s234_s14 = scalar_lea.sflag (!%p13540_p8), [#allocation4], %s233_s6 }
  0x46   : > { %s11325_s7 = smul.u32 (!%p13540_p8), 6272, %s233_s6 }
  0x48   : > { %s12521_s21 = scalar_lea.vmem (!%p13540_p8), [#allocation3], %s11325_s7 }
  0x4a   : > { %12332 = dma.done.wait (%p13541_p10), %s234_s14, 100352  }
  0x4b   : > { %12334 = vsyncadd (%p13541_p10), %s234_s14, 4294866944  ;;  %p13542_p13 = scmp.eq.s32.totalorder %s12418_s22, 0 }
  0x4d   : > { %12336 = dma.done.wait (%p13542_p13), [#allocation7], 32   ;;  %p13543_p0 = pmov %p13542_p13 }
  0x4e   : > { %s272_s29 = smul.u32 98, %s12418_s22  ;;  %p13544_p6 = scmp.ne.s32.totalorder %s12418_s22, 0 }
  0x4f   : > { %12338 = vsyncadd (%p13543_p0), [#allocation7], 4294967264 }
  0x50   : > { %p273_p1 = scmp.lt.s32.totalorder %s272_s29, 195  ;;  %283 = sbr.rel (%p13544_p6) target bundleno = 87 (0x57), region = 56 }
  0x52   : > { %s13550_s29 = smov (!%p273_p1, %s272_s29), 195 }
  0x53   : > { %s9399_s10 = sshll.u32 %s13550_s29, 1 }
  0x54   : > { %s12535_s13 = scalar_lea.vmem %s13526_s0, %s9399_s10 }
  0x55   : > { %v12364_v0 = vmov 0.0  }
  0x56   : > { %284 = vst [vmem:[#allocation2] sm:$0x3] %v12364_v0 }
  0x57 PF: > { %v11399_v1 = vld [vmem:[%s12521_s21 + $0x78] sm:$0xff]   ;;  %v11403_v5 = vld [vmem:[%s12521_s21 + $0x70] sm:$0xff]   ;;  %v11407_v9 = vld [vmem:[%s12521_s21 + $0x68] sm:$0xff]   ;;  %v340_v29 = vlaneseq  ;;  %v12365_v37 = vmov 1983009808   ;;  %p10186_p11 = scmp.ne.s32.totalorder %s12418_s22, 1 }
  0x58   : > { %v11400_v2 = vld [vmem:[%s12521_s21 + $0xf8] sm:$0xff]   ;;  %10194 = vmatprep.subr.bf16.mxu0 %v11399_v1  ;;  %v11404_v6 = vld [vmem:[%s12521_s21 + $0xf0] sm:$0xff]   ;;  %v11408_v10 = vld [vmem:[%s12521_s21 + $0xe8] sm:$0xff]   ;;  %v338_v38 = vunpack.c.l.s4 %v12365_v37 }
  0x59   : > { %v11401_v3 = vld [vmem:[%s12521_s21 + $0x38] sm:$0xff]   ;;  %10216 = vmatprep.subr.bf16.mxu1 %v11400_v2  ;;  %v11405_v7 = vld [vmem:[%s12521_s21 + $0x30] sm:$0xff]   ;;  %v11409_v11 = vld [vmem:[%s12521_s21 + $0x28] sm:$0xff]   ;;  %v341_v34 = vshrl.u32 %v340_v29, 7 }
  0x5a   : > { %v11402_v4 = vld [vmem:[%s12521_s21 + $0xb8] sm:$0xff]   ;;  %10195 = vmatpush3.bf16.msra.mxu0 %v11401_v3  ;;  %v11406_v8 = vld [vmem:[%s12521_s21 + $0xb0] sm:$0xff]   ;;  %v11410_v12 = vld [vmem:[%s12521_s21 + $0xa8] sm:$0xff]   ;;  %v339_v39 = vunpack.c.0.s8 %v338_v38 }
  0x5b   : > { %10217 = vmatpush3.bf16.msra.mxu1 %v11402_v4  ;;  %10196 = vmatprep.subr.bf16.mxu0 %v11403_v5  ;;  %v11411_v13 = vld [vmem:[%s12521_s21 + $0x60] sm:$0xff]   ;;  %v11415_v17 = vld [vmem:[%s12521_s21 + $0x58] sm:$0xff]   ;;  %v11419_v21 = vld [vmem:[%s12521_s21 + $0x50] sm:$0xff]  }
  0x5c   : > { %10218 = vmatprep.subr.bf16.mxu1 %v11404_v6  ;;  %v11412_v14 = vld [vmem:[%s12521_s21 + $0xe0] sm:$0xff]   ;;  %v11416_v18 = vld [vmem:[%s12521_s21 + $0xd8] sm:$0xff]   ;;  %v11420_v22 = vld [vmem:[%s12521_s21 + $0xd0] sm:$0xff]   ;;  %v12574_v42 = vsub.s32 %v339_v39, %v341_v34 }
  0x5d   : > { %v11413_v15 = vld [vmem:[%s12521_s21 + $0x20] sm:$0xff]   ;;  %v11417_v19 = vld [vmem:[%s12521_s21 + $0x18] sm:$0xff]   ;;  %v11421_v23 = vld [vmem:[%s12521_s21 + $0x10] sm:$0xff]  }
  0x5e   : > { %10197 = vmatpush3.bf16.msra.mxu0 %v11405_v7  ;;  %v11414_v16 = vld [vmem:[%s12521_s21 + $0xa0] sm:$0xff]   ;;  %v11418_v20 = vld [vmem:[%s12521_s21 + $0x98] sm:$0xff]   ;;  %v11422_v24 = vld [vmem:[%s12521_s21 + $0x90] sm:$0xff]  }
  0x5f   : > { %10219 = vmatpush3.bf16.msra.mxu1 %v11406_v8  ;;  %10198 = vmatprep.subr.bf16.mxu0 %v11407_v9  ;;  %v11423_v25 = vld [vmem:[%s12521_s21 + $0x48] sm:$0xff]   ;;  %v11427_v30 = vld [vmem:[%s12521_s21 + $0x40] sm:$0xff]   ;;  %v11432_v36 = vld [vmem:[%s12521_s21 + $0x178] sm:$0xff]  }
  0x60   : > { %10220 = vmatprep.subr.bf16.mxu1 %v11408_v10  ;;  %v11424_v26 = vld [vmem:[%s12521_s21 + $0xc8] sm:$0xff]   ;;  %v11428_v31 = vld [vmem:[%s12521_s21 + $0xc0] sm:$0xff]   ;;  %v11434_v41 = vld [vmem:[%s12521_s21 + $0x1f8] sm:$0xff]  }
  0x61   : > { %v11425_v27 = vld [vmem:[%s12521_s21 + $0x8] sm:$0xff]   ;;  %v11429_v32 = vld [vmem:[%s12521_s21] sm:$0xff]   ;;  %v11433_v47 = vld [vmem:[%s12521_s21 + $0x138] sm:$0xff]  }
  0x62   : > { %10199 = vmatpush3.bf16.msra.mxu0 %v11409_v11  ;;  %v11426_v28 = vld [vmem:[%s12521_s21 + $0x88] sm:$0xff]   ;;  %v11430_v33 = vld [vmem:[%s12521_s21 + $0x80] sm:$0xff]   ;;  %v11435_v50 = vld [vmem:[%s12521_s21 + $0x1b8] sm:$0xff]  }
  0x63   : > { %10221 = vmatpush3.bf16.msra.mxu1 %v11410_v12  ;;  %10200 = vmatprep.subr.bf16.mxu0 %v11411_v13  ;;  %v286_v35 = vld [vmem:[%s12535_s13] sm:$0xff]  ;;  %v11436_v53 = vld [vmem:[%s12521_s21 + $0x170] sm:$0xff]   ;;  %v11440_v57 = vld [vmem:[%s12521_s21 + $0x168] sm:$0xff]  }
  0x64   : > { %10222 = vmatprep.subr.bf16.mxu1 %v11412_v14  ;;  %v336_v40 = vcombine.high %v286_v35, %v286_v35  ;;  %v343_v43 = vrot.slane %v286_v35, %v12574_v42  ;;  %v11438_v54 = vld [vmem:[%s12521_s21 + $0x1f0] sm:$0xff]   ;;  %v11442_v58 = vld [vmem:[%s12521_s21 + $0x1e8] sm:$0xff]   ;;  %v11444_v61 = vld [vmem:[%s12521_s21 + $0x160] sm:$0xff]  }
  0x65   : > { %v11437_v55 = vld [vmem:[%s12521_s21 + $0x130] sm:$0xff]   ;;  %v11441_v59 = vld [vmem:[%s12521_s21 + $0x128] sm:$0xff]   ;;  %v11446_v62 = vld [vmem:[%s12521_s21 + $0x1e0] sm:$0xff]  }
  0x66   : > { %10201 = vmatpush3.bf16.msra.mxu0 %v11413_v15  ;;  %v350_v44 = vrot.slane %v336_v40, %v12574_v42  ;;  %v351_v45 = vcombine.high %v343_v43, %v343_v43  ;;  %v850_v48 = vpack.c.bf16 %v343_v43, %v343_v43  ;;  %v11439_v56 = vld [vmem:[%s12521_s21 + $0x1b0] sm:$0xff]   ;;  %v11443_v60 = vld [vmem:[%s12521_s21 + $0x1a8] sm:$0xff]   ;;  %v11445_v63 = vld [vmem:[%s12521_s21 + $0x120] sm:$0xff]  }
  0x67   : > { %10223 = vmatpush3.bf16.msra.mxu1 %v11414_v16  ;;  %10202 = vmatprep.subr.bf16.mxu0 %v11415_v17  ;;  %v11447_v0 = vld [vmem:[%s12521_s21 + $0x1a0] sm:$0xff]   ;;  %v11448_v1 = vld [vmem:[%s12521_s21 + $0x158] sm:$0xff]   ;;  %v11452_v5 = vld [vmem:[%s12521_s21 + $0x150] sm:$0xff]  }
  0x68   : > { %10224 = vmatprep.subr.bf16.mxu1 %v11416_v18  ;;  %v352_v46 = vcombine.high %v350_v44, %v350_v44  ;;  %v852_v49 = vpack.c.bf16 %v350_v44, %v350_v44  ;;  %v851_v51 = vpack.c.bf16 %v351_v45, %v351_v45  ;;  %v11450_v2 = vld [vmem:[%s12521_s21 + $0x1d8] sm:$0xff]   ;;  %v11454_v6 = vld [vmem:[%s12521_s21 + $0x1d0] sm:$0xff]   ;;  %v11456_v9 = vld [vmem:[%s12521_s21 + $0x148] sm:$0xff]  }
  0x69   : > { %v11449_v3 = vld [vmem:[%s12521_s21 + $0x118] sm:$0xff]   ;;  %v11453_v7 = vld [vmem:[%s12521_s21 + $0x110] sm:$0xff]   ;;  %v287_v10 = vld [vmem:[%s12535_s13 + $0x8] sm:$0xff] }
  0x6a   : > { %10203 = vmatpush3.bf16.msra.mxu0 %v11417_v19  ;;  %v853_v52 = vpack.c.bf16 %v352_v46, %v352_v46  ;;  %7252 = vmatprep.mubr.bf16.mxu0 %v851_v51  ;;  %v11451_v4 = vld [vmem:[%s12521_s21 + $0x198] sm:$0xff]   ;;  %v11455_v8 = vld [vmem:[%s12521_s21 + $0x190] sm:$0xff]   ;;  %v11458_v11 = vld [vmem:[%s12521_s21 + $0x1c8] sm:$0xff]   ;;  %v360_v12 = vrot.slane %v287_v10, %v12574_v42  ;;  %v353_v13 = vcombine.high %v287_v10, %v287_v10 }
  0x6b   : > { %10225 = vmatpush3.bf16.msra.mxu1 %v11418_v20  ;;  %10204 = vmatprep.subr.bf16.mxu0 %v11419_v21  ;;  %v11457_v14 = vld [vmem:[%s12521_s21 + $0x108] sm:$0xff]   ;;  %v11460_v18 = vld [vmem:[%s12521_s21 + $0x140] sm:$0xff]   ;;  %v11472_v34 = vld [vmem:[%s12521_s21 + $0x2b0] sm:$0xff]  }
  0x6c   : > { %10226 = vmatprep.subr.bf16.mxu1 %v11420_v22  ;;  %7292 = vmatprep.mubr.bf16.mxu1 %v853_v52  ;;  %v11459_v15 = vld [vmem:[%s12521_s21 + $0x188] sm:$0xff]   ;;  %v368_v16 = vcombine.high %v360_v12, %v360_v12  ;;  %v367_v17 = vrot.slane %v353_v13, %v12574_v42  ;;  %v11462_v19 = vld [vmem:[%s12521_s21 + $0x1c0] sm:$0xff]   ;;  %v11481_v44 = vld [vmem:[%s12521_s21 + $0x258] sm:$0xff]  }
  0x6d   : > { %v11461_v22 = vld [vmem:[%s12521_s21 + $0x100] sm:$0xff]   ;;  %v11473_v35 = vld [vmem:[%s12521_s21 + $0x268] sm:$0xff]   ;;  %v11483_v45 = vld [vmem:[%s12521_s21 + $0x2d8] sm:$0xff]  }
  0x6e   : > { %10205 = vmatpush3.bf16.msra.mxu0 %v11421_v23  ;;  %v855_v20 = vpack.c.bf16 %v368_v16, %v368_v16  ;;  %v369_v21 = vcombine.high %v367_v17, %v367_v17  ;;  %v11463_v23 = vld [vmem:[%s12521_s21 + $0x180] sm:$0xff]   ;;  %v856_v29 = vpack.c.bf16 %v367_v17, %v367_v17  ;;  %v11474_v37 = vld [vmem:[%s12521_s21 + $0x228] sm:$0xff]   ;;  %v11482_v46 = vld [vmem:[%s12521_s21 + $0x218] sm:$0xff]  }
  0x6f   : > { %10227 = vmatpush3.bf16.msra.mxu1 %v11422_v24  ;;  %10206 = vmatprep.subr.bf16.mxu0 %v11423_v25  ;;  %v11464_v25 = vld [vmem:[%s12521_s21 + $0x278] sm:$0xff]   ;;  %v11476_v38 = vld [vmem:[%s12521_s21 + $0x2a8] sm:$0xff]   ;;  %v11477_v39 = vld [vmem:[%s12521_s21 + $0x260] sm:$0xff]  }
  0x70   : > { %10228 = vmatprep.subr.bf16.mxu1 %v11424_v26  ;;  %v857_v24 = vpack.c.bf16 %v369_v21, %v369_v21  ;;  %v11467_v26 = vld [vmem:[%s12521_s21 + $0x2f8] sm:$0xff]   ;;  %v11479_v40 = vld [vmem:[%s12521_s21 + $0x2e0] sm:$0xff]   ;;  %v11488_v51 = vld [vmem:[%s12521_s21 + $0x290] sm:$0xff]  }
  0x71   : > { %v11480_v43 = vld [vmem:[%s12521_s21 + $0x2a0] sm:$0xff]   ;;  %v11489_v52 = vld [vmem:[%s12521_s21 + $0x248] sm:$0xff]   ;;  %v11502_v10 = vld [vmem:[%s12521_s21 + $0x370] sm:$0xff]  }
  0x72   : > { %10207 = vmatpush3.bf16.msra.mxu0 %v11425_v27  ;;  %v11466_v27 = vld [vmem:[%s12521_s21 + $0x238] sm:$0xff]   ;;  %v11505_v13 = vld [vmem:[%s12521_s21 + $0x3b0] sm:$0xff]   ;;  %v11507_v16 = vld [vmem:[%s12521_s21 + $0x328] sm:$0xff]  }
  0x73   : > { %10229 = vmatpush3.bf16.msra.mxu1 %v11426_v28  ;;  %10208 = vmatprep.subr.bf16.mxu0 %v11427_v30  ;;  %v854_v28 = vpack.c.bf16 %v360_v12, %v360_v12  ;;  %v11468_v30 = vld [vmem:[%s12521_s21 + $0x2b8] sm:$0xff]   ;;  %v11503_v12 = vld [vmem:[%s12521_s21 + $0x330] sm:$0xff]   ;;  %v11509_v17 = vld [vmem:[%s12521_s21 + $0x3a8] sm:$0xff]  }
  0x74   : > { %10230 = vmatprep.subr.bf16.mxu1 %v11428_v31  ;;  %v11469_v31 = vld [vmem:[%s12521_s21 + $0x270] sm:$0xff]   ;;  %v11513_v21 = vld [vmem:[%s12521_s21 + $0x3a0] sm:$0xff]  }
  0x76   : > { %10209 = vmatpush3.bf16.msra.mxu0 %v11429_v32  ;;  %v11471_v32 = vld [vmem:[%s12521_s21 + $0x2f0] sm:$0xff]  }
  0x77   : > { %10231 = vmatpush3.bf16.msra.mxu1 %v11430_v33  ;;  %10238 = vmatprep.subr.bf16.mxu0 %v11432_v36  ;;  %v11470_v33 = vld [vmem:[%s12521_s21 + $0x230] sm:$0xff]   ;;  %v11475_v36 = vld [vmem:[%s12521_s21 + $0x2e8] sm:$0xff]  }
  0x78   : > { %10260 = vmatprep.subr.bf16.mxu1 %v11434_v41  ;;  %v11478_v41 = vld [vmem:[%s12521_s21 + $0x220] sm:$0xff]  }
  0x79   : > { %7253 = vmatmul.mubr.bf16.vlgmr.msra.gmra.mxu0 %v850_v48  ;;  %v11485_v48 = vld [vmem:[%s12521_s21 + $0x250] sm:$0xff]  }
  0x7a   : > { %7293 = vmatmul.mubr.bf16.vlgmr.msra.gmra.mxu1 %v852_v49  ;;  %10239 = vmatpush3.bf16.msra.mxu0 %v11433_v47  ;;  %v11484_v47 = vld [vmem:[%s12521_s21 + $0x298] sm:$0xff]   ;;  %v11487_v49 = vld [vmem:[%s12521_s21 + $0x2d0] sm:$0xff]  }
  0x7b   : > { %10261 = vmatpush3.bf16.msra.mxu1 %v11435_v50  ;;  %10240 = vmatprep.subr.bf16.mxu0 %v11436_v53  ;;  %v11486_v50 = vld [vmem:[%s12521_s21 + $0x210] sm:$0xff]  }
  0x7c   : > { %10262 = vmatprep.subr.bf16.mxu1 %v11438_v54  ;;  %7332 = vmatprep.mubr.bf16.mxu0 %v855_v20  ;;  %v288_v53 = vld [vmem:[%s12535_s13 + $0x10] sm:$0xff]  ;;  %v11511_v20 = vld [vmem:[%s12521_s21 + $0x320] sm:$0xff]  }
  0x7d   : > { %7372 = vmatprep.mubr.bf16.mxu1 %v857_v24  ;;  %v11491_v54 = vld [vmem:[%s12521_s21 + $0x2c8] sm:$0xff]   ;;  %v11515_v24 = vld [vmem:[%s12521_s21 + $0x318] sm:$0xff]  }
  0x7e   : > { %10241 = vmatpush3.bf16.msra.mxu0 %v11437_v55  ;;  %v377_v55 = vrot.slane %v288_v53, %v12574_v42 }
  0x7f   : > { %10263 = vmatpush3.bf16.msra.mxu1 %v11439_v56  ;;  %10242 = vmatprep.subr.bf16.mxu0 %v11440_v57  ;;  %v370_v56 = vcombine.high %v288_v53, %v288_v53  ;;  %v11490_v57 = vld [vmem:[%s12521_s21 + $0x208] sm:$0xff]   ;;  %v11535_v53 = vld [vmem:[%s12521_s21 + $0x470] sm:$0xff]  }
  0x80   : > { %10264 = vmatprep.subr.bf16.mxu1 %v11442_v58  ;;  %v11492_v58 = vld [vmem:[%s12521_s21 + $0x288] sm:$0xff]  }
  0x82   : > { %10243 = vmatpush3.bf16.msra.mxu0 %v11441_v59  ;;  %v385_v59 = vcombine.high %v377_v55, %v377_v55 }
  0x83   : > { %10265 = vmatpush3.bf16.msra.mxu1 %v11443_v60  ;;  %10244 = vmatprep.subr.bf16.mxu0 %v11444_v61  ;;  %v384_v60 = vrot.slane %v370_v56, %v12574_v42  ;;  %v11493_v61 = vld [vmem:[%s12521_s21 + $0x240] sm:$0xff]   ;;  %v11538_v56 = vld [vmem:[%s12521_s21 + $0x4b0] sm:$0xff]  }
  0x84   : > { %10266 = vmatprep.subr.bf16.mxu1 %v11446_v62  ;;  %v11495_v62 = vld [vmem:[%s12521_s21 + $0x2c0] sm:$0xff]  }
  0x86   : > { %10245 = vmatpush3.bf16.msra.mxu0 %v11445_v63  ;;  %v859_v63 = vpack.c.bf16 %v385_v59, %v385_v59  ;;  %v11540_v59 = vld [vmem:[%s12521_s21 + $0x428] sm:$0xff]  }
  0x87   : > { %10267 = vmatpush3.bf16.msra.mxu1 %v11447_v0  ;;  %10246 = vmatprep.subr.bf16.mxu0 %v11448_v1  ;;  %v386_v0 = vcombine.high %v384_v60, %v384_v60  ;;  %v11494_v1 = vld [vmem:[%s12521_s21 + $0x200] sm:$0xff]  }
  0x88   : > { %10268 = vmatprep.subr.bf16.mxu1 %v11450_v2  ;;  %v11496_v2 = vld [vmem:[%s12521_s21 + $0x280] sm:$0xff]  }
  0x8a   : > { %10247 = vmatpush3.bf16.msra.mxu0 %v11449_v3  ;;  %v861_v3 = vpack.c.bf16 %v386_v0, %v386_v0  ;;  %v11546_v0 = vld [vmem:[%s12521_s21 + $0x4a0] sm:$0xff]  }
  0x8b   : > { %10269 = vmatpush3.bf16.msra.mxu1 %v11451_v4  ;;  %10248 = vmatprep.subr.bf16.mxu0 %v11452_v5  ;;  %v11497_v4 = vld [vmem:[%s12521_s21 + $0x378] sm:$0xff]  }
  0x8c   : > { %10270 = vmatprep.subr.bf16.mxu1 %v11454_v6  ;;  %v11500_v5 = vld [vmem:[%s12521_s21 + $0x3f8] sm:$0xff]  }
  0x8d   : > { %v11499_v6 = vld [vmem:[%s12521_s21 + $0x338] sm:$0xff]  }
  0x8e   : > { %10249 = vmatpush3.bf16.msra.mxu0 %v11453_v7  ;;  %v858_v7 = vpack.c.bf16 %v377_v55, %v377_v55  ;;  %v11536_v55 = vld [vmem:[%s12521_s21 + $0x430] sm:$0xff]  }
  0x8f   : > { %10271 = vmatpush3.bf16.msra.mxu1 %v11455_v8  ;;  %10250 = vmatprep.subr.bf16.mxu0 %v11456_v9  ;;  %v860_v8 = vpack.c.bf16 %v384_v60, %v384_v60  ;;  %v11501_v9 = vld [vmem:[%s12521_s21 + $0x3b8] sm:$0xff]   ;;  %v11542_v60 = vld [vmem:[%s12521_s21 + $0x4a8] sm:$0xff]  }
  0x90   : > { %10272 = vmatprep.subr.bf16.mxu1 %v11458_v11  ;;  %v11504_v11 = vld [vmem:[%s12521_s21 + $0x3f0] sm:$0xff]  }
  0x92   : > { %10251 = vmatpush3.bf16.msra.mxu0 %v11457_v14  ;;  %v11506_v14 = vld [vmem:[%s12521_s21 + $0x368] sm:$0xff]  }
  0x93   : > { %10273 = vmatpush3.bf16.msra.mxu1 %v11459_v15  ;;  %10252 = vmatprep.subr.bf16.mxu0 %v11460_v18  ;;  %v11508_v15 = vld [vmem:[%s12521_s21 + $0x3e8] sm:$0xff]   ;;  %v11510_v18 = vld [vmem:[%s12521_s21 + $0x360] sm:$0xff]  }
  0x94   : > { %10274 = vmatprep.subr.bf16.mxu1 %v11462_v19  ;;  %v11512_v19 = vld [vmem:[%s12521_s21 + $0x3e0] sm:$0xff]  }
  0x96   : > { %10253 = vmatpush3.bf16.msra.mxu0 %v11461_v22  ;;  %v11514_v22 = vld [vmem:[%s12521_s21 + $0x358] sm:$0xff]  }
  0x97   : > { %10275 = vmatpush3.bf16.msra.mxu1 %v11463_v23  ;;  %10282 = vmatprep.subr.bf16.mxu0 %v11464_v25  ;;  %v11516_v23 = vld [vmem:[%s12521_s21 + $0x3d8] sm:$0xff]  }
  0x98   : > { %10304 = vmatprep.subr.bf16.mxu1 %v11467_v26  ;;  %v11517_v25 = vld [vmem:[%s12521_s21 + $0x398] sm:$0xff]   ;;  %v11518_v26 = vld [vmem:[%s12521_s21 + $0x350] sm:$0xff]  }
  0x99   : > { %7333 = vmatmul.mubr.bf16.vlgmr.msra.gmra.mxu0 %v854_v28  ;;  %v11519_v28 = vld [vmem:[%s12521_s21 + $0x310] sm:$0xff]  }
  0x9a   : > { %7373 = vmatmul.mubr.bf16.vlgmr.msra.gmra.mxu1 %v856_v29  ;;  %10283 = vmatpush3.bf16.msra.mxu0 %v11466_v27  ;;  %v11520_v27 = vld [vmem:[%s12521_s21 + $0x3d0] sm:$0xff]  }
  0x9b   : > { %10305 = vmatpush3.bf16.msra.mxu1 %v11468_v30  ;;  %10284 = vmatprep.subr.bf16.mxu0 %v11469_v31  ;;  %v11521_v29 = vld [vmem:[%s12521_s21 + $0x390] sm:$0xff]   ;;  %v11522_v30 = vld [vmem:[%s12521_s21 + $0x348] sm:$0xff]  }
  0x9c   : > { %10306 = vmatprep.subr.bf16.mxu1 %v11471_v32  ;;  %7412 = vmatprep.mubr.bf16.mxu0 %v859_v63  ;;  %v11524_v31 = vld [vmem:[%s12521_s21 + $0x3c8] sm:$0xff]   ;;  %v289_v32 = vld [vmem:[%s12535_s13 + $0x18] sm:$0xff]  ;;  %v11544_v63 = vld [vmem:[%s12521_s21 + $0x420] sm:$0xff]  }
  0x9d   : > { %7452 = vmatprep.mubr.bf16.mxu1 %v861_v3  ;;  %v11548_v3 = vld [vmem:[%s12521_s21 + $0x418] sm:$0xff]  }
  0x9e   : > { %10285 = vmatpush3.bf16.msra.mxu0 %v11470_v33  ;;  %v11523_v33 = vld [vmem:[%s12521_s21 + $0x308] sm:$0xff]  }
  0x9f   : > { %10307 = vmatpush3.bf16.msra.mxu1 %v11472_v34  ;;  %10286 = vmatprep.subr.bf16.mxu0 %v11473_v35  ;;  %v394_v34 = vrot.slane %v289_v32, %v12574_v42  ;;  %v387_v35 = vcombine.high %v289_v32, %v289_v32  ;;  %v11570_v32 = vld [vmem:[%s12521_s21 + $0x5f0] sm:$0xff]  }
  0xa0   : > { %10308 = vmatprep.subr.bf16.mxu1 %v11475_v36  ;;  %v11525_v36 = vld [vmem:[%s12521_s21 + $0x388] sm:$0xff]  }
  0xa2   : > { %10287 = vmatpush3.bf16.msra.mxu0 %v11474_v37  ;;  %v11526_v37 = vld [vmem:[%s12521_s21 + $0x340] sm:$0xff]  }
  0xa3   : > { %10309 = vmatpush3.bf16.msra.mxu1 %v11476_v38  ;;  %10288 = vmatprep.subr.bf16.mxu0 %v11477_v39  ;;  %v402_v38 = vcombine.high %v394_v34, %v394_v34  ;;  %v401_v39 = vrot.slane %v387_v35, %v12574_v42  ;;  %v11572_v35 = vld [vmem:[%s12521_s21 + $0x568] sm:$0xff]  }
  0xa4   : > { %10310 = vmatprep.subr.bf16.mxu1 %v11479_v40  ;;  %v11528_v40 = vld [vmem:[%s12521_s21 + $0x3c0] sm:$0xff]  }
  0xa6   : > { %10289 = vmatpush3.bf16.msra.mxu0 %v11478_v41  ;;  %v11527_v41 = vld [vmem:[%s12521_s21 + $0x300] sm:$0xff]  }
  0xa7   : > { %10311 = vmatpush3.bf16.msra.mxu1 %v11480_v43  ;;  %10290 = vmatprep.subr.bf16.mxu0 %v11481_v44  ;;  %v863_v43 = vpack.c.bf16 %v402_v38, %v402_v38  ;;  %v403_v44 = vcombine.high %v401_v39, %v401_v39  ;;  %v11575_v38 = vld [vmem:[%s12521_s21 + $0x5a8] sm:$0xff]  }
  0xa8   : > { %10312 = vmatprep.subr.bf16.mxu1 %v11483_v45  ;;  %v11529_v45 = vld [vmem:[%s12521_s21 + $0x380] sm:$0xff]  }
  0xaa   : > { %10291 = vmatpush3.bf16.msra.mxu0 %v11482_v46  ;;  %v11530_v46 = vld [vmem:[%s12521_s21 + $0x478] sm:$0xff]  }
  0xab   : > { %10313 = vmatpush3.bf16.msra.mxu1 %v11484_v47  ;;  %10292 = vmatprep.subr.bf16.mxu0 %v11485_v48  ;;  %v865_v47 = vpack.c.bf16 %v403_v44, %v403_v44  ;;  %v11533_v48 = vld [vmem:[%s12521_s21 + $0x4f8] sm:$0xff]  }
  0xac   : > { %10314 = vmatprep.subr.bf16.mxu1 %v11487_v49  ;;  %v11532_v49 = vld [vmem:[%s12521_s21 + $0x438] sm:$0xff]  }
  0xad   : > { %v11580_v44 = vld [vmem:[%s12521_s21 + $0x558] sm:$0xff]  }
  0xae   : > { %10293 = vmatpush3.bf16.msra.mxu0 %v11486_v50  ;;  %v862_v50 = vpack.c.bf16 %v394_v34, %v394_v34  ;;  %v11571_v34 = vld [vmem:[%s12521_s21 + $0x5b0] sm:$0xff]  }
  0xaf   : > { %10315 = vmatpush3.bf16.msra.mxu1 %v11488_v51  ;;  %10294 = vmatprep.subr.bf16.mxu0 %v11489_v52  ;;  %v864_v51 = vpack.c.bf16 %v401_v39, %v401_v39  ;;  %v11534_v52 = vld [vmem:[%s12521_s21 + $0x4b8] sm:$0xff]   ;;  %v11576_v39 = vld [vmem:[%s12521_s21 + $0x560] sm:$0xff]  }
  0xb0   : > { %10316 = vmatprep.subr.bf16.mxu1 %v11491_v54  ;;  %v11537_v54 = vld [vmem:[%s12521_s21 + $0x4f0] sm:$0xff]  }
  0xb2   : > { %10295 = vmatpush3.bf16.msra.mxu0 %v11490_v57  ;;  %v11539_v57 = vld [vmem:[%s12521_s21 + $0x468] sm:$0xff]  }
  0xb3   : > { %10317 = vmatpush3.bf16.msra.mxu1 %v11492_v58  ;;  %10296 = vmatprep.subr.bf16.mxu0 %v11493_v61  ;;  %v11541_v58 = vld [vmem:[%s12521_s21 + $0x4e8] sm:$0xff]   ;;  %v11543_v61 = vld [vmem:[%s12521_s21 + $0x460] sm:$0xff]  }
  0xb4   : > { %10318 = vmatprep.subr.bf16.mxu1 %v11495_v62  ;;  %v11545_v62 = vld [vmem:[%s12521_s21 + $0x4e0] sm:$0xff]  }
  0xb6   : > { %10297 = vmatpush3.bf16.msra.mxu0 %v11494_v1  ;;  %v11547_v1 = vld [vmem:[%s12521_s21 + $0x458] sm:$0xff]  }
  0xb7   : > { %10319 = vmatpush3.bf16.msra.mxu1 %v11496_v2  ;;  %10326 = vmatprep.subr.bf16.mxu0 %v11497_v4  ;;  %v11549_v2 = vld [vmem:[%s12521_s21 + $0x4d8] sm:$0xff]  }
  0xb8   : > { %10348 = vmatprep.subr.bf16.mxu1 %v11500_v5  ;;  %v11550_v4 = vld [vmem:[%s12521_s21 + $0x498] sm:$0xff]   ;;  %v11551_v5 = vld [vmem:[%s12521_s21 + $0x450] sm:$0xff]  }
  0xb9   : > { %7413 = vmatmul.mubr.bf16.vlgmr.msra.gmra.mxu0 %v858_v7  ;;  %v11552_v7 = vld [vmem:[%s12521_s21 + $0x410] sm:$0xff]  }
  0xba   : > { %7453 = vmatmul.mubr.bf16.vlgmr.msra.gmra.mxu1 %v860_v8  ;;  %10327 = vmatpush3.bf16.msra.mxu0 %v11499_v6  ;;  %v11553_v6 = vld [vmem:[%s12521_s21 + $0x4d0] sm:$0xff]  }
  0xbb   : > { %10349 = vmatpush3.bf16.msra.mxu1 %v11501_v9  ;;  %10328 = vmatprep.subr.bf16.mxu0 %v11502_v10  ;;  %v11554_v8 = vld [vmem:[%s12521_s21 + $0x490] sm:$0xff]   ;;  %v11555_v9 = vld [vmem:[%s12521_s21 + $0x448] sm:$0xff]  }
  0xbc   : > { %10350 = vmatprep.subr.bf16.mxu1 %v11504_v11  ;;  %7492 = vmatprep.mubr.bf16.mxu0 %v863_v43  ;;  %v11557_v10 = vld [vmem:[%s12521_s21 + $0x4c8] sm:$0xff]   ;;  %v290_v11 = vld [vmem:[%s12535_s13 + $0x20] sm:$0xff] }
  0xbd   : > { %7532 = vmatprep.mubr.bf16.mxu1 %v865_v47  ;;  %v11579_v43 = vld [vmem:[%s12521_s21 + $0x5a0] sm:$0xff]   ;;  %v11583_v47 = vld [vmem:[%s12521_s21 + $0x598] sm:$0xff]  }
  0xbe   : > { %10329 = vmatpush3.bf16.msra.mxu0 %v11503_v12  ;;  %v11556_v12 = vld [vmem:[%s12521_s21 + $0x408] sm:$0xff]  }
  0xbf   : > { %10351 = vmatpush3.bf16.msra.mxu1 %v11505_v13  ;;  %10330 = vmatprep.subr.bf16.mxu0 %v11506_v14  ;;  %v411_v13 = vrot.slane %v290_v11, %v12574_v42  ;;  %v404_v14 = vcombine.high %v290_v11, %v290_v11  ;;  %v11603_v11 = vld [vmem:[%s12521_s21 + $0x6f0] sm:$0xff]  }
  0xc0   : > { %10352 = vmatprep.subr.bf16.mxu1 %v11508_v15  ;;  %v11558_v15 = vld [vmem:[%s12521_s21 + $0x488] sm:$0xff]  }
  0xc2   : > { %10331 = vmatpush3.bf16.msra.mxu0 %v11507_v16  ;;  %v11559_v16 = vld [vmem:[%s12521_s21 + $0x440] sm:$0xff]  }
  0xc3   : > { %10353 = vmatpush3.bf16.msra.mxu1 %v11509_v17  ;;  %10332 = vmatprep.subr.bf16.mxu0 %v11510_v18  ;;  %v419_v17 = vcombine.high %v411_v13, %v411_v13  ;;  %v418_v18 = vrot.slane %v404_v14, %v12574_v42  ;;  %v11605_v14 = vld [vmem:[%s12521_s21 + $0x668] sm:$0xff]  }
  0xc4   : > { %10354 = vmatprep.subr.bf16.mxu1 %v11512_v19  ;;  %v11561_v19 = vld [vmem:[%s12521_s21 + $0x4c0] sm:$0xff]  }
  0xc6   : > { %10333 = vmatpush3.bf16.msra.mxu0 %v11511_v20  ;;  %v11560_v20 = vld [vmem:[%s12521_s21 + $0x400] sm:$0xff]  }
  0xc7   : > { %10355 = vmatpush3.bf16.msra.mxu1 %v11513_v21  ;;  %10334 = vmatprep.subr.bf16.mxu0 %v11514_v22  ;;  %v867_v21 = vpack.c.bf16 %v419_v17, %v419_v17  ;;  %v420_v22 = vcombine.high %v418_v18, %v418_v18  ;;  %v11608_v17 = vld [vmem:[%s12521_s21 + $0x6a8] sm:$0xff]  }
  0xc8   : > { %10356 = vmatprep.subr.bf16.mxu1 %v11516_v23  ;;  %v11562_v23 = vld [vmem:[%s12521_s21 + $0x480] sm:$0xff]  }
  0xca   : > { %10335 = vmatpush3.bf16.msra.mxu0 %v11515_v24  ;;  %v11563_v24 = vld [vmem:[%s12521_s21 + $0x578] sm:$0xff]  }
  0xcb   : > { %10357 = vmatpush3.bf16.msra.mxu1 %v11517_v25  ;;  %10336 = vmatprep.subr.bf16.mxu0 %v11518_v26  ;;  %v869_v25 = vpack.c.bf16 %v420_v22, %v420_v22  ;;  %v11566_v26 = vld [vmem:[%s12521_s21 + $0x5f8] sm:$0xff]  }
  0xcc   : > { %10358 = vmatprep.subr.bf16.mxu1 %v11520_v27  ;;  %v11565_v27 = vld [vmem:[%s12521_s21 + $0x538] sm:$0xff]  }
  0xcd   : > { %v11613_v22 = vld [vmem:[%s12521_s21 + $0x658] sm:$0xff]  }
  0xce   : > { %10337 = vmatpush3.bf16.msra.mxu0 %v11519_v28  ;;  %v866_v28 = vpack.c.bf16 %v411_v13, %v411_v13  ;;  %v11604_v13 = vld [vmem:[%s12521_s21 + $0x6b0] sm:$0xff]  }
  0xcf   : > { %10359 = vmatpush3.bf16.msra.mxu1 %v11521_v29  ;;  %10338 = vmatprep.subr.bf16.mxu0 %v11522_v30  ;;  %v868_v29 = vpack.c.bf16 %v418_v18, %v418_v18  ;;  %v11567_v30 = vld [vmem:[%s12521_s21 + $0x5b8] sm:$0xff]   ;;  %v11609_v18 = vld [vmem:[%s12521_s21 + $0x660] sm:$0xff]  }
  0xd0   : > { %10360 = vmatprep.subr.bf16.mxu1 %v11524_v31  ;;  %v11568_v31 = vld [vmem:[%s12521_s21 + $0x570] sm:$0xff]  }
  0xd2   : > { %10339 = vmatpush3.bf16.msra.mxu0 %v11523_v33  ;;  %v11569_v33 = vld [vmem:[%s12521_s21 + $0x530] sm:$0xff]  }
  0xd3   : > { %10361 = vmatpush3.bf16.msra.mxu1 %v11525_v36  ;;  %10340 = vmatprep.subr.bf16.mxu0 %v11526_v37  ;;  %v11574_v36 = vld [vmem:[%s12521_s21 + $0x5e8] sm:$0xff]  }
  0xd4   : > { %10362 = vmatprep.subr.bf16.mxu1 %v11528_v40  ;;  %v11573_v37 = vld [vmem:[%s12521_s21 + $0x528] sm:$0xff]   ;;  %v11578_v40 = vld [vmem:[%s12521_s21 + $0x5e0] sm:$0xff]  }
  0xd6   : > { %10341 = vmatpush3.bf16.msra.mxu0 %v11527_v41  ;;  %v11577_v41 = vld [vmem:[%s12521_s21 + $0x520] sm:$0xff]  }
  0xd7   : > { %10363 = vmatpush3.bf16.msra.mxu1 %v11529_v45  ;;  %10370 = vmatprep.subr.bf16.mxu0 %v11530_v46  ;;  %v11582_v45 = vld [vmem:[%s12521_s21 + $0x5d8] sm:$0xff]  }
  0xd8   : > { %10392 = vmatprep.subr.bf16.mxu1 %v11533_v48  ;;  %v11581_v46 = vld [vmem:[%s12521_s21 + $0x518] sm:$0xff]   ;;  %v11584_v48 = vld [vmem:[%s12521_s21 + $0x550] sm:$0xff]  }
  0xd9   : > { %7493 = vmatmul.mubr.bf16.vlgmr.msra.gmra.mxu0 %v862_v50  ;;  %v11585_v50 = vld [vmem:[%s12521_s21 + $0x510] sm:$0xff]  }
  0xda   : > { %7533 = vmatmul.mubr.bf16.vlgmr.msra.gmra.mxu1 %v864_v51  ;;  %10371 = vmatpush3.bf16.msra.mxu0 %v11532_v49  ;;  %v11586_v49 = vld [vmem:[%s12521_s21 + $0x5d0] sm:$0xff]  }
  0xdb   : > { %10393 = vmatpush3.bf16.msra.mxu1 %v11534_v52  ;;  %10372 = vmatprep.subr.bf16.mxu0 %v11535_v53  ;;  %v11587_v51 = vld [vmem:[%s12521_s21 + $0x590] sm:$0xff]   ;;  %v11588_v52 = vld [vmem:[%s12521_s21 + $0x548] sm:$0xff]  }
  0xdc   : > { %10394 = vmatprep.subr.bf16.mxu1 %v11537_v54  ;;  %7572 = vmatprep.mubr.bf16.mxu0 %v867_v21  ;;  %v11590_v53 = vld [vmem:[%s12521_s21 + $0x5c8] sm:$0xff]   ;;  %v11612_v21 = vld [vmem:[%s12521_s21 + $0x6a0] sm:$0xff]  }
  0xdd   : > { %7612 = vmatprep.mubr.bf16.mxu1 %v869_v25  ;;  %v291_v54 = vld [vmem:[%s12535_s13 + $0x28] sm:$0xff]  ;;  %v11616_v25 = vld [vmem:[%s12521_s21 + $0x698] sm:$0xff]  }
  0xde   : > { %10373 = vmatpush3.bf16.msra.mxu0 %v11536_v55  ;;  %v11589_v55 = vld [vmem:[%s12521_s21 + $0x508] sm:$0xff]  }
  0xdf   : > { %10395 = vmatpush3.bf16.msra.mxu1 %v11538_v56  ;;  %10374 = vmatprep.subr.bf16.mxu0 %v11539_v57  ;;  %v428_v56 = vrot.slane %v291_v54, %v12574_v42  ;;  %v421_v57 = vcombine.high %v291_v54, %v291_v54  ;;  %v11636_v54 = vld [vmem:[%s12521_s21 + $0x7f0] sm:$0xff]  }
  0xe0   : > { %10396 = vmatprep.subr.bf16.mxu1 %v11541_v58  ;;  %v11591_v58 = vld [vmem:[%s12521_s21 + $0x588] sm:$0xff]  }
  0xe2   : > { %10375 = vmatpush3.bf16.msra.mxu0 %v11540_v59  ;;  %v11592_v59 = vld [vmem:[%s12521_s21 + $0x540] sm:$0xff]  }
  0xe3   : > { %10397 = vmatpush3.bf16.msra.mxu1 %v11542_v60  ;;  %10376 = vmatprep.subr.bf16.mxu0 %v11543_v61  ;;  %v436_v60 = vcombine.high %v428_v56, %v428_v56  ;;  %v435_v61 = vrot.slane %v421_v57, %v12574_v42 }
  0xe4   : > { %10398 = vmatprep.subr.bf16.mxu1 %v11545_v62  ;;  %v11594_v62 = vld [vmem:[%s12521_s21 + $0x5c0] sm:$0xff]  }
  0xe6   : > { %10377 = vmatpush3.bf16.msra.mxu0 %v11544_v63  ;;  %v11593_v63 = vld [vmem:[%s12521_s21 + $0x500] sm:$0xff]  }
  0xe7   : > { %10399 = vmatpush3.bf16.msra.mxu1 %v11546_v0  ;;  %10378 = vmatprep.subr.bf16.mxu0 %v11547_v1  ;;  %v871_v0 = vpack.c.bf16 %v436_v60, %v436_v60  ;;  %v437_v1 = vcombine.high %v435_v61, %v435_v61 }
  0xe8   : > { %10400 = vmatprep.subr.bf16.mxu1 %v11549_v2  ;;  %v11595_v2 = vld [vmem:[%s12521_s21 + $0x580] sm:$0xff]  }
  0xea   : > { %10379 = vmatpush3.bf16.msra.mxu0 %v11548_v3  ;;  %v11596_v3 = vld [vmem:[%s12521_s21 + $0x678] sm:$0xff]  }
  0xeb   : > { %10401 = vmatpush3.bf16.msra.mxu1 %v11550_v4  ;;  %10380 = vmatprep.subr.bf16.mxu0 %v11551_v5  ;;  %v873_v4 = vpack.c.bf16 %v437_v1, %v437_v1  ;;  %v11599_v5 = vld [vmem:[%s12521_s21 + $0x6f8] sm:$0xff]   ;;  %v11639_v1 = vld [vmem:[%s12521_s21 + $0x728] sm:$0xff]  }
  0xec   : > { %10402 = vmatprep.subr.bf16.mxu1 %v11553_v6  ;;  %v11598_v6 = vld [vmem:[%s12521_s21 + $0x638] sm:$0xff]  }
  0xee   : > { %10381 = vmatpush3.bf16.msra.mxu0 %v11552_v7  ;;  %v870_v7 = vpack.c.bf16 %v428_v56, %v428_v56 }
  0xef   : > { %10403 = vmatpush3.bf16.msra.mxu1 %v11554_v8  ;;  %10382 = vmatprep.subr.bf16.mxu0 %v11555_v9  ;;  %v872_v8 = vpack.c.bf16 %v435_v61, %v435_v61  ;;  %v11600_v9 = vld [vmem:[%s12521_s21 + $0x6b8] sm:$0xff]  }
  0xf0   : > { %10404 = vmatprep.subr.bf16.mxu1 %v11557_v10  ;;  %v11601_v10 = vld [vmem:[%s12521_s21 + $0x670] sm:$0xff]  }
  0xf2   : > { %10383 = vmatpush3.bf16.msra.mxu0 %v11556_v12  ;;  %v11602_v12 = vld [vmem:[%s12521_s21 + $0x630] sm:$0xff]  }
  0xf3   : > { %10405 = vmatpush3.bf16.msra.mxu1 %v11558_v15  ;;  %10384 = vmatprep.subr.bf16.mxu0 %v11559_v16  ;;  %v11607_v15 = vld [vmem:[%s12521_s21 + $0x6e8] sm:$0xff]  }
  0xf4   : > { %10406 = vmatprep.subr.bf16.mxu1 %v11561_v19  ;;  %v11606_v16 = vld [vmem:[%s12521_s21 + $0x628] sm:$0xff]   ;;  %v11611_v19 = vld [vmem:[%s12521_s21 + $0x6e0] sm:$0xff]  }
  0xf6   : > { %10385 = vmatpush3.bf16.msra.mxu0 %v11560_v20  ;;  %v11610_v20 = vld [vmem:[%s12521_s21 + $0x620] sm:$0xff]  }
  0xf7   : > { %10407 = vmatpush3.bf16.msra.mxu1 %v11562_v23  ;;  %10414 = vmatprep.subr.bf16.mxu0 %v11563_v24  ;;  %v11615_v23 = vld [vmem:[%s12521_s21 + $0x6d8] sm:$0xff]  }
  0xf8   : > { %10436 = vmatprep.subr.bf16.mxu1 %v11566_v26  ;;  %v11614_v24 = vld [vmem:[%s12521_s21 + $0x618] sm:$0xff]   ;;  %v11617_v26 = vld [vmem:[%s12521_s21 + $0x650] sm:$0xff]  }
  0xf9   : > { %7573 = vmatmul.mubr.bf16.vlgmr.msra.gmra.mxu0 %v866_v28  ;;  %v11618_v28 = vld [vmem:[%s12521_s21 + $0x610] sm:$0xff]  }
  0xfa   : > { %7613 = vmatmul.mubr.bf16.vlgmr.msra.gmra.mxu1 %v868_v29  ;;  %10415 = vmatpush3.bf16.msra.mxu0 %v11565_v27  ;;  %v11619_v27 = vld [vmem:[%s12521_s21 + $0x6d0] sm:$0xff]  }
  0xfb   : > { %10437 = vmatpush3.bf16.msra.mxu1 %v11567_v30  ;;  %10416 = vmatprep.subr.bf16.mxu0 %v11568_v31  ;;  %v11620_v29 = vld [vmem:[%s12521_s21 + $0x690] sm:$0xff]   ;;  %v11621_v30 = vld [vmem:[%s12521_s21 + $0x648] sm:$0xff]  }
  0xfc   : > { %10438 = vmatprep.subr.bf16.mxu1 %v11570_v32  ;;  %7652 = vmatprep.mubr.bf16.mxu0 %v871_v0  ;;  %v11623_v31 = vld [vmem:[%s12521_s21 + $0x6c8] sm:$0xff]  }
  0xfd   : > { %7692 = vmatprep.mubr.bf16.mxu1 %v873_v4  ;;  %v11622_v32 = vld [vmem:[%s12521_s21 + $0x608] sm:$0xff]  }
  0xfe   : > { %10417 = vmatpush3.bf16.msra.mxu0 %v11569_v33  ;;  %v292_v33 = vld [vmem:[%s12535_s13 + $0x30] sm:$0xff] }
  0xff   : > { %10439 = vmatpush3.bf16.msra.mxu1 %v11571_v34  ;;  %10418 = vmatprep.subr.bf16.mxu0 %v11572_v35  ;;  %v11624_v34 = vld [vmem:[%s12521_s21 + $0x688] sm:$0xff]   ;;  %v445_v35 = vrot.slane %v292_v33, %v12574_v42 }
 0x100   : > { %10440 = vmatprep.subr.bf16.mxu1 %v11574_v36  ;;  %v438_v36 = vcombine.high %v292_v33, %v292_v33  ;;  %v11661_v33 = vld [vmem:[%s12521_s21 + $0x780] sm:$0xff]  }
 0x102   : > { %10419 = vmatpush3.bf16.msra.mxu0 %v11573_v37  ;;  %v11625_v37 = vld [vmem:[%s12521_s21 + $0x640] sm:$0xff]  }
 0x103   : > { %10441 = vmatpush3.bf16.msra.mxu1 %v11575_v38  ;;  %10420 = vmatprep.subr.bf16.mxu0 %v11576_v39  ;;  %v11627_v38 = vld [vmem:[%s12521_s21 + $0x6c0] sm:$0xff]   ;;  %v453_v39 = vcombine.high %v445_v35, %v445_v35 }
 0x104   : > { %10442 = vmatprep.subr.bf16.mxu1 %v11578_v40  ;;  %v452_v40 = vrot.slane %v438_v36, %v12574_v42 }
 0x106   : > { %10421 = vmatpush3.bf16.msra.mxu0 %v11577_v41  ;;  %v11626_v41 = vld [vmem:[%s12521_s21 + $0x600] sm:$0xff]  }
 0x107   : > { %10443 = vmatpush3.bf16.msra.mxu1 %v11579_v43  ;;  %10422 = vmatprep.subr.bf16.mxu0 %v11580_v44  ;;  %v875_v43 = vpack.c.bf16 %v453_v39, %v453_v39  ;;  %v11628_v44 = vld [vmem:[%s12521_s21 + $0x680] sm:$0xff]  }
 0x108   : > { %10444 = vmatprep.subr.bf16.mxu1 %v11582_v45  ;;  %v454_v45 = vcombine.high %v452_v40, %v452_v40 }
 0x10a   : > { %10423 = vmatpush3.bf16.msra.mxu0 %v11581_v46  ;;  %v11629_v46 = vld [vmem:[%s12521_s21 + $0x778] sm:$0xff]  }
 0x10b   : > { %10445 = vmatpush3.bf16.msra.mxu1 %v11583_v47  ;;  %10424 = vmatprep.subr.bf16.mxu0 %v11584_v48  ;;  %v877_v47 = vpack.c.bf16 %v454_v45, %v454_v45  ;;  %v11632_v48 = vld [vmem:[%s12521_s21 + $0x7f8] sm:$0xff]   ;;  %v11668_v45 = vld [vmem:[%s12521_s21 + $0x830] sm:$0xff]  }
 0x10c   : > { %10446 = vmatprep.subr.bf16.mxu1 %v11586_v49  ;;  %v11631_v49 = vld [vmem:[%s12521_s21 + $0x738] sm:$0xff]  }
 0x10e   : > { %10425 = vmatpush3.bf16.msra.mxu0 %v11585_v50  ;;  %v874_v50 = vpack.c.bf16 %v445_v35, %v445_v35  ;;  %v11662_v35 = vld [vmem:[%s12521_s21 + $0x878] sm:$0xff]  }
 0x10f   : > { %10447 = vmatpush3.bf16.msra.mxu1 %v11587_v51  ;;  %10426 = vmatprep.subr.bf16.mxu0 %v11588_v52  ;;  %v876_v51 = vpack.c.bf16 %v452_v40, %v452_v40  ;;  %v11633_v52 = vld [vmem:[%s12521_s21 + $0x7b8] sm:$0xff]  }
 0x110   : > { %10448 = vmatprep.subr.bf16.mxu1 %v11590_v53  ;;  %v11634_v53 = vld [vmem:[%s12521_s21 + $0x770] sm:$0xff]  }
 0x112   : > { %10427 = vmatpush3.bf16.msra.mxu0 %v11589_v55  ;;  %v11635_v55 = vld [vmem:[%s12521_s21 + $0x730] sm:$0xff]  }
 0x113   : > { %10449 = vmatpush3.bf16.msra.mxu1 %v11591_v58  ;;  %10428 = vmatprep.subr.bf16.mxu0 %v11592_v59  ;;  %v11637_v58 = vld [vmem:[%s12521_s21 + $0x7b0] sm:$0xff]   ;;  %v11638_v59 = vld [vmem:[%s12521_s21 + $0x768] sm:$0xff]  }
 0x114   : > { %10450 = vmatprep.subr.bf16.mxu1 %v11594_v62  ;;  %v11640_v62 = vld [vmem:[%s12521_s21 + $0x7e8] sm:$0xff]  }
 0x116   : > { %10429 = vmatpush3.bf16.msra.mxu0 %v11593_v63 }
 0x117   : > { %10451 = vmatpush3.bf16.msra.mxu1 %v11595_v2  ;;  %10458 = vmatprep.subr.bf16.mxu0 %v11596_v3  ;;  %v11641_v3 = vld [vmem:[%s12521_s21 + $0x7a8] sm:$0xff]  }
 0x118   : > { %10480 = vmatprep.subr.bf16.mxu1 %v11599_v5 }
 0x119   : > { %7653 = vmatmul.mubr.bf16.vlgmr.msra.gmra.mxu0 %v870_v7 }
 0x11a   : > { %7693 = vmatmul.mubr.bf16.vlgmr.msra.gmra.mxu1 %v872_v8  ;;  %10459 = vmatpush3.bf16.msra.mxu0 %v11598_v6  ;;  %v11642_v6 = vld [vmem:[%s12521_s21 + $0x760] sm:$0xff]  }
 0x11b   : > { %10481 = vmatpush3.bf16.msra.mxu1 %v11600_v9  ;;  %10460 = vmatprep.subr.bf16.mxu0 %v11601_v10  ;;  %v11644_v8 = vld [vmem:[%s12521_s21 + $0x7e0] sm:$0xff]  }
 0x11c   : > { %10482 = vmatprep.subr.bf16.mxu1 %v11603_v11  ;;  %7732 = vmatprep.mubr.bf16.mxu0 %v875_v43  ;;  %v11643_v10 = vld [vmem:[%s12521_s21 + $0x720] sm:$0xff]   ;;  %v11667_v43 = vld [vmem:[%s12521_s21 + $0x870] sm:$0xff]  }
 0x11d   : > { %7772 = vmatprep.mubr.bf16.mxu1 %v877_v47  ;;  %v11645_v11 = vld [vmem:[%s12521_s21 + $0x7a0] sm:$0xff]  }
 0x11e   : > { %10461 = vmatpush3.bf16.msra.mxu0 %v11602_v12  ;;  %v11646_v12 = vld [vmem:[%s12521_s21 + $0x758] sm:$0xff]  }
 0x11f   : > { %10483 = vmatpush3.bf16.msra.mxu1 %v11604_v13  ;;  %10462 = vmatprep.subr.bf16.mxu0 %v11605_v14  ;;  %v11648_v13 = vld [vmem:[%s12521_s21 + $0x7d8] sm:$0xff]  }
 0x120   : > { %10484 = vmatprep.subr.bf16.mxu1 %v11607_v15  ;;  %v11647_v14 = vld [vmem:[%s12521_s21 + $0x718] sm:$0xff]  }
 0x121   : > { %v11649_v15 = vld [vmem:[%s12521_s21 + $0x798] sm:$0xff]  }
 0x122   : > { %10463 = vmatpush3.bf16.msra.mxu0 %v11606_v16  ;;  %v11650_v16 = vld [vmem:[%s12521_s21 + $0x750] sm:$0xff]  }
 0x123   : > { %10485 = vmatpush3.bf16.msra.mxu1 %v11608_v17  ;;  %10464 = vmatprep.subr.bf16.mxu0 %v11609_v18  ;;  %v11652_v17 = vld [vmem:[%s12521_s21 + $0x7d0] sm:$0xff]  }
 0x124   : > { %10486 = vmatprep.subr.bf16.mxu1 %v11611_v19  ;;  %v11651_v18 = vld [vmem:[%s12521_s21 + $0x710] sm:$0xff]  }
 0x125   : > { %v11653_v19 = vld [vmem:[%s12521_s21 + $0x790] sm:$0xff]  }
 0x126   : > { %10465 = vmatpush3.bf16.msra.mxu0 %v11610_v20  ;;  %v11654_v20 = vld [vmem:[%s12521_s21 + $0x748] sm:$0xff]  }
 0x127   : > { %10487 = vmatpush3.bf16.msra.mxu1 %v11612_v21  ;;  %10466 = vmatprep.subr.bf16.mxu0 %v11613_v22  ;;  %v11656_v21 = vld [vmem:[%s12521_s21 + $0x7c8] sm:$0xff]  }
 0x128   : > { %10488 = vmatprep.subr.bf16.mxu1 %v11615_v23  ;;  %v11655_v22 = vld [vmem:[%s12521_s21 + $0x708] sm:$0xff]   ;;  %v293_v23 = vld [vmem:[%s12535_s13 + $0x38] sm:$0xff] }
 0x12a   : > { %10467 = vmatpush3.bf16.msra.mxu0 %v11614_v24  ;;  %v11657_v24 = vld [vmem:[%s12521_s21 + $0x788] sm:$0xff]  }
 0x12b   : > { %10489 = vmatpush3.bf16.msra.mxu1 %v11616_v25  ;;  %10468 = vmatprep.subr.bf16.mxu0 %v11617_v26  ;;  %v462_v25 = vrot.slane %v293_v23, %v12574_v42  ;;  %v455_v26 = vcombine.high %v293_v23, %v293_v23 }
 0x12c   : > { %10490 = vmatprep.subr.bf16.mxu1 %v11619_v27  ;;  %v11658_v27 = vld [vmem:[%s12521_s21 + $0x740] sm:$0xff]  }
 0x12d   : > { %v878_v39 = vpack.c.bf16 %v462_v25, %v462_v25 }
 0x12e   : > { %10469 = vmatpush3.bf16.msra.mxu0 %v11618_v28  ;;  %v11660_v28 = vld [vmem:[%s12521_s21 + $0x7c0] sm:$0xff]  }
 0x12f   : > { %10491 = vmatpush3.bf16.msra.mxu1 %v11620_v29  ;;  %10470 = vmatprep.subr.bf16.mxu0 %v11621_v30  ;;  %v470_v29 = vcombine.high %v462_v25, %v462_v25  ;;  %v469_v30 = vrot.slane %v455_v26, %v12574_v42  ;;  %v11695_v26 = vld [vmem:[%s12521_s21 + $0x978] sm:$0xff]  }
 0x130   : > { %10492 = vmatprep.subr.bf16.mxu1 %v11623_v31  ;;  %v11659_v31 = vld [vmem:[%s12521_s21 + $0x700] sm:$0xff]  }
 0x131   : > { %v880_v40 = vpack.c.bf16 %v469_v30, %v469_v30 }
 0x132   : > { %10471 = vmatpush3.bf16.msra.mxu0 %v11622_v32  ;;  %v879_v32 = vpack.c.bf16 %v470_v29, %v470_v29  ;;  %v11697_v29 = vld [vmem:[%s12521_s21 + $0x938] sm:$0xff]  }
 0x133   : > { %10493 = vmatpush3.bf16.msra.mxu1 %v11624_v34  ;;  %10472 = vmatprep.subr.bf16.mxu0 %v11625_v37  ;;  %v471_v34 = vcombine.high %v469_v30, %v469_v30  ;;  %v11665_v37 = vld [vmem:[%s12521_s21 + $0x8f8] sm:$0xff]  }
 0x134   : > { %10494 = vmatprep.subr.bf16.mxu1 %v11627_v38  ;;  %v11664_v38 = vld [vmem:[%s12521_s21 + $0x838] sm:$0xff]  }
 0x135   : > { %v881_v36 = vpack.c.bf16 %v471_v34, %v471_v34  ;;  %v11702_v34 = vld [vmem:[%s12521_s21 + $0x9f0] sm:$0xff]  }
 0x136   : > { %10473 = vmatpush3.bf16.msra.mxu0 %v11626_v41  ;;  %v11666_v41 = vld [vmem:[%s12521_s21 + $0x8b8] sm:$0xff]  }
 0x137   : > { %10495 = vmatpush3.bf16.msra.mxu1 %v11628_v44  ;;  %10502 = vmatprep.subr.bf16.mxu0 %v11629_v46  ;;  %v11669_v44 = vld [vmem:[%s12521_s21 + $0x8f0] sm:$0xff]  }
 0x138   : > { %10524 = vmatprep.subr.bf16.mxu1 %v11632_v48  ;;  %v11670_v48 = vld [vmem:[%s12521_s21 + $0x8b0] sm:$0xff]  }
 0x139   : > { %v10210_v56 = vpop.f32.mrf.mxu0  ;;  %7733 = vmatmul.mubr.bf16.vlgmr.msra.gmra.mxu0 %v874_v50 }
 0x13a   : > { %v10232_v57 = vpop.f32.mrf.mxu1  ;;  %7773 = vmatmul.mubr.bf16.vlgmr.msra.gmra.mxu1 %v876_v51  ;;  %10503 = vmatpush3.bf16.msra.mxu0 %v11631_v49  ;;  %v11671_v49 = vld [vmem:[%s12521_s21 + $0x868] sm:$0xff]  }
 0x13b   : > { %10525 = vmatpush3.bf16.msra.mxu1 %v11633_v52  ;;  %v10211_v60 = vpop.f32.mrf.mxu0  ;;  %10504 = vmatprep.subr.bf16.mxu0 %v11634_v53  ;;  %v11673_v52 = vld [vmem:[%s12521_s21 + $0x8e8] sm:$0xff]  }
 0x13c   : > { %v10233_v61 = vpop.f32.mrf.mxu1  ;;  %10526 = vmatprep.subr.bf16.mxu1 %v11636_v54  ;;  %v10212_v63 = vadd.f32 %v10211_v60, %v10210_v56  ;;  %7812 = vmatprep.mubr.bf16.mxu0 %v879_v32  ;;  %v11675_v60 = vld [vmem:[%s12521_s21 + $0x860] sm:$0xff]   ;;  %v11699_v32 = vld [vmem:[%s12521_s21 + $0x9b8] sm:$0xff]  }
 0x13d   : > { %v10234_v0 = vadd.f32 %v10233_v61, %v10232_v57  ;;  %v10213_v2 = vpop.f32.mrf.mxu0  ;;  %7852 = vmatprep.mubr.bf16.mxu1 %v881_v36  ;;  %v11674_v57 = vld [vmem:[%s12521_s21 + $0x8a8] sm:$0xff]  }
 0x13e   : > { %v10235_v4 = vpop.f32.mrf.mxu1  ;;  %10505 = vmatpush3.bf16.msra.mxu0 %v11635_v55  ;;  %v11672_v55 = vld [vmem:[%s12521_s21 + $0x828] sm:$0xff]   ;;  %v11678_v2 = vld [vmem:[%s12521_s21 + $0x8a0] sm:$0xff]  }
 0x13f   : > { %v12798_v5 = vadd.f32 %v10234_v0, %v10212_v63  ;;  %10527 = vmatpush3.bf16.msra.mxu1 %v11637_v58  ;;  %v10214_v7 = vpop.f32.mrf.mxu0  ;;  %10506 = vmatprep.subr.bf16.mxu0 %v11638_v59  ;;  %v11681_v4 = vld [vmem:[%s12521_s21 + $0x8d8] sm:$0xff]  }
 0x140   : > { %10528 = vmatprep.subr.bf16.mxu1 %v11640_v62  ;;  %v10236_v9 = vpop.f32.mrf.mxu1  ;;  %v11677_v62 = vld [vmem:[%s12521_s21 + $0x8e0] sm:$0xff]   ;;  %v11683_v7 = vld [vmem:[%s12521_s21 + $0x850] sm:$0xff]  }
 0x141   : > { %v11684_v9 = vld [vmem:[%s12521_s21 + $0x810] sm:$0xff]  }
 0x142   : > { %10507 = vmatpush3.bf16.msra.mxu0 %v11639_v1  ;;  %v11676_v1 = vld [vmem:[%s12521_s21 + $0x820] sm:$0xff]  }
 0x143   : > { %10529 = vmatpush3.bf16.msra.mxu1 %v11641_v3  ;;  %10508 = vmatprep.subr.bf16.mxu0 %v11642_v6  ;;  %v11679_v3 = vld [vmem:[%s12521_s21 + $0x858] sm:$0xff]  }
 0x144   : > { %10530 = vmatprep.subr.bf16.mxu1 %v11644_v8  ;;  %v11682_v6 = vld [vmem:[%s12521_s21 + $0x898] sm:$0xff]   ;;  %v11685_v8 = vld [vmem:[%s12521_s21 + $0x8d0] sm:$0xff]  }
 0x146   : > { %10509 = vmatpush3.bf16.msra.mxu0 %v11643_v10  ;;  %v11686_v10 = vld [vmem:[%s12521_s21 + $0x890] sm:$0xff]  }
 0x147   : > { %10531 = vmatpush3.bf16.msra.mxu1 %v11645_v11  ;;  %10510 = vmatprep.subr.bf16.mxu0 %v11646_v12  ;;  %v11687_v11 = vld [vmem:[%s12521_s21 + $0x848] sm:$0xff]  }
 0x148   : > { %10532 = vmatprep.subr.bf16.mxu1 %v11648_v13  ;;  %v11689_v12 = vld [vmem:[%s12521_s21 + $0x8c8] sm:$0xff]  }
 0x149   : > { %v11688_v13 = vld [vmem:[%s12521_s21 + $0x808] sm:$0xff]  }
 0x14a   : > { %10511 = vmatpush3.bf16.msra.mxu0 %v11647_v14  ;;  %v294_v14 = vld [vmem:[%s12535_s13 + $0x40] sm:$0xff] }
 0x14b   : > { %10533 = vmatpush3.bf16.msra.mxu1 %v11649_v15  ;;  %10512 = vmatprep.subr.bf16.mxu0 %v11650_v16  ;;  %v11690_v15 = vld [vmem:[%s12521_s21 + $0x888] sm:$0xff]   ;;  %v479_v16 = vrot.slane %v294_v14, %v12574_v42 }
 0x14c   : > { %10534 = vmatprep.subr.bf16.mxu1 %v11652_v17  ;;  %v472_v17 = vcombine.high %v294_v14, %v294_v14 }
 0x14d   : > { %v882_v30 = vpack.c.bf16 %v479_v16, %v479_v16 }
 0x14e   : > { %10513 = vmatpush3.bf16.msra.mxu0 %v11651_v18  ;;  %v11691_v18 = vld [vmem:[%s12521_s21 + $0x840] sm:$0xff]  }
 0x14f   : > { %10535 = vmatpush3.bf16.msra.mxu1 %v11653_v19  ;;  %10514 = vmatprep.subr.bf16.mxu0 %v11654_v20  ;;  %v11693_v19 = vld [vmem:[%s12521_s21 + $0x8c0] sm:$0xff]   ;;  %v487_v20 = vcombine.high %v479_v16, %v479_v16 }
 0x150   : > { %10536 = vmatprep.subr.bf16.mxu1 %v11656_v21  ;;  %v486_v21 = vrot.slane %v472_v17, %v12574_v42  ;;  %v11728_v17 = vld [vmem:[%s12521_s21 + $0xa78] sm:$0xff]  }
 0x151   : > { %v883_v23 = vpack.c.bf16 %v487_v20, %v487_v20  ;;  %v11731_v20 = vld [vmem:[%s12521_s21 + $0xaf8] sm:$0xff]  }
 0x152   : > { %10515 = vmatpush3.bf16.msra.mxu0 %v11655_v22  ;;  %v11692_v22 = vld [vmem:[%s12521_s21 + $0x800] sm:$0xff]   ;;  %v488_v25 = vcombine.high %v486_v21, %v486_v21 }
 0x153   : > { %10537 = vmatpush3.bf16.msra.mxu1 %v11657_v24  ;;  %10516 = vmatprep.subr.bf16.mxu0 %v11658_v27  ;;  %v11694_v24 = vld [vmem:[%s12521_s21 + $0x880] sm:$0xff]  }
 0x154   : > { %10538 = vmatprep.subr.bf16.mxu1 %v11660_v28  ;;  %v885_v27 = vpack.c.bf16 %v488_v25, %v488_v25  ;;  %v11698_v28 = vld [vmem:[%s12521_s21 + $0x9f8] sm:$0xff]   ;;  %v11735_v25 = vld [vmem:[%s12521_s21 + $0xaf0] sm:$0xff]  }
 0x156   : > { %10517 = vmatpush3.bf16.msra.mxu0 %v11659_v31  ;;  %v884_v31 = vpack.c.bf16 %v486_v21, %v486_v21 }
 0x157   : > { %10539 = vmatpush3.bf16.msra.mxu1 %v11661_v33  ;;  %10546 = vmatprep.subr.bf16.mxu0 %v11662_v35  ;;  %v11700_v33 = vld [vmem:[%s12521_s21 + $0x970] sm:$0xff]  }
 0x158   : > { %10568 = vmatprep.subr.bf16.mxu1 %v11665_v37  ;;  %v11701_v35 = vld [vmem:[%s12521_s21 + $0x930] sm:$0xff]  }
 0x159   : > { %v10254_v46 = vpop.f32.mrf.mxu0  ;;  %7813 = vmatmul.mubr.bf16.vlgmr.msra.gmra.mxu0 %v878_v39  ;;  %v11704_v39 = vld [vmem:[%s12521_s21 + $0x968] sm:$0xff]  }
 0x15a   : > { %v10276_v47 = vpop.f32.mrf.mxu1  ;;  %7853 = vmatmul.mubr.bf16.vlgmr.msra.gmra.mxu1 %v880_v40  ;;  %10547 = vmatpush3.bf16.msra.mxu0 %v11664_v38  ;;  %v11703_v38 = vld [vmem:[%s12521_s21 + $0x9b0] sm:$0xff]  }
 0x15b   : > { %10569 = vmatpush3.bf16.msra.mxu1 %v11666_v41  ;;  %v10255_v50 = vpop.f32.mrf.mxu0  ;;  %10548 = vmatprep.subr.bf16.mxu0 %v11667_v43  ;;  %v11706_v43 = vld [vmem:[%s12521_s21 + $0x9e8] sm:$0xff]  }
 0x15c   : > { %v10277_v51 = vpop.f32.mrf.mxu1  ;;  %10570 = vmatprep.subr.bf16.mxu1 %v11669_v44  ;;  %v10256_v53 = vadd.f32 %v10255_v50, %v10254_v46  ;;  %7892 = vmatprep.mubr.bf16.mxu0 %v883_v23  ;;  %v11705_v46 = vld [vmem:[%s12521_s21 + $0x928] sm:$0xff]   ;;  %v11732_v23 = vld [vmem:[%s12521_s21 + $0xab8] sm:$0xff]  }
 0x15d   : > { %v10278_v54 = vadd.f32 %v10277_v51, %v10276_v47  ;;  %v10257_v56 = vpop.f32.mrf.mxu0  ;;  %7932 = vmatprep.mubr.bf16.mxu1 %v885_v27  ;;  %v11708_v51 = vld [vmem:[%s12521_s21 + $0x960] sm:$0xff]  }
 0x15e   : > { %v10279_v58 = vpop.f32.mrf.mxu1  ;;  %v7335_v59 = vadd.f32 %v10256_v53, %v12798_v5  ;;  %10549 = vmatpush3.bf16.msra.mxu0 %v11668_v45  ;;  %v11680_v5 = vld [vmem:[%s12521_s21 + $0x818] sm:$0xff]   ;;  %v11710_v53 = vld [vmem:[%s12521_s21 + $0x9e0] sm:$0xff]  }
 0x15f   : > { %10571 = vmatpush3.bf16.msra.mxu1 %v11670_v48  ;;  %v10258_v61 = vpop.f32.mrf.mxu0  ;;  %10550 = vmatprep.subr.bf16.mxu0 %v11671_v49  ;;  %v11707_v48 = vld [vmem:[%s12521_s21 + $0x9a8] sm:$0xff]   ;;  %v11709_v56 = vld [vmem:[%s12521_s21 + $0x920] sm:$0xff]   ;;  %v11712_v58 = vld [vmem:[%s12521_s21 + $0x958] sm:$0xff]  }
 0x160   : > { %10572 = vmatprep.subr.bf16.mxu1 %v11673_v52  ;;  %v10280_v63 = vpop.f32.mrf.mxu1  ;;  %v12838_v0 = vadd.f32 %v10278_v54, %v7335_v59  ;;  %v11714_v59 = vld [vmem:[%s12521_s21 + $0x9d8] sm:$0xff]  }
 0x161   : > { %v11715_v61 = vld [vmem:[%s12521_s21 + $0x998] sm:$0xff]   ;;  %v11718_v63 = vld [vmem:[%s12521_s21 + $0x9d0] sm:$0xff]  }
 0x162   : > { %10551 = vmatpush3.bf16.msra.mxu0 %v11672_v55 }
 0x163   : > { %10573 = vmatpush3.bf16.msra.mxu1 %v11674_v57  ;;  %10552 = vmatprep.subr.bf16.mxu0 %v11675_v60  ;;  %v11711_v57 = vld [vmem:[%s12521_s21 + $0x9a0] sm:$0xff]   ;;  %v11713_v60 = vld [vmem:[%s12521_s21 + $0x918] sm:$0xff]  }
 0x164   : > { %10574 = vmatprep.subr.bf16.mxu1 %v11677_v62  ;;  %v11716_v62 = vld [vmem:[%s12521_s21 + $0x950] sm:$0xff]  }
 0x166   : > { %10553 = vmatpush3.bf16.msra.mxu0 %v11676_v1  ;;  %v11719_v1 = vld [vmem:[%s12521_s21 + $0x990] sm:$0xff]  }
 0x167   : > { %10575 = vmatpush3.bf16.msra.mxu1 %v11678_v2  ;;  %10554 = vmatprep.subr.bf16.mxu0 %v11679_v3  ;;  %v11720_v2 = vld [vmem:[%s12521_s21 + $0x948] sm:$0xff]  }
 0x168   : > { %10576 = vmatprep.subr.bf16.mxu1 %v11681_v4  ;;  %v11722_v3 = vld [vmem:[%s12521_s21 + $0x9c8] sm:$0xff]  }
 0x169   : > { %v11721_v4 = vld [vmem:[%s12521_s21 + $0x908] sm:$0xff]  }
 0x16a   : > { %10555 = vmatpush3.bf16.msra.mxu0 %v11680_v5  ;;  %v11723_v5 = vld [vmem:[%s12521_s21 + $0x988] sm:$0xff]  }
 0x16b   : > { %10577 = vmatpush3.bf16.msra.mxu1 %v11682_v6  ;;  %10556 = vmatprep.subr.bf16.mxu0 %v11683_v7  ;;  %v295_v6 = vld [vmem:[%s12535_s13 + $0x48] sm:$0xff] }
 0x16c   : > { %10578 = vmatprep.subr.bf16.mxu1 %v11685_v8  ;;  %v11724_v7 = vld [vmem:[%s12521_s21 + $0x940] sm:$0xff]   ;;  %v496_v8 = vrot.slane %v295_v6, %v12574_v42 }
 0x16e   : > { %10557 = vmatpush3.bf16.msra.mxu0 %v11684_v9  ;;  %v489_v9 = vcombine.high %v295_v6, %v295_v6  ;;  %v886_v21 = vpack.c.bf16 %v496_v8, %v496_v8  ;;  %v11760_v6 = vld [vmem:[%s12521_s21 + $0xa80] sm:$0xff]  }
 0x16f   : > { %10579 = vmatpush3.bf16.msra.mxu1 %v11686_v10  ;;  %10558 = vmatprep.subr.bf16.mxu0 %v11687_v11  ;;  %v11726_v10 = vld [vmem:[%s12521_s21 + $0x9c0] sm:$0xff]   ;;  %v504_v11 = vcombine.high %v496_v8, %v496_v8  ;;  %v11761_v8 = vld [vmem:[%s12521_s21 + $0xb78] sm:$0xff]  }
 0x170   : > { %10580 = vmatprep.subr.bf16.mxu1 %v11689_v12  ;;  %v503_v12 = vrot.slane %v489_v9, %v12574_v42 }
 0x171   : > { %v887_v14 = vpack.c.bf16 %v504_v11, %v504_v11  ;;  %v11764_v11 = vld [vmem:[%s12521_s21 + $0xbf8] sm:$0xff]  }
 0x172   : > { %10559 = vmatpush3.bf16.msra.mxu0 %v11688_v13  ;;  %v11725_v13 = vld [vmem:[%s12521_s21 + $0x900] sm:$0xff]   ;;  %v505_v16 = vcombine.high %v503_v12, %v503_v12 }
 0x173   : > { %10581 = vmatpush3.bf16.msra.mxu1 %v11690_v15  ;;  %10560 = vmatprep.subr.bf16.mxu0 %v11691_v18  ;;  %v11727_v15 = vld [vmem:[%s12521_s21 + $0x980] sm:$0xff]  }
 0x174   : > { %10582 = vmatprep.subr.bf16.mxu1 %v11693_v19  ;;  %v889_v18 = vpack.c.bf16 %v505_v16, %v505_v16  ;;  %v11730_v19 = vld [vmem:[%s12521_s21 + $0xa38] sm:$0xff]   ;;  %v11768_v16 = vld [vmem:[%s12521_s21 + $0xbf0] sm:$0xff]  }
 0x176   : > { %10561 = vmatpush3.bf16.msra.mxu0 %v11692_v22  ;;  %v888_v22 = vpack.c.bf16 %v503_v12, %v503_v12 }
 0x177   : > { %10583 = vmatpush3.bf16.msra.mxu1 %v11694_v24  ;;  %10590 = vmatprep.subr.bf16.mxu0 %v11695_v26  ;;  %v11733_v24 = vld [vmem:[%s12521_s21 + $0xa70] sm:$0xff]  }
 0x178   : > { %10612 = vmatprep.subr.bf16.mxu1 %v11698_v28  ;;  %v11734_v26 = vld [vmem:[%s12521_s21 + $0xa30] sm:$0xff]  }
 0x179   : > { %v10298_v36 = vpop.f32.mrf.mxu0  ;;  %7893 = vmatmul.mubr.bf16.vlgmr.msra.gmra.mxu0 %v882_v30  ;;  %v11737_v30 = vld [vmem:[%s12521_s21 + $0xa68] sm:$0xff]  }
 0x17a   : > { %v10320_v37 = vpop.f32.mrf.mxu1  ;;  %7933 = vmatmul.mubr.bf16.vlgmr.msra.gmra.mxu1 %v884_v31  ;;  %10591 = vmatpush3.bf16.msra.mxu0 %v11697_v29  ;;  %v11736_v29 = vld [vmem:[%s12521_s21 + $0xab0] sm:$0xff]  }
 0x17b   : > { %10613 = vmatpush3.bf16.msra.mxu1 %v11699_v32  ;;  %v10299_v40 = vpop.f32.mrf.mxu0  ;;  %10592 = vmatprep.subr.bf16.mxu0 %v11700_v33  ;;  %v11739_v33 = vld [vmem:[%s12521_s21 + $0xae8] sm:$0xff]  }
 0x17c   : > { %v10321_v41 = vpop.f32.mrf.mxu1  ;;  %10614 = vmatprep.subr.bf16.mxu1 %v11702_v34  ;;  %v10300_v44 = vadd.f32 %v10299_v40, %v10298_v36  ;;  %7972 = vmatprep.mubr.bf16.mxu0 %v887_v14  ;;  %v11738_v36 = vld [vmem:[%s12521_s21 + $0xa28] sm:$0xff]   ;;  %v11765_v14 = vld [vmem:[%s12521_s21 + $0xbb8] sm:$0xff]  }
 0x17d   : > { %v10322_v45 = vadd.f32 %v10321_v41, %v10320_v37  ;;  %v10301_v47 = vpop.f32.mrf.mxu0  ;;  %8012 = vmatprep.mubr.bf16.mxu1 %v889_v18  ;;  %v11741_v41 = vld [vmem:[%s12521_s21 + $0xa60] sm:$0xff]  }
 0x17e   : > { %v10323_v49 = vpop.f32.mrf.mxu1  ;;  %v7415_v50 = vadd.f32 %v10300_v44, %v12838_v0  ;;  %10593 = vmatpush3.bf16.msra.mxu0 %v11701_v35  ;;  %v11717_v0 = vld [vmem:[%s12521_s21 + $0x910] sm:$0xff]   ;;  %v11743_v44 = vld [vmem:[%s12521_s21 + $0xae0] sm:$0xff]  }
 0x17f   : > { %10615 = vmatpush3.bf16.msra.mxu1 %v11703_v38  ;;  %v10302_v52 = vpop.f32.mrf.mxu0  ;;  %10594 = vmatprep.subr.bf16.mxu0 %v11704_v39  ;;  %v11740_v38 = vld [vmem:[%s12521_s21 + $0xaa8] sm:$0xff]   ;;  %v11742_v47 = vld [vmem:[%s12521_s21 + $0xa20] sm:$0xff]   ;;  %v11745_v49 = vld [vmem:[%s12521_s21 + $0xa58] sm:$0xff]  }
 0x180   : > { %10616 = vmatprep.subr.bf16.mxu1 %v11706_v43  ;;  %v10324_v54 = vpop.f32.mrf.mxu1  ;;  %v12876_v55 = vadd.f32 %v10322_v45, %v7415_v50  ;;  %v11747_v50 = vld [vmem:[%s12521_s21 + $0xad8] sm:$0xff]  }
 0x181   : > { %v11748_v52 = vld [vmem:[%s12521_s21 + $0xa98] sm:$0xff]   ;;  %v11751_v54 = vld [vmem:[%s12521_s21 + $0xad0] sm:$0xff]  }
 0x182   : > { %10595 = vmatpush3.bf16.msra.mxu0 %v11705_v46 }
 0x183   : > { %10617 = vmatpush3.bf16.msra.mxu1 %v11707_v48  ;;  %10596 = vmatprep.subr.bf16.mxu0 %v11708_v51  ;;  %v11744_v48 = vld [vmem:[%s12521_s21 + $0xaa0] sm:$0xff]   ;;  %v11746_v51 = vld [vmem:[%s12521_s21 + $0xa18] sm:$0xff]  }
 0x184   : > { %10618 = vmatprep.subr.bf16.mxu1 %v11710_v53  ;;  %v11749_v53 = vld [vmem:[%s12521_s21 + $0xa50] sm:$0xff]  }
 0x186   : > { %10597 = vmatpush3.bf16.msra.mxu0 %v11709_v56  ;;  %v11752_v56 = vld [vmem:[%s12521_s21 + $0xa90] sm:$0xff]  }
 0x187   : > { %10619 = vmatpush3.bf16.msra.mxu1 %v11711_v57  ;;  %10598 = vmatprep.subr.bf16.mxu0 %v11712_v58  ;;  %v11753_v57 = vld [vmem:[%s12521_s21 + $0xa48] sm:$0xff]  }
 0x188   : > { %10620 = vmatprep.subr.bf16.mxu1 %v11714_v59  ;;  %v11755_v58 = vld [vmem:[%s12521_s21 + $0xac8] sm:$0xff]  }
 0x189   : > { %v11754_v59 = vld [vmem:[%s12521_s21 + $0xa08] sm:$0xff]  }
 0x18a   : > { %10599 = vmatpush3.bf16.msra.mxu0 %v11713_v60  ;;  %v11756_v60 = vld [vmem:[%s12521_s21 + $0xa88] sm:$0xff]  }
 0x18b   : > { %10621 = vmatpush3.bf16.msra.mxu1 %v11715_v61  ;;  %10600 = vmatprep.subr.bf16.mxu0 %v11716_v62  ;;  %v296_v61 = vld [vmem:[%s12535_s13 + $0x50] sm:$0xff]  ;;  %v11757_v62 = vld [vmem:[%s12521_s21 + $0xa40] sm:$0xff]  }
 0x18c   : > { %10622 = vmatprep.subr.bf16.mxu1 %v11718_v63  ;;  %v513_v63 = vrot.slane %v296_v61, %v12574_v42 }
 0x18e   : > { %10601 = vmatpush3.bf16.msra.mxu0 %v11717_v0  ;;  %v506_v0 = vcombine.high %v296_v61, %v296_v61  ;;  %v890_v12 = vpack.c.bf16 %v513_v63, %v513_v63  ;;  %v11793_v61 = vld [vmem:[%s12521_s21 + $0xb80] sm:$0xff]  }
 0x18f   : > { %10623 = vmatpush3.bf16.msra.mxu1 %v11719_v1  ;;  %10602 = vmatprep.subr.bf16.mxu0 %v11720_v2  ;;  %v11759_v1 = vld [vmem:[%s12521_s21 + $0xac0] sm:$0xff]   ;;  %v521_v2 = vcombine.high %v513_v63, %v513_v63  ;;  %v11794_v63 = vld [vmem:[%s12521_s21 + $0xc78] sm:$0xff]  }
 0x190   : > { %10624 = vmatprep.subr.bf16.mxu1 %v11722_v3  ;;  %v520_v3 = vrot.slane %v506_v0, %v12574_v42 }
 0x192   : > { %10603 = vmatpush3.bf16.msra.mxu0 %v11721_v4  ;;  %v11758_v4 = vld [vmem:[%s12521_s21 + $0xa00] sm:$0xff]  }
 0x193   : > { %10625 = vmatpush3.bf16.msra.mxu1 %v11723_v5  ;;  %10604 = vmatprep.subr.bf16.mxu0 %v11724_v7  ;;  %v891_v5 = vpack.c.bf16 %v521_v2, %v521_v2  ;;  %v522_v7 = vcombine.high %v520_v3, %v520_v3  ;;  %v11797_v2 = vld [vmem:[%s12521_s21 + $0xcf8] sm:$0xff]  }
 0x194   : > { %10626 = vmatprep.subr.bf16.mxu1 %v11726_v10  ;;  %v11763_v10 = vld [vmem:[%s12521_s21 + $0xb38] sm:$0xff]  }
 0x195   : > { %v893_v9 = vpack.c.bf16 %v522_v7, %v522_v7  ;;  %v11801_v7 = vld [vmem:[%s12521_s21 + $0xcf0] sm:$0xff]  }
 0x196   : > { %10605 = vmatpush3.bf16.msra.mxu0 %v11725_v13  ;;  %v892_v13 = vpack.c.bf16 %v520_v3, %v520_v3 }
 0x197   : > { %10627 = vmatpush3.bf16.msra.mxu1 %v11727_v15  ;;  %10634 = vmatprep.subr.bf16.mxu0 %v11728_v17  ;;  %v11766_v15 = vld [vmem:[%s12521_s21 + $0xb70] sm:$0xff]  }
 0x198   : > { %10656 = vmatprep.subr.bf16.mxu1 %v11731_v20  ;;  %v11767_v17 = vld [vmem:[%s12521_s21 + $0xb30] sm:$0xff]  }
 0x199   : > { %v10342_v27 = vpop.f32.mrf.mxu0  ;;  %7973 = vmatmul.mubr.bf16.vlgmr.msra.gmra.mxu0 %v886_v21  ;;  %v11769_v20 = vld [vmem:[%s12521_s21 + $0xbb0] sm:$0xff]   ;;  %v11770_v21 = vld [vmem:[%s12521_s21 + $0xb68] sm:$0xff]  }
 0x19a   : > { %v10364_v28 = vpop.f32.mrf.mxu1  ;;  %8013 = vmatmul.mubr.bf16.vlgmr.msra.gmra.mxu1 %v888_v22  ;;  %10635 = vmatpush3.bf16.msra.mxu0 %v11730_v19 }
 0x19b   : > { %10657 = vmatpush3.bf16.msra.mxu1 %v11732_v23  ;;  %v10343_v31 = vpop.f32.mrf.mxu0  ;;  %10636 = vmatprep.subr.bf16.mxu0 %v11733_v24  ;;  %v11772_v24 = vld [vmem:[%s12521_s21 + $0xbe8] sm:$0xff]  }
 0x19c   : > { %v10365_v32 = vpop.f32.mrf.mxu1  ;;  %10658 = vmatprep.subr.bf16.mxu1 %v11735_v25  ;;  %v10344_v34 = vadd.f32 %v10343_v31, %v10342_v27  ;;  %8052 = vmatprep.mubr.bf16.mxu0 %v891_v5  ;;  %v11771_v27 = vld [vmem:[%s12521_s21 + $0xb28] sm:$0xff]   ;;  %v11798_v5 = vld [vmem:[%s12521_s21 + $0xcb8] sm:$0xff]  }
 0x19d   : > { %v10366_v35 = vadd.f32 %v10365_v32, %v10364_v28  ;;  %v10345_v37 = vpop.f32.mrf.mxu0  ;;  %8092 = vmatprep.mubr.bf16.mxu1 %v893_v9  ;;  %v11774_v32 = vld [vmem:[%s12521_s21 + $0xb60] sm:$0xff]  }
 0x19e   : > { %v10367_v39 = vpop.f32.mrf.mxu1  ;;  %v7495_v40 = vadd.f32 %v10344_v34, %v12876_v55  ;;  %10637 = vmatpush3.bf16.msra.mxu0 %v11734_v26  ;;  %v11750_v55 = vld [vmem:[%s12521_s21 + $0xa10] sm:$0xff]   ;;  %v11776_v34 = vld [vmem:[%s12521_s21 + $0xbe0] sm:$0xff]  }
 0x19f   : > { %10659 = vmatpush3.bf16.msra.mxu1 %v11736_v29  ;;  %v10346_v43 = vpop.f32.mrf.mxu0  ;;  %10638 = vmatprep.subr.bf16.mxu0 %v11737_v30  ;;  %v11773_v29 = vld [vmem:[%s12521_s21 + $0xba8] sm:$0xff]   ;;  %v11775_v37 = vld [vmem:[%s12521_s21 + $0xb20] sm:$0xff]   ;;  %v11778_v39 = vld [vmem:[%s12521_s21 + $0xb58] sm:$0xff]  }
 0x1a0   : > { %10660 = vmatprep.subr.bf16.mxu1 %v11739_v33  ;;  %v10368_v45 = vpop.f32.mrf.mxu1  ;;  %v12914_v46 = vadd.f32 %v10366_v35, %v7495_v40  ;;  %v11780_v40 = vld [vmem:[%s12521_s21 + $0xbd8] sm:$0xff]  }
 0x1a1   : > { %v11781_v43 = vld [vmem:[%s12521_s21 + $0xb98] sm:$0xff]   ;;  %v11784_v45 = vld [vmem:[%s12521_s21 + $0xbd0] sm:$0xff]  }
 0x1a2   : > { %10639 = vmatpush3.bf16.msra.mxu0 %v11738_v36 }
 0x1a3   : > { %10661 = vmatpush3.bf16.msra.mxu1 %v11740_v38  ;;  %10640 = vmatprep.subr.bf16.mxu0 %v11741_v41  ;;  %v11777_v38 = vld [vmem:[%s12521_s21 + $0xba0] sm:$0xff]   ;;  %v11779_v41 = vld [vmem:[%s12521_s21 + $0xb18] sm:$0xff]  }
 0x1a4   : > { %10662 = vmatprep.subr.bf16.mxu1 %v11743_v44  ;;  %v11782_v44 = vld [vmem:[%s12521_s21 + $0xb50] sm:$0xff]  }
 0x1a6   : > { %10641 = vmatpush3.bf16.msra.mxu0 %v11742_v47  ;;  %v11785_v47 = vld [vmem:[%s12521_s21 + $0xb90] sm:$0xff]  }
 0x1a7   : > { %10663 = vmatpush3.bf16.msra.mxu1 %v11744_v48  ;;  %10642 = vmatprep.subr.bf16.mxu0 %v11745_v49  ;;  %v11786_v48 = vld [vmem:[%s12521_s21 + $0xb48] sm:$0xff]  }
 0x1a8   : > { %10664 = vmatprep.subr.bf16.mxu1 %v11747_v50  ;;  %v11788_v49 = vld [vmem:[%s12521_s21 + $0xbc8] sm:$0xff]  }
 0x1a9   : > { %v11787_v50 = vld [vmem:[%s12521_s21 + $0xb08] sm:$0xff]  }
 0x1aa   : > { %10643 = vmatpush3.bf16.msra.mxu0 %v11746_v51  ;;  %v11789_v51 = vld [vmem:[%s12521_s21 + $0xb88] sm:$0xff]  }
 0x1ab   : > { %10665 = vmatpush3.bf16.msra.mxu1 %v11748_v52  ;;  %10644 = vmatprep.subr.bf16.mxu0 %v11749_v53  ;;  %v297_v52 = vld [vmem:[%s12535_s13 + $0x58] sm:$0xff]  ;;  %v11790_v53 = vld [vmem:[%s12521_s21 + $0xb40] sm:$0xff]  }
 0x1ac   : > { %10666 = vmatprep.subr.bf16.mxu1 %v11751_v54  ;;  %v530_v54 = vrot.slane %v297_v52, %v12574_v42 }
 0x1ae   : > { %10645 = vmatpush3.bf16.msra.mxu0 %v11750_v55  ;;  %v523_v55 = vcombine.high %v297_v52, %v297_v52  ;;  %v894_v3 = vpack.c.bf16 %v530_v54, %v530_v54 }
 0x1af   : > { %10667 = vmatpush3.bf16.msra.mxu1 %v11752_v56  ;;  %10646 = vmatprep.subr.bf16.mxu0 %v11753_v57  ;;  %v11792_v56 = vld [vmem:[%s12521_s21 + $0xbc0] sm:$0xff]   ;;  %v538_v57 = vcombine.high %v530_v54, %v530_v54 }
 0x1b0   : > { %10668 = vmatprep.subr.bf16.mxu1 %v11755_v58  ;;  %v537_v58 = vrot.slane %v523_v55, %v12574_v42  ;;  %v11829_v55 = vld [vmem:[%s12521_s21 + $0xd38] sm:$0xff]  }
 0x1b2   : > { %10647 = vmatpush3.bf16.msra.mxu0 %v11754_v59  ;;  %v11791_v59 = vld [vmem:[%s12521_s21 + $0xb00] sm:$0xff]  }
 0x1b3   : > { %10669 = vmatpush3.bf16.msra.mxu1 %v11756_v60  ;;  %10648 = vmatprep.subr.bf16.mxu0 %v11757_v62  ;;  %v895_v60 = vpack.c.bf16 %v538_v57, %v538_v57  ;;  %v539_v62 = vcombine.high %v537_v58, %v537_v58 }
 0x1b4   : > { %10670 = vmatprep.subr.bf16.mxu1 %v11759_v1  ;;  %v11796_v1 = vld [vmem:[%s12521_s21 + $0xc38] sm:$0xff]  }
 0x1b5   : > { %v897_v0 = vpack.c.bf16 %v539_v62, %v539_v62  ;;  %v11834_v62 = vld [vmem:[%s12521_s21 + $0xdf0] sm:$0xff]  }
 0x1b6   : > { %10649 = vmatpush3.bf16.msra.mxu0 %v11758_v4  ;;  %v896_v4 = vpack.c.bf16 %v537_v58, %v537_v58 }
 0x1b7   : > { %10671 = vmatpush3.bf16.msra.mxu1 %v11760_v6  ;;  %10678 = vmatprep.subr.bf16.mxu0 %v11761_v8  ;;  %v11799_v6 = vld [vmem:[%s12521_s21 + $0xc70] sm:$0xff]  }
 0x1b8   : > { %10700 = vmatprep.subr.bf16.mxu1 %v11764_v11  ;;  %v11800_v8 = vld [vmem:[%s12521_s21 + $0xc30] sm:$0xff]  }
 0x1b9   : > { %v10386_v18 = vpop.f32.mrf.mxu0  ;;  %8053 = vmatmul.mubr.bf16.vlgmr.msra.gmra.mxu0 %v890_v12  ;;  %v11802_v11 = vld [vmem:[%s12521_s21 + $0xcb0] sm:$0xff]   ;;  %v11803_v12 = vld [vmem:[%s12521_s21 + $0xc68] sm:$0xff]  }
 0x1ba   : > { %v10408_v19 = vpop.f32.mrf.mxu1  ;;  %8093 = vmatmul.mubr.bf16.vlgmr.msra.gmra.mxu1 %v892_v13  ;;  %10679 = vmatpush3.bf16.msra.mxu0 %v11763_v10 }
 0x1bb   : > { %10701 = vmatpush3.bf16.msra.mxu1 %v11765_v14  ;;  %v10387_v22 = vpop.f32.mrf.mxu0  ;;  %10680 = vmatprep.subr.bf16.mxu0 %v11766_v15  ;;  %v11805_v15 = vld [vmem:[%s12521_s21 + $0xce8] sm:$0xff]  }
 0x1bc   : > { %v10409_v23 = vpop.f32.mrf.mxu1  ;;  %10702 = vmatprep.subr.bf16.mxu1 %v11768_v16  ;;  %v10388_v25 = vadd.f32 %v10387_v22, %v10386_v18  ;;  %8132 = vmatprep.mubr.bf16.mxu0 %v895_v60  ;;  %v11804_v18 = vld [vmem:[%s12521_s21 + $0xc28] sm:$0xff]   ;;  %v11831_v60 = vld [vmem:[%s12521_s21 + $0xdb8] sm:$0xff]  }
 0x1bd   : > { %v10410_v26 = vadd.f32 %v10409_v23, %v10408_v19  ;;  %v10389_v28 = vpop.f32.mrf.mxu0  ;;  %8172 = vmatprep.mubr.bf16.mxu1 %v897_v0  ;;  %v11807_v23 = vld [vmem:[%s12521_s21 + $0xc60] sm:$0xff]  }
 0x1be   : > { %v10411_v30 = vpop.f32.mrf.mxu1  ;;  %v7575_v31 = vadd.f32 %v10388_v25, %v12914_v46  ;;  %10681 = vmatpush3.bf16.msra.mxu0 %v11767_v17  ;;  %v11783_v46 = vld [vmem:[%s12521_s21 + $0xb10] sm:$0xff]   ;;  %v11809_v25 = vld [vmem:[%s12521_s21 + $0xce0] sm:$0xff]  }
 0x1bf   : > { %10703 = vmatpush3.bf16.msra.mxu1 %v11769_v20  ;;  %v10390_v33 = vpop.f32.mrf.mxu0  ;;  %10682 = vmatprep.subr.bf16.mxu0 %v11770_v21  ;;  %v11806_v20 = vld [vmem:[%s12521_s21 + $0xca8] sm:$0xff]   ;;  %v11808_v28 = vld [vmem:[%s12521_s21 + $0xc20] sm:$0xff]   ;;  %v11811_v30 = vld [vmem:[%s12521_s21 + $0xc58] sm:$0xff]  }
 0x1c0   : > { %10704 = vmatprep.subr.bf16.mxu1 %v11772_v24  ;;  %v10412_v35 = vpop.f32.mrf.mxu1  ;;  %v12952_v36 = vadd.f32 %v10410_v26, %v7575_v31  ;;  %v11813_v31 = vld [vmem:[%s12521_s21 + $0xcd8] sm:$0xff]  }
 0x1c1   : > { %v11814_v33 = vld [vmem:[%s12521_s21 + $0xc98] sm:$0xff]   ;;  %v11817_v35 = vld [vmem:[%s12521_s21 + $0xcd0] sm:$0xff]  }
 0x1c2   : > { %10683 = vmatpush3.bf16.msra.mxu0 %v11771_v27 }
 0x1c3   : > { %10705 = vmatpush3.bf16.msra.mxu1 %v11773_v29  ;;  %10684 = vmatprep.subr.bf16.mxu0 %v11774_v32  ;;  %v11810_v29 = vld [vmem:[%s12521_s21 + $0xca0] sm:$0xff]   ;;  %v11812_v32 = vld [vmem:[%s12521_s21 + $0xc18] sm:$0xff]  }
 0x1c4   : > { %10706 = vmatprep.subr.bf16.mxu1 %v11776_v34  ;;  %v11815_v34 = vld [vmem:[%s12521_s21 + $0xc50] sm:$0xff]  }
 0x1c6   : > { %10685 = vmatpush3.bf16.msra.mxu0 %v11775_v37  ;;  %v11818_v37 = vld [vmem:[%s12521_s21 + $0xc90] sm:$0xff]  }
 0x1c7   : > { %10707 = vmatpush3.bf16.msra.mxu1 %v11777_v38  ;;  %10686 = vmatprep.subr.bf16.mxu0 %v11778_v39  ;;  %v11819_v38 = vld [vmem:[%s12521_s21 + $0xc48] sm:$0xff]  }
 0x1c8   : > { %10708 = vmatprep.subr.bf16.mxu1 %v11780_v40  ;;  %v11821_v39 = vld [vmem:[%s12521_s21 + $0xcc8] sm:$0xff]  }
 0x1c9   : > { %v11820_v40 = vld [vmem:[%s12521_s21 + $0xc08] sm:$0xff]  }
 0x1ca   : > { %10687 = vmatpush3.bf16.msra.mxu0 %v11779_v41  ;;  %v11822_v41 = vld [vmem:[%s12521_s21 + $0xc88] sm:$0xff]  }
 0x1cb   : > { %10709 = vmatpush3.bf16.msra.mxu1 %v11781_v43  ;;  %10688 = vmatprep.subr.bf16.mxu0 %v11782_v44  ;;  %v11823_v43 = vld [vmem:[%s12521_s21 + $0xc40] sm:$0xff]  }
 0x1cc   : > { %10710 = vmatprep.subr.bf16.mxu1 %v11784_v45  ;;  %v298_v44 = vld [vmem:[%s12535_s13 + $0x60] sm:$0xff] }
 0x1cd   : > { %v11825_v45 = vld [vmem:[%s12521_s21 + $0xcc0] sm:$0xff]  }
 0x1ce   : > { %10689 = vmatpush3.bf16.msra.mxu0 %v11783_v46  ;;  %v547_v46 = vrot.slane %v298_v44, %v12574_v42 }
 0x1cf   : > { %10711 = vmatpush3.bf16.msra.mxu1 %v11785_v47  ;;  %10690 = vmatprep.subr.bf16.mxu0 %v11786_v48  ;;  %v540_v47 = vcombine.high %v298_v44, %v298_v44  ;;  %v11824_v48 = vld [vmem:[%s12521_s21 + $0xc00] sm:$0xff]   ;;  %v11860_v44 = vld [vmem:[%s12521_s21 + $0xe78] sm:$0xff]  }
 0x1d0   : > { %10712 = vmatprep.subr.bf16.mxu1 %v11788_v49  ;;  %v555_v49 = vcombine.high %v547_v46, %v547_v46  ;;  %v898_v57 = vpack.c.bf16 %v547_v46, %v547_v46  ;;  %v11862_v46 = vld [vmem:[%s12521_s21 + $0xe38] sm:$0xff]  }
 0x1d2   : > { %10691 = vmatpush3.bf16.msra.mxu0 %v11787_v50  ;;  %v554_v50 = vrot.slane %v540_v47, %v12574_v42  ;;  %v899_v52 = vpack.c.bf16 %v555_v49, %v555_v49  ;;  %v11863_v47 = vld [vmem:[%s12521_s21 + $0xef8] sm:$0xff]  }
 0x1d3   : > { %10713 = vmatpush3.bf16.msra.mxu1 %v11789_v51  ;;  %10692 = vmatprep.subr.bf16.mxu0 %v11790_v53  ;;  %v11826_v51 = vld [vmem:[%s12521_s21 + $0xc80] sm:$0xff]   ;;  %v11827_v53 = vld [vmem:[%s12521_s21 + $0xd78] sm:$0xff]  }
 0x1d4   : > { %10714 = vmatprep.subr.bf16.mxu1 %v11792_v56  ;;  %v556_v54 = vcombine.high %v554_v50, %v554_v50  ;;  %v11830_v56 = vld [vmem:[%s12521_s21 + $0xdf8] sm:$0xff]  }
 0x1d6   : > { %10693 = vmatpush3.bf16.msra.mxu0 %v11791_v59  ;;  %v901_v58 = vpack.c.bf16 %v556_v54, %v556_v54  ;;  %v900_v59 = vpack.c.bf16 %v554_v50, %v554_v50  ;;  %v11866_v54 = vld [vmem:[%s12521_s21 + $0xe30] sm:$0xff]  }
 0x1d7   : > { %10715 = vmatpush3.bf16.msra.mxu1 %v11793_v61  ;;  %10722 = vmatprep.subr.bf16.mxu0 %v11794_v63  ;;  %v11832_v61 = vld [vmem:[%s12521_s21 + $0xd70] sm:$0xff]  }
 0x1d8   : > { %10744 = vmatprep.subr.bf16.mxu1 %v11797_v2  ;;  %v11833_v63 = vld [vmem:[%s12521_s21 + $0xd30] sm:$0xff]  }
 0x1d9   : > { %v10430_v9 = vpop.f32.mrf.mxu0  ;;  %8133 = vmatmul.mubr.bf16.vlgmr.msra.gmra.mxu0 %v894_v3  ;;  %v11835_v2 = vld [vmem:[%s12521_s21 + $0xdb0] sm:$0xff]   ;;  %v11836_v3 = vld [vmem:[%s12521_s21 + $0xd68] sm:$0xff]  }
 0x1da   : > { %v10452_v10 = vpop.f32.mrf.mxu1  ;;  %8173 = vmatmul.mubr.bf16.vlgmr.msra.gmra.mxu1 %v896_v4  ;;  %10723 = vmatpush3.bf16.msra.mxu0 %v11796_v1 }
 0x1db   : > { %10745 = vmatpush3.bf16.msra.mxu1 %v11798_v5  ;;  %v10431_v13 = vpop.f32.mrf.mxu0  ;;  %10724 = vmatprep.subr.bf16.mxu0 %v11799_v6  ;;  %v11838_v6 = vld [vmem:[%s12521_s21 + $0xde8] sm:$0xff]  }
 0x1dc   : > { %v10453_v14 = vpop.f32.mrf.mxu1  ;;  %10746 = vmatprep.subr.bf16.mxu1 %v11801_v7  ;;  %v10432_v16 = vadd.f32 %v10431_v13, %v10430_v9  ;;  %8212 = vmatprep.mubr.bf16.mxu0 %v899_v52  ;;  %v11837_v9 = vld [vmem:[%s12521_s21 + $0xd28] sm:$0xff]   ;;  %v11865_v52 = vld [vmem:[%s12521_s21 + $0xe70] sm:$0xff]  }
 0x1dd   : > { %v10454_v17 = vadd.f32 %v10453_v14, %v10452_v10  ;;  %v10433_v19 = vpop.f32.mrf.mxu0  ;;  %8252 = vmatprep.mubr.bf16.mxu1 %v901_v58  ;;  %v11840_v14 = vld [vmem:[%s12521_s21 + $0xd60] sm:$0xff]   ;;  %v11869_v58 = vld [vmem:[%s12521_s21 + $0xe68] sm:$0xff]  }
 0x1de   : > { %v10455_v21 = vpop.f32.mrf.mxu1  ;;  %v7655_v22 = vadd.f32 %v10432_v16, %v12952_v36  ;;  %10725 = vmatpush3.bf16.msra.mxu0 %v11800_v8  ;;  %v11816_v36 = vld [vmem:[%s12521_s21 + $0xc10] sm:$0xff]   ;;  %v11842_v16 = vld [vmem:[%s12521_s21 + $0xde0] sm:$0xff]  }
 0x1df   : > { %10747 = vmatpush3.bf16.msra.mxu1 %v11802_v11  ;;  %v10434_v24 = vpop.f32.mrf.mxu0  ;;  %10726 = vmatprep.subr.bf16.mxu0 %v11803_v12  ;;  %v11839_v11 = vld [vmem:[%s12521_s21 + $0xda8] sm:$0xff]   ;;  %v11841_v19 = vld [vmem:[%s12521_s21 + $0xd20] sm:$0xff]   ;;  %v11844_v21 = vld [vmem:[%s12521_s21 + $0xd58] sm:$0xff]  }
 0x1e0   : > { %10748 = vmatprep.subr.bf16.mxu1 %v11805_v15  ;;  %v10456_v26 = vpop.f32.mrf.mxu1  ;;  %v12990_v27 = vadd.f32 %v10454_v17, %v7655_v22  ;;  %v11846_v22 = vld [vmem:[%s12521_s21 + $0xdd8] sm:$0xff]  }
 0x1e1   : > { %v11847_v24 = vld [vmem:[%s12521_s21 + $0xd98] sm:$0xff]   ;;  %v11850_v26 = vld [vmem:[%s12521_s21 + $0xdd0] sm:$0xff]  }
 0x1e2   : > { %10727 = vmatpush3.bf16.msra.mxu0 %v11804_v18 }
 0x1e3   : > { %10749 = vmatpush3.bf16.msra.mxu1 %v11806_v20  ;;  %10728 = vmatprep.subr.bf16.mxu0 %v11807_v23  ;;  %v11843_v20 = vld [vmem:[%s12521_s21 + $0xda0] sm:$0xff]   ;;  %v11845_v23 = vld [vmem:[%s12521_s21 + $0xd18] sm:$0xff]  }
 0x1e4   : > { %10750 = vmatprep.subr.bf16.mxu1 %v11809_v25  ;;  %v11848_v25 = vld [vmem:[%s12521_s21 + $0xd50] sm:$0xff]  }
 0x1e6   : > { %10729 = vmatpush3.bf16.msra.mxu0 %v11808_v28  ;;  %v11851_v28 = vld [vmem:[%s12521_s21 + $0xd90] sm:$0xff]  }
 0x1e7   : > { %10751 = vmatpush3.bf16.msra.mxu1 %v11810_v29  ;;  %10730 = vmatprep.subr.bf16.mxu0 %v11811_v30  ;;  %v11852_v29 = vld [vmem:[%s12521_s21 + $0xd48] sm:$0xff]  }
 0x1e8   : > { %10752 = vmatprep.subr.bf16.mxu1 %v11813_v31  ;;  %v11854_v30 = vld [vmem:[%s12521_s21 + $0xdc8] sm:$0xff]  }
 0x1e9   : > { %v11853_v31 = vld [vmem:[%s12521_s21 + $0xd08] sm:$0xff]  }
 0x1ea   : > { %10731 = vmatpush3.bf16.msra.mxu0 %v11812_v32  ;;  %v11855_v32 = vld [vmem:[%s12521_s21 + $0xd88] sm:$0xff]  }
 0x1eb   : > { %10753 = vmatpush3.bf16.msra.mxu1 %v11814_v33  ;;  %10732 = vmatprep.subr.bf16.mxu0 %v11815_v34  ;;  %v11856_v33 = vld [vmem:[%s12521_s21 + $0xd40] sm:$0xff]  }
 0x1ec   : > { %10754 = vmatprep.subr.bf16.mxu1 %v11817_v35  ;;  %v299_v34 = vld [vmem:[%s12535_s13 + $0x68] sm:$0xff] }
 0x1ed   : > { %v11858_v35 = vld [vmem:[%s12521_s21 + $0xdc0] sm:$0xff]  }
 0x1ee   : > { %10733 = vmatpush3.bf16.msra.mxu0 %v11816_v36  ;;  %v564_v36 = vrot.slane %v299_v34, %v12574_v42 }
 0x1ef   : > { %10755 = vmatpush3.bf16.msra.mxu1 %v11818_v37  ;;  %10734 = vmatprep.subr.bf16.mxu0 %v11819_v38  ;;  %v557_v37 = vcombine.high %v299_v34, %v299_v34  ;;  %v11857_v38 = vld [vmem:[%s12521_s21 + $0xd00] sm:$0xff]   ;;  %v11893_v34 = vld [vmem:[%s12521_s21 + $0xf78] sm:$0xff]  }
 0x1f0   : > { %10756 = vmatprep.subr.bf16.mxu1 %v11821_v39  ;;  %v572_v39 = vcombine.high %v564_v36, %v564_v36 }
 0x1f2   : > { %10735 = vmatpush3.bf16.msra.mxu0 %v11820_v40  ;;  %v571_v40 = vrot.slane %v557_v37, %v12574_v42  ;;  %v11896_v37 = vld [vmem:[%s12521_s21 + $0xff8] sm:$0xff]  }
 0x1f3   : > { %10757 = vmatpush3.bf16.msra.mxu1 %v11822_v41  ;;  %10736 = vmatprep.subr.bf16.mxu0 %v11823_v43  ;;  %v11859_v41 = vld [vmem:[%s12521_s21 + $0xd80] sm:$0xff]   ;;  %v903_v43 = vpack.c.bf16 %v572_v39, %v572_v39 }
 0x1f4   : > { %10758 = vmatprep.subr.bf16.mxu1 %v11825_v45  ;;  %v573_v45 = vcombine.high %v571_v40, %v571_v40  ;;  %v904_v50 = vpack.c.bf16 %v571_v40, %v571_v40 }
 0x1f6   : > { %10737 = vmatpush3.bf16.msra.mxu0 %v11824_v48  ;;  %v902_v48 = vpack.c.bf16 %v564_v36, %v564_v36  ;;  %v905_v49 = vpack.c.bf16 %v573_v45, %v573_v45  ;;  %v11895_v36 = vld [vmem:[%s12521_s21 + $0xf38] sm:$0xff]   ;;  %v11899_v45 = vld [vmem:[%s12521_s21 + $0xf30] sm:$0xff]  }
 0x1f7   : > { %10759 = vmatpush3.bf16.msra.mxu1 %v11826_v51  ;;  %10766 = vmatprep.subr.bf16.mxu0 %v11827_v53  ;;  %v11864_v51 = vld [vmem:[%s12521_s21 + $0xeb8] sm:$0xff]   ;;  %v11867_v53 = vld [vmem:[%s12521_s21 + $0xef0] sm:$0xff]  }
 0x1f8   : > { %10788 = vmatprep.subr.bf16.mxu1 %v11830_v56 }
 0x1f9   : > { %v10474_v0 = vpop.f32.mrf.mxu0  ;;  %8213 = vmatmul.mubr.bf16.vlgmr.msra.gmra.mxu0 %v898_v57  ;;  %v11868_v57 = vld [vmem:[%s12521_s21 + $0xeb0] sm:$0xff]  }
 0x1fa   : > { %v10496_v1 = vpop.f32.mrf.mxu1  ;;  %8253 = vmatmul.mubr.bf16.vlgmr.msra.gmra.mxu1 %v900_v59  ;;  %10767 = vmatpush3.bf16.msra.mxu0 %v11829_v55 }
 0x1fb   : > { %10789 = vmatpush3.bf16.msra.mxu1 %v11831_v60  ;;  %v10475_v4 = vpop.f32.mrf.mxu0  ;;  %10768 = vmatprep.subr.bf16.mxu0 %v11832_v61  ;;  %v11871_v61 = vld [vmem:[%s12521_s21 + $0xee8] sm:$0xff]  }
 0x1fc   : > { %v10497_v5 = vpop.f32.mrf.mxu1  ;;  %10790 = vmatprep.subr.bf16.mxu1 %v11834_v62  ;;  %v10476_v7 = vadd.f32 %v10475_v4, %v10474_v0  ;;  %8292 = vmatprep.mubr.bf16.mxu0 %v903_v43  ;;  %v11870_v0 = vld [vmem:[%s12521_s21 + $0xe28] sm:$0xff]   ;;  %v11898_v43 = vld [vmem:[%s12521_s21 + $0xf70] sm:$0xff]  }
 0x1fd   : > { %v10498_v8 = vadd.f32 %v10497_v5, %v10496_v1  ;;  %v10477_v10 = vpop.f32.mrf.mxu0  ;;  %8332 = vmatprep.mubr.bf16.mxu1 %v905_v49  ;;  %v11873_v5 = vld [vmem:[%s12521_s21 + $0xe60] sm:$0xff]   ;;  %v11902_v49 = vld [vmem:[%s12521_s21 + $0xf68] sm:$0xff]  }
 0x1fe   : > { %v10499_v12 = vpop.f32.mrf.mxu1  ;;  %v7735_v13 = vadd.f32 %v10476_v7, %v12990_v27  ;;  %10769 = vmatpush3.bf16.msra.mxu0 %v11833_v63  ;;  %v11849_v27 = vld [vmem:[%s12521_s21 + $0xd10] sm:$0xff]   ;;  %v11875_v7 = vld [vmem:[%s12521_s21 + $0xee0] sm:$0xff]  }
 0x1ff   : > { %10791 = vmatpush3.bf16.msra.mxu1 %v11835_v2  ;;  %v10478_v15 = vpop.f32.mrf.mxu0  ;;  %10770 = vmatprep.subr.bf16.mxu0 %v11836_v3  ;;  %v11872_v2 = vld [vmem:[%s12521_s21 + $0xea8] sm:$0xff]   ;;  %v11874_v10 = vld [vmem:[%s12521_s21 + $0xe20] sm:$0xff]   ;;  %v11877_v12 = vld [vmem:[%s12521_s21 + $0xe58] sm:$0xff]  }
 0x200   : > { %10792 = vmatprep.subr.bf16.mxu1 %v11838_v6  ;;  %v10500_v17 = vpop.f32.mrf.mxu1  ;;  %v13028_v18 = vadd.f32 %v10498_v8, %v7735_v13  ;;  %v11879_v13 = vld [vmem:[%s12521_s21 + $0xed8] sm:$0xff]  }
 0x201   : > { %v11880_v15 = vld [vmem:[%s12521_s21 + $0xe98] sm:$0xff]   ;;  %v11883_v17 = vld [vmem:[%s12521_s21 + $0xed0] sm:$0xff]  }
 0x202   : > { %10771 = vmatpush3.bf16.msra.mxu0 %v11837_v9 }
 0x203   : > { %10793 = vmatpush3.bf16.msra.mxu1 %v11839_v11  ;;  %10772 = vmatprep.subr.bf16.mxu0 %v11840_v14  ;;  %v11876_v11 = vld [vmem:[%s12521_s21 + $0xea0] sm:$0xff]   ;;  %v11878_v14 = vld [vmem:[%s12521_s21 + $0xe18] sm:$0xff]  }
 0x204   : > { %10794 = vmatprep.subr.bf16.mxu1 %v11842_v16  ;;  %v11881_v16 = vld [vmem:[%s12521_s21 + $0xe50] sm:$0xff]  }
 0x206   : > { %10773 = vmatpush3.bf16.msra.mxu0 %v11841_v19  ;;  %v11884_v19 = vld [vmem:[%s12521_s21 + $0xe90] sm:$0xff]  }
 0x207   : > { %10795 = vmatpush3.bf16.msra.mxu1 %v11843_v20  ;;  %10774 = vmatprep.subr.bf16.mxu0 %v11844_v21  ;;  %v11885_v20 = vld [vmem:[%s12521_s21 + $0xe48] sm:$0xff]  }
 0x208   : > { %10796 = vmatprep.subr.bf16.mxu1 %v11846_v22  ;;  %v11887_v21 = vld [vmem:[%s12521_s21 + $0xec8] sm:$0xff]  }
 0x209   : > { %v11886_v22 = vld [vmem:[%s12521_s21 + $0xe08] sm:$0xff]  }
 0x20a   : > { %10775 = vmatpush3.bf16.msra.mxu0 %v11845_v23  ;;  %v11888_v23 = vld [vmem:[%s12521_s21 + $0xe88] sm:$0xff]  }
 0x20b   : > { %10797 = vmatpush3.bf16.msra.mxu1 %v11847_v24  ;;  %10776 = vmatprep.subr.bf16.mxu0 %v11848_v25  ;;  %v11889_v24 = vld [vmem:[%s12521_s21 + $0xe40] sm:$0xff]   ;;  %v300_v25 = vld [vmem:[%s12535_s13 + $0x70] sm:$0xff] }
 0x20c   : > { %10798 = vmatprep.subr.bf16.mxu1 %v11850_v26  ;;  %v11891_v26 = vld [vmem:[%s12521_s21 + $0xec0] sm:$0xff]  }
 0x20e   : > { %10777 = vmatpush3.bf16.msra.mxu0 %v11849_v27  ;;  %v581_v27 = vrot.slane %v300_v25, %v12574_v42 }
 0x20f   : > { %10799 = vmatpush3.bf16.msra.mxu1 %v11851_v28  ;;  %10778 = vmatprep.subr.bf16.mxu0 %v11852_v29  ;;  %v574_v28 = vcombine.high %v300_v25, %v300_v25  ;;  %v11890_v29 = vld [vmem:[%s12521_s21 + $0xe00] sm:$0xff]  }
 0x210   : > { %10800 = vmatprep.subr.bf16.mxu1 %v11854_v30  ;;  %v589_v30 = vcombine.high %v581_v27, %v581_v27 }
 0x212   : > { %10779 = vmatpush3.bf16.msra.mxu0 %v11853_v31  ;;  %v588_v31 = vrot.slane %v574_v28, %v12574_v42 }
 0x213   : > { %10801 = vmatpush3.bf16.msra.mxu1 %v11855_v32  ;;  %10780 = vmatprep.subr.bf16.mxu0 %v11856_v33  ;;  %v11892_v32 = vld [vmem:[%s12521_s21 + $0xe80] sm:$0xff]   ;;  %v907_v33 = vpack.c.bf16 %v589_v30, %v589_v30 }
 0x214   : > { %10802 = vmatprep.subr.bf16.mxu1 %v11858_v35  ;;  %v590_v35 = vcombine.high %v588_v31, %v588_v31  ;;  %v908_v40 = vpack.c.bf16 %v588_v31, %v588_v31 }
 0x216   : > { %10781 = vmatpush3.bf16.msra.mxu0 %v11857_v38  ;;  %v906_v38 = vpack.c.bf16 %v581_v27, %v581_v27  ;;  %v909_v39 = vpack.c.bf16 %v590_v35, %v590_v35  ;;  %v11929_v27 = vld [vmem:[%s12521_s21 + $0x10f8] sm:$0xff]  }
 0x217   : > { %10803 = vmatpush3.bf16.msra.mxu1 %v11859_v41  ;;  %10810 = vmatprep.subr.bf16.mxu0 %v11860_v44  ;;  %v11897_v41 = vld [vmem:[%s12521_s21 + $0xfb8] sm:$0xff]   ;;  %v11900_v44 = vld [vmem:[%s12521_s21 + $0xff0] sm:$0xff]  }
 0x218   : > { %10832 = vmatprep.subr.bf16.mxu1 %v11863_v47 }
 0x219   : > { %v10518_v55 = vpop.f32.mrf.mxu0  ;;  %8293 = vmatmul.mubr.bf16.vlgmr.msra.gmra.mxu0 %v902_v48  ;;  %v11901_v48 = vld [vmem:[%s12521_s21 + $0xfb0] sm:$0xff]  }
 0x21a   : > { %v10540_v56 = vpop.f32.mrf.mxu1  ;;  %8333 = vmatmul.mubr.bf16.vlgmr.msra.gmra.mxu1 %v904_v50  ;;  %10811 = vmatpush3.bf16.msra.mxu0 %v11862_v46 }
 0x21b   : > { %10833 = vmatpush3.bf16.msra.mxu1 %v11864_v51  ;;  %v10519_v59 = vpop.f32.mrf.mxu0  ;;  %10812 = vmatprep.subr.bf16.mxu0 %v11865_v52  ;;  %v11904_v52 = vld [vmem:[%s12521_s21 + $0xfe8] sm:$0xff]  }
 0x21c   : > { %v10541_v60 = vpop.f32.mrf.mxu1  ;;  %10834 = vmatprep.subr.bf16.mxu1 %v11867_v53  ;;  %v10520_v62 = vadd.f32 %v10519_v59, %v10518_v55  ;;  %8372 = vmatprep.mubr.bf16.mxu0 %v907_v33  ;;  %v11903_v55 = vld [vmem:[%s12521_s21 + $0xf28] sm:$0xff]   ;;  %v11931_v33 = vld [vmem:[%s12521_s21 + $0x1070] sm:$0xff]  }
 0x21d   : > { %v10542_v63 = vadd.f32 %v10541_v60, %v10540_v56  ;;  %v10521_v1 = vpop.f32.mrf.mxu0  ;;  %8412 = vmatprep.mubr.bf16.mxu1 %v909_v39  ;;  %v11906_v60 = vld [vmem:[%s12521_s21 + $0xf60] sm:$0xff]  }
 0x21e   : > { %v10543_v3 = vpop.f32.mrf.mxu1  ;;  %v7815_v4 = vadd.f32 %v10520_v62, %v13028_v18  ;;  %10813 = vmatpush3.bf16.msra.mxu0 %v11866_v54  ;;  %v11882_v18 = vld [vmem:[%s12521_s21 + $0xe10] sm:$0xff]   ;;  %v11908_v62 = vld [vmem:[%s12521_s21 + $0xfe0] sm:$0xff]  }
 0x21f   : > { %10835 = vmatpush3.bf16.msra.mxu1 %v11868_v57  ;;  %v10522_v6 = vpop.f32.mrf.mxu0  ;;  %10814 = vmatprep.subr.bf16.mxu0 %v11869_v58  ;;  %v11905_v57 = vld [vmem:[%s12521_s21 + $0xfa8] sm:$0xff]   ;;  %v11907_v1 = vld [vmem:[%s12521_s21 + $0xf20] sm:$0xff]   ;;  %v11910_v3 = vld [vmem:[%s12521_s21 + $0xf58] sm:$0xff]  }
 0x220   : > { %10836 = vmatprep.subr.bf16.mxu1 %v11871_v61  ;;  %v10544_v8 = vpop.f32.mrf.mxu1  ;;  %v13066_v9 = vadd.f32 %v10542_v63, %v7815_v4  ;;  %v11912_v4 = vld [vmem:[%s12521_s21 + $0xfd8] sm:$0xff]  }
 0x221   : > { %v11913_v6 = vld [vmem:[%s12521_s21 + $0xf98] sm:$0xff]   ;;  %v11916_v8 = vld [vmem:[%s12521_s21 + $0xfd0] sm:$0xff]  }
 0x222   : > { %10815 = vmatpush3.bf16.msra.mxu0 %v11870_v0 }
 0x223   : > { %10837 = vmatpush3.bf16.msra.mxu1 %v11872_v2  ;;  %10816 = vmatprep.subr.bf16.mxu0 %v11873_v5  ;;  %v11909_v2 = vld [vmem:[%s12521_s21 + $0xfa0] sm:$0xff]   ;;  %v11911_v5 = vld [vmem:[%s12521_s21 + $0xf18] sm:$0xff]  }
 0x224   : > { %10838 = vmatprep.subr.bf16.mxu1 %v11875_v7  ;;  %v11914_v7 = vld [vmem:[%s12521_s21 + $0xf50] sm:$0xff]  }
 0x226   : > { %10817 = vmatpush3.bf16.msra.mxu0 %v11874_v10  ;;  %v11917_v10 = vld [vmem:[%s12521_s21 + $0xf90] sm:$0xff]  }
 0x227   : > { %10839 = vmatpush3.bf16.msra.mxu1 %v11876_v11  ;;  %10818 = vmatprep.subr.bf16.mxu0 %v11877_v12  ;;  %v11918_v11 = vld [vmem:[%s12521_s21 + $0xf48] sm:$0xff]  }
 0x228   : > { %10840 = vmatprep.subr.bf16.mxu1 %v11879_v13  ;;  %v11920_v12 = vld [vmem:[%s12521_s21 + $0xfc8] sm:$0xff]  }
 0x229   : > { %v11919_v13 = vld [vmem:[%s12521_s21 + $0xf08] sm:$0xff]  }
 0x22a   : > { %10819 = vmatpush3.bf16.msra.mxu0 %v11878_v14  ;;  %v11921_v14 = vld [vmem:[%s12521_s21 + $0xf88] sm:$0xff]  }
 0x22b   : > { %10841 = vmatpush3.bf16.msra.mxu1 %v11880_v15  ;;  %10820 = vmatprep.subr.bf16.mxu0 %v11881_v16  ;;  %v11922_v15 = vld [vmem:[%s12521_s21 + $0xf40] sm:$0xff]  }
 0x22c   : > { %10842 = vmatprep.subr.bf16.mxu1 %v11883_v17  ;;  %v11924_v16 = vld [vmem:[%s12521_s21 + $0xfc0] sm:$0xff]   ;;  %v301_v17 = vld [vmem:[%s12535_s13 + $0x78] sm:$0xff] }
 0x22e   : > { %10821 = vmatpush3.bf16.msra.mxu0 %v11882_v18  ;;  %v598_v18 = vrot.slane %v301_v17, %v12574_v42 }
 0x22f   : > { %10843 = vmatpush3.bf16.msra.mxu1 %v11884_v19  ;;  %10822 = vmatprep.subr.bf16.mxu0 %v11885_v20  ;;  %v591_v19 = vcombine.high %v301_v17, %v301_v17  ;;  %v11923_v20 = vld [vmem:[%s12521_s21 + $0xf00] sm:$0xff]  }
 0x230   : > { %10844 = vmatprep.subr.bf16.mxu1 %v11887_v21  ;;  %v606_v21 = vcombine.high %v598_v18, %v598_v18  ;;  %v910_v28 = vpack.c.bf16 %v598_v18, %v598_v18  ;;  %v11962_v18 = vld [vmem:[%s12521_s21 + $0x11f8] sm:$0xff]  }
 0x232   : > { %10823 = vmatpush3.bf16.msra.mxu0 %v11886_v22  ;;  %v11925_v22 = vld [vmem:[%s12521_s21 + $0xf80] sm:$0xff]   ;;  %v911_v25 = vpack.c.bf16 %v606_v21, %v606_v21 }
 0x233   : > { %10845 = vmatpush3.bf16.msra.mxu1 %v11888_v23  ;;  %10824 = vmatprep.subr.bf16.mxu0 %v11889_v24  ;;  %v605_v23 = vrot.slane %v591_v19, %v12574_v42  ;;  %v11926_v24 = vld [vmem:[%s12521_s21 + $0x1078] sm:$0xff]  }
 0x234   : > { %10846 = vmatprep.subr.bf16.mxu1 %v11891_v26 }
 0x235   : > { %v607_v26 = vcombine.high %v605_v23, %v605_v23  ;;  %v912_v31 = vpack.c.bf16 %v605_v23, %v605_v23  ;;  %v11963_v23 = vld [vmem:[%s12521_s21 + $0x11b8] sm:$0xff]  }
 0x236   : > { %10825 = vmatpush3.bf16.msra.mxu0 %v11890_v29  ;;  %v11928_v29 = vld [vmem:[%s12521_s21 + $0x1038] sm:$0xff]  }
 0x237   : > { %10847 = vmatpush3.bf16.msra.mxu1 %v11892_v32  ;;  %10854 = vmatprep.subr.bf16.mxu0 %v11893_v34  ;;  %v913_v30 = vpack.c.bf16 %v607_v26, %v607_v26  ;;  %v11930_v32 = vld [vmem:[%s12521_s21 + $0x10b8] sm:$0xff]   ;;  %v11933_v34 = vld [vmem:[%s12521_s21 + $0x10f0] sm:$0xff]  }
 0x238   : > { %10876 = vmatprep.subr.bf16.mxu1 %v11896_v37  ;;  %v11932_v37 = vld [vmem:[%s12521_s21 + $0x1030] sm:$0xff]  }
 0x239   : > { %v10562_v46 = vpop.f32.mrf.mxu0  ;;  %8373 = vmatmul.mubr.bf16.vlgmr.msra.gmra.mxu0 %v906_v38  ;;  %v11934_v38 = vld [vmem:[%s12521_s21 + $0x10b0] sm:$0xff]  }
 0x23a   : > { %v10584_v47 = vpop.f32.mrf.mxu1  ;;  %8413 = vmatmul.mubr.bf16.vlgmr.msra.gmra.mxu1 %v908_v40  ;;  %10855 = vmatpush3.bf16.msra.mxu0 %v11895_v36 }
 0x23b   : > { %10877 = vmatpush3.bf16.msra.mxu1 %v11897_v41  ;;  %v10563_v50 = vpop.f32.mrf.mxu0  ;;  %10856 = vmatprep.subr.bf16.mxu0 %v11898_v43  ;;  %v11935_v41 = vld [vmem:[%s12521_s21 + $0x1068] sm:$0xff]  }
 0x23c   : > { %v10585_v51 = vpop.f32.mrf.mxu1  ;;  %10878 = vmatprep.subr.bf16.mxu1 %v11900_v44  ;;  %v10564_v53 = vadd.f32 %v10563_v50, %v10562_v46  ;;  %8452 = vmatprep.mubr.bf16.mxu0 %v911_v25  ;;  %v11938_v50 = vld [vmem:[%s12521_s21 + $0x10a8] sm:$0xff]   ;;  %v11966_v25 = vld [vmem:[%s12521_s21 + $0x11f0] sm:$0xff]  }
 0x23d   : > { %v10586_v54 = vadd.f32 %v10585_v51, %v10584_v47  ;;  %v10565_v56 = vpop.f32.mrf.mxu0  ;;  %8492 = vmatprep.mubr.bf16.mxu1 %v913_v30  ;;  %v11936_v47 = vld [vmem:[%s12521_s21 + $0x1028] sm:$0xff]  }
 0x23e   : > { %v10587_v58 = vpop.f32.mrf.mxu1  ;;  %v7895_v59 = vadd.f32 %v10564_v53, %v13066_v9  ;;  %10857 = vmatpush3.bf16.msra.mxu0 %v11899_v45  ;;  %v11915_v9 = vld [vmem:[%s12521_s21 + $0xf10] sm:$0xff]   ;;  %v11937_v45 = vld [vmem:[%s12521_s21 + $0x10e8] sm:$0xff]   ;;  %v11940_v56 = vld [vmem:[%s12521_s21 + $0x1020] sm:$0xff]  }
 0x23f   : > { %10879 = vmatpush3.bf16.msra.mxu1 %v11901_v48  ;;  %v10566_v61 = vpop.f32.mrf.mxu0  ;;  %10858 = vmatprep.subr.bf16.mxu0 %v11902_v49  ;;  %v11943_v58 = vld [vmem:[%s12521_s21 + $0x1058] sm:$0xff]  }
 0x240   : > { %10880 = vmatprep.subr.bf16.mxu1 %v11904_v52  ;;  %v10588_v63 = vpop.f32.mrf.mxu1  ;;  %v13104_v0 = vadd.f32 %v10586_v54, %v7895_v59  ;;  %v11939_v52 = vld [vmem:[%s12521_s21 + $0x1060] sm:$0xff]   ;;  %v11945_v59 = vld [vmem:[%s12521_s21 + $0x10d8] sm:$0xff]  }
 0x241   : > { %v11946_v61 = vld [vmem:[%s12521_s21 + $0x1098] sm:$0xff]   ;;  %v11949_v63 = vld [vmem:[%s12521_s21 + $0x10d0] sm:$0xff]  }
 0x242   : > { %10859 = vmatpush3.bf16.msra.mxu0 %v11903_v55  ;;  %v11941_v55 = vld [vmem:[%s12521_s21 + $0x10e0] sm:$0xff]  }
 0x243   : > { %10881 = vmatpush3.bf16.msra.mxu1 %v11905_v57  ;;  %10860 = vmatprep.subr.bf16.mxu0 %v11906_v60  ;;  %v11942_v57 = vld [vmem:[%s12521_s21 + $0x10a0] sm:$0xff]   ;;  %v11944_v60 = vld [vmem:[%s12521_s21 + $0x1018] sm:$0xff]  }
 0x244   : > { %10882 = vmatprep.subr.bf16.mxu1 %v11908_v62  ;;  %v11947_v62 = vld [vmem:[%s12521_s21 + $0x1050] sm:$0xff]  }
 0x246   : > { %10861 = vmatpush3.bf16.msra.mxu0 %v11907_v1  ;;  %v11950_v1 = vld [vmem:[%s12521_s21 + $0x1090] sm:$0xff]  }
 0x247   : > { %10883 = vmatpush3.bf16.msra.mxu1 %v11909_v2  ;;  %10862 = vmatprep.subr.bf16.mxu0 %v11910_v3  ;;  %v11951_v2 = vld [vmem:[%s12521_s21 + $0x1048] sm:$0xff]  }
 0x248   : > { %10884 = vmatprep.subr.bf16.mxu1 %v11912_v4  ;;  %v11953_v3 = vld [vmem:[%s12521_s21 + $0x10c8] sm:$0xff]  }
 0x249   : > { %v11952_v4 = vld [vmem:[%s12521_s21 + $0x1008] sm:$0xff]  }
 0x24a   : > { %10863 = vmatpush3.bf16.msra.mxu0 %v11911_v5  ;;  %v11954_v5 = vld [vmem:[%s12521_s21 + $0x1088] sm:$0xff]  }
 0x24b   : > { %10885 = vmatpush3.bf16.msra.mxu1 %v11913_v6  ;;  %10864 = vmatprep.subr.bf16.mxu0 %v11914_v7  ;;  %v11955_v6 = vld [vmem:[%s12521_s21 + $0x1040] sm:$0xff]  }
 0x24c   : > { %10886 = vmatprep.subr.bf16.mxu1 %v11916_v8  ;;  %v302_v7 = vld [vmem:[%s12535_s13 + $0x80] sm:$0xff] }
 0x24d   : > { %v11957_v8 = vld [vmem:[%s12521_s21 + $0x10c0] sm:$0xff]  }
 0x24e   : > { %10865 = vmatpush3.bf16.msra.mxu0 %v11915_v9  ;;  %v615_v9 = vrot.slane %v302_v7, %v12574_v42 }
 0x24f   : > { %10887 = vmatpush3.bf16.msra.mxu1 %v11917_v10  ;;  %10866 = vmatprep.subr.bf16.mxu0 %v11918_v11  ;;  %v608_v10 = vcombine.high %v302_v7, %v302_v7  ;;  %v11956_v11 = vld [vmem:[%s12521_s21 + $0x1000] sm:$0xff]  }
 0x250   : > { %10888 = vmatprep.subr.bf16.mxu1 %v11920_v12  ;;  %v623_v12 = vcombine.high %v615_v9, %v615_v9  ;;  %v914_v19 = vpack.c.bf16 %v615_v9, %v615_v9  ;;  %v11995_v9 = vld [vmem:[%s12521_s21 + $0x12f8] sm:$0xff]  }
 0x252   : > { %10867 = vmatpush3.bf16.msra.mxu0 %v11919_v13  ;;  %v11958_v13 = vld [vmem:[%s12521_s21 + $0x1080] sm:$0xff]  }
 0x253   : > { %10889 = vmatpush3.bf16.msra.mxu1 %v11921_v14  ;;  %10868 = vmatprep.subr.bf16.mxu0 %v11922_v15  ;;  %v622_v14 = vrot.slane %v608_v10, %v12574_v42  ;;  %v11959_v15 = vld [vmem:[%s12521_s21 + $0x1178] sm:$0xff]  }
 0x254   : > { %10890 = vmatprep.subr.bf16.mxu1 %v11924_v16  ;;  %v915_v16 = vpack.c.bf16 %v623_v12, %v623_v12 }
 0x255   : > { %v624_v17 = vcombine.high %v622_v14, %v622_v14 }
 0x256   : > { %10869 = vmatpush3.bf16.msra.mxu0 %v11923_v20  ;;  %v11961_v20 = vld [vmem:[%s12521_s21 + $0x1138] sm:$0xff]  }
 0x257   : > { %10891 = vmatpush3.bf16.msra.mxu1 %v11925_v22  ;;  %10898 = vmatprep.subr.bf16.mxu0 %v11926_v24  ;;  %v917_v21 = vpack.c.bf16 %v624_v17, %v624_v17  ;;  %v916_v22 = vpack.c.bf16 %v622_v14, %v622_v14  ;;  %v11964_v24 = vld [vmem:[%s12521_s21 + $0x1170] sm:$0xff]   ;;  %v11996_v14 = vld [vmem:[%s12521_s21 + $0x12b8] sm:$0xff]  }
 0x258   : > { %10920 = vmatprep.subr.bf16.mxu1 %v11929_v27 }
 0x259   : > { %v10606_v35 = vpop.f32.mrf.mxu0  ;;  %8453 = vmatmul.mubr.bf16.vlgmr.msra.gmra.mxu0 %v910_v28  ;;  %v11965_v28 = vld [vmem:[%s12521_s21 + $0x1130] sm:$0xff]  }
 0x25a   : > { %v10628_v36 = vpop.f32.mrf.mxu1  ;;  %10899 = vmatpush3.bf16.msra.mxu0 %v11928_v29  ;;  %8493 = vmatmul.mubr.bf16.vlgmr.msra.gmra.mxu1 %v912_v31  ;;  %v11967_v29 = vld [vmem:[%s12521_s21 + $0x11b0] sm:$0xff]  }
 0x25b   : > { %v10607_v39 = vpop.f32.mrf.mxu0  ;;  %10921 = vmatpush3.bf16.msra.mxu1 %v11930_v32  ;;  %10900 = vmatprep.subr.bf16.mxu0 %v11931_v33  ;;  %v11968_v32 = vld [vmem:[%s12521_s21 + $0x1168] sm:$0xff]  }
 0x25c   : > { %v10629_v40 = vpop.f32.mrf.mxu1  ;;  %v10608_v43 = vadd.f32 %v10607_v39, %v10606_v35  ;;  %10922 = vmatprep.subr.bf16.mxu1 %v11933_v34  ;;  %8532 = vmatprep.mubr.bf16.mxu0 %v915_v16  ;;  %v11970_v35 = vld [vmem:[%s12521_s21 + $0x11e8] sm:$0xff]   ;;  %v11999_v16 = vld [vmem:[%s12521_s21 + $0x12f0] sm:$0xff]  }
 0x25d   : > { %v10630_v44 = vadd.f32 %v10629_v40, %v10628_v36  ;;  %v10609_v46 = vpop.f32.mrf.mxu0  ;;  %8572 = vmatprep.mubr.bf16.mxu1 %v917_v21  ;;  %v11971_v40 = vld [vmem:[%s12521_s21 + $0x11a8] sm:$0xff]  }
 0x25e   : > { %v10631_v48 = vpop.f32.mrf.mxu1  ;;  %v7975_v49 = vadd.f32 %v10608_v43, %v13104_v0  ;;  %10901 = vmatpush3.bf16.msra.mxu0 %v11932_v37  ;;  %v11948_v0 = vld [vmem:[%s12521_s21 + $0x1010] sm:$0xff]   ;;  %v11969_v37 = vld [vmem:[%s12521_s21 + $0x1128] sm:$0xff]   ;;  %v11972_v43 = vld [vmem:[%s12521_s21 + $0x1160] sm:$0xff]  }
 0x25f   : > { %v10610_v51 = vpop.f32.mrf.mxu0  ;;  %10923 = vmatpush3.bf16.msra.mxu1 %v11934_v38  ;;  %10902 = vmatprep.subr.bf16.mxu0 %v11935_v41  ;;  %v11974_v46 = vld [vmem:[%s12521_s21 + $0x11e0] sm:$0xff]  }
 0x260   : > { %v10632_v53 = vpop.f32.mrf.mxu1  ;;  %v13141_v54 = vadd.f32 %v10630_v44, %v7975_v49  ;;  %10924 = vmatprep.subr.bf16.mxu1 %v11937_v45  ;;  %v11975_v48 = vld [vmem:[%s12521_s21 + $0x11a0] sm:$0xff]   ;;  %v11976_v49 = vld [vmem:[%s12521_s21 + $0x1158] sm:$0xff]  }
 0x261   : > { %v11977_v51 = vld [vmem:[%s12521_s21 + $0x1118] sm:$0xff]   ;;  %v11980_v53 = vld [vmem:[%s12521_s21 + $0x1150] sm:$0xff]  }
 0x262   : > { %10903 = vmatpush3.bf16.msra.mxu0 %v11936_v47  ;;  %v11973_v47 = vld [vmem:[%s12521_s21 + $0x1120] sm:$0xff]  }
 0x263   : > { %10925 = vmatpush3.bf16.msra.mxu1 %v11938_v50  ;;  %10904 = vmatprep.subr.bf16.mxu0 %v11939_v52  ;;  %v11978_v50 = vld [vmem:[%s12521_s21 + $0x11d8] sm:$0xff]  }
 0x264   : > { %10926 = vmatprep.subr.bf16.mxu1 %v11941_v55  ;;  %v11979_v52 = vld [vmem:[%s12521_s21 + $0x1198] sm:$0xff]   ;;  %v11981_v55 = vld [vmem:[%s12521_s21 + $0x1110] sm:$0xff]  }
 0x266   : > { %10905 = vmatpush3.bf16.msra.mxu0 %v11940_v56  ;;  %v11983_v56 = vld [vmem:[%s12521_s21 + $0x1190] sm:$0xff]  }
 0x267   : > { %10927 = vmatpush3.bf16.msra.mxu1 %v11942_v57  ;;  %10906 = vmatprep.subr.bf16.mxu0 %v11943_v58  ;;  %v11984_v57 = vld [vmem:[%s12521_s21 + $0x1148] sm:$0xff]  }
 0x268   : > { %10928 = vmatprep.subr.bf16.mxu1 %v11945_v59  ;;  %v11986_v58 = vld [vmem:[%s12521_s21 + $0x11c8] sm:$0xff]  }
 0x269   : > { %v11985_v59 = vld [vmem:[%s12521_s21 + $0x1108] sm:$0xff]  }
 0x26a   : > { %10907 = vmatpush3.bf16.msra.mxu0 %v11944_v60  ;;  %v11987_v60 = vld [vmem:[%s12521_s21 + $0x1188] sm:$0xff]  }
 0x26b   : > { %10929 = vmatpush3.bf16.msra.mxu1 %v11946_v61  ;;  %10908 = vmatprep.subr.bf16.mxu0 %v11947_v62  ;;  %v11988_v61 = vld [vmem:[%s12521_s21 + $0x1140] sm:$0xff]  }
 0x26c   : > { %10930 = vmatprep.subr.bf16.mxu1 %v11949_v63  ;;  %v303_v62 = vld [vmem:[%s12535_s13 + $0x88] sm:$0xff] }
 0x26d   : > { %v11990_v63 = vld [vmem:[%s12521_s21 + $0x11c0] sm:$0xff]  }
 0x26e   : > { %10909 = vmatpush3.bf16.msra.mxu0 %v11948_v0  ;;  %v632_v0 = vrot.slane %v303_v62, %v12574_v42 }
 0x26f   : > { %10931 = vmatpush3.bf16.msra.mxu1 %v11950_v1  ;;  %10910 = vmatprep.subr.bf16.mxu0 %v11951_v2  ;;  %v625_v1 = vcombine.high %v303_v62, %v303_v62  ;;  %v11989_v2 = vld [vmem:[%s12521_s21 + $0x1100] sm:$0xff]   ;;  %v12028_v62 = vld [vmem:[%s12521_s21 + $0x13f8] sm:$0xff]  }
 0x270   : > { %10932 = vmatprep.subr.bf16.mxu1 %v11953_v3  ;;  %v640_v3 = vcombine.high %v632_v0, %v632_v0  ;;  %v918_v10 = vpack.c.bf16 %v632_v0, %v632_v0 }
 0x272   : > { %10911 = vmatpush3.bf16.msra.mxu0 %v11952_v4  ;;  %v11991_v4 = vld [vmem:[%s12521_s21 + $0x1180] sm:$0xff]   ;;  %v919_v7 = vpack.c.bf16 %v640_v3, %v640_v3 }
 0x273   : > { %10933 = vmatpush3.bf16.msra.mxu1 %v11954_v5  ;;  %10912 = vmatprep.subr.bf16.mxu0 %v11955_v6  ;;  %v639_v5 = vrot.slane %v625_v1, %v12574_v42  ;;  %v11992_v6 = vld [vmem:[%s12521_s21 + $0x1278] sm:$0xff]  }
 0x274   : > { %10934 = vmatprep.subr.bf16.mxu1 %v11957_v8 }
 0x275   : > { %v641_v8 = vcombine.high %v639_v5, %v639_v5 }
 0x276   : > { %10913 = vmatpush3.bf16.msra.mxu0 %v11956_v11  ;;  %v11994_v11 = vld [vmem:[%s12521_s21 + $0x1238] sm:$0xff]  }
 0x277   : > { %10935 = vmatpush3.bf16.msra.mxu1 %v11958_v13  ;;  %10942 = vmatprep.subr.bf16.mxu0 %v11959_v15  ;;  %v921_v12 = vpack.c.bf16 %v641_v8, %v641_v8  ;;  %v920_v13 = vpack.c.bf16 %v639_v5, %v639_v5  ;;  %v11997_v15 = vld [vmem:[%s12521_s21 + $0x1270] sm:$0xff]  }
 0x278   : > { %10964 = vmatprep.subr.bf16.mxu1 %v11962_v18 }
 0x279   : > { %v10650_v26 = vpop.f32.mrf.mxu0  ;;  %8533 = vmatmul.mubr.bf16.vlgmr.msra.gmra.mxu0 %v914_v19  ;;  %v11998_v19 = vld [vmem:[%s12521_s21 + $0x1230] sm:$0xff]  }
 0x27a   : > { %v10672_v27 = vpop.f32.mrf.mxu1  ;;  %10943 = vmatpush3.bf16.msra.mxu0 %v11961_v20  ;;  %8573 = vmatmul.mubr.bf16.vlgmr.msra.gmra.mxu1 %v916_v22  ;;  %v12000_v20 = vld [vmem:[%s12521_s21 + $0x12b0] sm:$0xff]  }
 0x27b   : > { %v10651_v30 = vpop.f32.mrf.mxu0  ;;  %10965 = vmatpush3.bf16.msra.mxu1 %v11963_v23  ;;  %10944 = vmatprep.subr.bf16.mxu0 %v11964_v24  ;;  %v12001_v23 = vld [vmem:[%s12521_s21 + $0x1268] sm:$0xff]  }
 0x27c   : > { %v10673_v31 = vpop.f32.mrf.mxu1  ;;  %v10652_v33 = vadd.f32 %v10651_v30, %v10650_v26  ;;  %10966 = vmatprep.subr.bf16.mxu1 %v11966_v25  ;;  %8612 = vmatprep.mubr.bf16.mxu0 %v919_v7  ;;  %v12003_v26 = vld [vmem:[%s12521_s21 + $0x12e8] sm:$0xff]   ;;  %v12032_v7 = vld [vmem:[%s12521_s21 + $0x13f0] sm:$0xff]  }
 0x27d   : > { %v10674_v34 = vadd.f32 %v10673_v31, %v10672_v27  ;;  %v10653_v36 = vpop.f32.mrf.mxu0  ;;  %8652 = vmatprep.mubr.bf16.mxu1 %v921_v12  ;;  %v12004_v31 = vld [vmem:[%s12521_s21 + $0x12a8] sm:$0xff]  }
 0x27e   : > { %v10675_v38 = vpop.f32.mrf.mxu1  ;;  %v8055_v39 = vadd.f32 %v10652_v33, %v13141_v54  ;;  %10945 = vmatpush3.bf16.msra.mxu0 %v11965_v28  ;;  %v11982_v54 = vld [vmem:[%s12521_s21 + $0x11d0] sm:$0xff]   ;;  %v12002_v28 = vld [vmem:[%s12521_s21 + $0x1228] sm:$0xff]   ;;  %v12005_v33 = vld [vmem:[%s12521_s21 + $0x1260] sm:$0xff]  }
 0x27f   : > { %v10654_v41 = vpop.f32.mrf.mxu0  ;;  %10967 = vmatpush3.bf16.msra.mxu1 %v11967_v29  ;;  %10946 = vmatprep.subr.bf16.mxu0 %v11968_v32  ;;  %v12007_v36 = vld [vmem:[%s12521_s21 + $0x12e0] sm:$0xff]  }
 0x280   : > { %v10676_v44 = vpop.f32.mrf.mxu1  ;;  %v13179_v45 = vadd.f32 %v10674_v34, %v8055_v39  ;;  %10968 = vmatprep.subr.bf16.mxu1 %v11970_v35  ;;  %v12008_v38 = vld [vmem:[%s12521_s21 + $0x12a0] sm:$0xff]   ;;  %v12009_v39 = vld [vmem:[%s12521_s21 + $0x1258] sm:$0xff]  }
 0x281   : > { %v12010_v41 = vld [vmem:[%s12521_s21 + $0x1218] sm:$0xff]   ;;  %v12013_v44 = vld [vmem:[%s12521_s21 + $0x1250] sm:$0xff]  }
 0x282   : > { %10947 = vmatpush3.bf16.msra.mxu0 %v11969_v37  ;;  %v12006_v37 = vld [vmem:[%s12521_s21 + $0x1220] sm:$0xff]  }
 0x283   : > { %10969 = vmatpush3.bf16.msra.mxu1 %v11971_v40  ;;  %10948 = vmatprep.subr.bf16.mxu0 %v11972_v43  ;;  %v12011_v40 = vld [vmem:[%s12521_s21 + $0x12d8] sm:$0xff]  }
 0x284   : > { %10970 = vmatprep.subr.bf16.mxu1 %v11974_v46  ;;  %v12012_v43 = vld [vmem:[%s12521_s21 + $0x1298] sm:$0xff]   ;;  %v12014_v46 = vld [vmem:[%s12521_s21 + $0x1210] sm:$0xff]  }
 0x286   : > { %10949 = vmatpush3.bf16.msra.mxu0 %v11973_v47  ;;  %v12016_v47 = vld [vmem:[%s12521_s21 + $0x1290] sm:$0xff]  }
 0x287   : > { %10971 = vmatpush3.bf16.msra.mxu1 %v11975_v48  ;;  %10950 = vmatprep.subr.bf16.mxu0 %v11976_v49  ;;  %v12017_v48 = vld [vmem:[%s12521_s21 + $0x1248] sm:$0xff]  }
 0x288   : > { %10972 = vmatprep.subr.bf16.mxu1 %v11978_v50  ;;  %v12018_v49 = vld [vmem:[%s12521_s21 + $0x1208] sm:$0xff]  }
 0x289   : > { %v12019_v50 = vld [vmem:[%s12521_s21 + $0x12c8] sm:$0xff]  }
 0x28a   : > { %10951 = vmatpush3.bf16.msra.mxu0 %v11977_v51  ;;  %v12020_v51 = vld [vmem:[%s12521_s21 + $0x1288] sm:$0xff]  }
 0x28b   : > { %10973 = vmatpush3.bf16.msra.mxu1 %v11979_v52  ;;  %10952 = vmatprep.subr.bf16.mxu0 %v11980_v53  ;;  %v12021_v52 = vld [vmem:[%s12521_s21 + $0x1240] sm:$0xff]  }
 0x28c   : > { %10974 = vmatprep.subr.bf16.mxu1 %v11982_v54  ;;  %v12023_v53 = vld [vmem:[%s12521_s21 + $0x12c0] sm:$0xff]   ;;  %v304_v54 = vld [vmem:[%s12535_s13 + $0x90] sm:$0xff] }
 0x28e   : > { %10953 = vmatpush3.bf16.msra.mxu0 %v11981_v55  ;;  %v12022_v55 = vld [vmem:[%s12521_s21 + $0x1200] sm:$0xff]  }
 0x28f   : > { %10975 = vmatpush3.bf16.msra.mxu1 %v11983_v56  ;;  %10954 = vmatprep.subr.bf16.mxu0 %v11984_v57  ;;  %v649_v56 = vrot.slane %v304_v54, %v12574_v42  ;;  %v642_v57 = vcombine.high %v304_v54, %v304_v54 }
 0x290   : > { %10976 = vmatprep.subr.bf16.mxu1 %v11986_v58  ;;  %v12024_v58 = vld [vmem:[%s12521_s21 + $0x1280] sm:$0xff]  }
 0x291   : > { %v922_v0 = vpack.c.bf16 %v649_v56, %v649_v56 }
 0x292   : > { %10955 = vmatpush3.bf16.msra.mxu0 %v11985_v59  ;;  %v657_v59 = vcombine.high %v649_v56, %v649_v56 }
 0x293   : > { %10977 = vmatpush3.bf16.msra.mxu1 %v11987_v60  ;;  %10956 = vmatprep.subr.bf16.mxu0 %v11988_v61  ;;  %v12025_v60 = vld [vmem:[%s12521_s21 + $0x1378] sm:$0xff]   ;;  %v656_v61 = vrot.slane %v642_v57, %v12574_v42 }
 0x294   : > { %10978 = vmatprep.subr.bf16.mxu1 %v11990_v63  ;;  %v923_v63 = vpack.c.bf16 %v657_v59, %v657_v59  ;;  %v12060_v57 = vld [vmem:[%s12521_s21 + $0x1438] sm:$0xff]  }
 0x295   : > { %v658_v1 = vcombine.high %v656_v61, %v656_v61  ;;  %v924_v3 = vpack.c.bf16 %v656_v61, %v656_v61  ;;  %v12062_v59 = vld [vmem:[%s12521_s21 + $0x14b8] sm:$0xff]   ;;  %v12063_v61 = vld [vmem:[%s12521_s21 + $0x1470] sm:$0xff]  }
 0x296   : > { %10957 = vmatpush3.bf16.msra.mxu0 %v11989_v2  ;;  %v12027_v2 = vld [vmem:[%s12521_s21 + $0x1338] sm:$0xff]  }
 0x297   : > { %10979 = vmatpush3.bf16.msra.mxu1 %v11991_v4  ;;  %10986 = vmatprep.subr.bf16.mxu0 %v11992_v6  ;;  %v12029_v4 = vld [vmem:[%s12521_s21 + $0x13b8] sm:$0xff]   ;;  %v925_v5 = vpack.c.bf16 %v658_v1, %v658_v1  ;;  %v12030_v6 = vld [vmem:[%s12521_s21 + $0x1370] sm:$0xff]  }
 0x298   : > { %11008 = vmatprep.subr.bf16.mxu1 %v11995_v9  ;;  %v12064_v1 = vld [vmem:[%s12521_s21 + $0x1430] sm:$0xff]  }
 0x299   : > { %v10694_v17 = vpop.f32.mrf.mxu0  ;;  %8613 = vmatmul.mubr.bf16.vlgmr.msra.gmra.mxu0 %v918_v10  ;;  %v12031_v10 = vld [vmem:[%s12521_s21 + $0x1330] sm:$0xff]  }
 0x29a   : > { %v10716_v18 = vpop.f32.mrf.mxu1  ;;  %10987 = vmatpush3.bf16.msra.mxu0 %v11994_v11  ;;  %8653 = vmatmul.mubr.bf16.vlgmr.msra.gmra.mxu1 %v920_v13  ;;  %v12033_v11 = vld [vmem:[%s12521_s21 + $0x13b0] sm:$0xff]  }
 0x29b   : > { %v10695_v21 = vpop.f32.mrf.mxu0  ;;  %11009 = vmatpush3.bf16.msra.mxu1 %v11996_v14  ;;  %10988 = vmatprep.subr.bf16.mxu0 %v11997_v15  ;;  %v12034_v14 = vld [vmem:[%s12521_s21 + $0x1368] sm:$0xff]  }
 0x29c   : > { %v10717_v22 = vpop.f32.mrf.mxu1  ;;  %v10696_v24 = vadd.f32 %v10695_v21, %v10694_v17  ;;  %11010 = vmatprep.subr.bf16.mxu1 %v11999_v16  ;;  %8692 = vmatprep.mubr.bf16.mxu0 %v923_v63  ;;  %v12036_v17 = vld [vmem:[%s12521_s21 + $0x13e8] sm:$0xff]  }
 0x29d   : > { %v10718_v25 = vadd.f32 %v10717_v22, %v10716_v18  ;;  %v10697_v27 = vpop.f32.mrf.mxu0  ;;  %8732 = vmatprep.mubr.bf16.mxu1 %v925_v5  ;;  %v12037_v22 = vld [vmem:[%s12521_s21 + $0x13a8] sm:$0xff]  }
 0x29e   : > { %v10719_v29 = vpop.f32.mrf.mxu1  ;;  %v8135_v30 = vadd.f32 %v10696_v24, %v13179_v45  ;;  %10989 = vmatpush3.bf16.msra.mxu0 %v11998_v19  ;;  %v12015_v45 = vld [vmem:[%s12521_s21 + $0x12d0] sm:$0xff]   ;;  %v12035_v19 = vld [vmem:[%s12521_s21 + $0x1328] sm:$0xff]   ;;  %v12038_v24 = vld [vmem:[%s12521_s21 + $0x1360] sm:$0xff]  }
 0x29f   : > { %v10698_v32 = vpop.f32.mrf.mxu0  ;;  %11011 = vmatpush3.bf16.msra.mxu1 %v12000_v20  ;;  %10990 = vmatprep.subr.bf16.mxu0 %v12001_v23  ;;  %v12040_v27 = vld [vmem:[%s12521_s21 + $0x13e0] sm:$0xff]   ;;  %v12067_v5 = vld [vmem:[%s12521_s21 + $0x1468] sm:$0xff]  }
 0x2a0   : > { %v10720_v34 = vpop.f32.mrf.mxu1  ;;  %v13217_v35 = vadd.f32 %v10718_v25, %v8135_v30  ;;  %11012 = vmatprep.subr.bf16.mxu1 %v12003_v26  ;;  %v12041_v29 = vld [vmem:[%s12521_s21 + $0x13a0] sm:$0xff]   ;;  %v12042_v30 = vld [vmem:[%s12521_s21 + $0x1358] sm:$0xff]  }
 0x2a1   : > { %v12043_v32 = vld [vmem:[%s12521_s21 + $0x1318] sm:$0xff]   ;;  %v12046_v34 = vld [vmem:[%s12521_s21 + $0x1350] sm:$0xff]  }
 0x2a2   : > { %10991 = vmatpush3.bf16.msra.mxu0 %v12002_v28  ;;  %v12039_v28 = vld [vmem:[%s12521_s21 + $0x1320] sm:$0xff]  }
 0x2a3   : > { %11013 = vmatpush3.bf16.msra.mxu1 %v12004_v31  ;;  %10992 = vmatprep.subr.bf16.mxu0 %v12005_v33  ;;  %v12044_v31 = vld [vmem:[%s12521_s21 + $0x13d8] sm:$0xff]  }
 0x2a4   : > { %11014 = vmatprep.subr.bf16.mxu1 %v12007_v36  ;;  %v12045_v33 = vld [vmem:[%s12521_s21 + $0x1398] sm:$0xff]   ;;  %v12047_v36 = vld [vmem:[%s12521_s21 + $0x1310] sm:$0xff]  }
 0x2a6   : > { %10993 = vmatpush3.bf16.msra.mxu0 %v12006_v37  ;;  %v12049_v37 = vld [vmem:[%s12521_s21 + $0x1390] sm:$0xff]  }
 0x2a7   : > { %11015 = vmatpush3.bf16.msra.mxu1 %v12008_v38  ;;  %10994 = vmatprep.subr.bf16.mxu0 %v12009_v39  ;;  %v12050_v38 = vld [vmem:[%s12521_s21 + $0x1348] sm:$0xff]  }
 0x2a8   : > { %11016 = vmatprep.subr.bf16.mxu1 %v12011_v40  ;;  %v12052_v39 = vld [vmem:[%s12521_s21 + $0x13c8] sm:$0xff]  }
 0x2a9   : > { %v12051_v40 = vld [vmem:[%s12521_s21 + $0x1308] sm:$0xff]  }
 0x2aa   : > { %10995 = vmatpush3.bf16.msra.mxu0 %v12010_v41  ;;  %v12053_v41 = vld [vmem:[%s12521_s21 + $0x1388] sm:$0xff]  }
 0x2ab   : > { %11017 = vmatpush3.bf16.msra.mxu1 %v12012_v43  ;;  %10996 = vmatprep.subr.bf16.mxu0 %v12013_v44  ;;  %v12054_v43 = vld [vmem:[%s12521_s21 + $0x1340] sm:$0xff]  }
 0x2ac   : > { %11018 = vmatprep.subr.bf16.mxu1 %v12015_v45  ;;  %v12056_v44 = vld [vmem:[%s12521_s21 + $0x13c0] sm:$0xff]   ;;  %v305_v45 = vld [vmem:[%s12535_s13 + $0x98] sm:$0xff] }
 0x2ae   : > { %10997 = vmatpush3.bf16.msra.mxu0 %v12014_v46  ;;  %v12055_v46 = vld [vmem:[%s12521_s21 + $0x1300] sm:$0xff]  }
 0x2af   : > { %11019 = vmatpush3.bf16.msra.mxu1 %v12016_v47  ;;  %10998 = vmatprep.subr.bf16.mxu0 %v12017_v48  ;;  %v666_v47 = vrot.slane %v305_v45, %v12574_v42  ;;  %v659_v48 = vcombine.high %v305_v45, %v305_v45 }
 0x2b0   : > { %11020 = vmatprep.subr.bf16.mxu1 %v12019_v50 }
 0x2b1   : > { %v674_v50 = vcombine.high %v666_v47, %v666_v47 }
 0x2b2   : > { %10999 = vmatpush3.bf16.msra.mxu0 %v12018_v49  ;;  %v12057_v49 = vld [vmem:[%s12521_s21 + $0x1380] sm:$0xff]  }
 0x2b3   : > { %11021 = vmatpush3.bf16.msra.mxu1 %v12020_v51  ;;  %11000 = vmatprep.subr.bf16.mxu0 %v12021_v52  ;;  %v12058_v51 = vld [vmem:[%s12521_s21 + $0x1478] sm:$0xff]   ;;  %v673_v52 = vrot.slane %v659_v48, %v12574_v42  ;;  %v927_v54 = vpack.c.bf16 %v674_v50, %v674_v50 }
 0x2b4   : > { %11022 = vmatprep.subr.bf16.mxu1 %v12023_v53  ;;  %v12061_v53 = vld [vmem:[%s12521_s21 + $0x14f8] sm:$0xff]  }
 0x2b5   : > { %v675_v56 = vcombine.high %v673_v52, %v673_v52  ;;  %v12093_v48 = vld [vmem:[%s12521_s21 + $0x1538] sm:$0xff]  }
 0x2b6   : > { %11001 = vmatpush3.bf16.msra.mxu0 %v12022_v55  ;;  %v926_v55 = vpack.c.bf16 %v666_v47, %v666_v47  ;;  %v12095_v50 = vld [vmem:[%s12521_s21 + $0x15b8] sm:$0xff]  }
 0x2b7   : > { %11023 = vmatpush3.bf16.msra.mxu1 %v12024_v58  ;;  %11030 = vmatprep.subr.bf16.mxu0 %v12025_v60  ;;  %v928_v58 = vpack.c.bf16 %v673_v52, %v673_v52  ;;  %v929_v60 = vpack.c.bf16 %v675_v56, %v675_v56  ;;  %v12096_v52 = vld [vmem:[%s12521_s21 + $0x1570] sm:$0xff]  }
 0x2b8   : > { %11052 = vmatprep.subr.bf16.mxu1 %v12028_v62  ;;  %v12065_v62 = vld [vmem:[%s12521_s21 + $0x14f0] sm:$0xff]  }
 0x2b9   : > { %v10738_v8 = vpop.f32.mrf.mxu0  ;;  %8693 = vmatmul.mubr.bf16.vlgmr.msra.gmra.mxu0 %v922_v0  ;;  %v12097_v56 = vld [vmem:[%s12521_s21 + $0x1530] sm:$0xff]  }
 0x2ba   : > { %v10760_v9 = vpop.f32.mrf.mxu1  ;;  %11031 = vmatpush3.bf16.msra.mxu0 %v12027_v2  ;;  %8733 = vmatmul.mubr.bf16.vlgmr.msra.gmra.mxu1 %v924_v3  ;;  %v12066_v2 = vld [vmem:[%s12521_s21 + $0x14b0] sm:$0xff]  }
 0x2bb   : > { %v10739_v12 = vpop.f32.mrf.mxu0  ;;  %11053 = vmatpush3.bf16.msra.mxu1 %v12029_v4  ;;  %11032 = vmatprep.subr.bf16.mxu0 %v12030_v6 }
 0x2bc   : > { %v10761_v13 = vpop.f32.mrf.mxu1  ;;  %v10740_v15 = vadd.f32 %v10739_v12, %v10738_v8  ;;  %11054 = vmatprep.subr.bf16.mxu1 %v12032_v7  ;;  %8772 = vmatprep.mubr.bf16.mxu0 %v927_v54  ;;  %v12069_v8 = vld [vmem:[%s12521_s21 + $0x14e8] sm:$0xff]  }
 0x2bd   : > { %v10762_v16 = vadd.f32 %v10761_v13, %v10760_v9  ;;  %v10741_v18 = vpop.f32.mrf.mxu0  ;;  %8812 = vmatprep.mubr.bf16.mxu1 %v929_v60  ;;  %v12070_v13 = vld [vmem:[%s12521_s21 + $0x14a8] sm:$0xff]  }
 0x2be   : > { %v10763_v20 = vpop.f32.mrf.mxu1  ;;  %v8215_v21 = vadd.f32 %v10740_v15, %v13217_v35  ;;  %11033 = vmatpush3.bf16.msra.mxu0 %v12031_v10  ;;  %v12048_v35 = vld [vmem:[%s12521_s21 + $0x13d0] sm:$0xff]   ;;  %v12068_v10 = vld [vmem:[%s12521_s21 + $0x1428] sm:$0xff]   ;;  %v12071_v15 = vld [vmem:[%s12521_s21 + $0x1460] sm:$0xff]  }
 0x2bf   : > { %v10742_v23 = vpop.f32.mrf.mxu0  ;;  %11055 = vmatpush3.bf16.msra.mxu1 %v12033_v11  ;;  %11034 = vmatprep.subr.bf16.mxu0 %v12034_v14  ;;  %v12073_v18 = vld [vmem:[%s12521_s21 + $0x14e0] sm:$0xff]   ;;  %v12100_v60 = vld [vmem:[%s12521_s21 + $0x1568] sm:$0xff]  }
 0x2c0   : > { %v10764_v25 = vpop.f32.mrf.mxu1  ;;  %v13255_v26 = vadd.f32 %v10762_v16, %v8215_v21  ;;  %11056 = vmatprep.subr.bf16.mxu1 %v12036_v17  ;;  %v12074_v20 = vld [vmem:[%s12521_s21 + $0x14a0] sm:$0xff]   ;;  %v12075_v21 = vld [vmem:[%s12521_s21 + $0x1458] sm:$0xff]  }
 0x2c1   : > { %v12076_v23 = vld [vmem:[%s12521_s21 + $0x1418] sm:$0xff]   ;;  %v12079_v25 = vld [vmem:[%s12521_s21 + $0x1450] sm:$0xff]  }
 0x2c2   : > { %11035 = vmatpush3.bf16.msra.mxu0 %v12035_v19  ;;  %v12072_v19 = vld [vmem:[%s12521_s21 + $0x1420] sm:$0xff]  }
 0x2c3   : > { %11057 = vmatpush3.bf16.msra.mxu1 %v12037_v22  ;;  %11036 = vmatprep.subr.bf16.mxu0 %v12038_v24  ;;  %v12077_v22 = vld [vmem:[%s12521_s21 + $0x14d8] sm:$0xff]  }
 0x2c4   : > { %11058 = vmatprep.subr.bf16.mxu1 %v12040_v27  ;;  %v12078_v24 = vld [vmem:[%s12521_s21 + $0x1498] sm:$0xff]   ;;  %v12080_v27 = vld [vmem:[%s12521_s21 + $0x1410] sm:$0xff]  }
 0x2c6   : > { %11037 = vmatpush3.bf16.msra.mxu0 %v12039_v28  ;;  %v12082_v28 = vld [vmem:[%s12521_s21 + $0x1490] sm:$0xff]  }
 0x2c7   : > { %11059 = vmatpush3.bf16.msra.mxu1 %v12041_v29  ;;  %11038 = vmatprep.subr.bf16.mxu0 %v12042_v30  ;;  %v12083_v29 = vld [vmem:[%s12521_s21 + $0x1448] sm:$0xff]  }
 0x2c8   : > { %11060 = vmatprep.subr.bf16.mxu1 %v12044_v31  ;;  %v12085_v30 = vld [vmem:[%s12521_s21 + $0x14c8] sm:$0xff]  }
 0x2c9   : > { %v12084_v31 = vld [vmem:[%s12521_s21 + $0x1408] sm:$0xff]  }
 0x2ca   : > { %11039 = vmatpush3.bf16.msra.mxu0 %v12043_v32  ;;  %v12086_v32 = vld [vmem:[%s12521_s21 + $0x1488] sm:$0xff]  }
 0x2cb   : > { %11061 = vmatpush3.bf16.msra.mxu1 %v12045_v33  ;;  %11040 = vmatprep.subr.bf16.mxu0 %v12046_v34  ;;  %v12087_v33 = vld [vmem:[%s12521_s21 + $0x1440] sm:$0xff]  }
 0x2cc   : > { %11062 = vmatprep.subr.bf16.mxu1 %v12048_v35  ;;  %v12089_v34 = vld [vmem:[%s12521_s21 + $0x14c0] sm:$0xff]  }
 0x2cd   : > { %v306_v35 = vld [vmem:[%s12535_s13 + $0xa0] sm:$0xff] }
 0x2ce   : > { %11041 = vmatpush3.bf16.msra.mxu0 %v12047_v36  ;;  %v12088_v36 = vld [vmem:[%s12521_s21 + $0x1400] sm:$0xff]  }
 0x2cf   : > { %11063 = vmatpush3.bf16.msra.mxu1 %v12049_v37  ;;  %11042 = vmatprep.subr.bf16.mxu0 %v12050_v38  ;;  %v683_v37 = vrot.slane %v306_v35, %v12574_v42  ;;  %v676_v38 = vcombine.high %v306_v35, %v306_v35  ;;  %v12127_v35 = vld [vmem:[%s12521_s21 + $0x16f8] sm:$0xff]  }
 0x2d0   : > { %11064 = vmatprep.subr.bf16.mxu1 %v12052_v39  ;;  %v12090_v39 = vld [vmem:[%s12521_s21 + $0x1480] sm:$0xff]  }
 0x2d2   : > { %11043 = vmatpush3.bf16.msra.mxu0 %v12051_v40  ;;  %v691_v40 = vcombine.high %v683_v37, %v683_v37 }
 0x2d3   : > { %11065 = vmatpush3.bf16.msra.mxu1 %v12053_v41  ;;  %11044 = vmatprep.subr.bf16.mxu0 %v12054_v43  ;;  %v12091_v41 = vld [vmem:[%s12521_s21 + $0x1578] sm:$0xff]   ;;  %v690_v43 = vrot.slane %v676_v38, %v12574_v42 }
 0x2d4   : > { %11066 = vmatprep.subr.bf16.mxu1 %v12056_v44  ;;  %v12094_v44 = vld [vmem:[%s12521_s21 + $0x15f8] sm:$0xff]   ;;  %v931_v45 = vpack.c.bf16 %v691_v40, %v691_v40  ;;  %v12129_v40 = vld [vmem:[%s12521_s21 + $0x1670] sm:$0xff]  }
 0x2d5   : > { %v692_v47 = vcombine.high %v690_v43, %v690_v43  ;;  %v12126_v38 = vld [vmem:[%s12521_s21 + $0x1638] sm:$0xff]  }
 0x2d6   : > { %11045 = vmatpush3.bf16.msra.mxu0 %v12055_v46  ;;  %v930_v46 = vpack.c.bf16 %v683_v37, %v683_v37 }
 0x2d7   : > { %11067 = vmatpush3.bf16.msra.mxu1 %v12057_v49  ;;  %11074 = vmatprep.subr.bf16.mxu0 %v12058_v51  ;;  %v932_v49 = vpack.c.bf16 %v690_v43, %v690_v43  ;;  %v933_v51 = vpack.c.bf16 %v692_v47, %v692_v47  ;;  %v12128_v43 = vld [vmem:[%s12521_s21 + $0x16b8] sm:$0xff]   ;;  %v12130_v47 = vld [vmem:[%s12521_s21 + $0x1630] sm:$0xff]  }
 0x2d8   : > { %11096 = vmatprep.subr.bf16.mxu1 %v12061_v53  ;;  %v12098_v53 = vld [vmem:[%s12521_s21 + $0x15f0] sm:$0xff]  }
 0x2d9   : > { %v10782_v63 = vpop.f32.mrf.mxu0  ;;  %8773 = vmatmul.mubr.bf16.vlgmr.msra.gmra.mxu0 %v926_v55 }
 0x2da   : > { %v10804_v0 = vpop.f32.mrf.mxu1  ;;  %11075 = vmatpush3.bf16.msra.mxu0 %v12060_v57  ;;  %8813 = vmatmul.mubr.bf16.vlgmr.msra.gmra.mxu1 %v928_v58  ;;  %v12099_v57 = vld [vmem:[%s12521_s21 + $0x15b0] sm:$0xff]  }
 0x2db   : > { %v10783_v3 = vpop.f32.mrf.mxu0  ;;  %11097 = vmatpush3.bf16.msra.mxu1 %v12062_v59  ;;  %11076 = vmatprep.subr.bf16.mxu0 %v12063_v61 }
 0x2dc   : > { %v10805_v4 = vpop.f32.mrf.mxu1  ;;  %v10784_v6 = vadd.f32 %v10783_v3, %v10782_v63  ;;  %11098 = vmatprep.subr.bf16.mxu1 %v12065_v62  ;;  %8852 = vmatprep.mubr.bf16.mxu0 %v931_v45  ;;  %v12102_v63 = vld [vmem:[%s12521_s21 + $0x15e8] sm:$0xff]   ;;  %v12131_v45 = vld [vmem:[%s12521_s21 + $0x16f0] sm:$0xff]  }
 0x2dd   : > { %v10806_v7 = vadd.f32 %v10805_v4, %v10804_v0  ;;  %v10785_v9 = vpop.f32.mrf.mxu0  ;;  %8892 = vmatprep.mubr.bf16.mxu1 %v933_v51  ;;  %v12103_v4 = vld [vmem:[%s12521_s21 + $0x15a8] sm:$0xff]  }
 0x2de   : > { %v10807_v11 = vpop.f32.mrf.mxu1  ;;  %v8295_v12 = vadd.f32 %v10784_v6, %v13255_v26  ;;  %11077 = vmatpush3.bf16.msra.mxu0 %v12064_v1  ;;  %v12081_v26 = vld [vmem:[%s12521_s21 + $0x14d0] sm:$0xff]   ;;  %v12101_v1 = vld [vmem:[%s12521_s21 + $0x1528] sm:$0xff]   ;;  %v12104_v6 = vld [vmem:[%s12521_s21 + $0x1560] sm:$0xff]  }
 0x2df   : > { %v10786_v14 = vpop.f32.mrf.mxu0  ;;  %11099 = vmatpush3.bf16.msra.mxu1 %v12066_v2  ;;  %11078 = vmatprep.subr.bf16.mxu0 %v12067_v5  ;;  %v12106_v9 = vld [vmem:[%s12521_s21 + $0x15e0] sm:$0xff]  }
 0x2e0   : > { %v10808_v16 = vpop.f32.mrf.mxu1  ;;  %v13293_v17 = vadd.f32 %v10806_v7, %v8295_v12  ;;  %11100 = vmatprep.subr.bf16.mxu1 %v12069_v8  ;;  %v12107_v11 = vld [vmem:[%s12521_s21 + $0x15a0] sm:$0xff]   ;;  %v12108_v12 = vld [vmem:[%s12521_s21 + $0x1558] sm:$0xff]  }
 0x2e1   : > { %v12109_v14 = vld [vmem:[%s12521_s21 + $0x1518] sm:$0xff]   ;;  %v12112_v16 = vld [vmem:[%s12521_s21 + $0x1550] sm:$0xff]  }
 0x2e2   : > { %11079 = vmatpush3.bf16.msra.mxu0 %v12068_v10  ;;  %v12105_v10 = vld [vmem:[%s12521_s21 + $0x1520] sm:$0xff]  }
 0x2e3   : > { %11101 = vmatpush3.bf16.msra.mxu1 %v12070_v13  ;;  %11080 = vmatprep.subr.bf16.mxu0 %v12071_v15  ;;  %v12110_v13 = vld [vmem:[%s12521_s21 + $0x15d8] sm:$0xff]  }
 0x2e4   : > { %11102 = vmatprep.subr.bf16.mxu1 %v12073_v18  ;;  %v12111_v15 = vld [vmem:[%s12521_s21 + $0x1598] sm:$0xff]   ;;  %v12113_v18 = vld [vmem:[%s12521_s21 + $0x1510] sm:$0xff]  }
 0x2e6   : > { %11081 = vmatpush3.bf16.msra.mxu0 %v12072_v19  ;;  %v12115_v19 = vld [vmem:[%s12521_s21 + $0x1590] sm:$0xff]  }
 0x2e7   : > { %11103 = vmatpush3.bf16.msra.mxu1 %v12074_v20  ;;  %11082 = vmatprep.subr.bf16.mxu0 %v12075_v21  ;;  %v12116_v20 = vld [vmem:[%s12521_s21 + $0x1548] sm:$0xff]  }
 0x2e8   : > { %11104 = vmatprep.subr.bf16.mxu1 %v12077_v22  ;;  %v12118_v21 = vld [vmem:[%s12521_s21 + $0x15c8] sm:$0xff]  }
 0x2e9   : > { %v12117_v22 = vld [vmem:[%s12521_s21 + $0x1508] sm:$0xff]  }
 0x2ea   : > { %11083 = vmatpush3.bf16.msra.mxu0 %v12076_v23  ;;  %v12119_v23 = vld [vmem:[%s12521_s21 + $0x1588] sm:$0xff]  }
 0x2eb   : > { %11105 = vmatpush3.bf16.msra.mxu1 %v12078_v24  ;;  %11084 = vmatprep.subr.bf16.mxu0 %v12079_v25  ;;  %v12120_v24 = vld [vmem:[%s12521_s21 + $0x1540] sm:$0xff]  }
 0x2ec   : > { %11106 = vmatprep.subr.bf16.mxu1 %v12081_v26  ;;  %v12121_v25 = vld [vmem:[%s12521_s21 + $0x1500] sm:$0xff]  }
 0x2ed   : > { %v12122_v26 = vld [vmem:[%s12521_s21 + $0x15c0] sm:$0xff]  }
 0x2ee   : > { %11085 = vmatpush3.bf16.msra.mxu0 %v12080_v27  ;;  %v307_v27 = vld [vmem:[%s12535_s13 + $0xa8] sm:$0xff] }
 0x2ef   : > { %11107 = vmatpush3.bf16.msra.mxu1 %v12082_v28  ;;  %11086 = vmatprep.subr.bf16.mxu0 %v12083_v29  ;;  %v700_v28 = vrot.slane %v307_v27, %v12574_v42  ;;  %v12123_v29 = vld [vmem:[%s12521_s21 + $0x1580] sm:$0xff]  }
 0x2f0   : > { %11108 = vmatprep.subr.bf16.mxu1 %v12085_v30  ;;  %v693_v30 = vcombine.high %v307_v27, %v307_v27 }
 0x2f2   : > { %11087 = vmatpush3.bf16.msra.mxu0 %v12084_v31  ;;  %v12124_v31 = vld [vmem:[%s12521_s21 + $0x1678] sm:$0xff]  }
 0x2f3   : > { %11109 = vmatpush3.bf16.msra.mxu1 %v12086_v32  ;;  %11088 = vmatprep.subr.bf16.mxu0 %v12087_v33  ;;  %v708_v32 = vcombine.high %v700_v28, %v700_v28  ;;  %v707_v33 = vrot.slane %v693_v30, %v12574_v42 }
 0x2f4   : > { %11110 = vmatprep.subr.bf16.mxu1 %v12089_v34  ;;  %v934_v34 = vpack.c.bf16 %v700_v28, %v700_v28 }
 0x2f5   : > { %v709_v37 = vcombine.high %v707_v33, %v707_v33 }
 0x2f6   : > { %11089 = vmatpush3.bf16.msra.mxu0 %v12088_v36  ;;  %v935_v36 = vpack.c.bf16 %v708_v32, %v708_v32 }
 0x2f7   : > { %11111 = vmatpush3.bf16.msra.mxu1 %v12090_v39  ;;  %11118 = vmatprep.subr.bf16.mxu0 %v12091_v41  ;;  %v936_v39 = vpack.c.bf16 %v707_v33, %v707_v33  ;;  %v937_v41 = vpack.c.bf16 %v709_v37, %v709_v37  ;;  %v12161_v33 = vld [vmem:[%s12521_s21 + $0x17b8] sm:$0xff]   ;;  %v12163_v37 = vld [vmem:[%s12521_s21 + $0x1730] sm:$0xff]  }
 0x2f8   : > { %11140 = vmatprep.subr.bf16.mxu1 %v12094_v44 }
 0x2f9   : > { %v10826_v54 = vpop.f32.mrf.mxu0  ;;  %8853 = vmatmul.mubr.bf16.vlgmr.msra.gmra.mxu0 %v930_v46 }
 0x2fa   : > { %v10848_v55 = vpop.f32.mrf.mxu1  ;;  %11119 = vmatpush3.bf16.msra.mxu0 %v12093_v48  ;;  %8893 = vmatmul.mubr.bf16.vlgmr.msra.gmra.mxu1 %v932_v49  ;;  %v12133_v49 = vld [vmem:[%s12521_s21 + $0x1668] sm:$0xff]  }
 0x2fb   : > { %v10827_v58 = vpop.f32.mrf.mxu0  ;;  %11141 = vmatpush3.bf16.msra.mxu1 %v12095_v50  ;;  %11120 = vmatprep.subr.bf16.mxu0 %v12096_v52  ;;  %v12132_v52 = vld [vmem:[%s12521_s21 + $0x16b0] sm:$0xff]  }
 0x2fc   : > { %v10849_v59 = vpop.f32.mrf.mxu1  ;;  %v10828_v61 = vadd.f32 %v10827_v58, %v10826_v54  ;;  %11142 = vmatprep.subr.bf16.mxu1 %v12098_v53  ;;  %8932 = vmatprep.mubr.bf16.mxu0 %v935_v36 }
 0x2fd   : > { %v10850_v62 = vadd.f32 %v10849_v59, %v10848_v55  ;;  %v10829_v0 = vpop.f32.mrf.mxu0  ;;  %8972 = vmatprep.mubr.bf16.mxu1 %v937_v41  ;;  %v12135_v55 = vld [vmem:[%s12521_s21 + $0x16e8] sm:$0xff]  }
 0x2fe   : > { %v10851_v2 = vpop.f32.mrf.mxu1  ;;  %v8375_v3 = vadd.f32 %v10828_v61, %v13293_v17  ;;  %11121 = vmatpush3.bf16.msra.mxu0 %v12097_v56  ;;  %v12114_v17 = vld [vmem:[%s12521_s21 + $0x15d0] sm:$0xff]   ;;  %v12139_v0 = vld [vmem:[%s12521_s21 + $0x16e0] sm:$0xff]  }
 0x2ff   : > { %v10830_v5 = vpop.f32.mrf.mxu0  ;;  %11143 = vmatpush3.bf16.msra.mxu1 %v12099_v57  ;;  %11122 = vmatprep.subr.bf16.mxu0 %v12100_v60  ;;  %v12134_v57 = vld [vmem:[%s12521_s21 + $0x1628] sm:$0xff]   ;;  %v12137_v60 = vld [vmem:[%s12521_s21 + $0x1660] sm:$0xff]   ;;  %v12141_v2 = vld [vmem:[%s12521_s21 + $0x1658] sm:$0xff]  }
 0x300   : > { %v10852_v7 = vpop.f32.mrf.mxu1  ;;  %v13331_v8 = vadd.f32 %v10850_v62, %v8375_v3  ;;  %11144 = vmatprep.subr.bf16.mxu1 %v12102_v63  ;;  %v12136_v62 = vld [vmem:[%s12521_s21 + $0x16a8] sm:$0xff]   ;;  %v12140_v3 = vld [vmem:[%s12521_s21 + $0x16a0] sm:$0xff]   ;;  %v12142_v5 = vld [vmem:[%s12521_s21 + $0x1618] sm:$0xff]  }
 0x301   : > { %v12144_v7 = vld [vmem:[%s12521_s21 + $0x1698] sm:$0xff]  }
 0x302   : > { %11123 = vmatpush3.bf16.msra.mxu0 %v12101_v1  ;;  %v12138_v1 = vld [vmem:[%s12521_s21 + $0x1620] sm:$0xff]  }
 0x303   : > { %11145 = vmatpush3.bf16.msra.mxu1 %v12103_v4  ;;  %11124 = vmatprep.subr.bf16.mxu0 %v12104_v6  ;;  %v12143_v4 = vld [vmem:[%s12521_s21 + $0x16d8] sm:$0xff]   ;;  %v12145_v6 = vld [vmem:[%s12521_s21 + $0x1650] sm:$0xff]  }
 0x304   : > { %11146 = vmatprep.subr.bf16.mxu1 %v12106_v9  ;;  %v12146_v9 = vld [vmem:[%s12521_s21 + $0x1610] sm:$0xff]  }
 0x306   : > { %11125 = vmatpush3.bf16.msra.mxu0 %v12105_v10  ;;  %v12149_v10 = vld [vmem:[%s12521_s21 + $0x1648] sm:$0xff]  }
 0x307   : > { %11147 = vmatpush3.bf16.msra.mxu1 %v12107_v11  ;;  %11126 = vmatprep.subr.bf16.mxu0 %v12108_v12  ;;  %v12148_v11 = vld [vmem:[%s12521_s21 + $0x1690] sm:$0xff]   ;;  %v12151_v12 = vld [vmem:[%s12521_s21 + $0x16c8] sm:$0xff]  }
 0x308   : > { %11148 = vmatprep.subr.bf16.mxu1 %v12110_v13  ;;  %v12150_v13 = vld [vmem:[%s12521_s21 + $0x1608] sm:$0xff]  }
 0x30a   : > { %11127 = vmatpush3.bf16.msra.mxu0 %v12109_v14  ;;  %v12153_v14 = vld [vmem:[%s12521_s21 + $0x1640] sm:$0xff]  }
 0x30b   : > { %11149 = vmatpush3.bf16.msra.mxu1 %v12111_v15  ;;  %11128 = vmatprep.subr.bf16.mxu0 %v12112_v16  ;;  %v12152_v15 = vld [vmem:[%s12521_s21 + $0x1688] sm:$0xff]   ;;  %v12155_v16 = vld [vmem:[%s12521_s21 + $0x16c0] sm:$0xff]  }
 0x30c   : > { %11150 = vmatprep.subr.bf16.mxu1 %v12114_v17  ;;  %v308_v17 = vld [vmem:[%s12535_s13 + $0xb0] sm:$0xff] }
 0x30e   : > { %11129 = vmatpush3.bf16.msra.mxu0 %v12113_v18  ;;  %v12154_v18 = vld [vmem:[%s12521_s21 + $0x1600] sm:$0xff]  }
 0x30f   : > { %11151 = vmatpush3.bf16.msra.mxu1 %v12115_v19  ;;  %11130 = vmatprep.subr.bf16.mxu0 %v12116_v20  ;;  %v717_v19 = vrot.slane %v308_v17, %v12574_v42  ;;  %v710_v20 = vcombine.high %v308_v17, %v308_v17 }
 0x310   : > { %11152 = vmatprep.subr.bf16.mxu1 %v12118_v21  ;;  %v12157_v21 = vld [vmem:[%s12521_s21 + $0x1778] sm:$0xff]  }
 0x312   : > { %11131 = vmatpush3.bf16.msra.mxu0 %v12117_v22  ;;  %v725_v22 = vcombine.high %v717_v19, %v717_v19 }
 0x313   : > { %11153 = vmatpush3.bf16.msra.mxu1 %v12119_v23  ;;  %11132 = vmatprep.subr.bf16.mxu0 %v12120_v24  ;;  %v12156_v23 = vld [vmem:[%s12521_s21 + $0x1680] sm:$0xff]   ;;  %v724_v24 = vrot.slane %v710_v20, %v12574_v42 }
 0x314   : > { %11154 = vmatprep.subr.bf16.mxu1 %v12122_v26  ;;  %v12160_v26 = vld [vmem:[%s12521_s21 + $0x17f8] sm:$0xff]   ;;  %v939_v27 = vpack.c.bf16 %v725_v22, %v725_v22 }
 0x315   : > { %v726_v28 = vcombine.high %v724_v24, %v724_v24  ;;  %v940_v30 = vpack.c.bf16 %v724_v24, %v724_v24  ;;  %v12194_v24 = vld [vmem:[%s12521_s21 + $0x1830] sm:$0xff]  }
 0x316   : > { %11133 = vmatpush3.bf16.msra.mxu0 %v12121_v25  ;;  %v938_v25 = vpack.c.bf16 %v717_v19, %v717_v19  ;;  %v12192_v19 = vld [vmem:[%s12521_s21 + $0x1838] sm:$0xff]  }
 0x317   : > { %11155 = vmatpush3.bf16.msra.mxu1 %v12123_v29  ;;  %11162 = vmatprep.subr.bf16.mxu0 %v12124_v31  ;;  %v12159_v29 = vld [vmem:[%s12521_s21 + $0x1738] sm:$0xff]   ;;  %v12162_v31 = vld [vmem:[%s12521_s21 + $0x1770] sm:$0xff]   ;;  %v941_v32 = vpack.c.bf16 %v726_v28, %v726_v28 }
 0x318   : > { %11184 = vmatprep.subr.bf16.mxu1 %v12127_v35  ;;  %v12164_v35 = vld [vmem:[%s12521_s21 + $0x17f0] sm:$0xff]  }
 0x319   : > { %v10870_v44 = vpop.f32.mrf.mxu0  ;;  %8933 = vmatmul.mubr.bf16.vlgmr.msra.gmra.mxu0 %v934_v34 }
 0x31a   : > { %11163 = vmatpush3.bf16.msra.mxu0 %v12126_v38  ;;  %v10892_v46 = vpop.f32.mrf.mxu1  ;;  %8973 = vmatmul.mubr.bf16.vlgmr.msra.gmra.mxu1 %v936_v39  ;;  %v12166_v39 = vld [vmem:[%s12521_s21 + $0x1768] sm:$0xff]  }
 0x31b   : > { %v10871_v48 = vpop.f32.mrf.mxu0  ;;  %11164 = vmatprep.subr.bf16.mxu0 %v12129_v40  ;;  %11185 = vmatpush3.bf16.msra.mxu1 %v12128_v43  ;;  %v12165_v43 = vld [vmem:[%s12521_s21 + $0x17b0] sm:$0xff]  }
 0x31c   : > { %v10872_v50 = vadd.f32 %v10871_v48, %v10870_v44  ;;  %v10893_v51 = vpop.f32.mrf.mxu1  ;;  %11186 = vmatprep.subr.bf16.mxu1 %v12131_v45  ;;  %9012 = vmatprep.mubr.bf16.mxu0 %v939_v27  ;;  %v12167_v48 = vld [vmem:[%s12521_s21 + $0x1728] sm:$0xff]  }
 0x31d   : > { %v10873_v53 = vpop.f32.mrf.mxu0  ;;  %v10894_v54 = vadd.f32 %v10893_v51, %v10892_v46  ;;  %9052 = vmatprep.mubr.bf16.mxu1 %v941_v32  ;;  %v12168_v46 = vld [vmem:[%s12521_s21 + $0x17e8] sm:$0xff]   ;;  %v12170_v51 = vld [vmem:[%s12521_s21 + $0x1760] sm:$0xff]  }
 0x31e   : > { %v8455_v56 = vadd.f32 %v10872_v50, %v13331_v8  ;;  %11165 = vmatpush3.bf16.msra.mxu0 %v12130_v47  ;;  %v10895_v58 = vpop.f32.mrf.mxu1  ;;  %v12147_v8 = vld [vmem:[%s12521_s21 + $0x16d0] sm:$0xff]   ;;  %v12169_v53 = vld [vmem:[%s12521_s21 + $0x17a8] sm:$0xff]  }
 0x31f   : > { %v10874_v59 = vpop.f32.mrf.mxu0  ;;  %11166 = vmatprep.subr.bf16.mxu0 %v12133_v49  ;;  %11187 = vmatpush3.bf16.msra.mxu1 %v12132_v52  ;;  %v12173_v58 = vld [vmem:[%s12521_s21 + $0x17a0] sm:$0xff]   ;;  %v12196_v32 = vld [vmem:[%s12521_s21 + $0x1828] sm:$0xff]  }
 0x320   : > { %v13368_v61 = vadd.f32 %v10894_v54, %v8455_v56  ;;  %v10896_v63 = vpop.f32.mrf.mxu1  ;;  %11188 = vmatprep.subr.bf16.mxu1 %v12135_v55  ;;  %v12172_v55 = vld [vmem:[%s12521_s21 + $0x17e0] sm:$0xff]   ;;  %v12176_v59 = vld [vmem:[%s12521_s21 + $0x17d8] sm:$0xff]  }
 0x321   : > { %v12171_v56 = vld [vmem:[%s12521_s21 + $0x1720] sm:$0xff]   ;;  %v12180_v63 = vld [vmem:[%s12521_s21 + $0x17d0] sm:$0xff]  }
 0x322   : > { %11167 = vmatpush3.bf16.msra.mxu0 %v12134_v57  ;;  %v12174_v57 = vld [vmem:[%s12521_s21 + $0x1758] sm:$0xff]  }
 0x323   : > { %11168 = vmatprep.subr.bf16.mxu0 %v12137_v60  ;;  %11189 = vmatpush3.bf16.msra.mxu1 %v12136_v62  ;;  %v12175_v60 = vld [vmem:[%s12521_s21 + $0x1718] sm:$0xff]  }
 0x324   : > { %11190 = vmatprep.subr.bf16.mxu1 %v12139_v0  ;;  %v12177_v62 = vld [vmem:[%s12521_s21 + $0x1798] sm:$0xff]   ;;  %v12179_v0 = vld [vmem:[%s12521_s21 + $0x1710] sm:$0xff]  }
 0x326   : > { %11169 = vmatpush3.bf16.msra.mxu0 %v12138_v1  ;;  %v12182_v1 = vld [vmem:[%s12521_s21 + $0x1748] sm:$0xff]  }
 0x327   : > { %11170 = vmatprep.subr.bf16.mxu0 %v12141_v2  ;;  %11191 = vmatpush3.bf16.msra.mxu1 %v12140_v3  ;;  %v12181_v2 = vld [vmem:[%s12521_s21 + $0x1790] sm:$0xff]   ;;  %v12184_v3 = vld [vmem:[%s12521_s21 + $0x17c8] sm:$0xff]  }
 0x328   : > { %11192 = vmatprep.subr.bf16.mxu1 %v12143_v4  ;;  %v12183_v4 = vld [vmem:[%s12521_s21 + $0x1708] sm:$0xff]  }
 0x32a   : > { %11171 = vmatpush3.bf16.msra.mxu0 %v12142_v5  ;;  %v12186_v5 = vld [vmem:[%s12521_s21 + $0x1740] sm:$0xff]  }
 0x32b   : > { %11172 = vmatprep.subr.bf16.mxu0 %v12145_v6  ;;  %11193 = vmatpush3.bf16.msra.mxu1 %v12144_v7  ;;  %v12185_v6 = vld [vmem:[%s12521_s21 + $0x1788] sm:$0xff]   ;;  %v12188_v7 = vld [vmem:[%s12521_s21 + $0x17c0] sm:$0xff]  }
 0x32c   : > { %11194 = vmatprep.subr.bf16.mxu1 %v12147_v8  ;;  %v309_v8 = vld [vmem:[%s12535_s13 + $0xb8] sm:$0xff] }
 0x32e   : > { %11173 = vmatpush3.bf16.msra.mxu0 %v12146_v9  ;;  %v12187_v9 = vld [vmem:[%s12521_s21 + $0x1700] sm:$0xff]  }
 0x32f   : > { %11174 = vmatprep.subr.bf16.mxu0 %v12149_v10  ;;  %11195 = vmatpush3.bf16.msra.mxu1 %v12148_v11  ;;  %v734_v10 = vrot.slane %v309_v8, %v12574_v42  ;;  %v727_v11 = vcombine.high %v309_v8, %v309_v8 }
 0x330   : > { %11196 = vmatprep.subr.bf16.mxu1 %v12151_v12  ;;  %v12190_v12 = vld [vmem:[%s12521_s21 + $0x1878] sm:$0xff]  }
 0x332   : > { %11175 = vmatpush3.bf16.msra.mxu0 %v12150_v13  ;;  %v742_v13 = vcombine.high %v734_v10, %v734_v10 }
 0x333   : > { %11176 = vmatprep.subr.bf16.mxu0 %v12153_v14  ;;  %11197 = vmatpush3.bf16.msra.mxu1 %v12152_v15  ;;  %v12189_v14 = vld [vmem:[%s12521_s21 + $0x1780] sm:$0xff]   ;;  %v741_v15 = vrot.slane %v727_v11, %v12574_v42 }
 0x334   : > { %11198 = vmatprep.subr.bf16.mxu1 %v12155_v16  ;;  %v942_v16 = vpack.c.bf16 %v734_v10, %v734_v10  ;;  %v943_v17 = vpack.c.bf16 %v742_v13, %v742_v13 }
 0x335   : > { %v944_v20 = vpack.c.bf16 %v741_v15, %v741_v15 }
 0x336   : > { %11177 = vmatpush3.bf16.msra.mxu0 %v12154_v18  ;;  %v743_v18 = vcombine.high %v741_v15, %v741_v15 }
 0x337   : > { %11206 = vmatprep.subr.bf16.mxu0 %v12157_v21  ;;  %11199 = vmatpush3.bf16.msra.mxu1 %v12156_v23  ;;  %v12193_v21 = vld [vmem:[%s12521_s21 + $0x1870] sm:$0xff]  }
 0x338   : > { %11228 = vmatprep.subr.bf16.mxu1 %v12160_v26  ;;  %v945_v22 = vpack.c.bf16 %v743_v18, %v743_v18  ;;  %v12195_v26 = vld [vmem:[%s12521_s21 + $0x1868] sm:$0xff]  }
 0x339   : > { %v10914_v34 = vpop.f32.mrf.mxu0  ;;  %9013 = vmatmul.mubr.bf16.vlgmr.msra.gmra.mxu0 %v938_v25 }
 0x33a   : > { %11207 = vmatpush3.bf16.msra.mxu0 %v12159_v29  ;;  %v10936_v36 = vpop.f32.mrf.mxu1  ;;  %9053 = vmatmul.mubr.bf16.vlgmr.msra.gmra.mxu1 %v940_v30 }
 0x33b   : > { %v10915_v38 = vpop.f32.mrf.mxu0  ;;  %11208 = vmatprep.subr.bf16.mxu0 %v12162_v31  ;;  %11229 = vmatpush3.bf16.msra.mxu1 %v12161_v33 }
 0x33c   : > { %v10916_v40 = vadd.f32 %v10915_v38, %v10914_v34  ;;  %v10937_v41 = vpop.f32.mrf.mxu1  ;;  %11230 = vmatprep.subr.bf16.mxu1 %v12164_v35  ;;  %9092 = vmatprep.mubr.bf16.mxu0 %v943_v17  ;;  %v12197_v35 = vld [vmem:[%s12521_s21 + $0x1860] sm:$0xff]  }
 0x33d   : > { %v10917_v44 = vpop.f32.mrf.mxu0  ;;  %v10938_v45 = vadd.f32 %v10937_v41, %v10936_v36  ;;  %9132 = vmatprep.mubr.bf16.mxu1 %v945_v22  ;;  %v12198_v38 = vld [vmem:[%s12521_s21 + $0x1820] sm:$0xff]  }
 0x33e   : > { %v8535_v47 = vadd.f32 %v10916_v40, %v13368_v61  ;;  %11209 = vmatpush3.bf16.msra.mxu0 %v12163_v37  ;;  %v10939_v49 = vpop.f32.mrf.mxu1  ;;  %v12178_v61 = vld [vmem:[%s12521_s21 + $0x1750] sm:$0xff]   ;;  %v9401_v40 = vld.sshfl [vmem:[%s12535_s13 + $0xc0] sm:$0x33 pattern:$0x76325410] }
 0x33f   : > { %v10918_v50 = vpop.f32.mrf.mxu0  ;;  %11210 = vmatprep.subr.bf16.mxu0 %v12166_v39  ;;  %11231 = vmatpush3.bf16.msra.mxu1 %v12165_v43  ;;  %v12199_v39 = vld [vmem:[%s12521_s21 + $0x1858] sm:$0xff]   ;;  %v751_v41 = vcombine.high %v9401_v40, %v9401_v40  ;;  %v12205_v49 = vld [vmem:[%s12521_s21 + $0x1840] sm:$0xff]  }
 0x340   : > { %v13406_v52 = vadd.f32 %v10938_v45, %v8535_v47  ;;  %v10940_v54 = vpop.f32.mrf.mxu1  ;;  %11232 = vmatprep.subr.bf16.mxu1 %v12168_v46  ;;  %v12200_v43 = vld [vmem:[%s12521_s21 + $0x1818] sm:$0xff]   ;;  %v12201_v45 = vld [vmem:[%s12521_s21 + $0x1850] sm:$0xff]   ;;  %v12203_v47 = vld [vmem:[%s12521_s21 + $0x1848] sm:$0xff]  }
 0x341   : > { %v947_v44 = vpack.c.bf16 %v751_v41, %v751_v41  ;;  %v12202_v46 = vld [vmem:[%s12521_s21 + $0x1810] sm:$0xff]   ;;  %v12206_v50 = vld [vmem:[%s12521_s21 + $0x1800] sm:$0xff]  }
 0x342   : > { %11211 = vmatpush3.bf16.msra.mxu0 %v12167_v48  ;;  %v12204_v48 = vld [vmem:[%s12521_s21 + $0x1808] sm:$0xff]  }
 0x343   : > { %11212 = vmatprep.subr.bf16.mxu0 %v12170_v51  ;;  %11233 = vmatpush3.bf16.msra.mxu1 %v12169_v53  ;;  %v946_v51 = vpack.c.bf16 %v9401_v40, %v9401_v40 }
 0x344   : > { %11234 = vmatprep.subr.bf16.mxu1 %v12172_v55 }
 0x346   : > { %11213 = vmatpush3.bf16.msra.mxu0 %v12171_v56 }
 0x347   : > { %11214 = vmatprep.subr.bf16.mxu0 %v12174_v57  ;;  %11235 = vmatpush3.bf16.msra.mxu1 %v12173_v58 }
 0x348   : > { %11236 = vmatprep.subr.bf16.mxu1 %v12176_v59 }
 0x34a   : > { %11215 = vmatpush3.bf16.msra.mxu0 %v12175_v60 }
 0x34b   : > { %11216 = vmatprep.subr.bf16.mxu0 %v12178_v61  ;;  %11237 = vmatpush3.bf16.msra.mxu1 %v12177_v62 }
 0x34c   : > { %11238 = vmatprep.subr.bf16.mxu1 %v12180_v63 }
 0x34e   : > { %11217 = vmatpush3.bf16.msra.mxu0 %v12179_v0 }
 0x34f   : > { %11218 = vmatprep.subr.bf16.mxu0 %v12182_v1  ;;  %11239 = vmatpush3.bf16.msra.mxu1 %v12181_v2 }
 0x350   : > { %11240 = vmatprep.subr.bf16.mxu1 %v12184_v3 }
 0x352   : > { %11219 = vmatpush3.bf16.msra.mxu0 %v12183_v4 }
 0x353   : > { %11220 = vmatprep.subr.bf16.mxu0 %v12186_v5  ;;  %11241 = vmatpush3.bf16.msra.mxu1 %v12185_v6 }
 0x354   : > { %11242 = vmatprep.subr.bf16.mxu1 %v12188_v7 }
 0x356   : > { %11221 = vmatpush3.bf16.msra.mxu0 %v12187_v9 }
 0x357   : > { %11250 = vmatprep.subr.bf16.mxu0 %v12190_v12  ;;  %11243 = vmatpush3.bf16.msra.mxu1 %v12189_v14 }
 0x359   : > { %v10958_v23 = vpop.f32.mrf.mxu0  ;;  %9093 = vmatmul.mubr.bf16.vlgmr.msra.gmra.mxu0 %v942_v16 }
 0x35a   : > { %11251 = vmatpush3.bf16.msra.mxu0 %v12192_v19  ;;  %v10980_v42 = vpop.f32.mrf.mxu1  ;;  %9133 = vmatmul.mubr.bf16.vlgmr.msra.gmra.mxu1 %v944_v20 }
 0x35b   : > { %v10959_v25 = vpop.f32.mrf.mxu0  ;;  %11252 = vmatprep.subr.bf16.mxu0 %v12193_v21  ;;  %9172 = vmatprep.mubr.bf16.mxu0 %v947_v44 }
 0x35c   : > { %v10960_v27 = vadd.f32 %v10959_v25, %v10958_v23  ;;  %v10981_v28 = vpop.f32.mrf.mxu1 }
 0x35d   : > { %v10961_v29 = vpop.f32.mrf.mxu0  ;;  %v10982_v30 = vadd.f32 %v10981_v28, %v10980_v42 }
 0x35e   : > { %v8615_v31 = vadd.f32 %v10960_v27, %v13406_v52  ;;  %11253 = vmatpush3.bf16.msra.mxu0 %v12194_v24  ;;  %v10983_v33 = vpop.f32.mrf.mxu1 }
 0x35f   : > { %v10962_v34 = vpop.f32.mrf.mxu0  ;;  %11254 = vmatprep.subr.bf16.mxu0 %v12195_v26 }
 0x360   : > { %v8655_v36 = vadd.f32 %v10982_v30, %v8615_v31  ;;  %v10984_v37 = vpop.f32.mrf.mxu1 }
 0x362   : > { %11255 = vmatpush3.bf16.msra.mxu0 %v12196_v32 }
 0x363   : > { %11256 = vmatprep.subr.bf16.mxu0 %v12197_v35 }
 0x366   : > { %11257 = vmatpush3.bf16.msra.mxu0 %v12198_v38 }
 0x367   : > { %11258 = vmatprep.subr.bf16.mxu0 %v12199_v39 }
 0x36a   : > { %11259 = vmatpush3.bf16.msra.mxu0 %v12200_v43 }
 0x36b   : > { %11260 = vmatprep.subr.bf16.mxu0 %v12201_v45 }
 0x36e   : > { %11261 = vmatpush3.bf16.msra.mxu0 %v12202_v46 }
 0x36f   : > { %11262 = vmatprep.subr.bf16.mxu0 %v12203_v47 }
 0x372   : > { %11263 = vmatpush3.bf16.msra.mxu0 %v12204_v48 }
 0x373   : > { %11264 = vmatprep.subr.bf16.mxu0 %v12205_v49 }
 0x376   : > { %11265 = vmatpush3.bf16.msra.mxu0 %v12206_v50 }
 0x379   : > { %v11002_v52 = vpop.f32.mrf.mxu0  ;;  %9173 = vmatmul.mubr.bf16.vlgmr.msra.gmra.mxu0 %v946_v51 }
 0x37a   : > { %v11024_v53 = vpop.f32.mrf.mxu1 }
 0x37b   : > { %v11003_v54 = vpop.f32.mrf.mxu0 }
 0x37c   : > { %v11004_v55 = vadd.f32 %v11003_v54, %v11002_v52  ;;  %v11025_v56 = vpop.f32.mrf.mxu1 }
 0x37d   : > { %v11005_v57 = vpop.f32.mrf.mxu0  ;;  %v11026_v58 = vadd.f32 %v11025_v56, %v11024_v53 }
 0x37e   : > { %v8695_v59 = vadd.f32 %v11004_v55, %v8655_v36  ;;  %v11027_v60 = vpop.f32.mrf.mxu1 }
 0x37f   : > { %v11006_v61 = vpop.f32.mrf.mxu0 }
 0x380   : > { %v8735_v62 = vadd.f32 %v11026_v58, %v8695_v59  ;;  %v11028_v63 = vpop.f32.mrf.mxu1 }
 0x381   : > { %v285_v63 = vld [vmem:[#allocation2] sm:$0x3] }
 0x399   : > { %v11046_v0 = vpop.f32.mrf.mxu0 }
 0x39a   : > { %v11068_v1 = vpop.f32.mrf.mxu1 }
 0x39b   : > { %v11047_v2 = vpop.f32.mrf.mxu0 }
 0x39c   : > { %v11048_v3 = vadd.f32 %v11047_v2, %v11046_v0  ;;  %v11069_v4 = vpop.f32.mrf.mxu1 }
 0x39d   : > { %v11049_v5 = vpop.f32.mrf.mxu0  ;;  %v11070_v6 = vadd.f32 %v11069_v4, %v11068_v1 }
 0x39e   : > { %v8775_v7 = vadd.f32 %v11048_v3, %v8735_v62  ;;  %v11071_v8 = vpop.f32.mrf.mxu1 }
 0x39f   : > { %v11050_v9 = vpop.f32.mrf.mxu0 }
 0x3a0   : > { %v8815_v10 = vadd.f32 %v11070_v6, %v8775_v7  ;;  %v11072_v11 = vpop.f32.mrf.mxu1 }
 0x3b9   : > { %v11090_v12 = vpop.f32.mrf.mxu0 }
 0x3ba   : > { %v11112_v13 = vpop.f32.mrf.mxu1 }
 0x3bb   : > { %v11091_v14 = vpop.f32.mrf.mxu0 }
 0x3bc   : > { %v11092_v15 = vadd.f32 %v11091_v14, %v11090_v12  ;;  %v11113_v16 = vpop.f32.mrf.mxu1 }
 0x3bd   : > { %v11093_v17 = vpop.f32.mrf.mxu0  ;;  %v11114_v18 = vadd.f32 %v11113_v16, %v11112_v13 }
 0x3be   : > { %v8855_v19 = vadd.f32 %v11092_v15, %v8815_v10  ;;  %v11115_v20 = vpop.f32.mrf.mxu1 }
 0x3bf   : > { %v11094_v21 = vpop.f32.mrf.mxu0 }
 0x3c0   : > { %v8895_v22 = vadd.f32 %v11114_v18, %v8855_v19  ;;  %v11116_v23 = vpop.f32.mrf.mxu1 }
 0x3d9   : > { %v11134_v42 = vpop.f32.mrf.mxu0 }
 0x3da   : > { %v11156_v25 = vpop.f32.mrf.mxu1 }
 0x3db   : > { %v11135_v24 = vpop.f32.mrf.mxu0 }
 0x3dc   : > { %v11136_v26 = vadd.f32 %v11135_v24, %v11134_v42  ;;  %v11157_v28 = vpop.f32.mrf.mxu1 }
 0x3dd   : > { %v11137_v27 = vpop.f32.mrf.mxu0  ;;  %v11158_v30 = vadd.f32 %v11157_v28, %v11156_v25 }
 0x3de   : > { %v8935_v29 = vadd.f32 %v11136_v26, %v8895_v22  ;;  %v11159_v32 = vpop.f32.mrf.mxu1 }
 0x3df   : > { %v11138_v31 = vpop.f32.mrf.mxu0 }
 0x3e0   : > { %v8975_v33 = vadd.f32 %v11158_v30, %v8935_v29  ;;  %v11160_v34 = vpop.f32.mrf.mxu1 }
 0x3f9   : > { %v11178_v35 = vpop.f32.mrf.mxu0 }
 0x3fa   : > { %v11200_v37 = vpop.f32.mrf.mxu1 }
 0x3fb   : > { %v11179_v36 = vpop.f32.mrf.mxu0 }
 0x3fc   : > { %v11201_v39 = vpop.f32.mrf.mxu1  ;;  %v11180_v52 = vadd.f32 %v11179_v36, %v11178_v35 }
 0x3fd   : > { %v11181_v38 = vpop.f32.mrf.mxu0  ;;  %v11202_v54 = vadd.f32 %v11201_v39, %v11200_v37 }
 0x3fe   : > { %v11203_v41 = vpop.f32.mrf.mxu1  ;;  %v9015_v53 = vadd.f32 %v11180_v52, %v8975_v33 }
 0x3ff   : > { %v11182_v40 = vpop.f32.mrf.mxu0 }
 0x400   : > { %v11204_v43 = vpop.f32.mrf.mxu1  ;;  %v9055_v56 = vadd.f32 %v11202_v54, %v9015_v53 }
 0x419   : > { %v11222_v44 = vpop.f32.mrf.mxu0 }
 0x41a   : > { %v11244_v46 = vpop.f32.mrf.mxu1 }
 0x41b   : > { %v11223_v45 = vpop.f32.mrf.mxu0 }
 0x41c   : > { %v11245_v48 = vpop.f32.mrf.mxu1  ;;  %v11224_v55 = vadd.f32 %v11223_v45, %v11222_v44 }
 0x41d   : > { %v11225_v47 = vpop.f32.mrf.mxu0  ;;  %v11246_v58 = vadd.f32 %v11245_v48, %v11244_v46 }
 0x41e   : > { %v11247_v50 = vpop.f32.mrf.mxu1  ;;  %v9095_v57 = vadd.f32 %v11224_v55, %v9055_v56 }
 0x41f   : > { %v11226_v49 = vpop.f32.mrf.mxu0 }
 0x420   : > { %v11248_v51 = vpop.f32.mrf.mxu1  ;;  %v9135_v61 = vadd.f32 %v11246_v58, %v9095_v57 }
 0x439   : > { %v11266_v59 = vpop.f32.mrf.mxu0 }
 0x43b   : > { %v11267_v60 = vpop.f32.mrf.mxu0 }
 0x43c   : > { %v11268_v62 = vadd.f32 %v11267_v60, %v11266_v59 }
 0x43d   : > { %v11269_v0 = vpop.f32.mrf.mxu0 }
 0x43e   : > { %v9175_v1 = vadd.f32 %v11268_v62, %v9135_v61  ;;  %9185 = sbr.rel (%p10186_p11) target bundleno = 1632 (0x660), region = 60 }
 0x43f   : > { %v11270_v2 = vpop.f32.mrf.mxu0 }
 0x440   : > { %v9180_v3 = vadd.f32 %v9175_v1, %v285_v63 }
 0x442   : > { %9181 = vst [vmem:[#allocation2] sm:$0x3] %v9180_v3 }
 0x443   : > { %v9211_v4 = vld [vmem:[%s13529_s3 + $0x78] sm:$0xff]  ;;  %v12366_v5 = vmov 0.0   ;;  %v9210_v6 = vld [vmem:[%s13529_s3 + $0x70] sm:$0xff]  ;;  %vm12367_vm0 = vmmov 0   ;;  %v9209_v7 = vld [vmem:[%s13529_s3 + $0x68] sm:$0xff]  ;;  %vm9289_vm1 = vcmask 25600  }
 0x444   : > { %11289 = vmatprep.subr.mxu0 %v12366_v5  ;;  %11321 = vmatprep.mubr.msk.f32.mxu0 %vm12367_vm0, %v12366_v5  ;;  %v9208_v8 = vld [vmem:[%s13529_s3 + $0x60] sm:$0xff]  ;;  %v9207_v9 = vld [vmem:[%s13529_s3 + $0x58] sm:$0xff]  ;;  %v9206_v10 = vld [vmem:[%s13529_s3 + $0x50] sm:$0xff] }
 0x445   : > { %11290 = vmatpush3.msra.mxu0 %v9211_v4  ;;  %v9205_v11 = vld [vmem:[%s13529_s3 + $0x48] sm:$0xff]  ;;  %v9204_v12 = vld [vmem:[%s13529_s3 + $0x40] sm:$0xff]  ;;  %v9203_v13 = vld [vmem:[%s13529_s3 + $0x38] sm:$0xff] }
 0x446   : > { %11291 = vmatprep.subr.mxu0 %v12366_v5  ;;  %v9202_v14 = vld [vmem:[%s13529_s3 + $0x30] sm:$0xff]  ;;  %v9201_v15 = vld [vmem:[%s13529_s3 + $0x28] sm:$0xff]  ;;  %v9200_v16 = vld [vmem:[%s13529_s3 + $0x20] sm:$0xff] }
 0x447   : > { %11292 = vmatpush3.msra.mxu0 %v9210_v6  ;;  %v10187_v18 = vld [vmem:[#allocation6] ss:$0 sm:$0xff]  ;;  %v9199_v19 = vld [vmem:[%s13529_s3 + $0x18] sm:$0xff]  ;;  %v9198_v20 = vld [vmem:[%s13529_s3 + $0x10] sm:$0xff] }
 0x448   : > { %11293 = vmatprep.subr.mxu0 %v12366_v5  ;;  %v9197_v22 = vld [vmem:[%s13529_s3 + $0x8] sm:$0xff]  ;;  %v9196_v23 = vld [vmem:[%s13529_s3] sm:$0xff] }
 0x449   : > { %11294 = vmatpush3.msra.mxu0 %v9209_v7  ;;  %v9186_v17 = vld [vmem:[#allocation2] sm:$0x3]  ;;  %v10188_v24 = vld [vmem:[#allocation8] ss:$0 sm:$0xff] }
 0x44a   : > { %11295 = vmatprep.subr.mxu0 %v12366_v5  ;;  %v9194_v21 = vadd.f32 %v10187_v18, %v9186_v17 }
 0x44b   : > { %11296 = vmatpush3.msra.mxu0 %v9208_v8 }
 0x44c   : > { %11297 = vmatprep.subr.mxu0 %v12366_v5  ;;  %v9195_v42 = vmax.f32 %v9194_v21, 0.0 }
 0x44d   : > { %11298 = vmatpush3.msra.mxu0 %v9207_v9 }
 0x44e   : > { %11299 = vmatprep.subr.mxu0 %v12366_v5 }
 0x44f   : > { %11300 = vmatpush3.msra.mxu0 %v9206_v10 }
 0x450   : > { %11301 = vmatprep.subr.mxu0 %v12366_v5 }
 0x451   : > { %11302 = vmatpush3.msra.mxu0 %v9205_v11 }
 0x452   : > { %11303 = vmatprep.subr.mxu0 %v12366_v5 }
 0x453   : > { %11304 = vmatpush3.msra.mxu0 %v9204_v12 }
 0x454   : > { %11305 = vmatprep.subr.mxu0 %v12366_v5 }
 0x455   : > { %11306 = vmatpush3.msra.mxu0 %v9203_v13 }
 0x456   : > { %11307 = vmatprep.subr.mxu0 %v12366_v5 }
 0x457   : > { %11308 = vmatpush3.msra.mxu0 %v9202_v14 }
 0x458   : > { %11309 = vmatprep.subr.mxu0 %v12366_v5 }
 0x459   : > { %11310 = vmatpush3.msra.mxu0 %v9201_v15 }
 0x45a   : > { %11311 = vmatprep.subr.mxu0 %v12366_v5 }
 0x45b   : > { %11312 = vmatpush3.msra.mxu0 %v9200_v16 }
 0x45c   : > { %11313 = vmatprep.subr.mxu0 %v12366_v5 }
 0x45d   : > { %11314 = vmatpush3.msra.mxu0 %v9199_v19 }
 0x45e   : > { %11315 = vmatprep.subr.mxu0 %v12366_v5 }
 0x45f   : > { %11316 = vmatpush3.msra.mxu0 %v9198_v20 }
 0x460   : > { %11317 = vmatprep.subr.mxu0 %v12366_v5 }
 0x461   : > { %11318 = vmatpush3.msra.mxu0 %v9197_v22 }
 0x462   : > { %11319 = vmatprep.subr.mxu0 %v12366_v5 }
 0x463   : > { %11320 = vmatpush3.msra.mxu0 %v9196_v23 }
 0x464   : > { %11322 = vmatmul.mubr.f32.vlgmr.msra.gmra.mxu0 %v9195_v42 }
 0x524   : > { %v9285_v25 = vpop.f32.mrf.mxu0 }
 0x525   : > { %v9286_v26 = vadd.f32 %v10188_v24, %v9285_v25 }
 0x526   : > { %v11323_v27 = vpop.f32.mrf.mxu0 }
 0x527   : > { %v9290_v28 = vsel %vm9289_vm1, %v9286_v26, -inf }
 0x528   : > { %9291 = vmax.xlane.f32.xlu0 %v9290_v28 }
 0x5b1   : > { %v9292_v29 = vpop.xlane.xlu0 %9291 }
 0x5b2   : > { %v9293_v30 = vsub.f32 %v9286_v26, %v9292_v29 }
 0x5b4   : > { %v9294_v31 = vmul.f32 1.442695, %v9293_v30 }
 0x5b6   : > { %12207 = vpow2.f32 %v9294_v31 }
 0x5c3   : > { %v12208_v32 = vpop.eup %12207 }
 0x5c4   : > { %v9296_v33 = vsel %vm9289_vm1, %v12208_v32, 0.0 }
 0x5c5   : > { %9297 = vadd.xlane.f32.xlu0 %v9296_v33 }
 0x64e   : > { %v9298_v34 = vpop.xlane.xlu0 %9297 }
 0x64f   : > { %12209 = vrcp.f32 %v9298_v34 }
 0x65c   : > { %v12210_v35 = vpop.eup %12209 }
 0x65d   : > { %v9300_v36 = vmul.f32 %v12210_v35, %v12208_v32 }
 0x65f   : > { %9301 = vst.msk [vmem:[#allocation9] sm:$0x3] %vm9289_vm1, %v9300_v36 }
 0x660 PF: > { %p11356_p4 = scmp.eq.s32.totalorder %s12418_s22, 1  ;;  %s12368_s7 = smov [#allocation9]  }
 0x661   : > { %s9309_s14 = sshll.u32 %s12368_s7, 4  ;;  %s9310_s14 = int_to_ptr.vmem [resolvable:$true] %s9309_s14 }
 0x662   : > { %s12291_s21 = scalar_lea.vmem %s9310_s14, 32  ;;  %p12298_p7 = scmp.lt.s32.totalorder %s9310_s14, %s9310_s14 }
 0x663   : > { %p12292_p12 = scmp.ne.s32.totalorder %s9310_s14, %s12291_s21  ;;  %p12299_p5 = scmp.lt.s32.totalorder %s12291_s21, %s12291_s21 }
 0x665   : > { %p12293_p2 = pnand %p12292_p12, %p11356_p4  ;;  %p12300_p9 = por %p12299_p5, %p12298_p7 }
 0x667   : > { %p12294_p3 = pneg %p12293_p2 }
 0x669   : > { %p12301_p8 = pnand %p12300_p9, %p12294_p3 }
 0x66b   : > { %12304 = shalt.err (!%p12301_p8)
}
 0x66c   : > { %11337 = dma.vmem_to_hbm [thread:$0]  (%p11356_p4), %s9310_s14, 32, %s13531_s5, [#allocation5]  }
 0x66d   : > { %12340 = dma.done.wait (%p11356_p4), [#allocation5], 32  }
 0x66e   : > { %12342 = vsyncadd (%p11356_p4), [#allocation5], 4294967264 }
 0x66f PF: > { %p17_p10 = scmp.ge.s32.totalorder %s12421_s23, 4   ;;  %s13545_s18 = smov %s12349_s19 }
 0x670   : > { %s13546_s19 = smov %s12353_s20  ;;  %s13547_s20 = smov %s12431_s26 }
 0x671   : > { %s13548_s21 = smov %s12421_s23  ;;  %19 = sbr.rel (!%p17_p10) target bundleno = 5 (0x5), region = 96 }
 0x676   :  { %9322 = vsyncpa [#allocation4], 1 }
 0x677   :  { %9324 = vsyncpa [#allocation4 + $0x1], 1 }
 0x678   :  { %9325 = vsyncpa [#allocation7], 1 }
 0x679   :  { %9326 = vsyncpa [#allocation5], 1 }
 0x67a   :  { %9328 = vsyncpa [#allocation5 + $0x1], 1 }

</bundles_post_ra>
